<compile_context>
chip_gen: v7x
topology: tpu7x:2x2x1
jax: 0.10.0
libtpu: 0.0.40
codegen_flags: <defaults>
</compile_context>

<pallas_src>
import functools

import jax
import jax.numpy as jnp
from jax.experimental import pallas as pl
from jax.experimental.pallas import tpu as pltpu


def _round_up(x, m):
    return (x + m - 1) // m * m


# ---------------------------------------------------------------------------
# Kernel: one (batch-tile, OH-row-tile) per grid step.
#   - gathers the KH*KW taps for the tile directly from the VMEM input block
#     and concatenates them along the contraction (lane) axis -> im2col patch
#     matrix (TN*TOH*OW, KH*KW*C), built once per step
#   - single MXU matmul against the (KH*KW*C, OC_pad) weight slab, f32 acc
#   - fused bias add + ReLU epilogue, lane-dense (OC_pad) unmasked store
# ---------------------------------------------------------------------------
def _conv2d_relu_kernel(x_ref, w_ref, b_ref, o_ref, *,
                        KH, KW, TN, TOH, OW, sh, sw,
                        n_row_tiles, apply_relu, precision):
    if n_row_tiles == 1:
        row0 = 0                                  # static starts for the taps
    else:
        row0 = pl.program_id(1) * (TOH * sh)      # first padded-input row

    taps = []
    for kh in range(KH):                          # static unroll over window
        for kw in range(KW):
            if sh == 1 and sw == 1:
                t = x_ref[:, pl.ds(row0 + kh, TOH), pl.ds(kw, OW), :]
            else:
                # TODO(synk): compact the strided rows once per kh (KH strided
                # loads + contiguous column slices) instead of one strided
                # load per (kh, kw) tap.
                t = x_ref[:,
                          pl.ds(row0 + kh, TOH, stride=sh),
                          pl.ds(kw, OW, stride=sw), :]
            taps.append(t)                        # (TN, TOH, OW, C)

    # im2col: concat along the contraction (lane) axis.  OW is a multiple of
    # 8, so the merge reshape below is layout-preserving (no relayout copy).
    # TODO(synk): for C << 128 this lane-concat / shallow-K matmul is the
    # wrong shape (XLU/VPU bound); add a dedicated small-C path.
    patches = jnp.concatenate(taps, axis=-1)           # (TN, TOH, OW, KH*KW*C)
    patches = patches.reshape(TN * TOH * OW, -1)       # (M, K)

    # One big-K MXU matmul, f32 accumulation, lane-dense N = OC_pad.
    acc = jnp.dot(patches, w_ref[...],
                  preferred_element_type=jnp.float32, precision=precision)

    acc = acc + b_ref[...]                             # (1, OC_pad) broadcast
    if apply_relu:
        acc = jnp.maximum(acc, 0.0)
    o_ref[...] = acc.reshape(TN, TOH, OW, -1).astype(o_ref.dtype)


# ---------------------------------------------------------------------------
# Wrapper: layout plumbing (NCHW<->NHWC, zero padding, weight slab, OC/OW pad,
# batch folding) plus pallas_call setup.
# ---------------------------------------------------------------------------
def conv2d_relu(img_nchw, weight_oihw, bias=None, *, strides=(1, 1),
                padding=(0, 0), apply_relu=True,
                compute_dtype=jnp.bfloat16, precision=None,
                output_layout="NCHW"):
    """Fused conv2d + bias + ReLU with PyTorch NCHW/OIHW semantics.

    NOTE: the default ``compute_dtype=bfloat16`` quantizes activations and
    weights before the MXU (accumulation stays f32).  For nn.Conv2d-level
    numerical fidelity pass ``compute_dtype=jnp.float32`` (and optionally
    ``precision=jax.lax.Precision.HIGHEST``).
    Set ``output_layout="NHWC"`` to keep the lane-dense layout and skip the
    final transpose when the consumer allows it.
    """
    # TODO(synk): optional fp8 compute path for v7x (halves patch/weight VMEM
    # and HBM traffic); bf16 stays the default.
    if isinstance(strides, int):
        strides = (strides, strides)
    if isinstance(padding, int):
        padding = (padding, padding)

    N, C, H, W = img_nchw.shape
    OC, C_w, KH, KW = weight_oihw.shape
    assert C == C_w
    sh, sw = strides
    ph, pw = padding

    Hp, Wp = H + 2 * ph, W + 2 * pw
    OH = (Hp - KH) // sh + 1
    OW = (Wp - KW) // sw + 1

    out_dtype = img_nchw.dtype
    bc = jnp.dtype(compute_dtype).itemsize
    bo = jnp.dtype(out_dtype).itemsize
    C_lane = _round_up(C, 128)                 # in-VMEM lane-padded channels
    K = KH * KW * C
    K_lane = _round_up(K, 128)
    OC_pad = _round_up(OC, 128)                # lane-dense output channels

    # Generation-aware tile target: bigger M on 128 MiB-VMEM parts (v5e/v6e),
    # conservative on 64 MiB parts (v7x).
    try:
        _info = pltpu.get_tpu_info()
        vmem_capacity = int(getattr(_info, "vmem_capacity_bytes",
                                    64 * 1024 * 1024))
    except Exception:
        vmem_capacity = 64 * 1024 * 1024
    MAX_M = 1024 if vmem_capacity >= 96 * 1024 * 1024 else 512

    # Sublane-align the output width so reshapes are layout-preserving and
    # stores unmasked; the extra columns read only zero padding.
    OW_pad = _round_up(OW, 8)
    Wp_in = max(Wp, (OW_pad - 1) * sw + KW)

    # Row tiling / batch folding: cap the live patch matrix + accumulator at
    # MAX_M matmul rows.
    M_image = OH * OW_pad
    if M_image <= MAX_M:
        TOH, n_row_tiles = OH, 1
    else:
        TOH = min(OH, max(1, MAX_M // OW_pad))
        n_row_tiles = pl.cdiv(OH, TOH)
    OH_pad = n_row_tiles * TOH
    # Pad input rows so the last (possibly overhanging) row tile reads only
    # zero padding, never out of bounds.
    Hp_in = max(Hp, (OH_pad - 1) * sh + KH)

    if n_row_tiles == 1:
        # Fold batch elements until M reaches MAX_M, bounded by the
        # lane-padded per-image VMEM footprint.
        per_image_in = Hp_in * _round_up(Wp_in, 8) * C_lane * bc
        TN = max(1, min(N, MAX_M // M_image,
                        max(1, (8 << 20) // max(per_image_in, 1))))
    else:
        TN = 1
    N_pad = _round_up(N, TN)

    # Cast first so pad/transpose touch half-width data, then NCHW -> NHWC
    # (lane dim = channels) and zero pad batch / rows / cols.
    x = img_nchw.astype(compute_dtype)
    x = jnp.transpose(x, (0, 2, 3, 1))
    x = jnp.pad(x, ((0, N_pad - N), (ph, Hp_in - H - ph),
                    (pw, Wp_in - W - pw), (0, 0)))

    # OIHW -> (KH*KW*C, OC_pad) im2col weight slab (tap order matches kernel).
    w = jnp.transpose(weight_oihw, (2, 3, 1, 0)).reshape(K, OC)
    w = jnp.pad(w, ((0, 0), (0, OC_pad - OC))).astype(compute_dtype)

    if bias is None:
        b = jnp.zeros((1, OC_pad), jnp.float32)
    else:
        b = jnp.pad(bias.astype(jnp.float32),
                    (0, OC_pad - OC)).reshape(1, OC_pad)

    kernel = functools.partial(
        _conv2d_relu_kernel,
        KH=KH, KW=KW, TN=TN, TOH=TOH, OW=OW_pad, sh=sh, sw=sw,
        n_row_tiles=n_row_tiles, apply_relu=apply_relu, precision=precision)

    # Honest VMEM budget: lane-padded input block (x2 buffers), weight slab
    # (counted x2 in case single-buffering is unavailable), output block (x2),
    # plus live tap/patch/accumulator values; clamped to a fraction of the
    # physical capacity.
    M = TN * TOH * OW_pad
    in_block = TN * Hp_in * _round_up(Wp_in, 8) * C_lane * bc
    w_block = K * OC_pad * bc
    b_block = 8 * OC_pad * 4
    out_block = TN * TOH * OW_pad * OC_pad * bo
    live = M * (2 * K_lane * bc + OC_pad * 4) + KH * KW * M * C_lane * bc
    est = 2 * in_block + 2 * w_block + 2 * b_block + 2 * out_block + live
    vmem_limit = int(min(max(est + (4 << 20), 32 << 20),
                         int(0.85 * vmem_capacity)))

    cost = pl.CostEstimate(
        flops=2 * N * OH * OW * KH * KW * C * OC,
        transcendentals=0,
        bytes_accessed=int(x.size) * bc + K * OC_pad * bc + OC_pad * 4
                       + N_pad * OH_pad * OW_pad * OC_pad * bo)

    def _build(single_buffer_consts):
        if single_buffer_consts:
            # Constant-index weight slab / bias: one buffer is enough.
            const_kw = dict(pipeline_mode=pl.Buffered(1))
        else:
            const_kw = {}
        return pl.pallas_call(
            kernel,
            out_shape=jax.ShapeDtypeStruct((N_pad, OH_pad, OW_pad, OC_pad),
                                           out_dtype),
            grid_spec=pltpu.PrefetchScalarGridSpec(
                num_scalar_prefetch=0,
                grid=(N_pad // TN, n_row_tiles),
                in_specs=[
                    # Whole padded image(s) per batch tile; block index is
                    # constant along the row-tile axis -> DMA'd once per nb.
                    # TODO(synk): for very large images switch to per-row-tile
                    # halo windows via manual DMA (memory_space=pl.ANY +
                    # make_async_copy) so VMEM scales with the tile, not the
                    # image (matters most on v7x's 64 MiB VMEM).
                    pl.BlockSpec((TN, Hp_in, Wp_in, C),
                                 lambda nb, r: (nb, 0, 0, 0)),
                    pl.BlockSpec((K, OC_pad), lambda nb, r: (0, 0),
                                 **const_kw),
                    pl.BlockSpec((1, OC_pad), lambda nb, r: (0, 0),
                                 **const_kw),
                ],
                out_specs=pl.BlockSpec((TN, TOH, OW_pad, OC_pad),
                                       lambda nb, r: (nb, r, 0, 0)),
            ),
            compiler_params=pltpu.CompilerParams(
                # Disjoint output blocks, no carried state -> both axes
                # parallel (v7x shards them across its two TensorCores).
                dimension_semantics=("parallel", "parallel"),
                vmem_limit_bytes=vmem_limit),
            cost_estimate=cost,
        )

    try:
        out_full = _build(True)(x, w, b)
    except Exception:
        # This jax build does not honor pipeline_mode=Buffered(1); fall back
        # to default (double) buffering for the constant blocks.
        out_full = _build(False)(x, w, b)

    # Drop the batch / OH / OW / OC padding.
    out = out_full[:N, :OH, :OW, :OC]
    if output_layout == "NHWC":
        return out
    return jnp.transpose(out, (0, 3, 1, 2))      # back to PyTorch NCHW


# ---------------------------------------------------------------------------
# Deterministic parameter init matching Conv2D.__init__ semantics:
#   variance_scaling_init with relu gain (std = gain * sqrt(2 / fan_in)),
#   bias constant-initialized to bias_init_value.
# ---------------------------------------------------------------------------
def init_conv2d_params(key, in_channels, out_channels, kernel_size,
                       kernel_init_gain=1.0, bias_init_value=0.0):
    kh = kw = kernel_size
    fan_in = in_channels * kh * kw
    std = kernel_init_gain * (2.0 / fan_in) ** 0.5   # relu nonlinearity gain
    weight = std * jax.random.normal(
        key, (out_channels, in_channels, kh, kw), dtype=jnp.float32)
    bias = jnp.full((out_channels,), bias_init_value, dtype=jnp.float32)
    return weight, bias


if __name__ == "__main__":
    # Small shapes consistent with the module's forward: NCHW image input.
    N, C, H, W = 2, 4, 16, 16
    OC, K = 8, 3

    root = jax.random.PRNGKey(0)
    k_x, k_w = jax.random.split(root)
    x = jax.random.normal(k_x, (N, C, H, W), dtype=jnp.float32)
    weight, bias = init_conv2d_params(k_w, C, OC, K)

    def ref_conv(img, w, b, strides, padding):
        out = jax.lax.conv_general_dilated(
            img, w, window_strides=strides,
            padding=((padding[0], padding[0]), (padding[1], padding[1])),
            dimension_numbers=("NCHW", "OIHW", "NCHW"))
        return jnp.maximum(out + b.reshape(1, -1, 1, 1), 0.0)

    for strides, padding in [((1, 1), (0, 0)), ((1, 1), (1, 1))]:
        ref = ref_conv(x, weight, bias, strides, padding)

        # Exact path (f32 MXU inputs) -> tight tolerance vs XLA conv.
        out_f32 = conv2d_relu(x, weight, bias, strides=strides,
                              padding=padding, compute_dtype=jnp.float32)
        out_f32 = jax.block_until_ready(out_f32)
        assert out_f32.shape == ref.shape
        assert jnp.allclose(out_f32, ref, atol=1e-4, rtol=1e-4)

        # Fast path (bf16 MXU inputs, f32 accumulation) -> looser tolerance.
        out_bf16 = conv2d_relu(x, weight, bias, strides=strides,
                               padding=padding)
        out_bf16 = jax.block_until_ready(out_bf16)
        assert out_bf16.shape == ref.shape
        assert jnp.allclose(out_bf16, ref, atol=5e-2, rtol=5e-2)

    print("KERNEL_OK")
</pallas_src>

<mosaic_0001>
module attributes {stable_mosaic.version = 11 : i64} {
  func.func @_conv2d_relu_kernel(%arg0: i32, %arg1: i32, %arg2: memref<2x16x18x4xf32, #tpu.memory_space<vmem>>, %arg3: memref<36x128xf32, #tpu.memory_space<vmem>>, %arg4: memref<1x128xf32, #tpu.memory_space<vmem>>, %arg5: memref<2x14x16x128xf32, #tpu.memory_space<vmem>>) attributes {dimension_semantics = [#tpu.dimension_semantics<parallel>, #tpu.dimension_semantics<parallel>], iteration_bounds = array<i64: 1, 1>, scalar_prefetch = 0 : i64, scratch_operands = 0 : i64, tpu.core_type = #tpu.core_type<tc>, window_params = [{transform_indices = @transform_0, window_bounds = array<i64: 2, 16, 18, 4>}, {pipeline_mode = #tpu.pipeline_mode<synchronous>, transform_indices = @transform_1, window_bounds = array<i64: 36, 128>}, {pipeline_mode = #tpu.pipeline_mode<synchronous>, transform_indices = @transform_2, window_bounds = array<i64: 1, 128>}, {transform_indices = @transform_3, window_bounds = array<i64: 2, 14, 16, 128>}]} {
    %c0 = arith.constant 0 : index
    %c0_0 = arith.constant 0 : index
    %c0_1 = arith.constant 0 : index
    %c0_2 = arith.constant 0 : index
    %0 = vector.load %arg2[%c0, %c0_0, %c0_1, %c0_2] : memref<2x16x18x4xf32, #tpu.memory_space<vmem>>, vector<2x14x16x4xf32>
    %c0_3 = arith.constant 0 : index
    %c0_4 = arith.constant 0 : index
    %c1 = arith.constant 1 : index
    %c0_5 = arith.constant 0 : index
    %1 = vector.load %arg2[%c0_3, %c0_4, %c1, %c0_5] : memref<2x16x18x4xf32, #tpu.memory_space<vmem>>, vector<2x14x16x4xf32>
    %c0_6 = arith.constant 0 : index
    %c0_7 = arith.constant 0 : index
    %c2 = arith.constant 2 : index
    %c0_8 = arith.constant 0 : index
    %2 = vector.load %arg2[%c0_6, %c0_7, %c2, %c0_8] : memref<2x16x18x4xf32, #tpu.memory_space<vmem>>, vector<2x14x16x4xf32>
    %c0_9 = arith.constant 0 : index
    %c1_10 = arith.constant 1 : index
    %c0_11 = arith.constant 0 : index
    %c0_12 = arith.constant 0 : index
    %3 = vector.load %arg2[%c0_9, %c1_10, %c0_11, %c0_12] : memref<2x16x18x4xf32, #tpu.memory_space<vmem>>, vector<2x14x16x4xf32>
    %c0_13 = arith.constant 0 : index
    %c1_14 = arith.constant 1 : index
    %c1_15 = arith.constant 1 : index
    %c0_16 = arith.constant 0 : index
    %4 = vector.load %arg2[%c0_13, %c1_14, %c1_15, %c0_16] : memref<2x16x18x4xf32, #tpu.memory_space<vmem>>, vector<2x14x16x4xf32>
    %c0_17 = arith.constant 0 : index
    %c1_18 = arith.constant 1 : index
    %c2_19 = arith.constant 2 : index
    %c0_20 = arith.constant 0 : index
    %5 = vector.load %arg2[%c0_17, %c1_18, %c2_19, %c0_20] : memref<2x16x18x4xf32, #tpu.memory_space<vmem>>, vector<2x14x16x4xf32>
    %c0_21 = arith.constant 0 : index
    %c2_22 = arith.constant 2 : index
    %c0_23 = arith.constant 0 : index
    %c0_24 = arith.constant 0 : index
    %6 = vector.load %arg2[%c0_21, %c2_22, %c0_23, %c0_24] : memref<2x16x18x4xf32, #tpu.memory_space<vmem>>, vector<2x14x16x4xf32>
    %c0_25 = arith.constant 0 : index
    %c2_26 = arith.constant 2 : index
    %c1_27 = arith.constant 1 : index
    %c0_28 = arith.constant 0 : index
    %7 = vector.load %arg2[%c0_25, %c2_26, %c1_27, %c0_28] : memref<2x16x18x4xf32, #tpu.memory_space<vmem>>, vector<2x14x16x4xf32>
    %c0_29 = arith.constant 0 : index
    %c2_30 = arith.constant 2 : index
    %c2_31 = arith.constant 2 : index
    %c0_32 = arith.constant 0 : index
    %8 = vector.load %arg2[%c0_29, %c2_30, %c2_31, %c0_32] : memref<2x16x18x4xf32, #tpu.memory_space<vmem>>, vector<2x14x16x4xf32>
    %9 = tpu.concatenate %0, %1, %2, %3, %4, %5, %6, %7, %8 in 3 : vector<2x14x16x4xf32>, vector<2x14x16x4xf32>, vector<2x14x16x4xf32>, vector<2x14x16x4xf32>, vector<2x14x16x4xf32>, vector<2x14x16x4xf32>, vector<2x14x16x4xf32>, vector<2x14x16x4xf32>, vector<2x14x16x4xf32> -> vector<2x14x16x36xf32>
    %10 = vector.shape_cast %9 : vector<2x14x16x36xf32> to vector<448x36xf32>
    %c0_33 = arith.constant 0 : index
    %c0_34 = arith.constant 0 : index
    %11 = vector.load %arg3[%c0_33, %c0_34] : memref<36x128xf32, #tpu.memory_space<vmem>>, vector<36x128xf32>
    %cst = arith.constant dense<0.000000e+00> : vector<448x128xf32>
    %12 = tpu.matmul %10, %11, %cst {dimension_numbers = #tpu.dot_dimension_numbers<[1], [0], [0], [1], [0, 0, 1, 1], [], []>} : vector<448x36xf32>, vector<36x128xf32>, vector<448x128xf32> -> vector<448x128xf32>
    %c0_35 = arith.constant 0 : index
    %c0_36 = arith.constant 0 : index
    %13 = vector.load %arg4[%c0_35, %c0_36] : memref<1x128xf32, #tpu.memory_space<vmem>>, vector<1x128xf32>
    %14 = vector.broadcast %13 : vector<1x128xf32> to vector<448x128xf32>
    %15 = arith.addf %12, %14 : vector<448x128xf32>
    %cst_37 = arith.constant 0.000000e+00 : f32
    %16 = vector.broadcast %cst_37 : f32 to vector<448x128xf32>
    %17 = arith.maximumf %15, %16 : vector<448x128xf32>
    %18 = vector.shape_cast %17 : vector<448x128xf32> to vector<2x14x16x128xf32>
    %c0_38 = arith.constant 0 : index
    %c0_39 = arith.constant 0 : index
    %c0_40 = arith.constant 0 : index
    %c0_41 = arith.constant 0 : index
    %19 = vector.load %arg5[%c0_38, %c0_39, %c0_40, %c0_41] : memref<2x14x16x128xf32, #tpu.memory_space<vmem>>, vector<2x14x16x128xf32>
    tpu.vector_store %arg5[%c0_38, %c0_39, %c0_40, %c0_41], %18 {strides = array<i32>} : memref<2x14x16x128xf32, #tpu.memory_space<vmem>>, vector<2x14x16x128xf32>,
    return
  }
  func.func @transform_0(%arg0: i32, %arg1: i32) -> (i32, i32, i32, i32) {
    %c0_i32 = arith.constant 0 : i32
    %c0_i32_0 = arith.constant 0 : i32
    %c0_i32_1 = arith.constant 0 : i32
    %c0_i32_2 = arith.constant 0 : i32
    return %arg0, %c0_i32, %c0_i32_0, %c0_i32_1 : i32, i32, i32, i32
  }
  func.func @transform_1(%arg0: i32, %arg1: i32) -> (i32, i32) {
    %c0_i32 = arith.constant 0 : i32
    %c0_i32_0 = arith.constant 0 : i32
    %c0_i32_1 = arith.constant 0 : i32
    return %c0_i32, %c0_i32_0 : i32, i32
  }
  func.func @transform_2(%arg0: i32, %arg1: i32) -> (i32, i32) {
    %c0_i32 = arith.constant 0 : i32
    %c0_i32_0 = arith.constant 0 : i32
    %c0_i32_1 = arith.constant 0 : i32
    return %c0_i32, %c0_i32_0 : i32, i32
  }
  func.func @transform_3(%arg0: i32, %arg1: i32) -> (i32, i32, i32, i32) {
    %c0_i32 = arith.constant 0 : i32
    %c0_i32_0 = arith.constant 0 : i32
    %c0_i32_1 = arith.constant 0 : i32
    return %arg0, %arg1, %c0_i32, %c0_i32_0 : i32, i32, i32, i32
  }
}

module attributes {stable_mosaic.version = 11 : i64} {
  func.func @_conv2d_relu_kernel(%arg0: i32, %arg1: i32, %arg2: memref<2x16x18x4xf32, #tpu.memory_space<vmem>>, %arg3: memref<36x128xf32, #tpu.memory_space<vmem>>, %arg4: memref<1x128xf32, #tpu.memory_space<vmem>>, %arg5: memref<2x14x16x128xf32, #tpu.memory_space<vmem>>) attributes {dimension_semantics = [#tpu.dimension_semantics<parallel>, #tpu.dimension_semantics<parallel>], iteration_bounds = array<i64: 1, 1>, scalar_prefetch = 0 : i64, scratch_operands = 0 : i64, tpu.core_type = #tpu.core_type<tc>, window_params = [{transform_indices = @transform_0, window_bounds = array<i64: 2, 16, 18, 4>}, {pipeline_mode = #tpu.pipeline_mode<synchronous>, transform_indices = @transform_1, window_bounds = array<i64: 36, 128>}, {pipeline_mode = #tpu.pipeline_mode<synchronous>, transform_indices = @transform_2, window_bounds = array<i64: 1, 128>}, {transform_indices = @transform_3, window_bounds = array<i64: 2, 14, 16, 128>}]} {
    %c0 = arith.constant 0 : index
    %c0_0 = arith.constant 0 : index
    %c0_1 = arith.constant 0 : index
    %c0_2 = arith.constant 0 : index
    %0 = vector.load %arg2[%c0, %c0_0, %c0_1, %c0_2] : memref<2x16x18x4xf32, #tpu.memory_space<vmem>>, vector<2x14x16x4xf32>
    %c0_3 = arith.constant 0 : index
    %c0_4 = arith.constant 0 : index
    %c1 = arith.constant 1 : index
    %c0_5 = arith.constant 0 : index
    %1 = vector.load %arg2[%c0_3, %c0_4, %c1, %c0_5] : memref<2x16x18x4xf32, #tpu.memory_space<vmem>>, vector<2x14x16x4xf32>
    %c0_6 = arith.constant 0 : index
    %c0_7 = arith.constant 0 : index
    %c2 = arith.constant 2 : index
    %c0_8 = arith.constant 0 : index
    %2 = vector.load %arg2[%c0_6, %c0_7, %c2, %c0_8] : memref<2x16x18x4xf32, #tpu.memory_space<vmem>>, vector<2x14x16x4xf32>
    %c0_9 = arith.constant 0 : index
    %c1_10 = arith.constant 1 : index
    %c0_11 = arith.constant 0 : index
    %c0_12 = arith.constant 0 : index
    %3 = vector.load %arg2[%c0_9, %c1_10, %c0_11, %c0_12] : memref<2x16x18x4xf32, #tpu.memory_space<vmem>>, vector<2x14x16x4xf32>
    %c0_13 = arith.constant 0 : index
    %c1_14 = arith.constant 1 : index
    %c1_15 = arith.constant 1 : index
    %c0_16 = arith.constant 0 : index
    %4 = vector.load %arg2[%c0_13, %c1_14, %c1_15, %c0_16] : memref<2x16x18x4xf32, #tpu.memory_space<vmem>>, vector<2x14x16x4xf32>
    %c0_17 = arith.constant 0 : index
    %c1_18 = arith.constant 1 : index
    %c2_19 = arith.constant 2 : index
    %c0_20 = arith.constant 0 : index
    %5 = vector.load %arg2[%c0_17, %c1_18, %c2_19, %c0_20] : memref<2x16x18x4xf32, #tpu.memory_space<vmem>>, vector<2x14x16x4xf32>
    %c0_21 = arith.constant 0 : index
    %c2_22 = arith.constant 2 : index
    %c0_23 = arith.constant 0 : index
    %c0_24 = arith.constant 0 : index
    %6 = vector.load %arg2[%c0_21, %c2_22, %c0_23, %c0_24] : memref<2x16x18x4xf32, #tpu.memory_space<vmem>>, vector<2x14x16x4xf32>
    %c0_25 = arith.constant 0 : index
    %c2_26 = arith.constant 2 : index
    %c1_27 = arith.constant 1 : index
    %c0_28 = arith.constant 0 : index
    %7 = vector.load %arg2[%c0_25, %c2_26, %c1_27, %c0_28] : memref<2x16x18x4xf32, #tpu.memory_space<vmem>>, vector<2x14x16x4xf32>
    %c0_29 = arith.constant 0 : index
    %c2_30 = arith.constant 2 : index
    %c2_31 = arith.constant 2 : index
    %c0_32 = arith.constant 0 : index
    %8 = vector.load %arg2[%c0_29, %c2_30, %c2_31, %c0_32] : memref<2x16x18x4xf32, #tpu.memory_space<vmem>>, vector<2x14x16x4xf32>
    %9 = tpu.concatenate %0, %1, %2, %3, %4, %5, %6, %7, %8 in 3 : vector<2x14x16x4xf32>, vector<2x14x16x4xf32>, vector<2x14x16x4xf32>, vector<2x14x16x4xf32>, vector<2x14x16x4xf32>, vector<2x14x16x4xf32>, vector<2x14x16x4xf32>, vector<2x14x16x4xf32>, vector<2x14x16x4xf32> -> vector<2x14x16x36xf32>
    %10 = vector.shape_cast %9 : vector<2x14x16x36xf32> to vector<448x36xf32>
    %c0_33 = arith.constant 0 : index
    %c0_34 = arith.constant 0 : index
    %11 = vector.load %arg3[%c0_33, %c0_34] : memref<36x128xf32, #tpu.memory_space<vmem>>, vector<36x128xf32>
    %cst = arith.constant dense<0.000000e+00> : vector<448x128xf32>
    %12 = tpu.matmul %10, %11, %cst {dimension_numbers = #tpu.dot_dimension_numbers<[1], [0], [0], [1], [0, 0, 1, 1], [], []>} : vector<448x36xf32>, vector<36x128xf32>, vector<448x128xf32> -> vector<448x128xf32>
    %c0_35 = arith.constant 0 : index
    %c0_36 = arith.constant 0 : index
    %13 = vector.load %arg4[%c0_35, %c0_36] : memref<1x128xf32, #tpu.memory_space<vmem>>, vector<1x128xf32>
    %14 = vector.broadcast %13 : vector<1x128xf32> to vector<448x128xf32>
    %15 = arith.addf %12, %14 : vector<448x128xf32>
    %cst_37 = arith.constant 0.000000e+00 : f32
    %16 = vector.broadcast %cst_37 : f32 to vector<448x128xf32>
    %17 = arith.maximumf %15, %16 : vector<448x128xf32>
    %18 = vector.shape_cast %17 : vector<448x128xf32> to vector<2x14x16x128xf32>
    %c0_38 = arith.constant 0 : index
    %c0_39 = arith.constant 0 : index
    %c0_40 = arith.constant 0 : index
    %c0_41 = arith.constant 0 : index
    %19 = vector.load %arg5[%c0_38, %c0_39, %c0_40, %c0_41] : memref<2x14x16x128xf32, #tpu.memory_space<vmem>>, vector<2x14x16x128xf32>
    tpu.vector_store %arg5[%c0_38, %c0_39, %c0_40, %c0_41], %18 {strides = array<i32>} : memref<2x14x16x128xf32, #tpu.memory_space<vmem>>, vector<2x14x16x128xf32>,
    return
  }
  func.func @transform_0(%arg0: i32, %arg1: i32) -> (i32, i32, i32, i32) {
    %c0_i32 = arith.constant 0 : i32
    %c0_i32_0 = arith.constant 0 : i32
    %c0_i32_1 = arith.constant 0 : i32
    %c0_i32_2 = arith.constant 0 : i32
    return %arg0, %c0_i32, %c0_i32_0, %c0_i32_1 : i32, i32, i32, i32
  }
  func.func @transform_1(%arg0: i32, %arg1: i32) -> (i32, i32) {
    %c0_i32 = arith.constant 0 : i32
    %c0_i32_0 = arith.constant 0 : i32
    %c0_i32_1 = arith.constant 0 : i32
    return %c0_i32, %c0_i32_0 : i32, i32
  }
  func.func @transform_2(%arg0: i32, %arg1: i32) -> (i32, i32) {
    %c0_i32 = arith.constant 0 : i32
    %c0_i32_0 = arith.constant 0 : i32
    %c0_i32_1 = arith.constant 0 : i32
    return %c0_i32, %c0_i32_0 : i32, i32
  }
  func.func @transform_3(%arg0: i32, %arg1: i32) -> (i32, i32, i32, i32) {
    %c0_i32 = arith.constant 0 : i32
    %c0_i32_0 = arith.constant 0 : i32
    %c0_i32_1 = arith.constant 0 : i32
    return %arg0, %arg1, %c0_i32, %c0_i32_0 : i32, i32, i32, i32
  }
}

</mosaic_0001>

<bundles_post_ra>
// kernel: tpu_custom_call.1
= control target key start
LH: loop header
LB: loop body
LE: loop exit
PB: predicated region body
PF: predicated region fallthrough
CT: control target
= control target key end

     0   :  { %s4076_s16 = smov 4   ;;  %s7548_s0 = inlined_call_operand.vmem [shape: f32[2,16,18,4], index: 0, kind: input, shape index: {}]   ;;  %s7549_s1 = inlined_call_operand.vmem [shape: f32[36,128], index: 1, kind: input, shape index: {}]   ;;  %s7550_s2 = inlined_call_operand.vmem [shape: f32[1,128], index: 2, kind: input, shape index: {}]   ;;  %s7551_s3 = inlined_call_operand.hbm [shape: f32[2,14,16,128], index: 3, kind: output, shape index: {}]  }
   0x1   :  { %v73_v0 = vld [vmem:[%s7548_s0 + $0x19] sm:$0xff]  ;;  %v71_v1 = vld [vmem:[%s7548_s0 + $0x1] sm:$0xff]  ;;  %v72_v3 = vld [vmem:[%s7548_s0 + $0x9] sm:$0xff] }
   0x2   :  { %581 = vrot.lane.b32.xlu1 %v73_v0, %s4076_s16  ;;  %577 = vrot.lane.b32.xlu0 %v71_v1, %s4076_s16  ;;  %v74_v2 = vld [vmem:[%s7548_s0 + $0x21] sm:$0xff]  ;;  %v76_v4 = vld [vmem:[%s7548_s0 + $0x39] sm:$0xff] }
   0x3   :  { %v75_v5 = vld [vmem:[%s7548_s0 + $0x31] sm:$0xff]  ;;  %v77_v7 = vld [vmem:[%s7548_s0 + $0x49] sm:$0xff]  ;;  %v79_v9 = vld [vmem:[%s7548_s0 + $0x61] sm:$0xff] }
   0x4   :  { %v78_v6 = vld [vmem:[%s7548_s0 + $0x51] sm:$0xff]  ;;  %v80_v8 = vld [vmem:[%s7548_s0 + $0x69] sm:$0xff]  ;;  %v82_v10 = vld [vmem:[%s7548_s0 + $0x81] sm:$0xff] }
   0x5   :  { %v81_v11 = vld [vmem:[%s7548_s0 + $0x79] sm:$0xff]  ;;  %v83_v13 = vld [vmem:[%s7548_s0 + $0x91] sm:$0xff]  ;;  %v85_v15 = vld [vmem:[%s7548_s0 + $0xa9] sm:$0xff] }
   0x6   :  { %583 = vrot.lane.b32.xlu1 %v74_v2, %s4076_s16  ;;  %579 = vrot.lane.b32.xlu0 %v72_v3, %s4076_s16  ;;  %v84_v12 = vld [vmem:[%s7548_s0 + $0x99] sm:$0xff]  ;;  %v86_v14 = vld [vmem:[%s7548_s0 + $0xb1] sm:$0xff] }
   0x7   :  { %v88_v16 = vld [vmem:[%s7548_s0 + $0xc9] sm:$0xff]  ;;  %v87_v17 = vld [vmem:[%s7548_s0 + $0xc1] sm:$0xff]  ;;  %v89_v19 = vld [vmem:[%s7548_s0 + $0xd9] sm:$0xff] }
   0x8   :  { %v90_v18 = vld [vmem:[%s7548_s0 + $0xe1] sm:$0xff]  ;;  %v92_v20 = vld [vmem:[%s7548_s0 + $0xf9] sm:$0xff]  ;;  %v91_v21 = vld [vmem:[%s7548_s0 + $0xf1] sm:$0xff] }
   0xa   :  { %587 = vrot.lane.b32.xlu1 %v76_v4, %s4076_s16  ;;  %585 = vrot.lane.b32.xlu0 %v75_v5, %s4076_s16 }
   0xe   :  { %591 = vrot.lane.b32.xlu1 %v78_v6, %s4076_s16  ;;  %589 = vrot.lane.b32.xlu0 %v77_v7, %s4076_s16 }
  0x12   :  { %595 = vrot.lane.b32.xlu1 %v80_v8, %s4076_s16  ;;  %593 = vrot.lane.b32.xlu0 %v79_v9, %s4076_s16 }
  0x16   :  { %599 = vrot.lane.b32.xlu1 %v82_v10, %s4076_s16  ;;  %597 = vrot.lane.b32.xlu0 %v81_v11, %s4076_s16 }
  0x1a   :  { %603 = vrot.lane.b32.xlu1 %v84_v12, %s4076_s16  ;;  %601 = vrot.lane.b32.xlu0 %v83_v13, %s4076_s16 }
  0x1e   :  { %607 = vrot.lane.b32.xlu1 %v86_v14, %s4076_s16  ;;  %605 = vrot.lane.b32.xlu0 %v85_v15, %s4076_s16 }
  0x22   :  { %611 = vrot.lane.b32.xlu1 %v88_v16, %s4076_s16  ;;  %609 = vrot.lane.b32.xlu0 %v87_v17, %s4076_s16 }
  0x26   :  { %615 = vrot.lane.b32.xlu1 %v90_v18, %s4076_s16  ;;  %613 = vrot.lane.b32.xlu0 %v89_v19, %s4076_s16 }
  0x2a   :  { %619 = vrot.lane.b32.xlu1 %v92_v20, %s4076_s16  ;;  %617 = vrot.lane.b32.xlu0 %v91_v21, %s4076_s16 }
  0x2b   :  { %8 = vsyncpa [#allocation3], 0  ;;  %v94_v22 = vld [vmem:[%s7548_s0 + $0x111] sm:$0xff]  ;;  %v93_v23 = vld [vmem:[%s7548_s0 + $0x109] sm:$0xff]  ;;  %s4077_s25 = smov 8   ;;  %s4078_s6 = smov 12  }
  0x2c   :  { %v96_v24 = vld [vmem:[%s7548_s0 + $0x129] sm:$0xff]  ;;  %v95_v25 = vld [vmem:[%s7548_s0 + $0x121] sm:$0xff]  ;;  %v97_v27 = vld [vmem:[%s7548_s0 + $0x139] sm:$0xff]  ;;  %s4079_s20 = smov 16   ;;  %s4080_s5 = smov 20   ;;  %vm2950_vm0 = vcmask 1043456  }
  0x2d   :  { %v98_v26 = vld [vmem:[%s7548_s0 + $0x141] sm:$0xff]  ;;  %v100_v28 = vld [vmem:[%s7548_s0 + $0x189] sm:$0xff]  ;;  %v101_v31 = vld [vmem:[%s7548_s0 + $0x199] sm:$0xff]  ;;  %s4081_s24 = smov 24   ;;  %s4082_s8 = smov 28   ;;  %vm2313_vm1 = vcmask 31744  }
  0x2e   :  { %623 = vrot.lane.b32.xlu1 %v94_v22, %s4076_s16  ;;  %621 = vrot.lane.b32.xlu0 %v93_v23, %s4076_s16  ;;  %v99_v29 = vld [vmem:[%s7548_s0 + $0x181] sm:$0xff]  ;;  %v104_v32 = vld [vmem:[%s7548_s0 + $0x1b9] sm:$0xff]  ;;  %vm2370_vm2 = vcmask 64512   ;;  %vm2427_vm3 = vcmask 97280   ;;  %vm2484_vm4 = vcmask 130048   ;;  %vm2541_vm5 = vcmask 162816  }
  0x2f   :  { %v102_v30 = vld [vmem:[%s7548_s0 + $0x1a1] sm:$0xff]  ;;  %v103_v33 = vld [vmem:[%s7548_s0 + $0x1b1] sm:$0xff]  ;;  %v105_v35 = vld [vmem:[%s7548_s0 + $0x1c9] sm:$0xff]  ;;  %vm2598_vm6 = vcmask 195584   ;;  %vm2655_vm7 = vcmask 228352   ;;  %vm2712_vm8 = vcmask 261120  }
  0x30   :  { %v106_v34 = vld [vmem:[%s7548_s0 + $0x1d1] sm:$0xff]  ;;  %v108_v36 = vld [vmem:[%s7548_s0 + $0x1e9] sm:$0xff]  ;;  %v107_v37 = vld [vmem:[%s7548_s0 + $0x1e1] sm:$0xff]  ;;  %vm2781_vm9 = vcmask 293888  }
  0x31   :  { %v110_v38 = vld [vmem:[%s7548_s0 + $0x201] sm:$0xff]  ;;  %v109_v39 = vld [vmem:[%s7548_s0 + $0x1f9] sm:$0xff]  ;;  %v111_v41 = vld [vmem:[%s7548_s0 + $0x211] sm:$0xff] }
  0x32   :  { %627 = vrot.lane.b32.xlu1 %v96_v24, %s4076_s16  ;;  %625 = vrot.lane.b32.xlu0 %v95_v25, %s4076_s16  ;;  %v112_v40 = vld [vmem:[%s7548_s0 + $0x219] sm:$0xff]  ;;  %v114_v42 = vld [vmem:[%s7548_s0 + $0x231] sm:$0xff] }
  0x33   :  { %v113_v43 = vld [vmem:[%s7548_s0 + $0x229] sm:$0xff]  ;;  %v115_v45 = vld [vmem:[%s7548_s0 + $0x241] sm:$0xff]  ;;  %v117_v47 = vld [vmem:[%s7548_s0 + $0x259] sm:$0xff] }
  0x34   :  { %v116_v44 = vld [vmem:[%s7548_s0 + $0x249] sm:$0xff]  ;;  %v118_v46 = vld [vmem:[%s7548_s0 + $0x261] sm:$0xff]  ;;  %v120_v48 = vld [vmem:[%s7548_s0 + $0x279] sm:$0xff] }
  0x35   :  { %v119_v49 = vld [vmem:[%s7548_s0 + $0x271] sm:$0xff]  ;;  %v121_v51 = vld [vmem:[%s7548_s0 + $0x289] sm:$0xff]  ;;  %v123_v53 = vld [vmem:[%s7548_s0 + $0x2a1] sm:$0xff] }
  0x36   :  { %631 = vrot.lane.b32.xlu1 %v98_v26, %s4076_s16  ;;  %629 = vrot.lane.b32.xlu0 %v97_v27, %s4076_s16  ;;  %v122_v50 = vld [vmem:[%s7548_s0 + $0x291] sm:$0xff]  ;;  %v124_v52 = vld [vmem:[%s7548_s0 + $0x2a9] sm:$0xff] }
  0x37   :  { %v126_v54 = vld [vmem:[%s7548_s0 + $0x2c1] sm:$0xff]  ;;  %v125_v55 = vld [vmem:[%s7548_s0 + $0x2b9] sm:$0xff]  ;;  %v128_v56 = vld [vmem:[%s7548_s0 + $0xa] sm:$0xff] }
  0x38   :  { %v127_v57 = vld [vmem:[%s7548_s0 + $0x2] sm:$0xff]  ;;  %v129_v59 = vld [vmem:[%s7548_s0 + $0x1a] sm:$0xff]  ;;  %v131_v63 = vld [vmem:[%s7548_s0 + $0x32] sm:$0xff] }
  0x39   :  { %v130_v58 = vld [vmem:[%s7548_s0 + $0x22] sm:$0xff]  ;;  %v132_v62 = vld [vmem:[%s7548_s0 + $0x3a] sm:$0xff]  ;;  %v134_v2 = vld [vmem:[%s7548_s0 + $0x52] sm:$0xff] }
  0x3a   :  { %635 = vrot.lane.b32.xlu1 %v100_v28, %s4076_s16  ;;  %633 = vrot.lane.b32.xlu0 %v99_v29, %s4076_s16  ;;  %v133_v3 = vld [vmem:[%s7548_s0 + $0x4a] sm:$0xff]  ;;  %v135_v7 = vld [vmem:[%s7548_s0 + $0x62] sm:$0xff] }
  0x3b   :  { %v136_v6 = vld [vmem:[%s7548_s0 + $0x6a] sm:$0xff]  ;;  %v138_v10 = vld [vmem:[%s7548_s0 + $0x82] sm:$0xff]  ;;  %v137_v11 = vld [vmem:[%s7548_s0 + $0x7a] sm:$0xff] }
  0x3c   :  { %v140_v14 = vld [vmem:[%s7548_s0 + $0x9a] sm:$0xff]  ;;  %v139_v15 = vld [vmem:[%s7548_s0 + $0x92] sm:$0xff]  ;;  %v141_v19 = vld [vmem:[%s7548_s0 + $0xaa] sm:$0xff] }
  0x3d   :  { %v142_v18 = vld [vmem:[%s7548_s0 + $0xb2] sm:$0xff]  ;;  %v144_v22 = vld [vmem:[%s7548_s0 + $0xca] sm:$0xff]  ;;  %v143_v23 = vld [vmem:[%s7548_s0 + $0xc2] sm:$0xff] }
  0x3e   :  { %639 = vrot.lane.b32.xlu1 %v102_v30, %s4076_s16  ;;  %637 = vrot.lane.b32.xlu0 %v101_v31, %s4076_s16  ;;  %v146_v26 = vld [vmem:[%s7548_s0 + $0xe2] sm:$0xff]  ;;  %v145_v27 = vld [vmem:[%s7548_s0 + $0xda] sm:$0xff] }
  0x3f   :  { %v148_v30 = vld [vmem:[%s7548_s0 + $0xfa] sm:$0xff]  ;;  %v147_v31 = vld [vmem:[%s7548_s0 + $0xf2] sm:$0xff] }
  0x42   :  { %643 = vrot.lane.b32.xlu1 %v104_v32, %s4076_s16  ;;  %641 = vrot.lane.b32.xlu0 %v103_v33, %s4076_s16 }
  0x46   :  { %647 = vrot.lane.b32.xlu1 %v106_v34, %s4076_s16  ;;  %645 = vrot.lane.b32.xlu0 %v105_v35, %s4076_s16  ;;  %v150_v34 = vld [vmem:[%s7548_s0 + $0x112] sm:$0xff]  ;;  %v149_v35 = vld [vmem:[%s7548_s0 + $0x10a] sm:$0xff] }
  0x4a   :  { %651 = vrot.lane.b32.xlu1 %v108_v36, %s4076_s16  ;;  %649 = vrot.lane.b32.xlu0 %v107_v37, %s4076_s16 }
  0x4e   :  { %655 = vrot.lane.b32.xlu1 %v110_v38, %s4076_s16  ;;  %653 = vrot.lane.b32.xlu0 %v109_v39, %s4076_s16  ;;  %v152_v38 = vld [vmem:[%s7548_s0 + $0x12a] sm:$0xff]  ;;  %v151_v39 = vld [vmem:[%s7548_s0 + $0x122] sm:$0xff] }
  0x52   :  { %659 = vrot.lane.b32.xlu1 %v112_v40, %s4076_s16  ;;  %657 = vrot.lane.b32.xlu0 %v111_v41, %s4076_s16 }
  0x56   :  { %663 = vrot.lane.b32.xlu1 %v114_v42, %s4076_s16  ;;  %661 = vrot.lane.b32.xlu0 %v113_v43, %s4076_s16  ;;  %v154_v42 = vld [vmem:[%s7548_s0 + $0x142] sm:$0xff]  ;;  %v153_v43 = vld [vmem:[%s7548_s0 + $0x13a] sm:$0xff] }
  0x5a   :  { %667 = vrot.lane.b32.xlu1 %v116_v44, %s4076_s16  ;;  %665 = vrot.lane.b32.xlu0 %v115_v45, %s4076_s16 }
  0x5e   :  { %671 = vrot.lane.b32.xlu1 %v118_v46, %s4076_s16  ;;  %669 = vrot.lane.b32.xlu0 %v117_v47, %s4076_s16  ;;  %v156_v46 = vld [vmem:[%s7548_s0 + $0x18a] sm:$0xff]  ;;  %v155_v47 = vld [vmem:[%s7548_s0 + $0x182] sm:$0xff] }
  0x62   :  { %675 = vrot.lane.b32.xlu1 %v120_v48, %s4076_s16  ;;  %673 = vrot.lane.b32.xlu0 %v119_v49, %s4076_s16 }
  0x66   :  { %679 = vrot.lane.b32.xlu1 %v122_v50, %s4076_s16  ;;  %677 = vrot.lane.b32.xlu0 %v121_v51, %s4076_s16  ;;  %v158_v50 = vld [vmem:[%s7548_s0 + $0x1a2] sm:$0xff]  ;;  %v157_v51 = vld [vmem:[%s7548_s0 + $0x19a] sm:$0xff] }
  0x6a   :  { %683 = vrot.lane.b32.xlu1 %v124_v52, %s4076_s16  ;;  %681 = vrot.lane.b32.xlu0 %v123_v53, %s4076_s16 }
  0x6e   :  { %687 = vrot.lane.b32.xlu1 %v126_v54, %s4076_s16  ;;  %685 = vrot.lane.b32.xlu0 %v125_v55, %s4076_s16  ;;  %v160_v54 = vld [vmem:[%s7548_s0 + $0x1ba] sm:$0xff]  ;;  %v159_v55 = vld [vmem:[%s7548_s0 + $0x1b2] sm:$0xff] }
  0x72   :  { %803 = vrot.lane.b32.xlu1 %v128_v56, %s4077_s25  ;;  %801 = vrot.lane.b32.xlu0 %v127_v57, %s4077_s25 }
  0x74   :  { %v4344_v60 = vpop.permute.xlu1 %581  ;;  %v4346_v61 = vpop.permute.xlu0 %577 }
  0x76   :  { %807 = vrot.lane.b32.xlu1 %v130_v58, %s4077_s25  ;;  %805 = vrot.lane.b32.xlu0 %v129_v59, %s4077_s25  ;;  %v162_v58 = vld [vmem:[%s7548_s0 + $0x1d2] sm:$0xff]  ;;  %v161_v59 = vld [vmem:[%s7548_s0 + $0x1ca] sm:$0xff] }
  0x78   :  { %v4356_v0 = vpop.permute.xlu1 %583  ;;  %v4358_v1 = vpop.permute.xlu0 %579 }
  0x79   :  { %7558 = vst [vmem:[#allocation5_spill] sm:$0xff] %v4356_v0 }
  0x7a   :  { %811 = vrot.lane.b32.xlu1 %v132_v62, %s4077_s25  ;;  %809 = vrot.lane.b32.xlu0 %v131_v63, %s4077_s25 }
  0x7c   :  { %v4368_v4 = vpop.permute.xlu1 %587  ;;  %v4370_v5 = vpop.permute.xlu0 %585 }
  0x7d   :  { %7559 = vst [vmem:[#allocation6_spill] sm:$0xff] %v4368_v4  ;;  %7560 = vst [vmem:[#allocation7_spill] sm:$0xff] %v4370_v5 }
  0x7e   :  { %815 = vrot.lane.b32.xlu1 %v134_v2, %s4077_s25  ;;  %813 = vrot.lane.b32.xlu0 %v133_v3, %s4077_s25  ;;  %v164_v2 = vld [vmem:[%s7548_s0 + $0x1ea] sm:$0xff]  ;;  %v163_v3 = vld [vmem:[%s7548_s0 + $0x1e2] sm:$0xff] }
  0x80   :  { %v4380_v8 = vpop.permute.xlu1 %591  ;;  %v4382_v9 = vpop.permute.xlu0 %589 }
  0x81   :  { %7561 = vst [vmem:[#allocation8_spill] sm:$0xff] %v4380_v8  ;;  %7562 = vst [vmem:[#allocation9_spill] sm:$0xff] %v4382_v9  ;;  %v5424_v8 = vld [vmem:[%s7548_s0 + $0x6a] sm:$0xff] }
  0x82   :  { %819 = vrot.lane.b32.xlu1 %v136_v6, %s4077_s25  ;;  %817 = vrot.lane.b32.xlu0 %v135_v7, %s4077_s25 }
  0x84   :  { %v4392_v12 = vpop.permute.xlu1 %595  ;;  %v4394_v13 = vpop.permute.xlu0 %593 }
  0x85   :  { %7563 = vst [vmem:[#allocation10_spill] sm:$0xff] %v4392_v12  ;;  %7564 = vst [vmem:[#allocation11_spill] sm:$0xff] %v4394_v13 }
  0x86   :  { %823 = vrot.lane.b32.xlu1 %v138_v10, %s4077_s25  ;;  %821 = vrot.lane.b32.xlu0 %v137_v11, %s4077_s25  ;;  %v166_v10 = vld [vmem:[%s7548_s0 + $0x202] sm:$0xff]  ;;  %v165_v11 = vld [vmem:[%s7548_s0 + $0x1fa] sm:$0xff] }
  0x88   :  { %v4404_v16 = vpop.permute.xlu1 %599  ;;  %v4406_v17 = vpop.permute.xlu0 %597 }
  0x89   :  { %7565 = vst [vmem:[#allocation12_spill] sm:$0xff] %v4404_v16  ;;  %7566 = vst [vmem:[#allocation13_spill] sm:$0xff] %v4406_v17  ;;  %v5234_v17 = vld [vmem:[%s7548_s0 + $0x1e1] sm:$0xff] }
  0x8a   :  { %827 = vrot.lane.b32.xlu1 %v140_v14, %s4077_s25  ;;  %825 = vrot.lane.b32.xlu0 %v139_v15, %s4077_s25 }
  0x8c   :  { %v4416_v20 = vpop.permute.xlu1 %603  ;;  %v4418_v21 = vpop.permute.xlu0 %601 }
  0x8d   :  { %7567 = vst [vmem:[#allocation14_spill] sm:$0xff] %v4416_v20  ;;  %7568 = vst [vmem:[#allocation15_spill] sm:$0xff] %v4418_v21 }
  0x8e   :  { %831 = vrot.lane.b32.xlu1 %v142_v18, %s4077_s25  ;;  %829 = vrot.lane.b32.xlu0 %v141_v19, %s4077_s25  ;;  %v168_v18 = vld [vmem:[%s7548_s0 + $0x21a] sm:$0xff]  ;;  %v167_v19 = vld [vmem:[%s7548_s0 + $0x212] sm:$0xff] }
  0x90   :  { %v4428_v24 = vpop.permute.xlu1 %607  ;;  %v4430_v25 = vpop.permute.xlu0 %605 }
  0x91   :  { %7569 = vst [vmem:[#allocation16_spill] sm:$0xff] %v4428_v24  ;;  %7570 = vst [vmem:[#allocation17_spill] sm:$0xff] %v4430_v25 }
  0x92   :  { %835 = vrot.lane.b32.xlu1 %v144_v22, %s4077_s25  ;;  %833 = vrot.lane.b32.xlu0 %v143_v23, %s4077_s25 }
  0x94   :  { %v4440_v28 = vpop.permute.xlu1 %611  ;;  %v4442_v29 = vpop.permute.xlu0 %609 }
  0x95   :  { %7571 = vst [vmem:[#allocation18_spill] sm:$0xff] %v4440_v28  ;;  %7572 = vst [vmem:[#allocation19_spill] sm:$0xff] %v4442_v29  ;;  %v57_v29 = vld [vmem:[%s7548_s0 + $0x228] sm:$0xff] }
  0x96   :  { %839 = vrot.lane.b32.xlu1 %v146_v26, %s4077_s25  ;;  %837 = vrot.lane.b32.xlu0 %v145_v27, %s4077_s25  ;;  %v170_v26 = vld [vmem:[%s7548_s0 + $0x232] sm:$0xff]  ;;  %v169_v27 = vld [vmem:[%s7548_s0 + $0x22a] sm:$0xff] }
  0x98   :  { %v4452_v32 = vpop.permute.xlu1 %615  ;;  %v4454_v33 = vpop.permute.xlu0 %613 }
  0x99   :  { %7573 = vst [vmem:[#allocation20_spill] sm:$0xff] %v4452_v32  ;;  %7574 = vst [vmem:[#allocation21_spill] sm:$0xff] %v4454_v33  ;;  %v51_v33 = vld [vmem:[%s7548_s0 + $0x1e0] sm:$0xff] }
  0x9a   :  { %843 = vrot.lane.b32.xlu1 %v148_v30, %s4077_s25  ;;  %841 = vrot.lane.b32.xlu0 %v147_v31, %s4077_s25 }
  0x9c   :  { %v4464_v36 = vpop.permute.xlu1 %619  ;;  %v4466_v37 = vpop.permute.xlu0 %617 }
  0x9d   :  { %7575 = vst [vmem:[#allocation22_spill] sm:$0xff] %v4464_v36  ;;  %7576 = vst [vmem:[#allocation23_spill] sm:$0xff] %v4466_v37  ;;  %v35_v36 = vld [vmem:[%s7548_s0 + $0xf0] sm:$0xff]  ;;  %v37_v37 = vld [vmem:[%s7548_s0 + $0x108] sm:$0xff] }
  0x9e   :  { %847 = vrot.lane.b32.xlu1 %v150_v34, %s4077_s25  ;;  %845 = vrot.lane.b32.xlu0 %v149_v35, %s4077_s25  ;;  %v172_v34 = vld [vmem:[%s7548_s0 + $0x24a] sm:$0xff]  ;;  %v171_v35 = vld [vmem:[%s7548_s0 + $0x242] sm:$0xff] }
  0xa0   :  { %v4476_v40 = vpop.permute.xlu1 %623  ;;  %v4478_v41 = vpop.permute.xlu0 %621 }
  0xa1   :  { %7577 = vst [vmem:[#allocation24_spill] sm:$0xff] %v4476_v40  ;;  %7578 = vst [vmem:[#allocation25_spill] sm:$0xff] %v4478_v41  ;;  %v31_v40 = vld [vmem:[%s7548_s0 + $0xc0] sm:$0xff]  ;;  %v33_v41 = vld [vmem:[%s7548_s0 + $0xd8] sm:$0xff] }
  0xa2   :  { %851 = vrot.lane.b32.xlu1 %v152_v38, %s4077_s25  ;;  %849 = vrot.lane.b32.xlu0 %v151_v39, %s4077_s25 }
  0xa4   :  { %v4488_v44 = vpop.permute.xlu1 %627  ;;  %v4490_v45 = vpop.permute.xlu0 %625 }
  0xa5   :  { %7579 = vst [vmem:[#allocation26_spill] sm:$0xff] %v4488_v44  ;;  %7580 = vst [vmem:[#allocation27_spill] sm:$0xff] %v4490_v45  ;;  %v27_v44 = vld [vmem:[%s7548_s0 + $0x90] sm:$0xff]  ;;  %v29_v45 = vld [vmem:[%s7548_s0 + $0xa8] sm:$0xff] }
  0xa6   :  { %855 = vrot.lane.b32.xlu1 %v154_v42, %s4077_s25  ;;  %853 = vrot.lane.b32.xlu0 %v153_v43, %s4077_s25  ;;  %v174_v42 = vld [vmem:[%s7548_s0 + $0x262] sm:$0xff]  ;;  %v173_v43 = vld [vmem:[%s7548_s0 + $0x25a] sm:$0xff] }
  0xa8   :  { %v4500_v48 = vpop.permute.xlu1 %631  ;;  %v4502_v49 = vpop.permute.xlu0 %629 }
  0xa9   :  { %7581 = vst [vmem:[#allocation28_spill] sm:$0xff] %v4500_v48  ;;  %7582 = vst [vmem:[#allocation29_spill] sm:$0xff] %v4502_v49  ;;  %v23_v48 = vld [vmem:[%s7548_s0 + $0x60] sm:$0xff]  ;;  %v25_v49 = vld [vmem:[%s7548_s0 + $0x78] sm:$0xff] }
  0xaa   :  { %859 = vrot.lane.b32.xlu1 %v156_v46, %s4077_s25  ;;  %857 = vrot.lane.b32.xlu0 %v155_v47, %s4077_s25 }
  0xac   :  { %v4512_v52 = vpop.permute.xlu1 %635  ;;  %v4514_v53 = vpop.permute.xlu0 %633 }
  0xae   :  { %863 = vrot.lane.b32.xlu1 %v158_v50, %s4077_s25  ;;  %861 = vrot.lane.b32.xlu0 %v157_v51, %s4077_s25  ;;  %v176_v50 = vld [vmem:[%s7548_s0 + $0x27a] sm:$0xff]  ;;  %v175_v51 = vld [vmem:[%s7548_s0 + $0x272] sm:$0xff] }
  0xb0   :  { %v4524_v56 = vpop.permute.xlu1 %639  ;;  %v4526_v57 = vpop.permute.xlu0 %637 }
  0xb1   :  { %7583 = vst [vmem:[#allocation30_spill] sm:$0xff] %v4524_v56  ;;  %7584 = vst [vmem:[#allocation31_spill] sm:$0xff] %v4526_v57  ;;  %v5687_v56 = vld [vmem:[%s7548_s0 + $0x22a] sm:$0xff] }
  0xb2   :  { %867 = vrot.lane.b32.xlu1 %v160_v54, %s4077_s25  ;;  %865 = vrot.lane.b32.xlu0 %v159_v55, %s4077_s25 }
  0xb4   :  { %v4536_v62 = vpop.permute.xlu1 %643  ;;  %v4538_v63 = vpop.permute.xlu0 %641 }
  0xb5   :  { %7585 = vst [vmem:[#allocation32_spill] sm:$0xff] %v4536_v62  ;;  %7586 = vst [vmem:[#allocation33_spill] sm:$0xff] %v4538_v63  ;;  %v5633_v63 = vld [vmem:[%s7548_s0 + $0x1e2] sm:$0xff] }
  0xb6   :  { %871 = vrot.lane.b32.xlu1 %v162_v58, %s4077_s25  ;;  %869 = vrot.lane.b32.xlu0 %v161_v59, %s4077_s25  ;;  %v178_v58 = vld [vmem:[%s7548_s0 + $0x292] sm:$0xff]  ;;  %v177_v59 = vld [vmem:[%s7548_s0 + $0x28a] sm:$0xff] }
  0xb8   :  { %v4548_v6 = vpop.permute.xlu1 %647  ;;  %v4550_v7 = vpop.permute.xlu0 %645 }
  0xb9   :  { %7587 = vst [vmem:[#allocation34_spill] sm:$0xff] %v4548_v6  ;;  %7588 = vst [vmem:[#allocation35_spill] sm:$0xff] %v4550_v7  ;;  %v5447_v7 = vld [vmem:[%s7548_s0 + $0x7a] sm:$0xff] }
  0xba   :  { %875 = vrot.lane.b32.xlu1 %v164_v2, %s4077_s25  ;;  %873 = vrot.lane.b32.xlu0 %v163_v3, %s4077_s25 }
  0xbc   :  { %v4560_v14 = vpop.permute.xlu1 %651  ;;  %v4562_v15 = vpop.permute.xlu0 %649 }
  0xbd   :  { %7589 = vst [vmem:[#allocation36_spill] sm:$0xff] %v4560_v14  ;;  %7590 = vst [vmem:[#allocation37_spill] sm:$0xff] %v4562_v15  ;;  %v5252_v14 = vld [vmem:[%s7548_s0 + $0x1f9] sm:$0xff] }
  0xbe   :  { %879 = vrot.lane.b32.xlu1 %v166_v10, %s4077_s25  ;;  %877 = vrot.lane.b32.xlu0 %v165_v11, %s4077_s25  ;;  %v180_v10 = vld [vmem:[%s7548_s0 + $0x2aa] sm:$0xff]  ;;  %v179_v11 = vld [vmem:[%s7548_s0 + $0x2a2] sm:$0xff] }
  0xc0   :  { %v4572_v22 = vpop.permute.xlu1 %655  ;;  %v4574_v23 = vpop.permute.xlu0 %653 }
  0xc1   :  { %7591 = vst [vmem:[#allocation38_spill] sm:$0xff] %v4572_v22  ;;  %7592 = vst [vmem:[#allocation39_spill] sm:$0xff] %v4574_v23  ;;  %v5229_v23 = vld [vmem:[%s7548_s0 + $0x1e9] sm:$0xff] }
  0xc2   :  { %883 = vrot.lane.b32.xlu1 %v168_v18, %s4077_s25  ;;  %881 = vrot.lane.b32.xlu0 %v167_v19, %s4077_s25 }
  0xc4   :  { %v4584_v30 = vpop.permute.xlu1 %659  ;;  %v4586_v31 = vpop.permute.xlu0 %657 }
  0xc5   :  { %7593 = vst [vmem:[#allocation40_spill] sm:$0xff] %v4584_v30  ;;  %7594 = vst [vmem:[#allocation41_spill] sm:$0xff] %v4586_v31 }
  0xc6   :  { %887 = vrot.lane.b32.xlu1 %v170_v26, %s4077_s25  ;;  %885 = vrot.lane.b32.xlu0 %v169_v27, %s4077_s25  ;;  %v182_v26 = vld [vmem:[%s7548_s0 + $0x2c2] sm:$0xff]  ;;  %v181_v27 = vld [vmem:[%s7548_s0 + $0x2ba] sm:$0xff] }
  0xc8   :  { %v4596_v38 = vpop.permute.xlu1 %663  ;;  %v4598_v39 = vpop.permute.xlu0 %661 }
  0xc9   :  { %7595 = vst [vmem:[#allocation42_spill] sm:$0xff] %v4596_v38  ;;  %7596 = vst [vmem:[#allocation43_spill] sm:$0xff] %v4598_v39  ;;  %v59_v38 = vld [vmem:[%s7548_s0 + $0x240] sm:$0xff] }
  0xca   :  { %891 = vrot.lane.b32.xlu1 %v172_v34, %s4077_s25  ;;  %889 = vrot.lane.b32.xlu0 %v171_v35, %s4077_s25 }
  0xcc   :  { %v4608_v46 = vpop.permute.xlu1 %667  ;;  %v4610_v47 = vpop.permute.xlu0 %665 }
  0xcd   :  { %7597 = vst [vmem:[#allocation44_spill] sm:$0xff] %v4608_v46  ;;  %7598 = vst [vmem:[#allocation45_spill] sm:$0xff] %v4610_v47  ;;  %v53_v46 = vld [vmem:[%s7548_s0 + $0x1f8] sm:$0xff] }
  0xce   :  { %895 = vrot.lane.b32.xlu1 %v174_v42, %s4077_s25  ;;  %893 = vrot.lane.b32.xlu0 %v173_v43, %s4077_s25 }
  0xd0   :  { %v4620_v54 = vpop.permute.xlu1 %671  ;;  %v4622_v55 = vpop.permute.xlu0 %669 }
  0xd1   :  { %7599 = vst [vmem:[#allocation46_spill] sm:$0xff] %v4620_v54  ;;  %7600 = vst [vmem:[#allocation47_spill] sm:$0xff] %v4622_v55 }
  0xd2   :  { %899 = vrot.lane.b32.xlu1 %v176_v50, %s4077_s25  ;;  %897 = vrot.lane.b32.xlu0 %v175_v51, %s4077_s25  ;;  %v17_v50 = vld [vmem:[%s7548_s0 + $0x18] sm:$0xff]  ;;  %v18_v51 = vld [vmem:[%s7548_s0 + $0x20] sm:$0xff] }
  0xd4   :  { %v4632_v2 = vpop.permute.xlu1 %675  ;;  %v4634_v3 = vpop.permute.xlu0 %673 }
  0xd5   :  { %7601 = vst [vmem:[#allocation48_spill] sm:$0xff] %v4632_v2  ;;  %7602 = vst [vmem:[#allocation49_spill] sm:$0xff] %v4634_v3 }
  0xd6   :  { %903 = vrot.lane.b32.xlu1 %v178_v58, %s4077_s25  ;;  %901 = vrot.lane.b32.xlu0 %v177_v59, %s4077_s25 }
  0xd8   :  { %v4644_v18 = vpop.permute.xlu1 %679  ;;  %v4646_v19 = vpop.permute.xlu0 %677 }
  0xd9   :  { %7603 = vst [vmem:[#allocation50_spill] sm:$0xff] %v4644_v18  ;;  %7604 = vst [vmem:[#allocation51_spill] sm:$0xff] %v4646_v19 }
  0xda   :  { %907 = vrot.lane.b32.xlu1 %v180_v10, %s4077_s25  ;;  %905 = vrot.lane.b32.xlu0 %v179_v11, %s4077_s25  ;;  %v20_v10 = vld [vmem:[%s7548_s0 + $0x38] sm:$0xff]  ;;  %v19_v11 = vld [vmem:[%s7548_s0 + $0x30] sm:$0xff] }
  0xdc   :  { %v4656_v34 = vpop.permute.xlu1 %683  ;;  %v4658_v35 = vpop.permute.xlu0 %681 }
  0xdd   :  { %7605 = vst [vmem:[#allocation52_spill] sm:$0xff] %v4656_v34  ;;  %7606 = vst [vmem:[#allocation53_spill] sm:$0xff] %v4658_v35 }
  0xde   :  { %911 = vrot.lane.b32.xlu1 %v182_v26, %s4077_s25  ;;  %909 = vrot.lane.b32.xlu0 %v181_v27, %s4077_s25 }
  0xe0   :  { %v4662_v42 = vpop.permute.xlu1 %687  ;;  %v4664_v43 = vpop.permute.xlu0 %685 }
  0xe1   :  { %7607 = vst [vmem:[#allocation54_spill] sm:$0xff] %v4662_v42  ;;  %7608 = vst [vmem:[#allocation55_spill] sm:$0xff] %v4664_v43 }
  0xe2   :  { %1027 = vrot.lane.b32.xlu1 %v18_v51, %s4078_s6  ;;  %1025 = vrot.lane.b32.xlu0 %v17_v50, %s4078_s6  ;;  %v22_v50 = vld [vmem:[%s7548_s0 + $0x50] sm:$0xff]  ;;  %v21_v51 = vld [vmem:[%s7548_s0 + $0x48] sm:$0xff] }
  0xe4   :  { %v4674_v58 = vpop.permute.xlu1 %803  ;;  %v4676_v59 = vpop.permute.xlu0 %801 }
  0xe6   :  { %1031 = vrot.lane.b32.xlu1 %v20_v10, %s4078_s6  ;;  %1029 = vrot.lane.b32.xlu0 %v19_v11, %s4078_s6  ;;  %v24_v11 = vld [vmem:[%s7548_s0 + $0x68] sm:$0xff] }
  0xe8   :  { %v4686_v26 = vpop.permute.xlu1 %807  ;;  %v4688_v27 = vpop.permute.xlu0 %805 }
  0xe9   :  { %7609 = vst [vmem:[#allocation56_spill] sm:$0xff] %v4686_v26  ;;  %7610 = vst [vmem:[#allocation57_spill] sm:$0xff] %v4688_v27 }
  0xea   :  { %1035 = vrot.lane.b32.xlu1 %v22_v50, %s4078_s6  ;;  %1033 = vrot.lane.b32.xlu0 %v21_v51, %s4078_s6  ;;  %v26_v51 = vld [vmem:[%s7548_s0 + $0x80] sm:$0xff] }
  0xec   :  { %v4698_v42 = vpop.permute.xlu1 %811  ;;  %v4700_v10 = vpop.permute.xlu0 %809 }
  0xed   :  { %7611 = vst [vmem:[#allocation58_spill] sm:$0xff] %v4698_v42  ;;  %7612 = vst [vmem:[#allocation59_spill] sm:$0xff] %v4700_v10  ;;  %v5483_v42 = vld [vmem:[%s7548_s0 + $0xaa] sm:$0xff] }
  0xee   :  { %1039 = vrot.lane.b32.xlu1 %v24_v11, %s4078_s6  ;;  %1037 = vrot.lane.b32.xlu0 %v23_v48, %s4078_s6  ;;  %v28_v48 = vld [vmem:[%s7548_s0 + $0x98] sm:$0xff]  ;;  %v5628_v10 = vld [vmem:[%s7548_s0 + $0x1ea] sm:$0xff] }
  0xf0   :  { %v4710_v43 = vpop.permute.xlu1 %815  ;;  %v4712_v50 = vpop.permute.xlu0 %813 }
  0xf1   :  { %7613 = vst [vmem:[#allocation60_spill] sm:$0xff] %v4710_v43  ;;  %7614 = vst [vmem:[#allocation61_spill] sm:$0xff] %v4712_v50  ;;  %v5442_v50 = vld [vmem:[%s7548_s0 + $0x82] sm:$0xff] }
  0xf2   :  { %1043 = vrot.lane.b32.xlu1 %v26_v51, %s4078_s6  ;;  %1041 = vrot.lane.b32.xlu0 %v25_v49, %s4078_s6  ;;  %v30_v49 = vld [vmem:[%s7548_s0 + $0xb0] sm:$0xff] }
  0xf4   :  { %v4722_v34 = vpop.permute.xlu1 %819  ;;  %v4724_v11 = vpop.permute.xlu0 %817 }
  0xf5   :  { %7615 = vst [vmem:[#allocation62_spill] sm:$0xff] %v4722_v34  ;;  %7616 = vst [vmem:[#allocation63_spill] sm:$0xff] %v4724_v11  ;;  %v5247_v34 = vld [vmem:[%s7548_s0 + $0x201] sm:$0xff]  ;;  %v5268_v11 = vld [vmem:[%s7548_s0 + $0x211] sm:$0xff] }
  0xf6   :  { %1047 = vrot.lane.b32.xlu1 %v28_v48, %s4078_s6  ;;  %1045 = vrot.lane.b32.xlu0 %v27_v44, %s4078_s6  ;;  %v32_v44 = vld [vmem:[%s7548_s0 + $0xc8] sm:$0xff] }
  0xf8   :  { %v4734_v35 = vpop.permute.xlu1 %823  ;;  %v4736_v51 = vpop.permute.xlu0 %821 }
  0xf9   :  { %7617 = vst [vmem:[#allocation64_spill] sm:$0xff] %v4734_v35  ;;  %7618 = vst [vmem:[#allocation65_spill] sm:$0xff] %v4736_v51 }
  0xfa   :  { %1051 = vrot.lane.b32.xlu1 %v30_v49, %s4078_s6  ;;  %1049 = vrot.lane.b32.xlu0 %v29_v45, %s4078_s6  ;;  %v34_v45 = vld [vmem:[%s7548_s0 + $0xe0] sm:$0xff] }
  0xfc   :  { %v4746_v18 = vpop.permute.xlu1 %827  ;;  %v4748_v48 = vpop.permute.xlu0 %825 }
  0xfd   :  { %7619 = vst [vmem:[#allocation66_spill] sm:$0xff] %v4746_v18  ;;  %7620 = vst [vmem:[#allocation67_spill] sm:$0xff] %v4748_v48  ;;  %v3489_v18 = vld [vmem:[%s7548_s0 + $0x61] sm:$0xff]  ;;  %v3491_v48 = vld [vmem:[%s7548_s0 + $0x79] sm:$0xff] }
  0xfe   :  { %1055 = vrot.lane.b32.xlu1 %v32_v44, %s4078_s6  ;;  %1053 = vrot.lane.b32.xlu0 %v31_v40, %s4078_s6  ;;  %v36_v40 = vld [vmem:[%s7548_s0 + $0xf8] sm:$0xff] }
 0x100   :  { %v4758_v19 = vpop.permute.xlu1 %831  ;;  %v4760_v49 = vpop.permute.xlu0 %829 }
 0x101   :  { %7621 = vst [vmem:[#allocation68_spill] sm:$0xff] %v4758_v19  ;;  %7622 = vst [vmem:[#allocation69_spill] sm:$0xff] %v4760_v49  ;;  %v61_v49 = vld [vmem:[%s7548_s0 + $0x258] sm:$0xff] }
 0x102   :  { %1059 = vrot.lane.b32.xlu1 %v34_v45, %s4078_s6  ;;  %1057 = vrot.lane.b32.xlu0 %v33_v41, %s4078_s6  ;;  %v38_v41 = vld [vmem:[%s7548_s0 + $0x110] sm:$0xff] }
 0x104   :  { %v4770_v2 = vpop.permute.xlu1 %835  ;;  %v4772_v44 = vpop.permute.xlu0 %833 }
 0x105   :  { %7623 = vst [vmem:[#allocation70_spill] sm:$0xff] %v4770_v2  ;;  %7624 = vst [vmem:[#allocation71_spill] sm:$0xff] %v4772_v44  ;;  %v55_v44 = vld [vmem:[%s7548_s0 + $0x210] sm:$0xff] }
 0x106   :  { %1063 = vrot.lane.b32.xlu1 %v36_v40, %s4078_s6  ;;  %1061 = vrot.lane.b32.xlu0 %v35_v36, %s4078_s6  ;;  %v40_v36 = vld [vmem:[%s7548_s0 + $0x128] sm:$0xff] }
 0x108   :  { %v4782_v3 = vpop.permute.xlu1 %839  ;;  %v4784_v45 = vpop.permute.xlu0 %837 }
 0x109   :  { %7625 = vst [vmem:[#allocation72_spill] sm:$0xff] %v4782_v3  ;;  %7626 = vst [vmem:[#allocation73_spill] sm:$0xff] %v4784_v45  ;;  %v39_v3 = vld [vmem:[%s7548_s0 + $0x120] sm:$0xff]  ;;  %v45_v45 = vld [vmem:[%s7548_s0 + $0x198] sm:$0xff] }
 0x10a   :  { %1067 = vrot.lane.b32.xlu1 %v38_v41, %s4078_s6  ;;  %1065 = vrot.lane.b32.xlu0 %v37_v37, %s4078_s6  ;;  %v42_v37 = vld [vmem:[%s7548_s0 + $0x140] sm:$0xff] }
 0x10c   :  { %v4794_v54 = vpop.permute.xlu1 %843  ;;  %v4796_v40 = vpop.permute.xlu0 %841 }
 0x10d   :  { %7627 = vst [vmem:[#allocation74_spill] sm:$0xff] %v4794_v54  ;;  %7628 = vst [vmem:[#allocation75_spill] sm:$0xff] %v4796_v40  ;;  %v41_v54 = vld [vmem:[%s7548_s0 + $0x138] sm:$0xff] }
 0x10e   :  { %1071 = vrot.lane.b32.xlu1 %v40_v36, %s4078_s6  ;;  %1069 = vrot.lane.b32.xlu0 %v39_v3, %s4078_s6  ;;  %v3454_v3 = vld [vmem:[%s7548_s0 + $0x158] sm:$0xff]  ;;  %v3453_v36 = vld [vmem:[%s7548_s0 + $0x150] sm:$0xff] }
 0x110   :  { %v4806_v32 = vpop.permute.xlu1 %847  ;;  %v4808_v41 = vpop.permute.xlu0 %845 }
 0x111   :  { %7629 = vst [vmem:[#allocation76_spill] sm:$0xff] %v4806_v32  ;;  %7630 = vst [vmem:[#allocation77_spill] sm:$0xff] %v4808_v41 }
 0x112   :  { %1075 = vrot.lane.b32.xlu1 %v42_v37, %s4078_s6  ;;  %1073 = vrot.lane.b32.xlu0 %v41_v54, %s4078_s6  ;;  %v46_v54 = vld [vmem:[%s7548_s0 + $0x1a0] sm:$0xff] }
 0x114   :  { %v4824_v32 = vpop.permute.xlu1 %851  ;;  %v4826_v41 = vpop.permute.xlu0 %849 }
 0x115   :  { %7631 = vst [vmem:[#allocation78_spill] sm:$0xff] %v4824_v32  ;;  %7632 = vst [vmem:[#allocation79_spill] sm:$0xff] %v4826_v41  ;;  %v49_v41 = vld [vmem:[%s7548_s0 + $0x1c8] sm:$0xff] }
 0x116   :  { %1079 = vrot.lane.b32.xlu1 %v3454_v3, %s4078_s6  ;;  %1077 = vrot.lane.b32.xlu0 %v3453_v36, %s4078_s6  ;;  %v48_v36 = vld [vmem:[%s7548_s0 + $0x1b8] sm:$0xff] }
 0x118   :  { %v4830_v40 = vpop.permute.xlu1 %855  ;;  %v4832_v37 = vpop.permute.xlu0 %853 }
 0x119   :  { %7633 = vst [vmem:[#allocation80_spill] sm:$0xff] %v4830_v40  ;;  %7634 = vst [vmem:[#allocation81_spill] sm:$0xff] %v4832_v37  ;;  %v47_v40 = vld [vmem:[%s7548_s0 + $0x1b0] sm:$0xff] }
 0x11a   :  { %1083 = vrot.lane.b32.xlu1 %v46_v54, %s4078_s6  ;;  %1081 = vrot.lane.b32.xlu0 %v45_v45, %s4078_s6  ;;  %v50_v45 = vld [vmem:[%s7548_s0 + $0x1d0] sm:$0xff] }
 0x11c   :  { %v4842_v32 = vpop.permute.xlu1 %859  ;;  %v4844_v3 = vpop.permute.xlu0 %857 }
 0x11e   :  { %1087 = vrot.lane.b32.xlu1 %v48_v36, %s4078_s6  ;;  %1085 = vrot.lane.b32.xlu0 %v47_v40, %s4078_s6  ;;  %v52_v40 = vld [vmem:[%s7548_s0 + $0x1e8] sm:$0xff] }
 0x120   :  { %v4854_v37 = vpop.permute.xlu1 %863  ;;  %v4856_v54 = vpop.permute.xlu0 %861 }
 0x121   :  { %7635 = vst [vmem:[#allocation82_spill] sm:$0xff] %v4854_v37  ;;  %7636 = vst [vmem:[#allocation83_spill] sm:$0xff] %v4856_v54  ;;  %v5669_v37 = vld [vmem:[%s7548_s0 + $0x212] sm:$0xff] }
 0x122   :  { %1091 = vrot.lane.b32.xlu1 %v50_v45, %s4078_s6  ;;  %1089 = vrot.lane.b32.xlu0 %v49_v41, %s4078_s6  ;;  %v54_v41 = vld [vmem:[%s7548_s0 + $0x200] sm:$0xff] }
 0x124   :  { %v4866_v55 = vpop.permute.xlu1 %867  ;;  %v4868_v36 = vpop.permute.xlu0 %865 }
 0x125   :  { %7637 = vst [vmem:[#allocation84_spill] sm:$0xff] %v4866_v55  ;;  %7638 = vst [vmem:[#allocation85_spill] sm:$0xff] %v4868_v36 }
 0x126   :  { %1095 = vrot.lane.b32.xlu1 %v52_v40, %s4078_s6  ;;  %1093 = vrot.lane.b32.xlu0 %v51_v33, %s4078_s6  ;;  %v56_v33 = vld [vmem:[%s7548_s0 + $0x218] sm:$0xff] }
 0x128   :  { %v4878_v2 = vpop.permute.xlu1 %871  ;;  %v4880_v45 = vpop.permute.xlu0 %869 }
 0x129   :  { %7639 = vst [vmem:[#allocation86_spill] sm:$0xff] %v4878_v2  ;;  %7640 = vst [vmem:[#allocation87_spill] sm:$0xff] %v4880_v45 }
 0x12a   :  { %1099 = vrot.lane.b32.xlu1 %v54_v41, %s4078_s6  ;;  %1097 = vrot.lane.b32.xlu0 %v53_v46, %s4078_s6  ;;  %v58_v46 = vld [vmem:[%s7548_s0 + $0x230] sm:$0xff] }
 0x12c   :  { %v4890_v28 = vpop.permute.xlu1 %875  ;;  %v4892_v40 = vpop.permute.xlu0 %873 }
 0x12d   :  { %7641 = vst [vmem:[#allocation88_spill] sm:$0xff] %v4890_v28  ;;  %7642 = vst [vmem:[#allocation89_spill] sm:$0xff] %v4892_v40  ;;  %v3522_v40 = vld [vmem:[%s7548_s0 + $0x219] sm:$0xff] }
 0x12e   :  { %1103 = vrot.lane.b32.xlu1 %v56_v33, %s4078_s6  ;;  %1101 = vrot.lane.b32.xlu0 %v55_v44, %s4078_s6  ;;  %v60_v44 = vld [vmem:[%s7548_s0 + $0x248] sm:$0xff] }
 0x130   :  { %v4902_v47 = vpop.permute.xlu1 %879  ;;  %v4904_v41 = vpop.permute.xlu0 %877 }
 0x131   :  { %7643 = vst [vmem:[#allocation90_spill] sm:$0xff] %v4902_v47  ;;  %7644 = vst [vmem:[#allocation91_spill] sm:$0xff] %v4904_v41 }
 0x132   :  { %1107 = vrot.lane.b32.xlu1 %v58_v46, %s4078_s6  ;;  %1105 = vrot.lane.b32.xlu0 %v57_v29, %s4078_s6  ;;  %v62_v29 = vld [vmem:[%s7548_s0 + $0x260] sm:$0xff] }
 0x134   :  { %v4914_v19 = vpop.permute.xlu1 %883  ;;  %v4916_v33 = vpop.permute.xlu0 %881 }
 0x135   :  { %7645 = vst [vmem:[#allocation92_spill] sm:$0xff] %v4914_v19  ;;  %7646 = vst [vmem:[#allocation93_spill] sm:$0xff] %v4916_v33  ;;  %v3490_v19 = vld [vmem:[%s7548_s0 + $0x69] sm:$0xff]  ;;  %v3492_v33 = vld [vmem:[%s7548_s0 + $0x81] sm:$0xff] }
 0x136   :  { %1111 = vrot.lane.b32.xlu1 %v60_v44, %s4078_s6  ;;  %1109 = vrot.lane.b32.xlu0 %v59_v38, %s4078_s6  ;;  %v64_v38 = vld [vmem:[%s7548_s0 + $0x278] sm:$0xff] }
 0x138   :  { %v4926_v24 = vpop.permute.xlu1 %887  ;;  %v4928_v46 = vpop.permute.xlu0 %885 }
 0x139   :  { %7647 = vst [vmem:[#allocation94_spill] sm:$0xff] %v4926_v24  ;;  %7648 = vst [vmem:[#allocation95_spill] sm:$0xff] %v4928_v46  ;;  %v63_v24 = vld [vmem:[%s7548_s0 + $0x270] sm:$0xff] }
 0x13a   :  { %1115 = vrot.lane.b32.xlu1 %v62_v29, %s4078_s6  ;;  %1113 = vrot.lane.b32.xlu0 %v61_v49, %s4078_s6  ;;  %v66_v49 = vld [vmem:[%s7548_s0 + $0x290] sm:$0xff] }
 0x13c   :  { %v4938_v39 = vpop.permute.xlu1 %891  ;;  %v4940_v44 = vpop.permute.xlu0 %889 }
 0x13d   :  { %7649 = vst [vmem:[#allocation96_spill] sm:$0xff] %v4938_v39  ;;  %7650 = vst [vmem:[#allocation97_spill] sm:$0xff] %v4940_v44  ;;  %v65_v39 = vld [vmem:[%s7548_s0 + $0x288] sm:$0xff] }
 0x13e   :  { %1119 = vrot.lane.b32.xlu1 %v64_v38, %s4078_s6  ;;  %1117 = vrot.lane.b32.xlu0 %v63_v24, %s4078_s6  ;;  %v68_v24 = vld [vmem:[%s7548_s0 + $0x2a8] sm:$0xff] }
 0x140   :  { %v4950_v46 = vpop.permute.xlu1 %895  ;;  %v4952_v29 = vpop.permute.xlu0 %893 }
 0x141   :  { %7651 = vst [vmem:[#allocation98_spill] sm:$0xff] %v4950_v46  ;;  %7652 = vst [vmem:[#allocation99_spill] sm:$0xff] %v4952_v29  ;;  %v67_v46 = vld [vmem:[%s7548_s0 + $0x2a0] sm:$0xff] }
 0x142   :  { %1123 = vrot.lane.b32.xlu1 %v66_v49, %s4078_s6  ;;  %1121 = vrot.lane.b32.xlu0 %v65_v39, %s4078_s6  ;;  %v70_v39 = vld [vmem:[%s7548_s0 + $0x2c0] sm:$0xff] }
 0x144   :  { %v4962_v44 = vpop.permute.xlu1 %899  ;;  %v4964_v38 = vpop.permute.xlu0 %897 }
 0x145   :  { %7653 = vst [vmem:[#allocation100_spill] sm:$0xff] %v4962_v44  ;;  %7654 = vst [vmem:[#allocation101_spill] sm:$0xff] %v4964_v38  ;;  %v69_v44 = vld [vmem:[%s7548_s0 + $0x2b8] sm:$0xff] }
 0x146   :  { %1127 = vrot.lane.b32.xlu1 %v68_v24, %s4078_s6  ;;  %1125 = vrot.lane.b32.xlu0 %v67_v46, %s4078_s6  ;;  %v3482_v46 = vld [vmem:[%s7548_s0 + $0x2d8] sm:$0xff]  ;;  %v3481_v24 = vld [vmem:[%s7548_s0 + $0x2d0] sm:$0xff] }
 0x148   :  { %v4974_v29 = vpop.permute.xlu1 %903  ;;  %v4976_v49 = vpop.permute.xlu0 %901 }
 0x149   :  { %7655 = vst [vmem:[#allocation102_spill] sm:$0xff] %v4974_v29  ;;  %7656 = vst [vmem:[#allocation103_spill] sm:$0xff] %v4976_v49 }
 0x14a   :  { %1131 = vrot.lane.b32.xlu1 %v70_v39, %s4078_s6  ;;  %1129 = vrot.lane.b32.xlu0 %v69_v44, %s4078_s6  ;;  %v3484_v44 = vld [vmem:[%s7548_s0 + $0x21] sm:$0xff]  ;;  %v3483_v39 = vld [vmem:[%s7548_s0 + $0x19] sm:$0xff] }
 0x14c   :  { %v4992_v29 = vpop.permute.xlu1 %907  ;;  %v4994_v49 = vpop.permute.xlu0 %905 }
 0x14d   :  { %7657 = vst [vmem:[#allocation104_spill] sm:$0xff] %v4992_v29  ;;  %7658 = vst [vmem:[#allocation105_spill] sm:$0xff] %v4994_v49 }
 0x14e   :  { %1135 = vrot.lane.b32.xlu1 %v3482_v46, %s4078_s6  ;;  %1133 = vrot.lane.b32.xlu0 %v3481_v24, %s4078_s6  ;;  %v5013_v46 = vld [vmem:[%s7548_s0 + $0x39] sm:$0xff]  ;;  %v5018_v24 = vld [vmem:[%s7548_s0 + $0x31] sm:$0xff] }
 0x150   :  { %v5004_v38 = vpop.permute.xlu1 %911  ;;  %v5006_v25 = vpop.permute.xlu0 %909 }
 0x151   :  { %7659 = vst [vmem:[#allocation106_spill] sm:$0xff] %v5004_v38  ;;  %7660 = vst [vmem:[#allocation107_spill] sm:$0xff] %v5006_v25 }
 0x152   :  { %1251 = vrot.lane.b32.xlu1 %v3484_v44, %s4079_s20  ;;  %1249 = vrot.lane.b32.xlu0 %v3483_v39, %s4079_s20  ;;  %v5031_v44 = vld [vmem:[%s7548_s0 + $0x51] sm:$0xff]  ;;  %v5036_v39 = vld [vmem:[%s7548_s0 + $0x49] sm:$0xff] }
 0x154   :  { %v5020_v29 = vpop.permute.xlu1 %1027  ;;  %v5022_v38 = vpop.permute.xlu0 %1025 }
 0x156   :  { %1255 = vrot.lane.b32.xlu1 %v5013_v46, %s4079_s20  ;;  %1253 = vrot.lane.b32.xlu0 %v5018_v24, %s4079_s20 }
 0x158   :  { %v5038_v25 = vpop.permute.xlu1 %1031  ;;  %v5040_v49 = vpop.permute.xlu0 %1029 }
 0x159   :  { %7661 = vst [vmem:[#allocation108_spill] sm:$0xff] %v5038_v25  ;;  %7662 = vst [vmem:[#allocation109_spill] sm:$0xff] %v5040_v49 }
 0x15a   :  { %1259 = vrot.lane.b32.xlu1 %v5031_v44, %s4079_s20  ;;  %1257 = vrot.lane.b32.xlu0 %v5036_v39, %s4079_s20 }
 0x15c   :  { %v5052_v30 = vpop.permute.xlu1 %1035  ;;  %v5054_v20 = vpop.permute.xlu0 %1033 }
 0x15d   :  { %7663 = vst [vmem:[#allocation110_spill] sm:$0xff] %v5052_v30  ;;  %7664 = vst [vmem:[#allocation111_spill] sm:$0xff] %v5054_v20  ;;  %v5465_v30 = vld [vmem:[%s7548_s0 + $0x92] sm:$0xff] }
 0x15e   :  { %1263 = vrot.lane.b32.xlu1 %v3490_v19, %s4079_s20  ;;  %1261 = vrot.lane.b32.xlu0 %v3489_v18, %s4079_s20  ;;  %v3494_v18 = vld [vmem:[%s7548_s0 + $0x99] sm:$0xff]  ;;  %v3493_v19 = vld [vmem:[%s7548_s0 + $0x91] sm:$0xff] }
 0x160   :  { %v5064_v31 = vpop.permute.xlu1 %1039  ;;  %v5066_v21 = vpop.permute.xlu0 %1037 }
 0x161   :  { %7665 = vst [vmem:[#allocation112_spill] sm:$0xff] %v5064_v31  ;;  %7666 = vst [vmem:[#allocation113_spill] sm:$0xff] %v5066_v21  ;;  %v3523_v31 = vld [vmem:[%s7548_s0 + $0x229] sm:$0xff] }
 0x162   :  { %1267 = vrot.lane.b32.xlu1 %v3492_v33, %s4079_s20  ;;  %1265 = vrot.lane.b32.xlu0 %v3491_v48, %s4079_s20  ;;  %v3496_v48 = vld [vmem:[%s7548_s0 + $0xb1] sm:$0xff]  ;;  %v3495_v33 = vld [vmem:[%s7548_s0 + $0xa9] sm:$0xff] }
 0x164   :  { %v5076_v47 = vpop.permute.xlu1 %1043  ;;  %v5078_v35 = vpop.permute.xlu0 %1041 }
 0x165   :  { %7667 = vst [vmem:[#allocation114_spill] sm:$0xff] %v5076_v47  ;;  %7668 = vst [vmem:[#allocation115_spill] sm:$0xff] %v5078_v35 }
 0x166   :  { %1271 = vrot.lane.b32.xlu1 %v3494_v18, %s4079_s20  ;;  %1269 = vrot.lane.b32.xlu0 %v3493_v19, %s4079_s20  ;;  %v3498_v18 = vld [vmem:[%s7548_s0 + $0xc9] sm:$0xff]  ;;  %v3497_v19 = vld [vmem:[%s7548_s0 + $0xc1] sm:$0xff] }
 0x168   :  { %v5088_v22 = vpop.permute.xlu1 %1047  ;;  %v5090_v16 = vpop.permute.xlu0 %1045 }
 0x169   :  { %7669 = vst [vmem:[#allocation116_spill] sm:$0xff] %v5088_v22  ;;  %7670 = vst [vmem:[#allocation117_spill] sm:$0xff] %v5090_v16 }
 0x16a   :  { %1275 = vrot.lane.b32.xlu1 %v3496_v48, %s4079_s20  ;;  %1273 = vrot.lane.b32.xlu0 %v3495_v33, %s4079_s20  ;;  %v3500_v48 = vld [vmem:[%s7548_s0 + $0xe1] sm:$0xff]  ;;  %v3499_v33 = vld [vmem:[%s7548_s0 + $0xd9] sm:$0xff] }
 0x16c   :  { %v5100_v41 = vpop.permute.xlu1 %1051  ;;  %v5102_v51 = vpop.permute.xlu0 %1049 }
 0x16d   :  { %7671 = vst [vmem:[#allocation118_spill] sm:$0xff] %v5100_v41  ;;  %7672 = vst [vmem:[#allocation119_spill] sm:$0xff] %v5102_v51 }
 0x16e   :  { %1279 = vrot.lane.b32.xlu1 %v3498_v18, %s4079_s20  ;;  %1277 = vrot.lane.b32.xlu0 %v3497_v19, %s4079_s20  ;;  %v3502_v18 = vld [vmem:[%s7548_s0 + $0xf9] sm:$0xff]  ;;  %v3501_v19 = vld [vmem:[%s7548_s0 + $0xf1] sm:$0xff] }
 0x170   :  { %v5112_v22 = vpop.permute.xlu1 %1055  ;;  %v5114_v16 = vpop.permute.xlu0 %1053 }
 0x171   :  { %7673 = vst [vmem:[#allocation120_spill] sm:$0xff] %v5112_v22  ;;  %7674 = vst [vmem:[#allocation121_spill] sm:$0xff] %v5114_v16 }
 0x172   :  { %1283 = vrot.lane.b32.xlu1 %v3500_v48, %s4079_s20  ;;  %1281 = vrot.lane.b32.xlu0 %v3499_v33, %s4079_s20  ;;  %v3504_v48 = vld [vmem:[%s7548_s0 + $0x111] sm:$0xff]  ;;  %v3503_v33 = vld [vmem:[%s7548_s0 + $0x109] sm:$0xff] }
 0x174   :  { %v5124_v41 = vpop.permute.xlu1 %1059  ;;  %v5126_v51 = vpop.permute.xlu0 %1057 }
 0x175   :  { %7675 = vst [vmem:[#allocation122_spill] sm:$0xff] %v5124_v41  ;;  %7676 = vst [vmem:[#allocation123_spill] sm:$0xff] %v5126_v51 }
 0x176   :  { %1287 = vrot.lane.b32.xlu1 %v3502_v18, %s4079_s20  ;;  %1285 = vrot.lane.b32.xlu0 %v3501_v19, %s4079_s20  ;;  %v3506_v18 = vld [vmem:[%s7548_s0 + $0x129] sm:$0xff]  ;;  %v3505_v19 = vld [vmem:[%s7548_s0 + $0x121] sm:$0xff] }
 0x178   :  { %v5136_v22 = vpop.permute.xlu1 %1063  ;;  %v5138_v16 = vpop.permute.xlu0 %1061 }
 0x179   :  { %7677 = vst [vmem:[#allocation124_spill] sm:$0xff] %v5136_v22  ;;  %7678 = vst [vmem:[#allocation125_spill] sm:$0xff] %v5138_v16 }
 0x17a   :  { %1291 = vrot.lane.b32.xlu1 %v3504_v48, %s4079_s20  ;;  %1289 = vrot.lane.b32.xlu0 %v3503_v33, %s4079_s20  ;;  %v3508_v48 = vld [vmem:[%s7548_s0 + $0x141] sm:$0xff]  ;;  %v3507_v33 = vld [vmem:[%s7548_s0 + $0x139] sm:$0xff] }
 0x17c   :  { %v5148_v41 = vpop.permute.xlu1 %1067  ;;  %v5150_v51 = vpop.permute.xlu0 %1065 }
 0x17d   :  { %7679 = vst [vmem:[#allocation126_spill] sm:$0xff] %v5148_v41  ;;  %7680 = vst [vmem:[#allocation127_spill] sm:$0xff] %v5150_v51 }
 0x17e   :  { %1295 = vrot.lane.b32.xlu1 %v3506_v18, %s4079_s20  ;;  %1293 = vrot.lane.b32.xlu0 %v3505_v19, %s4079_s20  ;;  %v3510_v18 = vld [vmem:[%s7548_s0 + $0x159] sm:$0xff]  ;;  %v3509_v19 = vld [vmem:[%s7548_s0 + $0x151] sm:$0xff] }
 0x180   :  { %v5160_v22 = vpop.permute.xlu1 %1071  ;;  %v5162_v16 = vpop.permute.xlu0 %1069 }
 0x181   :  { %7681 = vst [vmem:[#allocation128_spill] sm:$0xff] %v5160_v22  ;;  %7682 = vst [vmem:[#allocation129_spill] sm:$0xff] %v5162_v16 }
 0x182   :  { %1299 = vrot.lane.b32.xlu1 %v3508_v48, %s4079_s20  ;;  %1297 = vrot.lane.b32.xlu0 %v3507_v33, %s4079_s20  ;;  %v3512_v48 = vld [vmem:[%s7548_s0 + $0x1a1] sm:$0xff]  ;;  %v3511_v33 = vld [vmem:[%s7548_s0 + $0x199] sm:$0xff] }
 0x184   :  { %v5172_v41 = vpop.permute.xlu1 %1075  ;;  %v5174_v51 = vpop.permute.xlu0 %1073 }
 0x185   :  { %7683 = vst [vmem:[#allocation130_spill] sm:$0xff] %v5172_v41  ;;  %7684 = vst [vmem:[#allocation131_spill] sm:$0xff] %v5174_v51 }
 0x186   :  { %1303 = vrot.lane.b32.xlu1 %v3510_v18, %s4079_s20  ;;  %1301 = vrot.lane.b32.xlu0 %v3509_v19, %s4079_s20  ;;  %v5193_v18 = vld [vmem:[%s7548_s0 + $0x1b9] sm:$0xff]  ;;  %v5198_v19 = vld [vmem:[%s7548_s0 + $0x1b1] sm:$0xff] }
 0x188   :  { %v5184_v22 = vpop.permute.xlu1 %1079  ;;  %v5186_v16 = vpop.permute.xlu0 %1077 }
 0x189   :  { %7685 = vst [vmem:[#allocation132_spill] sm:$0xff] %v5184_v22  ;;  %7686 = vst [vmem:[#allocation133_spill] sm:$0xff] %v5186_v16 }
 0x18a   :  { %1307 = vrot.lane.b32.xlu1 %v3512_v48, %s4079_s20  ;;  %1305 = vrot.lane.b32.xlu0 %v3511_v33, %s4079_s20  ;;  %v5211_v48 = vld [vmem:[%s7548_s0 + $0x1d1] sm:$0xff]  ;;  %v5216_v33 = vld [vmem:[%s7548_s0 + $0x1c9] sm:$0xff] }
 0x18c   :  { %v5200_v41 = vpop.permute.xlu1 %1083  ;;  %v5202_v51 = vpop.permute.xlu0 %1081 }
 0x18e   :  { %1311 = vrot.lane.b32.xlu1 %v5193_v18, %s4079_s20  ;;  %1309 = vrot.lane.b32.xlu0 %v5198_v19, %s4079_s20 }
 0x190   :  { %v5218_v22 = vpop.permute.xlu1 %1087  ;;  %v5220_v16 = vpop.permute.xlu0 %1085 }
 0x191   :  { %7687 = vst [vmem:[#allocation134_spill] sm:$0xff] %v5218_v22  ;;  %7688 = vst [vmem:[#allocation135_spill] sm:$0xff] %v5220_v16  ;;  %v5651_v22 = vld [vmem:[%s7548_s0 + $0x1fa] sm:$0xff] }
 0x192   :  { %1315 = vrot.lane.b32.xlu1 %v5211_v48, %s4079_s20  ;;  %1313 = vrot.lane.b32.xlu0 %v5216_v33, %s4079_s20  ;;  %v5723_v16 = vld [vmem:[%s7548_s0 + $0x25a] sm:$0xff] }
 0x193   :  { %7754 = vst [vmem:[#allocation201_spill] sm:$0xff] %v5723_v16 }
 0x194   :  { %v5236_v47 = vpop.permute.xlu1 %1091  ;;  %v5238_v28 = vpop.permute.xlu0 %1089 }
 0x195   :  { %7689 = vst [vmem:[#allocation136_spill] sm:$0xff] %v5236_v47  ;;  %7690 = vst [vmem:[#allocation137_spill] sm:$0xff] %v5238_v28  ;;  %v5460_v47 = vld [vmem:[%s7548_s0 + $0x9a] sm:$0xff] }
 0x196   :  { %1319 = vrot.lane.b32.xlu1 %v5229_v23, %s4079_s20  ;;  %1317 = vrot.lane.b32.xlu0 %v5234_v17, %s4079_s20 }
 0x198   :  { %v5254_v12 = vpop.permute.xlu1 %1095  ;;  %v5256_v35 = vpop.permute.xlu0 %1093 }
 0x199   :  { %7691 = vst [vmem:[#allocation138_spill] sm:$0xff] %v5254_v12  ;;  %7692 = vst [vmem:[#allocation139_spill] sm:$0xff] %v5256_v35  ;;  %v3524_v12 = vld [vmem:[%s7548_s0 + $0x231] sm:$0xff]  ;;  %v5429_v35 = vld [vmem:[%s7548_s0 + $0x62] sm:$0xff] }
 0x19a   :  { %1323 = vrot.lane.b32.xlu1 %v5247_v34, %s4079_s20  ;;  %1321 = vrot.lane.b32.xlu0 %v5252_v14, %s4079_s20 }
 0x19c   :  { %v5270_v15 = vpop.permute.xlu1 %1099  ;;  %v5272_v13 = vpop.permute.xlu0 %1097 }
 0x19d   :  { %7693 = vst [vmem:[#allocation140_spill] sm:$0xff] %v5270_v15  ;;  %7694 = vst [vmem:[#allocation141_spill] sm:$0xff] %v5272_v13  ;;  %v3525_v15 = vld [vmem:[%s7548_s0 + $0x241] sm:$0xff] }
 0x19e   :  { %1327 = vrot.lane.b32.xlu1 %v3522_v40, %s4079_s20  ;;  %1325 = vrot.lane.b32.xlu0 %v5268_v11, %s4079_s20  ;;  %v3526_v40 = vld [vmem:[%s7548_s0 + $0x249] sm:$0xff] }
 0x1a0   :  { %v5283_v2 = vpop.permute.xlu1 %1103  ;;  %v5285_v43 = vpop.permute.xlu0 %1101 }
 0x1a1   :  { %7695 = vst [vmem:[#allocation142_spill] sm:$0xff] %v5283_v2  ;;  %7696 = vst [vmem:[#allocation143_spill] sm:$0xff] %v5285_v43 }
 0x1a2   :  { %1331 = vrot.lane.b32.xlu1 %v3524_v12, %s4079_s20  ;;  %1329 = vrot.lane.b32.xlu0 %v3523_v31, %s4079_s20  ;;  %v3528_v12 = vld [vmem:[%s7548_s0 + $0x261] sm:$0xff]  ;;  %v3527_v31 = vld [vmem:[%s7548_s0 + $0x259] sm:$0xff] }
 0x1a4   :  { %v5295_v13 = vpop.permute.xlu1 %1107  ;;  %v5297_v6 = vpop.permute.xlu0 %1105 }
 0x1a5   :  { %7697 = vst [vmem:[#allocation144_spill] sm:$0xff] %v5295_v13  ;;  %7698 = vst [vmem:[#allocation145_spill] sm:$0xff] %v5297_v6 }
 0x1a6   :  { %1335 = vrot.lane.b32.xlu1 %v3526_v40, %s4079_s20  ;;  %1333 = vrot.lane.b32.xlu0 %v3525_v15, %s4079_s20  ;;  %v3530_v15 = vld [vmem:[%s7548_s0 + $0x279] sm:$0xff]  ;;  %v3529_v40 = vld [vmem:[%s7548_s0 + $0x271] sm:$0xff] }
 0x1a8   :  { %v5307_v2 = vpop.permute.xlu1 %1111  ;;  %v5309_v43 = vpop.permute.xlu0 %1109 }
 0x1a9   :  { %7699 = vst [vmem:[#allocation146_spill] sm:$0xff] %v5307_v2  ;;  %7700 = vst [vmem:[#allocation147_spill] sm:$0xff] %v5309_v43 }
 0x1aa   :  { %1339 = vrot.lane.b32.xlu1 %v3528_v12, %s4079_s20  ;;  %1337 = vrot.lane.b32.xlu0 %v3527_v31, %s4079_s20  ;;  %v3532_v12 = vld [vmem:[%s7548_s0 + $0x291] sm:$0xff]  ;;  %v3531_v31 = vld [vmem:[%s7548_s0 + $0x289] sm:$0xff] }
 0x1ac   :  { %v5319_v13 = vpop.permute.xlu1 %1115  ;;  %v5321_v6 = vpop.permute.xlu0 %1113 }
 0x1ad   :  { %7701 = vst [vmem:[#allocation148_spill] sm:$0xff] %v5319_v13  ;;  %7702 = vst [vmem:[#allocation149_spill] sm:$0xff] %v5321_v6 }
 0x1ae   :  { %1343 = vrot.lane.b32.xlu1 %v3530_v15, %s4079_s20  ;;  %1341 = vrot.lane.b32.xlu0 %v3529_v40, %s4079_s20  ;;  %v3534_v15 = vld [vmem:[%s7548_s0 + $0x2a9] sm:$0xff]  ;;  %v3533_v40 = vld [vmem:[%s7548_s0 + $0x2a1] sm:$0xff] }
 0x1b0   :  { %v5331_v2 = vpop.permute.xlu1 %1119  ;;  %v5333_v43 = vpop.permute.xlu0 %1117 }
 0x1b1   :  { %7703 = vst [vmem:[#allocation150_spill] sm:$0xff] %v5331_v2  ;;  %7704 = vst [vmem:[#allocation151_spill] sm:$0xff] %v5333_v43 }
 0x1b2   :  { %1347 = vrot.lane.b32.xlu1 %v3532_v12, %s4079_s20  ;;  %1345 = vrot.lane.b32.xlu0 %v3531_v31, %s4079_s20  ;;  %v3536_v12 = vld [vmem:[%s7548_s0 + $0x2c1] sm:$0xff]  ;;  %v3535_v31 = vld [vmem:[%s7548_s0 + $0x2b9] sm:$0xff] }
 0x1b4   :  { %v5343_v13 = vpop.permute.xlu1 %1123  ;;  %v5345_v6 = vpop.permute.xlu0 %1121 }
 0x1b5   :  { %7705 = vst [vmem:[#allocation152_spill] sm:$0xff] %v5343_v13  ;;  %7706 = vst [vmem:[#allocation153_spill] sm:$0xff] %v5345_v6 }
 0x1b6   :  { %1351 = vrot.lane.b32.xlu1 %v3534_v15, %s4079_s20  ;;  %1349 = vrot.lane.b32.xlu0 %v3533_v40, %s4079_s20  ;;  %v3538_v15 = vld [vmem:[%s7548_s0 + $0x2d9] sm:$0xff]  ;;  %v3537_v40 = vld [vmem:[%s7548_s0 + $0x2d1] sm:$0xff] }
 0x1b8   :  { %v5355_v2 = vpop.permute.xlu1 %1127  ;;  %v5357_v43 = vpop.permute.xlu0 %1125 }
 0x1b9   :  { %7707 = vst [vmem:[#allocation154_spill] sm:$0xff] %v5355_v2  ;;  %7708 = vst [vmem:[#allocation155_spill] sm:$0xff] %v5357_v43 }
 0x1ba   :  { %1355 = vrot.lane.b32.xlu1 %v3536_v12, %s4079_s20  ;;  %1353 = vrot.lane.b32.xlu0 %v3535_v31, %s4079_s20  ;;  %v3540_v12 = vld [vmem:[%s7548_s0 + $0x22] sm:$0xff]  ;;  %v3539_v31 = vld [vmem:[%s7548_s0 + $0x1a] sm:$0xff] }
 0x1bc   :  { %v5367_v13 = vpop.permute.xlu1 %1131  ;;  %v5369_v6 = vpop.permute.xlu0 %1129 }
 0x1bd   :  { %7709 = vst [vmem:[#allocation156_spill] sm:$0xff] %v5367_v13  ;;  %7710 = vst [vmem:[#allocation157_spill] sm:$0xff] %v5369_v6 }
 0x1be   :  { %1359 = vrot.lane.b32.xlu1 %v3538_v15, %s4079_s20  ;;  %1357 = vrot.lane.b32.xlu0 %v3537_v40, %s4079_s20  ;;  %v5388_v15 = vld [vmem:[%s7548_s0 + $0x3a] sm:$0xff]  ;;  %v5393_v40 = vld [vmem:[%s7548_s0 + $0x32] sm:$0xff] }
 0x1c0   :  { %v5379_v2 = vpop.permute.xlu1 %1135  ;;  %v5381_v43 = vpop.permute.xlu0 %1133 }
 0x1c1   :  { %7711 = vst [vmem:[#allocation158_spill] sm:$0xff] %v5379_v2  ;;  %7712 = vst [vmem:[#allocation159_spill] sm:$0xff] %v5381_v43 }
 0x1c2   :  { %1475 = vrot.lane.b32.xlu1 %v3540_v12, %s4080_s5  ;;  %1473 = vrot.lane.b32.xlu0 %v3539_v31, %s4080_s5  ;;  %v5406_v12 = vld [vmem:[%s7548_s0 + $0x52] sm:$0xff]  ;;  %v5411_v31 = vld [vmem:[%s7548_s0 + $0x4a] sm:$0xff] }
 0x1c4   :  { %v5395_v13 = vpop.permute.xlu1 %1251  ;;  %v5397_v2 = vpop.permute.xlu0 %1249 }
 0x1c6   :  { %1479 = vrot.lane.b32.xlu1 %v5388_v15, %s4080_s5  ;;  %1477 = vrot.lane.b32.xlu0 %v5393_v40, %s4080_s5 }
 0x1c8   :  { %v5413_v43 = vpop.permute.xlu1 %1255  ;;  %v5415_v6 = vpop.permute.xlu0 %1253 }
 0x1c9   :  { %7713 = vst [vmem:[#allocation160_spill] sm:$0xff] %v5413_v43  ;;  %7714 = vst [vmem:[#allocation161_spill] sm:$0xff] %v5415_v6  ;;  %v5646_v43 = vld [vmem:[%s7548_s0 + $0x202] sm:$0xff] }
 0x1ca   :  { %1483 = vrot.lane.b32.xlu1 %v5406_v12, %s4080_s5  ;;  %1481 = vrot.lane.b32.xlu0 %v5411_v31, %s4080_s5  ;;  %v5705_v6 = vld [vmem:[%s7548_s0 + $0x242] sm:$0xff] }
 0x1cb   :  { %7750 = vst [vmem:[#allocation197_spill] sm:$0xff] %v5705_v6 }
 0x1cc   :  { %v5431_v21 = vpop.permute.xlu1 %1259  ;;  %v5433_v45 = vpop.permute.xlu0 %1257 }
 0x1cd   :  { %7715 = vst [vmem:[#allocation162_spill] sm:$0xff] %v5431_v21  ;;  %7716 = vst [vmem:[#allocation163_spill] sm:$0xff] %v5433_v45  ;;  %v3553_v45 = vld [vmem:[%s7548_s0 + $0xc2] sm:$0xff] }
 0x1ce   :  { %1487 = vrot.lane.b32.xlu1 %v5424_v8, %s4080_s5  ;;  %1485 = vrot.lane.b32.xlu0 %v5429_v35, %s4080_s5 }
 0x1d0   :  { %v5449_v9 = vpop.permute.xlu1 %1263  ;;  %v5451_v21 = vpop.permute.xlu0 %1261 }
 0x1d1   :  { %7717 = vst [vmem:[#allocation164_spill] sm:$0xff] %v5449_v9  ;;  %7718 = vst [vmem:[#allocation165_spill] sm:$0xff] %v5451_v21  ;;  %v5478_v21 = vld [vmem:[%s7548_s0 + $0xb2] sm:$0xff] }
 0x1d2   :  { %1491 = vrot.lane.b32.xlu1 %v5442_v50, %s4080_s5  ;;  %1489 = vrot.lane.b32.xlu0 %v5447_v7, %s4080_s5 }
 0x1d4   :  { %v5467_v55 = vpop.permute.xlu1 %1267  ;;  %v5469_v9 = vpop.permute.xlu0 %1265 }
 0x1d5   :  { %7719 = vst [vmem:[#allocation166_spill] sm:$0xff] %v5467_v55  ;;  %7720 = vst [vmem:[#allocation167_spill] sm:$0xff] %v5469_v9  ;;  %v3554_v9 = vld [vmem:[%s7548_s0 + $0xca] sm:$0xff] }
 0x1d6   :  { %1495 = vrot.lane.b32.xlu1 %v5460_v47, %s4080_s5  ;;  %1493 = vrot.lane.b32.xlu0 %v5465_v30, %s4080_s5 }
 0x1d8   :  { %v5485_v62 = vpop.permute.xlu1 %1271  ;;  %v5487_v55 = vpop.permute.xlu0 %1269 }
 0x1d9   :  { %7721 = vst [vmem:[#allocation168_spill] sm:$0xff] %v5485_v62  ;;  %7722 = vst [vmem:[#allocation169_spill] sm:$0xff] %v5487_v55  ;;  %v3556_v62 = vld [vmem:[%s7548_s0 + $0xe2] sm:$0xff]  ;;  %v3555_v55 = vld [vmem:[%s7548_s0 + $0xda] sm:$0xff] }
 0x1da   :  { %1499 = vrot.lane.b32.xlu1 %v5478_v21, %s4080_s5  ;;  %1497 = vrot.lane.b32.xlu0 %v5483_v42, %s4080_s5 }
 0x1dc   :  { %v5499_v4 = vpop.permute.xlu1 %1275  ;;  %v5501_v28 = vpop.permute.xlu0 %1273 }
 0x1dd   :  { %7723 = vst [vmem:[#allocation170_spill] sm:$0xff] %v5499_v4  ;;  %7724 = vst [vmem:[#allocation171_spill] sm:$0xff] %v5501_v28 }
 0x1de   :  { %1503 = vrot.lane.b32.xlu1 %v3554_v9, %s4080_s5  ;;  %1501 = vrot.lane.b32.xlu0 %v3553_v45, %s4080_s5  ;;  %v3558_v9 = vld [vmem:[%s7548_s0 + $0xfa] sm:$0xff]  ;;  %v3557_v45 = vld [vmem:[%s7548_s0 + $0xf2] sm:$0xff] }
 0x1e0   :  { %v5511_v20 = vpop.permute.xlu1 %1279  ;;  %v5513_v36 = vpop.permute.xlu0 %1277 }
 0x1e1   :  { %7725 = vst [vmem:[#allocation172_spill] sm:$0xff] %v5511_v20  ;;  %7726 = vst [vmem:[#allocation173_spill] sm:$0xff] %v5513_v36 }
 0x1e2   :  { %1507 = vrot.lane.b32.xlu1 %v3556_v62, %s4080_s5  ;;  %1505 = vrot.lane.b32.xlu0 %v3555_v55, %s4080_s5  ;;  %v3560_v62 = vld [vmem:[%s7548_s0 + $0x112] sm:$0xff]  ;;  %v3559_v55 = vld [vmem:[%s7548_s0 + $0x10a] sm:$0xff] }
 0x1e4   :  { %v5523_v4 = vpop.permute.xlu1 %1283  ;;  %v5525_v28 = vpop.permute.xlu0 %1281 }
 0x1e5   :  { %7727 = vst [vmem:[#allocation174_spill] sm:$0xff] %v5523_v4  ;;  %7728 = vst [vmem:[#allocation175_spill] sm:$0xff] %v5525_v28 }
 0x1e6   :  { %1511 = vrot.lane.b32.xlu1 %v3558_v9, %s4080_s5  ;;  %1509 = vrot.lane.b32.xlu0 %v3557_v45, %s4080_s5  ;;  %v3562_v9 = vld [vmem:[%s7548_s0 + $0x12a] sm:$0xff]  ;;  %v3561_v45 = vld [vmem:[%s7548_s0 + $0x122] sm:$0xff] }
 0x1e8   :  { %v5535_v20 = vpop.permute.xlu1 %1287  ;;  %v5537_v36 = vpop.permute.xlu0 %1285 }
 0x1e9   :  { %7729 = vst [vmem:[#allocation176_spill] sm:$0xff] %v5535_v20  ;;  %7730 = vst [vmem:[#allocation177_spill] sm:$0xff] %v5537_v36 }
 0x1ea   :  { %1515 = vrot.lane.b32.xlu1 %v3560_v62, %s4080_s5  ;;  %1513 = vrot.lane.b32.xlu0 %v3559_v55, %s4080_s5  ;;  %v3564_v62 = vld [vmem:[%s7548_s0 + $0x142] sm:$0xff]  ;;  %v3563_v55 = vld [vmem:[%s7548_s0 + $0x13a] sm:$0xff] }
 0x1ec   :  { %v5547_v4 = vpop.permute.xlu1 %1291  ;;  %v5549_v28 = vpop.permute.xlu0 %1289 }
 0x1ed   :  { %7731 = vst [vmem:[#allocation178_spill] sm:$0xff] %v5547_v4  ;;  %7732 = vst [vmem:[#allocation179_spill] sm:$0xff] %v5549_v28 }
 0x1ee   :  { %1519 = vrot.lane.b32.xlu1 %v3562_v9, %s4080_s5  ;;  %1517 = vrot.lane.b32.xlu0 %v3561_v45, %s4080_s5  ;;  %v3566_v9 = vld [vmem:[%s7548_s0 + $0x15a] sm:$0xff]  ;;  %v3565_v45 = vld [vmem:[%s7548_s0 + $0x152] sm:$0xff] }
 0x1f0   :  { %v5559_v20 = vpop.permute.xlu1 %1295  ;;  %v5561_v36 = vpop.permute.xlu0 %1293 }
 0x1f1   :  { %7733 = vst [vmem:[#allocation180_spill] sm:$0xff] %v5559_v20  ;;  %7734 = vst [vmem:[#allocation181_spill] sm:$0xff] %v5561_v36 }
 0x1f2   :  { %1523 = vrot.lane.b32.xlu1 %v3564_v62, %s4080_s5  ;;  %1521 = vrot.lane.b32.xlu0 %v3563_v55, %s4080_s5  ;;  %v3568_v62 = vld [vmem:[%s7548_s0 + $0x1a2] sm:$0xff]  ;;  %v3567_v55 = vld [vmem:[%s7548_s0 + $0x19a] sm:$0xff] }
 0x1f4   :  { %v5571_v4 = vpop.permute.xlu1 %1299  ;;  %v5573_v28 = vpop.permute.xlu0 %1297 }
 0x1f5   :  { %7735 = vst [vmem:[#allocation182_spill] sm:$0xff] %v5571_v4  ;;  %7736 = vst [vmem:[#allocation183_spill] sm:$0xff] %v5573_v28 }
 0x1f6   :  { %1527 = vrot.lane.b32.xlu1 %v3566_v9, %s4080_s5  ;;  %1525 = vrot.lane.b32.xlu0 %v3565_v45, %s4080_s5  ;;  %v5592_v9 = vld [vmem:[%s7548_s0 + $0x1ba] sm:$0xff]  ;;  %v5597_v45 = vld [vmem:[%s7548_s0 + $0x1b2] sm:$0xff] }
 0x1f8   :  { %v5583_v20 = vpop.permute.xlu1 %1303  ;;  %v5585_v36 = vpop.permute.xlu0 %1301 }
 0x1f9   :  { %7737 = vst [vmem:[#allocation184_spill] sm:$0xff] %v5583_v20  ;;  %7738 = vst [vmem:[#allocation185_spill] sm:$0xff] %v5585_v36 }
 0x1fa   :  { %1531 = vrot.lane.b32.xlu1 %v3568_v62, %s4080_s5  ;;  %1529 = vrot.lane.b32.xlu0 %v3567_v55, %s4080_s5  ;;  %v5610_v62 = vld [vmem:[%s7548_s0 + $0x1d2] sm:$0xff]  ;;  %v5615_v55 = vld [vmem:[%s7548_s0 + $0x1ca] sm:$0xff] }
 0x1fc   :  { %v5599_v4 = vpop.permute.xlu1 %1307  ;;  %v5601_v28 = vpop.permute.xlu0 %1305 }
 0x1fe   :  { %1535 = vrot.lane.b32.xlu1 %v5592_v9, %s4080_s5  ;;  %1533 = vrot.lane.b32.xlu0 %v5597_v45, %s4080_s5 }
 0x200   :  { %v5617_v20 = vpop.permute.xlu1 %1311  ;;  %v5619_v36 = vpop.permute.xlu0 %1309 }
 0x201   :  { %7739 = vst [vmem:[#allocation186_spill] sm:$0xff] %v5617_v20  ;;  %7740 = vst [vmem:[#allocation187_spill] sm:$0xff] %v5619_v36 }
 0x202   :  { %1539 = vrot.lane.b32.xlu1 %v5610_v62, %s4080_s5  ;;  %1537 = vrot.lane.b32.xlu0 %v5615_v55, %s4080_s5 }
 0x204   :  { %v5635_v5 = vpop.permute.xlu1 %1315  ;;  %v5637_v20 = vpop.permute.xlu0 %1313 }
 0x205   :  { %7741 = vst [vmem:[#allocation188_spill] sm:$0xff] %v5635_v5  ;;  %7742 = vst [vmem:[#allocation189_spill] sm:$0xff] %v5637_v20  ;;  %v5664_v20 = vld [vmem:[%s7548_s0 + $0x21a] sm:$0xff] }
 0x206   :  { %1543 = vrot.lane.b32.xlu1 %v5628_v10, %s4080_s5  ;;  %1541 = vrot.lane.b32.xlu0 %v5633_v63, %s4080_s5 }
 0x208   :  { %v5653_v25 = vpop.permute.xlu1 %1319  ;;  %v5655_v5 = vpop.permute.xlu0 %1317 }
 0x209   :  { %7743 = vst [vmem:[#allocation190_spill] sm:$0xff] %v5653_v25  ;;  %7744 = vst [vmem:[#allocation191_spill] sm:$0xff] %v5655_v5  ;;  %v5682_v5 = vld [vmem:[%s7548_s0 + $0x232] sm:$0xff] }
 0x20a   :  { %1547 = vrot.lane.b32.xlu1 %v5646_v43, %s4080_s5  ;;  %1545 = vrot.lane.b32.xlu0 %v5651_v22, %s4080_s5 }
 0x20c   :  { %v5671_v26 = vpop.permute.xlu1 %1323  ;;  %v5673_v25 = vpop.permute.xlu0 %1321 }
 0x20d   :  { %7745 = vst [vmem:[#allocation192_spill] sm:$0xff] %v5671_v26  ;;  %7746 = vst [vmem:[#allocation193_spill] sm:$0xff] %v5673_v25  ;;  %v5700_v25 = vld [vmem:[%s7548_s0 + $0x24a] sm:$0xff] }
 0x20e   :  { %1551 = vrot.lane.b32.xlu1 %v5664_v20, %s4080_s5  ;;  %1549 = vrot.lane.b32.xlu0 %v5669_v37, %s4080_s5  ;;  %7749 = vst [vmem:[#allocation196_spill] sm:$0xff] %v5700_v25 }
 0x210   :  { %v5689_v36 = vpop.permute.xlu1 %1327  ;;  %v5691_v26 = vpop.permute.xlu0 %1325 }
 0x211   :  { %7747 = vst [vmem:[#allocation194_spill] sm:$0xff] %v5689_v36  ;;  %7748 = vst [vmem:[#allocation195_spill] sm:$0xff] %v5691_v26  ;;  %v5718_v26 = vld [vmem:[%s7548_s0 + $0x262] sm:$0xff] }
 0x212   :  { %1555 = vrot.lane.b32.xlu1 %v5682_v5, %s4080_s5  ;;  %1553 = vrot.lane.b32.xlu0 %v5687_v56, %s4080_s5  ;;  %7753 = vst [vmem:[#allocation200_spill] sm:$0xff] %v5718_v26 }
 0x214   :  { %v5707_v0 = vpop.permute.xlu1 %1331  ;;  %v5709_v36 = vpop.permute.xlu0 %1329 }
 0x215   :  { %7751 = vst [vmem:[#allocation198_spill] sm:$0xff] %v5707_v0  ;;  %7752 = vst [vmem:[#allocation199_spill] sm:$0xff] %v5709_v36  ;;  %v5736_v36 = vld [vmem:[%s7548_s0 + $0x27a] sm:$0xff] }
 0x216   :  { %1559 = vrot.lane.b32.xlu1 %v5700_v25, %s4080_s5  ;;  %1557 = vrot.lane.b32.xlu0 %v5705_v6, %s4080_s5  ;;  %7757 = vst [vmem:[#allocation204_spill] sm:$0xff] %v5736_v36  ;;  %v5741_v25 = vld [vmem:[%s7548_s0 + $0x272] sm:$0xff] }
 0x217   :  { %7758 = vst [vmem:[#allocation205_spill] sm:$0xff] %v5741_v25 }
 0x218   :  { %v5725_v49 = vpop.permute.xlu1 %1335  ;;  %v5727_v0 = vpop.permute.xlu0 %1333 }
 0x219   :  { %7755 = vst [vmem:[#allocation202_spill] sm:$0xff] %v5725_v49  ;;  %7756 = vst [vmem:[#allocation203_spill] sm:$0xff] %v5727_v0  ;;  %v3588_v0 = vld [vmem:[%s7548_s0 + $0x292] sm:$0xff] }
 0x21a   :  { %1563 = vrot.lane.b32.xlu1 %v5718_v26, %s4080_s5  ;;  %1561 = vrot.lane.b32.xlu0 %v5723_v16, %s4080_s5  ;;  %v3587_v26 = vld [vmem:[%s7548_s0 + $0x28a] sm:$0xff] }
 0x21c   :  { %v5743_v6 = vpop.permute.xlu1 %1339  ;;  %v5745_v49 = vpop.permute.xlu0 %1337 }
 0x21d   :  { %7759 = vst [vmem:[#allocation206_spill] sm:$0xff] %v5743_v6  ;;  %7760 = vst [vmem:[#allocation207_spill] sm:$0xff] %v5745_v49  ;;  %v3590_v6 = vld [vmem:[%s7548_s0 + $0x2aa] sm:$0xff]  ;;  %v3589_v49 = vld [vmem:[%s7548_s0 + $0x2a2] sm:$0xff] }
 0x21e   :  { %1567 = vrot.lane.b32.xlu1 %v5736_v36, %s4080_s5  ;;  %1565 = vrot.lane.b32.xlu0 %v5741_v25, %s4080_s5 }
 0x220   :  { %v5757_v16 = vpop.permute.xlu1 %1343  ;;  %v5759_v54 = vpop.permute.xlu0 %1341 }
 0x221   :  { %7761 = vst [vmem:[#allocation208_spill] sm:$0xff] %v5757_v16  ;;  %7762 = vst [vmem:[#allocation209_spill] sm:$0xff] %v5759_v54 }
 0x222   :  { %1571 = vrot.lane.b32.xlu1 %v3588_v0, %s4080_s5  ;;  %1569 = vrot.lane.b32.xlu0 %v3587_v26, %s4080_s5  ;;  %v3592_v0 = vld [vmem:[%s7548_s0 + $0x2c2] sm:$0xff]  ;;  %v3591_v26 = vld [vmem:[%s7548_s0 + $0x2ba] sm:$0xff] }
 0x224   :  { %v5769_v36 = vpop.permute.xlu1 %1347  ;;  %v5771_v25 = vpop.permute.xlu0 %1345 }
 0x225   :  { %7763 = vst [vmem:[#allocation210_spill] sm:$0xff] %v5769_v36  ;;  %7764 = vst [vmem:[#allocation211_spill] sm:$0xff] %v5771_v25 }
 0x226   :  { %1575 = vrot.lane.b32.xlu1 %v3590_v6, %s4080_s5  ;;  %1573 = vrot.lane.b32.xlu0 %v3589_v49, %s4080_s5  ;;  %v3594_v6 = vld [vmem:[%s7548_s0 + $0x2da] sm:$0xff]  ;;  %v3593_v49 = vld [vmem:[%s7548_s0 + $0x2d2] sm:$0xff] }
 0x228   :  { %v5781_v16 = vpop.permute.xlu1 %1351  ;;  %v5783_v54 = vpop.permute.xlu0 %1349 }
 0x229   :  { %7765 = vst [vmem:[#allocation212_spill] sm:$0xff] %v5781_v16  ;;  %7766 = vst [vmem:[#allocation213_spill] sm:$0xff] %v5783_v54  ;;  %v2769_v16 = vld [vmem:[%s7549_s1] sm:$0xff] }
 0x22a   :  { %1579 = vrot.lane.b32.xlu1 %v3592_v0, %s4080_s5  ;;  %1577 = vrot.lane.b32.xlu0 %v3591_v26, %s4080_s5  ;;  %v2770_v0 = vld [vmem:[%s7549_s1 + $0x8] sm:$0xff]  ;;  %v3596_v26 = vld [vmem:[%s7548_s0 + $0x38] sm:$0xff] }
 0x22c   :  { %v5793_v36 = vpop.permute.xlu1 %1355  ;;  %v5795_v25 = vpop.permute.xlu0 %1353 }
 0x22d   :  { %7767 = vst [vmem:[#allocation214_spill] sm:$0xff] %v5793_v36  ;;  %7768 = vst [vmem:[#allocation215_spill] sm:$0xff] %v5795_v25  ;;  %v3595_v36 = vld [vmem:[%s7548_s0 + $0x30] sm:$0xff]  ;;  %v3976_v25 = vpack.c.bf16 %v2770_v0, %v2769_v16  ;;  %v3624_v16 = vld [vmem:[%s7548_s0 + $0x1b8] sm:$0xff] }
 0x22e   :  { %1583 = vrot.lane.b32.xlu1 %v3594_v6, %s4080_s5  ;;  %1581 = vrot.lane.b32.xlu0 %v3593_v49, %s4080_s5  ;;  %v2771_v6 = vld [vmem:[%s7549_s1 + $0x10] sm:$0xff]  ;;  %v2772_v49 = vld [vmem:[%s7549_s1 + $0x18] sm:$0xff] }
 0x22f   :  { %3977 = vmatprep.subr.bf16.mxu0 %v3976_v25  ;;  %3984 = vmatprep.subr.bf16.mxu1 %v3976_v25  ;;  %v3623_v0 = vld [vmem:[%s7548_s0 + $0x1b0] sm:$0xff] }
 0x230   :  { %v5811_v54 = vpop.permute.xlu1 %1359  ;;  %v5813_v27 = vpop.permute.xlu0 %1357  ;;  %3979 = vmatpush3.bf16.msra.mxu0 %v3976_v25  ;;  %3987 = vmatpush3.bf16.msra.mxu1 %v3976_v25 }
 0x231   :  { %7769 = vst [vmem:[#allocation216_spill] sm:$0xff] %v5811_v54  ;;  %7770 = vst [vmem:[#allocation217_spill] sm:$0xff] %v5813_v27  ;;  %v3980_v54 = vpack.c.bf16 %v2772_v49, %v2771_v6 }
 0x232   :  { %1699 = vrot.lane.b32.xlu1 %v3596_v26, %s4081_s24  ;;  %1697 = vrot.lane.b32.xlu0 %v3595_v36, %s4081_s24  ;;  %v2773_v36 = vld [vmem:[%s7549_s1 + $0x20] sm:$0xf]  ;;  %s4083_s1 = smov 32  }
 0x233   :  { %3981 = vmatprep.subr.bf16.mxu0 %v3980_v54  ;;  %3985 = vmatprep.subr.bf16.mxu1 %v3980_v54 }
 0x234   :  { %v5829_v27 = vpop.permute.xlu1 %1475  ;;  %v5831_v26 = vpop.permute.xlu0 %1473  ;;  %3983 = vmatpush3.bf16.msra.mxu0 %v3980_v54  ;;  %3988 = vmatpush3.bf16.msra.mxu1 %v3980_v54 }
 0x235   :  { %3890 = vmatprep.subr.msk.mxu0 %vm2950_vm0, %v2773_v36  ;;  %3986 = vmatprep.subr.msk.mxu1 %vm2950_vm0, %v2773_v36 }
 0x236   :  { %1755 = vrot.lane.b32.xlu1 %v3624_v16, %s4081_s24  ;;  %1753 = vrot.lane.b32.xlu0 %v3623_v0, %s4081_s24 }
 0x238   :  { %v5838_v57 = vpop.permute.xlu1 %1479  ;;  %v5840_v25 = vpop.permute.xlu0 %1477  ;;  %3891 = vmatpush3.msk.msra.mxu0 %vm2950_vm0, %v2773_v36  ;;  %3989 = vmatpush3.msk.msra.mxu1 %vm2950_vm0, %v2773_v36 }
 0x23a   :  { %1977 = vrot.lane.b32.xlu1 %v5198_v19, %s4082_s8  ;;  %1921 = vrot.lane.b32.xlu0 %v5018_v24, %s4082_s8 }
 0x23c   :  { %v5846_v54 = vpop.permute.xlu1 %1483  ;;  %v5848_v6 = vpop.permute.xlu0 %1481 }
 0x23e   :  { %1979 = vrot.lane.b32.xlu1 %v5193_v18, %s4082_s8  ;;  %1923 = vrot.lane.b32.xlu0 %v5013_v46, %s4082_s8  ;;  %v3625_v46 = vld [vmem:[%s7548_s0 + $0x1c8] sm:$0xff] }
 0x23f   :  { %v3597_v18 = vld [vmem:[%s7548_s0 + $0x48] sm:$0xff] }
 0x240   :  { %v5854_v49 = vpop.permute.xlu1 %1487  ;;  %v5856_v16 = vpop.permute.xlu0 %1485 }
 0x242   :  { %2201 = vrot.lane.b32.xlu1 %v5597_v45, %s4083_s1  ;;  %2145 = vrot.lane.b32.xlu0 %v5393_v40, %s4083_s1 }
 0x244   :  { %v5862_v24 = vpop.permute.xlu1 %1491  ;;  %v5864_v19 = vpop.permute.xlu0 %1489 }
 0x246   :  { %2203 = vrot.lane.b32.xlu1 %v5592_v9, %s4083_s1  ;;  %2147 = vrot.lane.b32.xlu0 %v5388_v15, %s4083_s1  ;;  %v3626_v15 = vld [vmem:[%s7548_s0 + $0x1d0] sm:$0xff] }
 0x247   :  { %v3598_v9 = vld [vmem:[%s7548_s0 + $0x50] sm:$0xff] }
 0x248   :  { %v5876_v45 = vpop.permute.xlu1 %1495  ;;  %v5878_v40 = vpop.permute.xlu0 %1493 }
 0x249   :  { %7771 = vst [vmem:[#allocation218_spill] sm:$0xff] %v5876_v45  ;;  %7772 = vst [vmem:[#allocation219_spill] sm:$0xff] %v5878_v40 }
 0x24a   :  { %1757 = vrot.lane.b32.xlu1 %v3625_v46, %s4081_s24  ;;  %1701 = vrot.lane.b32.xlu0 %v3597_v18, %s4081_s24 }
 0x24c   :  { %v5888_v0 = vpop.permute.xlu1 %1499  ;;  %v5890_v36 = vpop.permute.xlu0 %1497 }
 0x24e   :  { %1759 = vrot.lane.b32.xlu1 %v3626_v15, %s4081_s24  ;;  %1703 = vrot.lane.b32.xlu0 %v3598_v9, %s4081_s24 }
 0x250   :  { %v5894_v45 = vpop.permute.xlu1 %1503  ;;  %v5896_v46 = vpop.permute.xlu0 %1501 }
 0x251   :  { %7773 = vst [vmem:[#allocation220_spill] sm:$0xff] %v5894_v45 }
 0x252   :  { %1981 = vrot.lane.b32.xlu1 %v5216_v33, %s4082_s8  ;;  %1925 = vrot.lane.b32.xlu0 %v5036_v39, %s4082_s8 }
 0x254   :  { %v5902_v18 = vpop.permute.xlu1 %1507  ;;  %v5904_v40 = vpop.permute.xlu0 %1505 }
 0x255   :  { %7774 = vst [vmem:[#allocation221_spill] sm:$0xff] %v5902_v18  ;;  %7775 = vst [vmem:[#allocation222_spill] sm:$0xff] %v5904_v40 }
 0x256   :  { %1983 = vrot.lane.b32.xlu1 %v5211_v48, %s4082_s8  ;;  %1927 = vrot.lane.b32.xlu0 %v5031_v44, %s4082_s8  ;;  %v3627_v44 = vld [vmem:[%s7548_s0 + $0x1e0] sm:$0xff] }
 0x257   :  { %v3599_v48 = vld [vmem:[%s7548_s0 + $0x60] sm:$0xff] }
 0x258   :  { %v5910_v15 = vpop.permute.xlu1 %1511  ;;  %v5912_v9 = vpop.permute.xlu0 %1509 }
 0x259   :  { %7776 = vst [vmem:[#allocation223_spill] sm:$0xff] %v5910_v15  ;;  %7777 = vst [vmem:[#allocation224_spill] sm:$0xff] %v5912_v9  ;;  %v3658_v9 = vld [vmem:[%s7548_s0 + $0x81] sm:$0xff] }
 0x25a   :  { %2205 = vrot.lane.b32.xlu1 %v5615_v55, %s4083_s1  ;;  %2149 = vrot.lane.b32.xlu0 %v5411_v31, %s4083_s1 }
 0x25c   :  { %v5918_v39 = vpop.permute.xlu1 %1515  ;;  %v5920_v33 = vpop.permute.xlu0 %1513 }
 0x25d   :  { %7778 = vst [vmem:[#allocation225_spill] sm:$0xff] %v5918_v39  ;;  %7779 = vst [vmem:[#allocation226_spill] sm:$0xff] %v5920_v33 }
 0x25e   :  { %2207 = vrot.lane.b32.xlu1 %v5610_v62, %s4083_s1  ;;  %2151 = vrot.lane.b32.xlu0 %v5406_v12, %s4083_s1  ;;  %v3628_v12 = vld [vmem:[%s7548_s0 + $0x1e8] sm:$0xff] }
 0x25f   :  { %v3600_v62 = vld [vmem:[%s7548_s0 + $0x68] sm:$0xff] }
 0x260   :  { %v5932_v55 = vpop.permute.xlu1 %1519  ;;  %v5934_v31 = vpop.permute.xlu0 %1517 }
 0x261   :  { %7780 = vst [vmem:[#allocation227_spill] sm:$0xff] %v5932_v55  ;;  %7781 = vst [vmem:[#allocation228_spill] sm:$0xff] %v5934_v31 }
 0x262   :  { %1761 = vrot.lane.b32.xlu1 %v3627_v44, %s4081_s24  ;;  %1705 = vrot.lane.b32.xlu0 %v3599_v48, %s4081_s24  ;;  %v3655_v44 = vld [vmem:[%s7548_s0 + $0x61] sm:$0xff] }
 0x264   :  { %v5944_v39 = vpop.permute.xlu1 %1523  ;;  %v5946_v33 = vpop.permute.xlu0 %1521 }
 0x265   :  { %7782 = vst [vmem:[#allocation229_spill] sm:$0xff] %v5944_v39  ;;  %7783 = vst [vmem:[#allocation230_spill] sm:$0xff] %v5946_v33  ;;  %v3656_v39 = vld [vmem:[%s7548_s0 + $0x69] sm:$0xff] }
 0x266   :  { %1763 = vrot.lane.b32.xlu1 %v3628_v12, %s4081_s24  ;;  %1707 = vrot.lane.b32.xlu0 %v3600_v62, %s4081_s24 }
 0x268   :  { %v5953_v48 = vpop.permute.xlu1 %1527  ;;  %v5955_v55 = vpop.permute.xlu0 %1525 }
 0x269   :  { %7784 = vst [vmem:[#allocation231_spill] sm:$0xff] %v5953_v48  ;;  %7785 = vst [vmem:[#allocation232_spill] sm:$0xff] %v5955_v55 }
 0x26a   :  { %1985 = vrot.lane.b32.xlu1 %v5234_v17, %s4082_s8  ;;  %1929 = vrot.lane.b32.xlu0 %v3655_v44, %s4082_s8 }
 0x26c   :  { %v5963_v12 = vpop.permute.xlu1 %1531  ;;  %v5965_v62 = vpop.permute.xlu0 %1529 }
 0x26e   :  { %1987 = vrot.lane.b32.xlu1 %v5229_v23, %s4082_s8  ;;  %1931 = vrot.lane.b32.xlu0 %v3656_v39, %s4082_s8  ;;  %v3629_v23 = vld [vmem:[%s7548_s0 + $0x1f8] sm:$0xff] }
 0x270   :  { %v5970_v48 = vpop.permute.xlu1 %1535  ;;  %v5972_v55 = vpop.permute.xlu0 %1533 }
 0x272   :  { %2209 = vrot.lane.b32.xlu1 %v5633_v63, %s4083_s1  ;;  %2153 = vrot.lane.b32.xlu0 %v5429_v35, %s4083_s1  ;;  %v3601_v63 = vld [vmem:[%s7548_s0 + $0x78] sm:$0xff] }
 0x274   :  { %v5978_v17 = vpop.permute.xlu1 %1539  ;;  %v5980_v44 = vpop.permute.xlu0 %1537 }
 0x276   :  { %2211 = vrot.lane.b32.xlu1 %v5628_v10, %s4083_s1  ;;  %2155 = vrot.lane.b32.xlu0 %v5424_v8, %s4083_s1  ;;  %v3630_v8 = vld [vmem:[%s7548_s0 + $0x200] sm:$0xff] }
 0x277   :  { %v3602_v10 = vld [vmem:[%s7548_s0 + $0x80] sm:$0xff] }
 0x278   :  { %v5992_v39 = vpop.permute.xlu1 %1543  ;;  %v5994_v35 = vpop.permute.xlu0 %1541 }
 0x27a   :  { %1765 = vrot.lane.b32.xlu1 %v3629_v23, %s4081_s24  ;;  %1709 = vrot.lane.b32.xlu0 %v3601_v63, %s4081_s24  ;;  %v3657_v23 = vld [vmem:[%s7548_s0 + $0x79] sm:$0xff] }
 0x27c   :  { %v6004_v33 = vpop.permute.xlu1 %1547  ;;  %v6006_v31 = vpop.permute.xlu0 %1545 }
 0x27e   :  { %1767 = vrot.lane.b32.xlu1 %v3630_v8, %s4081_s24  ;;  %1711 = vrot.lane.b32.xlu0 %v3602_v10, %s4081_s24 }
 0x280   :  { %v6013_v63 = vpop.permute.xlu1 %1551  ;;  %v6015_v15 = vpop.permute.xlu0 %1549 }
 0x282   :  { %1989 = vrot.lane.b32.xlu1 %v5252_v14, %s4082_s8  ;;  %1933 = vrot.lane.b32.xlu0 %v3657_v23, %s4082_s8 }
 0x284   :  { %v6023_v8 = vpop.permute.xlu1 %1555  ;;  %v6025_v10 = vpop.permute.xlu0 %1553 }
 0x286   :  { %1991 = vrot.lane.b32.xlu1 %v5247_v34, %s4082_s8  ;;  %1935 = vrot.lane.b32.xlu0 %v3658_v9, %s4082_s8  ;;  %v3631_v34 = vld [vmem:[%s7548_s0 + $0x210] sm:$0xff] }
 0x288   :  { %v6030_v18 = vpop.permute.xlu1 %1559  ;;  %v6032_v40 = vpop.permute.xlu0 %1557 }
 0x289   :  { %7786 = vst [vmem:[#allocation233_spill] sm:$0xff] %v6030_v18  ;;  %7787 = vst [vmem:[#allocation234_spill] sm:$0xff] %v6032_v40 }
 0x28a   :  { %2213 = vrot.lane.b32.xlu1 %v5651_v22, %s4083_s1  ;;  %2157 = vrot.lane.b32.xlu0 %v5447_v7, %s4083_s1  ;;  %v3603_v22 = vld [vmem:[%s7548_s0 + $0x90] sm:$0xff] }
 0x28c   :  { %v6038_v14 = vpop.permute.xlu1 %1563  ;;  %v6040_v23 = vpop.permute.xlu0 %1561 }
 0x28d   :  { %7788 = vst [vmem:[#allocation235_spill] sm:$0xff] %v6038_v14  ;;  %7789 = vst [vmem:[#allocation236_spill] sm:$0xff] %v6040_v23 }
 0x28e   :  { %2215 = vrot.lane.b32.xlu1 %v5646_v43, %s4083_s1  ;;  %2159 = vrot.lane.b32.xlu0 %v5442_v50, %s4083_s1  ;;  %v3632_v43 = vld [vmem:[%s7548_s0 + $0x218] sm:$0xff] }
 0x28f   :  { %v3604_v50 = vld [vmem:[%s7548_s0 + $0x98] sm:$0xff] }
 0x290   :  { %v6052_v9 = vpop.permute.xlu1 %1567  ;;  %v6054_v7 = vpop.permute.xlu0 %1565 }
 0x291   :  { %7790 = vst [vmem:[#allocation237_spill] sm:$0xff] %v6052_v9  ;;  %7791 = vst [vmem:[#allocation238_spill] sm:$0xff] %v6054_v7  ;;  %v44_v7 = vld [vmem:[%s7548_s0 + $0x188] sm:$0xff] }
 0x292   :  { %1769 = vrot.lane.b32.xlu1 %v3631_v34, %s4081_s24  ;;  %1713 = vrot.lane.b32.xlu0 %v3603_v22, %s4081_s24  ;;  %v3659_v34 = vld [vmem:[%s7548_s0 + $0x91] sm:$0xff] }
 0x294   :  { %v6064_v14 = vpop.permute.xlu1 %1571  ;;  %v6066_v23 = vpop.permute.xlu0 %1569 }
 0x295   :  { %7792 = vst [vmem:[#allocation239_spill] sm:$0xff] %v6064_v14  ;;  %7793 = vst [vmem:[#allocation240_spill] sm:$0xff] %v6066_v23  ;;  %v3688_v14 = vld [vmem:[%s7548_s0 + $0x219] sm:$0xff] }
 0x296   :  { %1771 = vrot.lane.b32.xlu1 %v3632_v43, %s4081_s24  ;;  %1715 = vrot.lane.b32.xlu0 %v3604_v50, %s4081_s24  ;;  %v3660_v43 = vld [vmem:[%s7548_s0 + $0x99] sm:$0xff] }
 0x298   :  { %v6073_v22 = vpop.permute.xlu1 %1575  ;;  %v6075_v9 = vpop.permute.xlu0 %1573 }
 0x299   :  { %7794 = vst [vmem:[#allocation241_spill] sm:$0xff] %v6073_v22  ;;  %7795 = vst [vmem:[#allocation242_spill] sm:$0xff] %v6075_v9 }
 0x29a   :  { %1993 = vrot.lane.b32.xlu1 %v5268_v11, %s4082_s8  ;;  %1937 = vrot.lane.b32.xlu0 %v3659_v34, %s4082_s8 }
 0x29c   :  { %v6086_v50 = vpop.permute.xlu1 %1579  ;;  %v6088_v23 = vpop.permute.xlu0 %1577 }
 0x29d   :  { %7796 = vst [vmem:[#allocation243_spill] sm:$0xff] %v6086_v50  ;;  %7797 = vst [vmem:[#allocation244_spill] sm:$0xff] %v6088_v23 }
 0x29e   :  { %1995 = vrot.lane.b32.xlu1 %v3688_v14, %s4082_s8  ;;  %1939 = vrot.lane.b32.xlu0 %v3660_v43, %s4082_s8  ;;  %v3633_v14 = vld [vmem:[%s7548_s0 + $0x228] sm:$0xff] }
 0x2a0   :  { %v6092_v22 = vpop.permute.xlu1 %1583  ;;  %v6094_v11 = vpop.permute.xlu0 %1581 }
 0x2a1   :  { %7798 = vst [vmem:[#allocation245_spill] sm:$0xff] %v6092_v22  ;;  %7799 = vst [vmem:[#allocation246_spill] sm:$0xff] %v6094_v11  ;;  %v15_v22 = vld [vmem:[%s7548_s0] sm:$0xff]  ;;  %v3606_v11 = vld [vmem:[%s7548_s0 + $0xb0] sm:$0xff] }
 0x2a2   :  { %2217 = vrot.lane.b32.xlu1 %v5669_v37, %s4083_s1  ;;  %2161 = vrot.lane.b32.xlu0 %v5465_v30, %s4083_s1  ;;  %v3605_v37 = vld [vmem:[%s7548_s0 + $0xa8] sm:$0xff] }
 0x2a4   :  { %v6100_v34 = vpop.permute.xlu1 %1699  ;;  %v1698_v9 = vpop.permute.xlu0 %1697 }
 0x2a6   :  { %2219 = vrot.lane.b32.xlu1 %v5664_v20, %s4083_s1  ;;  %2163 = vrot.lane.b32.xlu0 %v5460_v47, %s4083_s1  ;;  %v43_v20 = vld [vmem:[%s7548_s0 + $0x180] sm:$0xff]  ;;  %v3634_v47 = vld [vmem:[%s7548_s0 + $0x230] sm:$0xff] }
 0x2a7   :  { %v2342_v18 = vsel %vm2313_vm1, %v43_v20, %v4514_v53  ;;  %v3661_v53 = vld [vmem:[%s7548_s0 + $0xa9] sm:$0xff]  ;;  %v2343_v20 = vsel %vm2313_vm1, %v44_v7, %v4512_v52 }
 0x2a8   :  { %v6112_v43 = vpop.permute.xlu1 %1755  ;;  %v1754_v30 = vpop.permute.xlu0 %1753  ;;  %v2399_v40 = vsel %vm2370_vm2, %v2342_v18, %v4844_v3  ;;  %v2400_v52 = vsel %vm2370_vm2, %v2343_v20, %v4842_v32 }
 0x2aa   :  { %1773 = vrot.lane.b32.xlu1 %v3633_v14, %s4081_s24  ;;  %1717 = vrot.lane.b32.xlu0 %v3605_v37, %s4081_s24  ;;  %v16_v14 = vld [vmem:[%s7548_s0 + $0x8] sm:$0xff]  ;;  %v2314_v37 = vsel %vm2313_vm1, %v15_v22, %v4346_v61 }
 0x2ab   :  { %v2371_v45 = vsel %vm2370_vm2, %v2314_v37, %v4676_v59  ;;  %v3689_v61 = vld [vmem:[%s7548_s0 + $0x229] sm:$0xff]  ;;  %v2315_v22 = vsel %vm2313_vm1, %v16_v14, %v4358_v1  ;;  %v2456_v59 = vsel %vm2427_vm3, %v2399_v40, %v5202_v51  ;;  %v2457_v40 = vsel %vm2427_vm3, %v2400_v52, %v5200_v41  ;;  %v7801_v52 = vld [vmem:[#allocation57_spill] sm:$0xff] }
 0x2ac   :  { %v1978_v50 = vpop.permute.xlu1 %1977  ;;  %v1922_v23 = vpop.permute.xlu0 %1921  ;;  %v2513_v37 = vsel %vm2484_vm4, %v2456_v59, %v5601_v28  ;;  %v2372_v1 = vsel %vm2370_vm2, %v2315_v22, %v4674_v58  ;;  %v3635_v59 = vld [vmem:[%s7548_s0 + $0x240] sm:$0xff] }
 0x2ad   :  { %v2570_v51 = vsel %vm2541_vm5, %v2513_v37, %v5965_v62  ;;  %v2429_v28 = vsel %vm2427_vm3, %v2372_v1, %v5020_v29  ;;  %v4001_v1 = vld [vmem:[%s7548_s0 + $0x198] sm:$0xff] }
 0x2ae   :  { %1775 = vrot.lane.b32.xlu1 %v3634_v47, %s4081_s24  ;;  %1719 = vrot.lane.b32.xlu0 %v3606_v11, %s4081_s24  ;;  %v2428_v11 = vsel %vm2427_vm3, %v2371_v45, %v5022_v38  ;;  %v2627_v58 = vsel %vm2598_vm6, %v2570_v51, %v1754_v30  ;;  %v3662_v45 = vld [vmem:[%s7548_s0 + $0xb1] sm:$0xff]  ;;  %v2514_v30 = vsel %vm2484_vm4, %v2457_v40, %v5599_v4 }
 0x2af   :  { %v2485_v47 = vsel %vm2484_vm4, %v2428_v11, %v5397_v2  ;;  %v2684_v32 = vsel %vm2655_vm7, %v2627_v58, %v1978_v50  ;;  %v2571_v50 = vsel %vm2541_vm5, %v2514_v30, %v5963_v12  ;;  %v7805_v30 = vld [vmem:[#allocation5_spill] sm:$0xff] }
 0x2b0   :  { %v1980_v3 = vpop.permute.xlu1 %1979  ;;  %v1924_v18 = vpop.permute.xlu0 %1923  ;;  %v2542_v38 = vsel %vm2541_vm5, %v2485_v47, %v5831_v26  ;;  %v3690_v26 = vld [vmem:[%s7548_s0 + $0x231] sm:$0xff]  ;;  %v2628_v4 = vsel %vm2598_vm6, %v2571_v50, %v6112_v43 }
 0x2b1   :  { %v2599_v2 = vsel %vm2598_vm6, %v2542_v38, %v1698_v9  ;;  %v2486_v9 = vsel %vm2484_vm4, %v2429_v28, %v5395_v13  ;;  %v4000_v47 = vld [vmem:[%s7548_s0 + $0x18] sm:$0xff]  ;;  %v7800_v38 = vld [vmem:[#allocation31_spill] sm:$0xff] }
 0x2b2   :  { %1997 = vrot.lane.b32.xlu1 %v3689_v61, %s4082_s8  ;;  %1941 = vrot.lane.b32.xlu0 %v3661_v53, %s4082_s8  ;;  %v2656_v62 = vsel %vm2655_vm7, %v2599_v2, %v1922_v23  ;;  %v2543_v41 = vsel %vm2541_vm5, %v2486_v9, %v5829_v27  ;;  %v2685_v23 = vsel %vm2655_vm7, %v2628_v4, %v1980_v3  ;;  %v7802_v2 = vld [vmem:[#allocation83_spill] sm:$0xff]  ;;  %v4002_v9 = vld [vmem:[%s7548_s0 + $0x20] sm:$0xff] }
 0x2b3   :  { %v2600_v13 = vsel %vm2598_vm6, %v2543_v41, %v6100_v34  ;;  %v2316_v37 = vsel %vm2313_vm1, %v4000_v47, %v4344_v60  ;;  %v2344_v51 = vsel %vm2313_vm1, %v4001_v1, %v7800_v38  ;;  %v3691_v60 = vld [vmem:[%s7548_s0 + $0x241] sm:$0xff]  ;;  %v7807_v50 = vld [vmem:[#allocation187_spill] sm:$0xff]  ;;  %v7811_v47 = vld [vmem:[#allocation108_spill] sm:$0xff] }
 0x2b4   :  { %v2202_v29 = vpop.permute.xlu1 %2201  ;;  %v2146_v7 = vpop.permute.xlu0 %2145  ;;  %v2657_v27 = vsel %vm2655_vm7, %v2600_v13, %v1924_v18  ;;  %v2373_v28 = vsel %vm2370_vm2, %v2316_v37, %v7801_v52  ;;  %v2401_v58 = vsel %vm2370_vm2, %v2344_v51, %v7802_v2  ;;  %v4003_v4 = vld [vmem:[%s7548_s0 + $0x1a0] sm:$0xff]  ;;  %v7812_v1 = vld [vmem:[#allocation134_spill] sm:$0xff] }
 0x2b5   :  { %v2713_v14 = vsel %vm2712_vm8, %v2656_v62, %v2146_v7  ;;  %v2741_v61 = vsel %vm2712_vm8, %v2684_v32, %v2202_v29  ;;  %v7804_v32 = vld [vmem:[#allocation135_spill] sm:$0xff] }
 0x2b6   :  { %1999 = vrot.lane.b32.xlu1 %v3690_v26, %s4082_s8  ;;  %1943 = vrot.lane.b32.xlu0 %v3662_v45, %s4082_s8  ;;  %v3663_v26 = vld [vmem:[%s7548_s0 + $0xc1] sm:$0xff]  ;;  %v2458_v62 = vsel %vm2427_vm3, %v2401_v58, %v7804_v32 }
 0x2b7   :  { %3892 = vmatprep.mubr.msk.f32.mxu0 %vm2781_vm9, %v2713_v14  ;;  %3934 = vmatprep.mubr.msk.f32.mxu1 %vm2781_vm9, %v2741_v61  ;;  %v7803_v45 = vld [vmem:[#allocation109_spill] sm:$0xff]  ;;  %v2317_v14 = vsel %vm2313_vm1, %v4002_v9, %v7805_v30  ;;  %v2515_v13 = vsel %vm2484_vm4, %v2458_v62, %v7807_v50  ;;  %v7814_v58 = vld [vmem:[#allocation186_spill] sm:$0xff]  ;;  %v3637_v50 = vld [vmem:[%s7548_s0 + $0x258] sm:$0xff] }
 0x2b8   :  { %v2204_v53 = vpop.permute.xlu1 %2203  ;;  %v2148_v12 = vpop.permute.xlu0 %2147  ;;  %v2430_v40 = vsel %vm2427_vm3, %v2373_v28, %v7803_v45  ;;  %v7806_v61 = vld [vmem:[#allocation161_spill] sm:$0xff]  ;;  %v7813_v28 = vld [vmem:[#allocation160_spill] sm:$0xff] }
 0x2b9   :  { %v2742_v22 = vsel %vm2712_vm8, %v2685_v23, %v2204_v53  ;;  %v2714_v11 = vsel %vm2712_vm8, %v2657_v27, %v2148_v12  ;;  %v2487_v41 = vsel %vm2484_vm4, %v2430_v40, %v7806_v61  ;;  %v7808_v23 = vld [vmem:[#allocation30_spill] sm:$0xff]  ;;  %v2572_v12 = vsel %vm2541_vm5, %v2515_v13, %v5972_v55  ;;  %v3609_v13 = vld [vmem:[%s7548_s0 + $0xd8] sm:$0xff] }
 0x2ba   :  { %2221 = vrot.lane.b32.xlu1 %v5687_v56, %s4083_s1  ;;  %2165 = vrot.lane.b32.xlu0 %v5483_v42, %s4083_s1  ;;  %v3607_v56 = vld [vmem:[%s7548_s0 + $0xc0] sm:$0xff]  ;;  %v2345_v27 = vsel %vm2313_vm1, %v4003_v4, %v7808_v23  ;;  %v2544_v53 = vsel %vm2541_vm5, %v2487_v41, %v5840_v25  ;;  %v3692_v25 = vld [vmem:[%s7548_s0 + $0x249] sm:$0xff]  ;;  %v7816_v41 = vld [vmem:[#allocation196_spill] sm:$0xff] }
 0x2bb   :  { %3893 = vmatmul.mubr.msk.f32.vlgmr.msra.gmra.mrb[0].mxu0 %vm2781_vm9, %v2714_v11  ;;  %3935 = vmatmul.mubr.msk.f32.vlgmr.msra.gmra.mrb[0].mxu1 %vm2781_vm9, %v2742_v22  ;;  %v7809_v22 = vld [vmem:[#allocation56_spill] sm:$0xff]  ;;  %v3664_v55 = vld [vmem:[%s7548_s0 + $0xc9] sm:$0xff] }
 0x2bc   :  { %v1758_v34 = vpop.permute.xlu1 %1757  ;;  %v1702_v43 = vpop.permute.xlu0 %1701  ;;  %v2374_v11 = vsel %vm2370_vm2, %v2317_v14, %v7809_v22  ;;  %v3719_v62 = vld [vmem:[%s7548_s0 + $0xc2] sm:$0xff] }
 0x2bd   :  { %v2431_v37 = vsel %vm2427_vm3, %v2374_v11, %v7811_v47  ;;  %v4004_v11 = vld [vmem:[%s7548_s0 + $0x30] sm:$0xff] }
 0x2be   :  { %2223 = vrot.lane.b32.xlu1 %v5682_v5, %s4083_s1  ;;  %2167 = vrot.lane.b32.xlu0 %v5478_v21, %s4083_s1  ;;  %v3636_v5 = vld [vmem:[%s7548_s0 + $0x248] sm:$0xff]  ;;  %v2488_v2 = vsel %vm2484_vm4, %v2431_v37, %v7813_v28  ;;  %v7820_v37 = vld [vmem:[#allocation85_spill] sm:$0xff] }
 0x2bf   :  { %v3608_v21 = vld [vmem:[%s7548_s0 + $0xc8] sm:$0xff]  ;;  %v2545_v40 = vsel %vm2541_vm5, %v2488_v2, %v5838_v57 }
 0x2c0   :  { %v1760_v42 = vpop.permute.xlu1 %1759  ;;  %v1704_v3 = vpop.permute.xlu0 %1703 }
 0x2c1   :  { %v2602_v32 = vsel %vm2598_vm6, %v2545_v40, %v1704_v3  ;;  %v7815_v3 = vld [vmem:[#allocation197_spill] sm:$0xff]  ;;  %v7824_v40 = vld [vmem:[#allocation163_spill] sm:$0xff] }
 0x2c2   :  { %1777 = vrot.lane.b32.xlu1 %v3635_v59, %s4081_s24  ;;  %1721 = vrot.lane.b32.xlu0 %v3607_v56, %s4081_s24  ;;  %v7810_v59 = vld [vmem:[#allocation82_spill] sm:$0xff] }
 0x2c3   :  { %v2402_v56 = vsel %vm2370_vm2, %v2345_v27, %v7810_v59  ;;  %v3638_v27 = vld [vmem:[%s7548_s0 + $0x260] sm:$0xff]  ;;  %v7817_v59 = vld [vmem:[#allocation7_spill] sm:$0xff] }
 0x2c4   :  { %v1982_v18 = vpop.permute.xlu1 %1981  ;;  %v1926_v20 = vpop.permute.xlu0 %1925  ;;  %v2459_v38 = vsel %vm2427_vm3, %v2402_v56, %v7812_v1  ;;  %v2318_v56 = vsel %vm2313_vm1, %v4004_v11, %v7817_v59 }
 0x2c6   :  { %1779 = vrot.lane.b32.xlu1 %v3636_v5, %s4081_s24  ;;  %1723 = vrot.lane.b32.xlu0 %v3608_v21, %s4081_s24  ;;  %v2629_v5 = vsel %vm2598_vm6, %v2572_v12, %v1758_v34  ;;  %v2601_v21 = vsel %vm2598_vm6, %v2544_v53, %v1702_v43  ;;  %v3610_v53 = vld [vmem:[%s7548_s0 + $0xe0] sm:$0xff] }
 0x2c7   :  { %v2686_v51 = vsel %vm2655_vm7, %v2629_v5, %v1982_v18  ;;  %v2658_v34 = vsel %vm2655_vm7, %v2601_v21, %v1926_v20  ;;  %v4005_v5 = vld [vmem:[%s7548_s0 + $0x1b0] sm:$0xff]  ;;  %v7818_v21 = vld [vmem:[#allocation33_spill] sm:$0xff] }
 0x2c8   :  { %v1984_v29 = vpop.permute.xlu1 %1983  ;;  %v1928_v7 = vpop.permute.xlu0 %1927 }
 0x2ca   :  { %2001 = vrot.lane.b32.xlu1 %v3691_v60, %s4082_s8  ;;  %1945 = vrot.lane.b32.xlu0 %v3663_v26, %s4082_s8  ;;  %v2516_v60 = vsel %vm2484_vm4, %v2459_v38, %v7814_v58  ;;  %v3693_v38 = vld [vmem:[%s7548_s0 + $0x259] sm:$0xff] }
 0x2cb   :  { %v2573_v18 = vsel %vm2541_vm5, %v2516_v60, %v5970_v48  ;;  %v2659_v48 = vsel %vm2655_vm7, %v2602_v32, %v1928_v7  ;;  %v4006_v60 = vld [vmem:[%s7548_s0 + $0x38] sm:$0xff] }
 0x2cc   :  { %v2206_v52 = vpop.permute.xlu1 %2205  ;;  %v2150_v43 = vpop.permute.xlu0 %2149  ;;  %v2630_v20 = vsel %vm2598_vm6, %v2573_v18, %v1760_v42 }
 0x2cd   :  { %v2743_v26 = vsel %vm2712_vm8, %v2686_v51, %v2206_v52  ;;  %v2715_v45 = vsel %vm2712_vm8, %v2658_v34, %v2150_v43  ;;  %v2687_v57 = vsel %vm2655_vm7, %v2630_v20, %v1984_v29  ;;  %v3720_v29 = vld [vmem:[%s7548_s0 + $0xca] sm:$0xff]  ;;  %v3665_v51 = vld [vmem:[%s7548_s0 + $0xd9] sm:$0xff] }
 0x2ce   :  { %2003 = vrot.lane.b32.xlu1 %v3692_v25, %s4082_s8  ;;  %1947 = vrot.lane.b32.xlu0 %v3664_v55, %s4082_s8  ;;  %v2346_v25 = vsel %vm2313_vm1, %v4005_v5, %v7818_v21  ;;  %v7819_v55 = vld [vmem:[#allocation59_spill] sm:$0xff]  ;;  %v7822_v43 = vld [vmem:[#allocation137_spill] sm:$0xff]  ;;  %v7831_v5 = vld [vmem:[#allocation162_spill] sm:$0xff] }
 0x2cf   :  { %3895 = vmatprep.mubr.msk.f32.mxu0 %vm2781_vm9, %v2715_v45  ;;  %3937 = vmatprep.mubr.msk.f32.mxu1 %vm2781_vm9, %v2743_v26  ;;  %v2375_v47 = vsel %vm2370_vm2, %v2318_v56, %v7819_v55  ;;  %v2403_v1 = vsel %vm2370_vm2, %v2346_v25, %v7820_v37  ;;  %v7821_v34 = vld [vmem:[#allocation111_spill] sm:$0xff]  ;;  %v7823_v26 = vld [vmem:[#allocation6_spill] sm:$0xff]  ;;  %v7825_v20 = vld [vmem:[#allocation189_spill] sm:$0xff] }
 0x2d0   :  { %v2208_v9 = vpop.permute.xlu1 %2207  ;;  %v2152_v30 = vpop.permute.xlu0 %2151  ;;  %v2432_v52 = vsel %vm2427_vm3, %v2375_v47, %v7821_v34  ;;  %v2460_v28 = vsel %vm2427_vm3, %v2403_v1, %v7822_v43  ;;  %v2319_v45 = vsel %vm2313_vm1, %v4006_v60, %v7823_v26  ;;  %v7832_v25 = vld [vmem:[#allocation188_spill] sm:$0xff]  ;;  %v3639_v26 = vld [vmem:[%s7548_s0 + $0x270] sm:$0xff] }
 0x2d1   :  { %v2744_v14 = vsel %vm2712_vm8, %v2687_v57, %v2208_v9  ;;  %v2716_v42 = vsel %vm2712_vm8, %v2659_v48, %v2152_v30  ;;  %v2489_v18 = vsel %vm2484_vm4, %v2432_v52, %v7824_v40  ;;  %v2517_v32 = vsel %vm2484_vm4, %v2460_v28, %v7825_v20  ;;  %v7826_v57 = vld [vmem:[#allocation32_spill] sm:$0xff]  ;;  %v3722_v28 = vld [vmem:[%s7548_s0 + $0xe2] sm:$0xff] }
 0x2d2   :  { %2225 = vrot.lane.b32.xlu1 %v7815_v3, %s4083_s1  ;;  %2169 = vrot.lane.b32.xlu0 %v3719_v62, %s4083_s1  ;;  %v4007_v62 = vld [vmem:[%s7548_s0 + $0x1b8] sm:$0xff]  ;;  %v2546_v9 = vsel %vm2541_vm5, %v2489_v18, %v5848_v6  ;;  %v2574_v30 = vsel %vm2541_vm5, %v2517_v32, %v5980_v44  ;;  %v3694_v6 = vld [vmem:[%s7548_s0 + $0x261] sm:$0xff] }
 0x2d3   :  { %3896 = vmatmul.mubr.msk.f32.gmra.mrb[2].mxu0 %vm2781_vm9, %v2716_v42  ;;  %3938 = vmatmul.mubr.msk.f32.gmra.mrb[2].mxu1 %vm2781_vm9, %v2744_v14  ;;  %v2347_v48 = vsel %vm2313_vm1, %v4007_v62, %v7826_v57  ;;  %v7827_v14 = vld [vmem:[#allocation58_spill] sm:$0xff]  ;;  %v7828_v3 = vld [vmem:[#allocation84_spill] sm:$0xff] }
 0x2d4   :  { %v1762_v7 = vpop.permute.xlu1 %1761  ;;  %v1706_v61 = vpop.permute.xlu0 %1705  ;;  %v2376_v42 = vsel %vm2370_vm2, %v2319_v45, %v7827_v14  ;;  %v3666_v44 = vld [vmem:[%s7548_s0 + $0xe1] sm:$0xff]  ;;  %v7834_v60 = vld [vmem:[#allocation200_spill] sm:$0xff]  ;;  %v3611_v45 = vld [vmem:[%s7548_s0 + $0xf0] sm:$0xff] }
 0x2d5   :  { %v3640_v20 = vld [vmem:[%s7548_s0 + $0x278] sm:$0xff]  ;;  %v4009_v14 = vld [vmem:[%s7548_s0 + $0x1c8] sm:$0xff] }
 0x2d6   :  { %2227 = vrot.lane.b32.xlu1 %v7816_v41, %s4083_s1  ;;  %2171 = vrot.lane.b32.xlu0 %v3720_v29, %s4083_s1  ;;  %v2404_v29 = vsel %vm2370_vm2, %v2347_v48, %v7828_v3  ;;  %v2631_v41 = vsel %vm2598_vm6, %v2574_v30, %v1762_v7  ;;  %v3612_v32 = vld [vmem:[%s7548_s0 + $0xf8] sm:$0xff]  ;;  %v4008_v48 = vld [vmem:[%s7548_s0 + $0x48] sm:$0xff] }
 0x2d8   :  { %v1764_v4 = vpop.permute.xlu1 %1763  ;;  %v1708_v23 = vpop.permute.xlu0 %1707 }
 0x2da   :  { %1781 = vrot.lane.b32.xlu1 %v3637_v50, %s4081_s24  ;;  %1725 = vrot.lane.b32.xlu0 %v3609_v13, %s4081_s24  ;;  %v2603_v50 = vsel %vm2598_vm6, %v2546_v9, %v1706_v61  ;;  %v7829_v13 = vld [vmem:[#allocation110_spill] sm:$0xff]  ;;  %v7835_v9 = vld [vmem:[#allocation9_spill] sm:$0xff] }
 0x2db   :  { %v2320_v30 = vsel %vm2313_vm1, %v4008_v48, %v7835_v9  ;;  %v7850_v9 = vld [vmem:[#allocation190_spill] sm:$0xff] }
 0x2dc   :  { %v1986_v12 = vpop.permute.xlu1 %1985  ;;  %v1930_v22 = vpop.permute.xlu0 %1929 }
 0x2dd   :  { %v2688_v59 = vsel %vm2655_vm7, %v2631_v41, %v1986_v12  ;;  %v2660_v7 = vsel %vm2655_vm7, %v2603_v50, %v1930_v22  ;;  %v7838_v50 = vld [vmem:[#allocation87_spill] sm:$0xff] }
 0x2de   :  { %1783 = vrot.lane.b32.xlu1 %v3638_v27, %s4081_s24  ;;  %1727 = vrot.lane.b32.xlu0 %v3610_v53, %s4081_s24  ;;  %v2433_v27 = vsel %vm2427_vm3, %v2376_v42, %v7829_v13  ;;  %v7830_v53 = vld [vmem:[#allocation136_spill] sm:$0xff]  ;;  %v7836_v42 = vld [vmem:[#allocation35_spill] sm:$0xff] }
 0x2df   :  { %v2461_v11 = vsel %vm2427_vm3, %v2404_v29, %v7830_v53  ;;  %v2490_v21 = vsel %vm2484_vm4, %v2433_v27, %v7831_v5  ;;  %v2348_v3 = vsel %vm2313_vm1, %v4009_v14, %v7836_v42  ;;  %v7837_v29 = vld [vmem:[#allocation61_spill] sm:$0xff]  ;;  %v3667_v13 = vld [vmem:[%s7548_s0 + $0xf1] sm:$0xff] }
 0x2e0   :  { %v1988_v2 = vpop.permute.xlu1 %1987  ;;  %v1932_v58 = vpop.permute.xlu0 %1931  ;;  %v2518_v55 = vsel %vm2484_vm4, %v2461_v11, %v7832_v25  ;;  %v2547_v1 = vsel %vm2541_vm5, %v2490_v21, %v5846_v54  ;;  %v2377_v41 = vsel %vm2370_vm2, %v2320_v30, %v7837_v29  ;;  %v7839_v27 = vld [vmem:[#allocation113_spill] sm:$0xff]  ;;  %v7840_v11 = vld [vmem:[#allocation139_spill] sm:$0xff]  ;;  %v7841_v5 = vld [vmem:[#allocation8_spill] sm:$0xff] }
 0x2e1   :  { %v2575_v12 = vsel %vm2541_vm5, %v2518_v55, %v5978_v17  ;;  %v2434_v53 = vsel %vm2427_vm3, %v2377_v41, %v7839_v27  ;;  %v7842_v25 = vld [vmem:[#allocation165_spill] sm:$0xff]  ;;  %v3723_v41 = vld [vmem:[%s7548_s0 + $0xf2] sm:$0xff] }
 0x2e2   :  { %2005 = vrot.lane.b32.xlu1 %v3693_v38, %s4082_s8  ;;  %1949 = vrot.lane.b32.xlu0 %v3665_v51, %s4082_s8  ;;  %v2632_v22 = vsel %vm2598_vm6, %v2575_v12, %v1764_v4  ;;  %v2604_v38 = vsel %vm2598_vm6, %v2547_v1, %v1708_v23  ;;  %v3721_v51 = vld [vmem:[%s7548_s0 + $0xda] sm:$0xff]  ;;  %v2491_v55 = vsel %vm2484_vm4, %v2434_v53, %v7842_v25  ;;  %v4011_v1 = vld [vmem:[%s7548_s0 + $0x1d0] sm:$0xff]  ;;  %v7844_v12 = vld [vmem:[#allocation34_spill] sm:$0xff] }
 0x2e3   :  { %v2689_v54 = vsel %vm2655_vm7, %v2632_v22, %v1988_v2  ;;  %v2661_v17 = vsel %vm2655_vm7, %v2604_v38, %v1932_v58  ;;  %v7833_v23 = vld [vmem:[#allocation201_spill] sm:$0xff]  ;;  %v2349_v22 = vsel %vm2313_vm1, %v4011_v1, %v7844_v12  ;;  %v2548_v38 = vsel %vm2541_vm5, %v2491_v55, %v5856_v16 }
 0x2e4   :  { %v2210_v56 = vpop.permute.xlu1 %2209  ;;  %v2154_v61 = vpop.permute.xlu0 %2153  ;;  %v3696_v16 = vld [vmem:[%s7548_s0 + $0x279] sm:$0xff] }
 0x2e5   :  { %v2745_v47 = vsel %vm2712_vm8, %v2688_v59, %v2210_v56  ;;  %v2717_v37 = vsel %vm2712_vm8, %v2660_v7, %v2154_v61  ;;  %v4010_v61 = vld [vmem:[%s7548_s0 + $0x50] sm:$0xff]  ;;  %v4013_v12 = vld [vmem:[%s7548_s0 + $0x1e0] sm:$0xff] }
 0x2e6   :  { %2007 = vrot.lane.b32.xlu1 %v3694_v6, %s4082_s8  ;;  %1951 = vrot.lane.b32.xlu0 %v3666_v44, %s4082_s8  ;;  %v2405_v6 = vsel %vm2370_vm2, %v2348_v3, %v7838_v50  ;;  %v3695_v44 = vld [vmem:[%s7548_s0 + $0x271] sm:$0xff]  ;;  %v2321_v21 = vsel %vm2313_vm1, %v4010_v61, %v7841_v5 }
 0x2e7   :  { %3898 = vmatprep.mubr.msk.f32.mxu0 %vm2781_vm9, %v2717_v37  ;;  %3940 = vmatprep.mubr.msk.f32.mxu1 %vm2781_vm9, %v2745_v47  ;;  %v2462_v59 = vsel %vm2427_vm3, %v2405_v6, %v7840_v11  ;;  %v7843_v47 = vld [vmem:[#allocation191_spill] sm:$0xff]  ;;  %v7852_v11 = vld [vmem:[#allocation204_spill] sm:$0xff] }
 0x2e8   :  { %v2212_v34 = vpop.permute.xlu1 %2211  ;;  %v2156_v52 = vpop.permute.xlu0 %2155  ;;  %v2519_v37 = vsel %vm2484_vm4, %v2462_v59, %v7843_v47  ;;  %v3641_v59 = vld [vmem:[%s7548_s0 + $0x288] sm:$0xff]  ;;  %v3642_v5 = vld [vmem:[%s7548_s0 + $0x290] sm:$0xff]  ;;  %v4012_v47 = vld [vmem:[%s7548_s0 + $0x60] sm:$0xff] }
 0x2e9   :  { %v2746_v43 = vsel %vm2712_vm8, %v2689_v54, %v2212_v34  ;;  %v2718_v4 = vsel %vm2712_vm8, %v2661_v17, %v2156_v52  ;;  %v7845_v54 = vld [vmem:[#allocation60_spill] sm:$0xff]  ;;  %v7846_v34 = vld [vmem:[#allocation86_spill] sm:$0xff] }
 0x2ea   :  { %2229 = vrot.lane.b32.xlu1 %v7833_v23, %s4083_s1  ;;  %2173 = vrot.lane.b32.xlu0 %v3721_v51, %s4083_s1  ;;  %v2576_v51 = vsel %vm2541_vm5, %v2519_v37, %v5994_v35  ;;  %v2378_v17 = vsel %vm2370_vm2, %v2321_v21, %v7845_v54  ;;  %v2406_v52 = vsel %vm2370_vm2, %v2349_v22, %v7846_v34  ;;  %v3668_v35 = vld [vmem:[%s7548_s0 + $0xf9] sm:$0xff]  ;;  %v3614_v21 = vld [vmem:[%s7548_s0 + $0x110] sm:$0xff] }
 0x2eb   :  { %3899 = vmatmul.mubr.msk.f32.gmra.mrb[4].mxu0 %vm2781_vm9, %v2718_v4  ;;  %3941 = vmatmul.mubr.msk.f32.gmra.mrb[4].mxu1 %vm2781_vm9, %v2746_v43  ;;  %v7847_v23 = vld [vmem:[#allocation112_spill] sm:$0xff]  ;;  %v7853_v37 = vld [vmem:[#allocation11_spill] sm:$0xff]  ;;  %v7854_v22 = vld [vmem:[#allocation37_spill] sm:$0xff] }
 0x2ec   :  { %v1766_v2 = vpop.permute.xlu1 %1765  ;;  %v1710_v58 = vpop.permute.xlu0 %1709  ;;  %v2322_v1 = vsel %vm2313_vm1, %v4012_v47, %v7853_v37 }
 0x2ed   :  { %v2633_v43 = vsel %vm2598_vm6, %v2576_v51, %v1766_v2  ;;  %v2605_v4 = vsel %vm2598_vm6, %v2548_v38, %v1710_v58  ;;  %v2350_v38 = vsel %vm2313_vm1, %v4013_v12, %v7854_v22  ;;  %v7855_v51 = vld [vmem:[#allocation63_spill] sm:$0xff] }
 0x2ee   :  { %2231 = vrot.lane.b32.xlu1 %v7834_v60, %s4083_s1  ;;  %2175 = vrot.lane.b32.xlu0 %v3722_v28, %s4083_s1  ;;  %v2435_v28 = vsel %vm2427_vm3, %v2378_v17, %v7847_v23  ;;  %v7848_v60 = vld [vmem:[#allocation138_spill] sm:$0xff]  ;;  %v2379_v54 = vsel %vm2370_vm2, %v2322_v1, %v7855_v51  ;;  %v7856_v17 = vld [vmem:[#allocation89_spill] sm:$0xff] }
 0x2ef   :  { %v2407_v34 = vsel %vm2370_vm2, %v2350_v38, %v7856_v17  ;;  %v3753_v12 = vld [vmem:[%s7548_s0 + $0x28a] sm:$0xff]  ;;  %v3726_v17 = vld [vmem:[%s7548_s0 + $0x112] sm:$0xff] }
 0x2f0   :  { %v1768_v40 = vpop.permute.xlu1 %1767  ;;  %v1712_v18 = vpop.permute.xlu0 %1711 }
 0x2f2   :  { %1785 = vrot.lane.b32.xlu1 %v3639_v26, %s4081_s24  ;;  %1729 = vrot.lane.b32.xlu0 %v3611_v45, %s4081_s24  ;;  %v2463_v26 = vsel %vm2427_vm3, %v2406_v52, %v7848_v60  ;;  %v3697_v52 = vld [vmem:[%s7548_s0 + $0x289] sm:$0xff] }
 0x2f3   :  { %v2520_v30 = vsel %vm2484_vm4, %v2463_v26, %v7850_v9  ;;  %v4014_v26 = vld [vmem:[%s7548_s0 + $0x68] sm:$0xff] }
 0x2f4   :  { %v1990_v62 = vpop.permute.xlu1 %1989  ;;  %v1934_v57 = vpop.permute.xlu0 %1933  ;;  %v4015_v9 = vld [vmem:[%s7548_s0 + $0x1e8] sm:$0xff] }
 0x2f5   :  { %v2690_v45 = vsel %vm2655_vm7, %v2633_v43, %v1990_v62  ;;  %v2662_v2 = vsel %vm2655_vm7, %v2605_v4, %v1934_v57  ;;  %v2577_v62 = vsel %vm2541_vm5, %v2520_v30, %v5992_v39  ;;  %v3669_v43 = vld [vmem:[%s7548_s0 + $0x109] sm:$0xff]  ;;  %v7862_v30 = vld [vmem:[#allocation36_spill] sm:$0xff] }
 0x2f6   :  { %1787 = vrot.lane.b32.xlu1 %v3640_v20, %s4081_s24  ;;  %1731 = vrot.lane.b32.xlu0 %v3612_v32, %s4081_s24  ;;  %v7849_v32 = vld [vmem:[#allocation164_spill] sm:$0xff]  ;;  %v2634_v57 = vsel %vm2598_vm6, %v2577_v62, %v1768_v40  ;;  %v7857_v4 = vld [vmem:[#allocation115_spill] sm:$0xff]  ;;  %v7863_v62 = vld [vmem:[#allocation62_spill] sm:$0xff] }
 0x2f7   :  { %v2492_v48 = vsel %vm2484_vm4, %v2435_v28, %v7849_v32  ;;  %v7861_v32 = vld [vmem:[#allocation193_spill] sm:$0xff] }
 0x2f8   :  { %v1992_v7 = vpop.permute.xlu1 %1991  ;;  %v1936_v56 = vpop.permute.xlu0 %1935  ;;  %v2549_v3 = vsel %vm2541_vm5, %v2492_v48, %v5854_v49 }
 0x2f9   :  { %v2606_v29 = vsel %vm2598_vm6, %v2549_v3, %v1712_v18  ;;  %v2691_v49 = vsel %vm2655_vm7, %v2634_v57, %v1992_v7  ;;  %v7851_v18 = vld [vmem:[#allocation205_spill] sm:$0xff]  ;;  %v3613_v7 = vld [vmem:[%s7548_s0 + $0x108] sm:$0xff] }
 0x2fa   :  { %2009 = vrot.lane.b32.xlu1 %v3695_v44, %s4082_s8  ;;  %1953 = vrot.lane.b32.xlu0 %v3667_v13, %s4082_s8  ;;  %v2663_v39 = vsel %vm2655_vm7, %v2606_v29, %v1936_v56  ;;  %v3724_v13 = vld [vmem:[%s7548_s0 + $0xfa] sm:$0xff] }
 0x2fb   :  { %v7864_v29 = vld [vmem:[#allocation88_spill] sm:$0xff] }
 0x2fc   :  { %v2214_v20 = vpop.permute.xlu1 %2213  ;;  %v2158_v58 = vpop.permute.xlu0 %2157 }
 0x2fd   :  { %v2747_v14 = vsel %vm2712_vm8, %v2690_v45, %v2214_v20  ;;  %v2719_v42 = vsel %vm2712_vm8, %v2662_v2, %v2158_v58  ;;  %v7859_v45 = vld [vmem:[#allocation10_spill] sm:$0xff]  ;;  %v7860_v20 = vld [vmem:[#allocation167_spill] sm:$0xff] }
 0x2fe   :  { %2011 = vrot.lane.b32.xlu1 %v3696_v16, %s4082_s8  ;;  %1955 = vrot.lane.b32.xlu0 %v3668_v35, %s4082_s8  ;;  %v2436_v16 = vsel %vm2427_vm3, %v2379_v54, %v7857_v4  ;;  %v7858_v35 = vld [vmem:[#allocation141_spill] sm:$0xff]  ;;  %v2323_v2 = vsel %vm2313_vm1, %v4014_v26, %v7859_v45  ;;  %v3754_v54 = vld [vmem:[%s7548_s0 + $0x292] sm:$0xff] }
 0x2ff   :  { %3901 = vmatprep.mubr.msk.f32.mxu0 %vm2781_vm9, %v2719_v42  ;;  %3943 = vmatprep.mubr.msk.f32.mxu1 %vm2781_vm9, %v2747_v14  ;;  %v2464_v23 = vsel %vm2427_vm3, %v2407_v34, %v7858_v35  ;;  %v2493_v58 = vsel %vm2484_vm4, %v2436_v16, %v7860_v20  ;;  %v2351_v14 = vsel %vm2313_vm1, %v4015_v9, %v7862_v30  ;;  %v3615_v4 = vld [vmem:[%s7548_s0 + $0x120] sm:$0xff]  ;;  %v4016_v45 = vld [vmem:[%s7548_s0 + $0x78] sm:$0xff] }
 0x300   :  { %v2216_v50 = vpop.permute.xlu1 %2215  ;;  %v2160_v6 = vpop.permute.xlu0 %2159  ;;  %v2521_v48 = vsel %vm2484_vm4, %v2464_v23, %v7861_v32  ;;  %v2550_v42 = vsel %vm2541_vm5, %v2493_v58, %v5864_v19  ;;  %v2380_v57 = vsel %vm2370_vm2, %v2323_v2, %v7863_v62  ;;  %v3698_v19 = vld [vmem:[%s7548_s0 + $0x291] sm:$0xff]  ;;  %v3644_v23 = vld [vmem:[%s7548_s0 + $0x2a8] sm:$0xff]  ;;  %v7869_v2 = vld [vmem:[#allocation13_spill] sm:$0xff] }
 0x301   :  { %v2748_v44 = vsel %vm2712_vm8, %v2691_v49, %v2216_v50  ;;  %v2720_v40 = vsel %vm2712_vm8, %v2663_v39, %v2160_v6  ;;  %v2578_v3 = vsel %vm2541_vm5, %v2521_v48, %v6006_v31  ;;  %v3670_v31 = vld [vmem:[%s7548_s0 + $0x111] sm:$0xff]  ;;  %v7865_v50 = vld [vmem:[#allocation114_spill] sm:$0xff]  ;;  %v2324_v20 = vsel %vm2313_vm1, %v4016_v45, %v7869_v2  ;;  %v7871_v9 = vld [vmem:[#allocation65_spill] sm:$0xff] }
 0x302   :  { %2233 = vrot.lane.b32.xlu1 %v7851_v18, %s4083_s1  ;;  %2177 = vrot.lane.b32.xlu0 %v3723_v41, %s4083_s1  ;;  %v2408_v41 = vsel %vm2370_vm2, %v2351_v14, %v7864_v29  ;;  %v2437_v6 = vsel %vm2427_vm3, %v2380_v57, %v7865_v50  ;;  %v4017_v58 = vld [vmem:[%s7548_s0 + $0x1f8] sm:$0xff]  ;;  %v7870_v32 = vld [vmem:[#allocation39_spill] sm:$0xff]  ;;  %v2381_v30 = vsel %vm2370_vm2, %v2324_v20, %v7871_v9  ;;  %v3671_v62 = vld [vmem:[%s7548_s0 + $0x121] sm:$0xff] }
 0x303   :  { %3902 = vmatmul.mubr.msk.f32.gmra.mrb[6].mxu0 %vm2781_vm9, %v2720_v40  ;;  %3944 = vmatmul.mubr.msk.f32.gmra.mrb[6].mxu1 %vm2781_vm9, %v2748_v44  ;;  %v7866_v44 = vld [vmem:[#allocation140_spill] sm:$0xff]  ;;  %v2352_v48 = vsel %vm2313_vm1, %v4017_v58, %v7870_v32  ;;  %v7872_v14 = vld [vmem:[#allocation91_spill] sm:$0xff]  ;;  %v7873_v57 = vld [vmem:[#allocation117_spill] sm:$0xff] }
 0x304   :  { %v1770_v27 = vpop.permute.xlu1 %1769  ;;  %v1714_v53 = vpop.permute.xlu0 %1713  ;;  %v2465_v40 = vsel %vm2427_vm3, %v2408_v41, %v7866_v44  ;;  %v2438_v29 = vsel %vm2427_vm3, %v2381_v30, %v7873_v57  ;;  %v7874_v41 = vld [vmem:[#allocation143_spill] sm:$0xff]  ;;  %v7875_v50 = vld [vmem:[#allocation12_spill] sm:$0xff]  ;;  %v7876_v44 = vld [vmem:[#allocation169_spill] sm:$0xff] }
 0x305   :  { %v2635_v49 = vsel %vm2598_vm6, %v2578_v3, %v1770_v27  ;;  %v2607_v39 = vsel %vm2598_vm6, %v2550_v42, %v1714_v53  ;;  %v2409_v42 = vsel %vm2370_vm2, %v2352_v48, %v7872_v14  ;;  %v3699_v3 = vld [vmem:[%s7548_s0 + $0x2a1] sm:$0xff]  ;;  %v3756_v30 = vld [vmem:[%s7548_s0 + $0x2aa] sm:$0xff]  ;;  %v3617_v57 = vld [vmem:[%s7548_s0 + $0x138] sm:$0xff] }
 0x306   :  { %2235 = vrot.lane.b32.xlu1 %v7852_v11, %s4083_s1  ;;  %2179 = vrot.lane.b32.xlu0 %v3724_v13, %s4083_s1  ;;  %v7867_v11 = vld [vmem:[#allocation166_spill] sm:$0xff] }
 0x307   :  { %v3755_v20 = vld [vmem:[%s7548_s0 + $0x2a2] sm:$0xff]  ;;  %v3728_v14 = vld [vmem:[%s7548_s0 + $0x12a] sm:$0xff] }
 0x308   :  { %v1772_v56 = vpop.permute.xlu1 %1771  ;;  %v1716_v61 = vpop.permute.xlu0 %1715 }
 0x30a   :  { %1789 = vrot.lane.b32.xlu1 %v3641_v59, %s4081_s24  ;;  %1733 = vrot.lane.b32.xlu0 %v3613_v7, %s4081_s24  ;;  %v2494_v59 = vsel %vm2484_vm4, %v2437_v6, %v7867_v11  ;;  %v7868_v7 = vld [vmem:[#allocation192_spill] sm:$0xff] }
 0x30b   :  { %v2551_v37 = vsel %vm2541_vm5, %v2494_v59, %v5862_v24  ;;  %v3725_v24 = vld [vmem:[%s7548_s0 + $0x10a] sm:$0xff] }
 0x30c   :  { %v1994_v25 = vpop.permute.xlu1 %1993  ;;  %v1938_v55 = vpop.permute.xlu0 %1937  ;;  %v2608_v1 = vsel %vm2598_vm6, %v2551_v37, %v1716_v61  ;;  %v7879_v59 = vld [vmem:[#allocation219_spill] sm:$0xff]  ;;  %v7881_v37 = vld [vmem:[#allocation90_spill] sm:$0xff] }
 0x30d   :  { %v2692_v18 = vsel %vm2655_vm7, %v2635_v49, %v1994_v25  ;;  %v2664_v13 = vsel %vm2655_vm7, %v2607_v39, %v1938_v55  ;;  %v2466_v49 = vsel %vm2427_vm3, %v2409_v42, %v7874_v41 }
 0x30e   :  { %1791 = vrot.lane.b32.xlu1 %v3642_v5, %s4081_s24  ;;  %1735 = vrot.lane.b32.xlu0 %v3614_v21, %s4081_s24  ;;  %v2522_v5 = vsel %vm2484_vm4, %v2465_v40, %v7868_v7  ;;  %v2495_v40 = vsel %vm2484_vm4, %v2438_v29, %v7876_v44 }
 0x30f   :  { %v2579_v25 = vsel %vm2541_vm5, %v2522_v5, %v6004_v33  ;;  %v2552_v7 = vsel %vm2541_vm5, %v2495_v40, %v7879_v59  ;;  %v4021_v40 = vld [vmem:[%s7548_s0 + $0x210] sm:$0xff] }
 0x310   :  { %v1996_v28 = vpop.permute.xlu1 %1995  ;;  %v1940_v60 = vpop.permute.xlu0 %1939  ;;  %v2636_v55 = vsel %vm2598_vm6, %v2579_v25, %v1772_v56 }
 0x311   :  { %v2693_v33 = vsel %vm2655_vm7, %v2636_v55, %v1996_v28  ;;  %v2665_v22 = vsel %vm2655_vm7, %v2608_v1, %v1940_v60  ;;  %v3616_v28 = vld [vmem:[%s7548_s0 + $0x128] sm:$0xff] }
 0x312   :  { %2013 = vrot.lane.b32.xlu1 %v3697_v52, %s4082_s8  ;;  %1957 = vrot.lane.b32.xlu0 %v3669_v43, %s4082_s8  ;;  %v3643_v43 = vld [vmem:[%s7548_s0 + $0x2a0] sm:$0xff] }
 0x314   :  { %v2218_v27 = vpop.permute.xlu1 %2217  ;;  %v2162_v53 = vpop.permute.xlu0 %2161 }
 0x315   :  { %v2749_v21 = vsel %vm2712_vm8, %v2692_v18, %v2218_v27  ;;  %v2721_v47 = vsel %vm2712_vm8, %v2664_v13, %v2162_v53  ;;  %v7877_v18 = vld [vmem:[#allocation195_spill] sm:$0xff]  ;;  %v4019_v27 = vld [vmem:[%s7548_s0 + $0x200] sm:$0xff]  ;;  %v7878_v53 = vld [vmem:[#allocation38_spill] sm:$0xff] }
 0x316   :  { %2015 = vrot.lane.b32.xlu1 %v3698_v19, %s4082_s8  ;;  %1959 = vrot.lane.b32.xlu0 %v3670_v31, %s4082_s8  ;;  %v4018_v31 = vld [vmem:[%s7548_s0 + $0x80] sm:$0xff]  ;;  %v2523_v13 = vsel %vm2484_vm4, %v2466_v49, %v7877_v18  ;;  %v2353_v11 = vsel %vm2313_vm1, %v4019_v27, %v7878_v53  ;;  %v7889_v27 = vld [vmem:[#allocation67_spill] sm:$0xff] }
 0x317   :  { %3904 = vmatprep.mubr.msk.f32.mxu0 %vm2781_vm9, %v2721_v47  ;;  %3946 = vmatprep.mubr.msk.f32.mxu1 %vm2781_vm9, %v2749_v21  ;;  %v2325_v6 = vsel %vm2313_vm1, %v4018_v31, %v7875_v50  ;;  %v2580_v5 = vsel %vm2541_vm5, %v2523_v13, %v6015_v15  ;;  %v7880_v21 = vld [vmem:[#allocation64_spill] sm:$0xff]  ;;  %v2410_v25 = vsel %vm2370_vm2, %v2353_v11, %v7881_v37  ;;  %v3672_v15 = vld [vmem:[%s7548_s0 + $0x129] sm:$0xff]  ;;  %v3646_v49 = vld [vmem:[%s7548_s0 + $0x2c0] sm:$0xff] }
 0x318   :  { %v2220_v38 = vpop.permute.xlu1 %2219  ;;  %v2164_v56 = vpop.permute.xlu0 %2163  ;;  %v2382_v47 = vsel %vm2370_vm2, %v2325_v6, %v7880_v21  ;;  %v4020_v50 = vld [vmem:[%s7548_s0 + $0x90] sm:$0xff]  ;;  %v7888_v18 = vld [vmem:[#allocation41_spill] sm:$0xff] }
 0x319   :  { %v2750_v61 = vsel %vm2712_vm8, %v2693_v33, %v2220_v38  ;;  %v2722_v51 = vsel %vm2712_vm8, %v2665_v22, %v2164_v56  ;;  %v7883_v22 = vld [vmem:[#allocation142_spill] sm:$0xff]  ;;  %v7887_v6 = vld [vmem:[#allocation15_spill] sm:$0xff]  ;;  %v2354_v13 = vsel %vm2313_vm1, %v4021_v40, %v7888_v18  ;;  %v7890_v11 = vld [vmem:[#allocation93_spill] sm:$0xff] }
 0x31a   :  { %2237 = vrot.lane.b32.xlu1 %v3753_v12, %s4083_s1  ;;  %2181 = vrot.lane.b32.xlu0 %v3725_v24, %s4083_s1  ;;  %v3700_v12 = vld [vmem:[%s7548_s0 + $0x2a9] sm:$0xff]  ;;  %v7882_v24 = vld [vmem:[#allocation116_spill] sm:$0xff]  ;;  %v2467_v38 = vsel %vm2427_vm3, %v2410_v25, %v7883_v22  ;;  %v2326_v44 = vsel %vm2313_vm1, %v4020_v50, %v7887_v6  ;;  %v2411_v59 = vsel %vm2370_vm2, %v2354_v13, %v7890_v11  ;;  %v7892_v37 = vld [vmem:[#allocation145_spill] sm:$0xff] }
 0x31b   :  { %3905 = vmatmul.mubr.msk.f32.gmra.mrb[8].mxu0 %vm2781_vm9, %v2722_v51  ;;  %3947 = vmatmul.mubr.msk.f32.gmra.mrb[8].mxu1 %vm2781_vm9, %v2750_v61  ;;  %v2439_v33 = vsel %vm2427_vm3, %v2382_v47, %v7882_v24  ;;  %v2383_v53 = vsel %vm2370_vm2, %v2326_v44, %v7889_v27  ;;  %v7891_v21 = vld [vmem:[#allocation119_spill] sm:$0xff]  ;;  %v2468_v25 = vsel %vm2427_vm3, %v2411_v59, %v7892_v37  ;;  %v3758_v6 = vld [vmem:[%s7548_s0 + $0x2c2] sm:$0xff]  ;;  %v3648_v59 = vld [vmem:[%s7548_s0 + $0x2d8] sm:$0xff] }
 0x31c   :  { %v1774_v34 = vpop.permute.xlu1 %1773  ;;  %v1718_v52 = vpop.permute.xlu0 %1717  ;;  %v2440_v47 = vsel %vm2427_vm3, %v2383_v53, %v7891_v21  ;;  %v3730_v44 = vld [vmem:[%s7548_s0 + $0x142] sm:$0xff]  ;;  %v3647_v13 = vld [vmem:[%s7548_s0 + $0x2d0] sm:$0xff] }
 0x31d   :  { %v2637_v55 = vsel %vm2598_vm6, %v2580_v5, %v1774_v34  ;;  %v2609_v1 = vsel %vm2598_vm6, %v2552_v7, %v1718_v52  ;;  %v7885_v52 = vld [vmem:[#allocation194_spill] sm:$0xff]  ;;  %v3701_v7 = vld [vmem:[%s7548_s0 + $0x2b9] sm:$0xff]  ;;  %v3619_v27 = vld [vmem:[%s7548_s0 + $0x150] sm:$0xff] }
 0x31e   :  { %2239 = vrot.lane.b32.xlu1 %v3754_v54, %s4083_s1  ;;  %2183 = vrot.lane.b32.xlu0 %v3726_v17, %s4083_s1  ;;  %v7884_v17 = vld [vmem:[#allocation168_spill] sm:$0xff]  ;;  %v7903_v37 = vld [vmem:[#allocation17_spill] sm:$0xff] }
 0x31f   :  { %v2496_v34 = vsel %vm2484_vm4, %v2439_v33, %v7884_v17  ;;  %v3673_v5 = vld [vmem:[%s7548_s0 + $0x139] sm:$0xff]  ;;  %v7894_v33 = vld [vmem:[#allocation171_spill] sm:$0xff] }
 0x320   :  { %v1776_v16 = vpop.permute.xlu1 %1775  ;;  %v1720_v35 = vpop.permute.xlu0 %1719  ;;  %v2497_v22 = vsel %vm2484_vm4, %v2440_v47, %v7894_v33  ;;  %v4024_v47 = vld [vmem:[%s7548_s0 + $0xa8] sm:$0xff]  ;;  %v7906_v33 = vld [vmem:[#allocation95_spill] sm:$0xff] }
 0x321   :  { %v2554_v17 = vsel %vm2541_vm5, %v2497_v22, %v5890_v36  ;;  %v3702_v36 = vld [vmem:[%s7548_s0 + $0x2c1] sm:$0xff] }
 0x322   :  { %1793 = vrot.lane.b32.xlu1 %v3643_v43, %s4081_s24  ;;  %1737 = vrot.lane.b32.xlu0 %v3615_v4, %s4081_s24  ;;  %v2524_v43 = vsel %vm2484_vm4, %v2467_v38, %v7885_v52  ;;  %v7895_v38 = vld [vmem:[#allocation199_spill] sm:$0xff]  ;;  %v7897_v52 = vld [vmem:[#allocation66_spill] sm:$0xff] }
 0x324   :  { %v1998_v60 = vpop.permute.xlu1 %1997  ;;  %v1942_v26 = vpop.permute.xlu0 %1941 }
 0x325   :  { %v2694_v56 = vsel %vm2655_vm7, %v2637_v55, %v1998_v60  ;;  %v2666_v61 = vsel %vm2655_vm7, %v2609_v1, %v1942_v26  ;;  %v2581_v60 = vsel %vm2541_vm5, %v2524_v43, %v6013_v63  ;;  %v3727_v63 = vld [vmem:[%s7548_s0 + $0x122] sm:$0xff] }
 0x326   :  { %1795 = vrot.lane.b32.xlu1 %v3644_v23, %s4081_s24  ;;  %1739 = vrot.lane.b32.xlu0 %v3616_v28, %s4081_s24  ;;  %v7886_v28 = vld [vmem:[#allocation218_spill] sm:$0xff]  ;;  %v2638_v26 = vsel %vm2598_vm6, %v2581_v60, %v1776_v16 }
 0x327   :  { %v2553_v45 = vsel %vm2541_vm5, %v2496_v34, %v7886_v28  ;;  %v7899_v60 = vld [vmem:[#allocation118_spill] sm:$0xff] }
 0x328   :  { %v2000_v39 = vpop.permute.xlu1 %1999  ;;  %v1944_v19 = vpop.permute.xlu0 %1943  ;;  %v2610_v2 = vsel %vm2598_vm6, %v2553_v45, %v1720_v35 }
 0x329   :  { %v2695_v58 = vsel %vm2655_vm7, %v2638_v26, %v2000_v39  ;;  %v2667_v32 = vsel %vm2655_vm7, %v2610_v2, %v1944_v19  ;;  %v3618_v39 = vld [vmem:[%s7548_s0 + $0x140] sm:$0xff]  ;;  %v7900_v2 = vld [vmem:[#allocation144_spill] sm:$0xff] }
 0x32a   :  { %2017 = vrot.lane.b32.xlu1 %v3699_v3, %s4082_s8  ;;  %1961 = vrot.lane.b32.xlu0 %v3671_v62, %s4082_s8  ;;  %v3645_v62 = vld [vmem:[%s7548_s0 + $0x2b8] sm:$0xff] }
 0x32c   :  { %v2222_v51 = vpop.permute.xlu1 %2221  ;;  %v2166_v54 = vpop.permute.xlu0 %2165 }
 0x32d   :  { %v2751_v4 = vsel %vm2712_vm8, %v2694_v56, %v2222_v51  ;;  %v2723_v23 = vsel %vm2712_vm8, %v2666_v61, %v2166_v54  ;;  %v2525_v56 = vsel %vm2484_vm4, %v2468_v25, %v7895_v38  ;;  %v4023_v61 = vld [vmem:[%s7548_s0 + $0x218] sm:$0xff]  ;;  %v2328_v25 = vsel %vm2313_vm1, %v4024_v47, %v7903_v37 }
 0x32e   :  { %2019 = vrot.lane.b32.xlu1 %v3700_v12, %s4082_s8  ;;  %1963 = vrot.lane.b32.xlu0 %v3672_v15, %s4082_s8  ;;  %v4022_v12 = vld [vmem:[%s7548_s0 + $0x98] sm:$0xff]  ;;  %v7893_v15 = vld [vmem:[#allocation14_spill] sm:$0xff]  ;;  %v2582_v34 = vsel %vm2541_vm5, %v2525_v56, %v6025_v10 }
 0x32f   :  { %3907 = vmatprep.mubr.msk.f32.mxu0 %vm2781_vm9, %v2723_v23  ;;  %3949 = vmatprep.mubr.msk.f32.mxu1 %vm2781_vm9, %v2751_v4  ;;  %v2327_v24 = vsel %vm2313_vm1, %v4022_v12, %v7893_v15  ;;  %v7896_v51 = vld [vmem:[#allocation40_spill] sm:$0xff]  ;;  %v3674_v10 = vld [vmem:[%s7548_s0 + $0x141] sm:$0xff] }
 0x330   :  { %v2224_v48 = vpop.permute.xlu1 %2223  ;;  %v2168_v16 = vpop.permute.xlu0 %2167  ;;  %v2355_v54 = vsel %vm2313_vm1, %v4023_v61, %v7896_v51  ;;  %v2384_v43 = vsel %vm2370_vm2, %v2327_v24, %v7897_v52  ;;  %v7898_v4 = vld [vmem:[#allocation92_spill] sm:$0xff]  ;;  %v7905_v15 = vld [vmem:[#allocation69_spill] sm:$0xff] }
 0x331   :  { %v2752_v35 = vsel %vm2712_vm8, %v2695_v58, %v2224_v48  ;;  %v2724_v9 = vsel %vm2712_vm8, %v2667_v32, %v2168_v16  ;;  %v2412_v23 = vsel %vm2370_vm2, %v2355_v54, %v7898_v4  ;;  %v2441_v26 = vsel %vm2427_vm3, %v2384_v43, %v7899_v60  ;;  %v7901_v16 = vld [vmem:[#allocation170_spill] sm:$0xff]  ;;  %v3703_v38 = vld [vmem:[%s7548_s0 + $0x2d1] sm:$0xff]  ;;  %v7907_v61 = vld [vmem:[#allocation121_spill] sm:$0xff] }
 0x332   :  { %2241 = vrot.lane.b32.xlu1 %v3755_v20, %s4083_s1  ;;  %2185 = vrot.lane.b32.xlu0 %v3727_v63, %s4083_s1  ;;  %v2469_v20 = vsel %vm2427_vm3, %v2412_v23, %v7900_v2  ;;  %v2385_v24 = vsel %vm2370_vm2, %v2328_v25, %v7905_v15  ;;  %v3675_v56 = vld [vmem:[%s7548_s0 + $0x151] sm:$0xff] }
 0x333   :  { %3908 = vmatmul.mubr.msk.f32.gmra.mrb[10].mxu0 %vm2781_vm9, %v2724_v9  ;;  %3950 = vmatmul.mubr.msk.f32.gmra.mrb[10].mxu1 %vm2781_vm9, %v2752_v35  ;;  %v2498_v35 = vsel %vm2484_vm4, %v2441_v26, %v7901_v16  ;;  %v7902_v9 = vld [vmem:[#allocation198_spill] sm:$0xff]  ;;  %v2442_v51 = vsel %vm2427_vm3, %v2385_v24, %v7907_v61  ;;  %v7908_v54 = vld [vmem:[#allocation147_spill] sm:$0xff]  ;;  %v7909_v4 = vld [vmem:[#allocation16_spill] sm:$0xff] }
 0x334   :  { %v1778_v42 = vpop.permute.xlu1 %1777  ;;  %v1722_v3 = vpop.permute.xlu0 %1721  ;;  %v4026_v43 = vld [vmem:[%s7548_s0 + $0xb0] sm:$0xff]  ;;  %v7912_v26 = vld [vmem:[#allocation42_spill] sm:$0xff] }
 0x335   :  { %v2639_v28 = vsel %vm2598_vm6, %v2582_v34, %v1778_v42  ;;  %v2611_v45 = vsel %vm2598_vm6, %v2554_v17, %v1722_v3  ;;  %v2555_v3 = vsel %vm2541_vm5, %v2498_v35, %v5888_v0  ;;  %v3729_v0 = vld [vmem:[%s7548_s0 + $0x13a] sm:$0xff]  ;;  %v2329_v23 = vsel %vm2313_vm1, %v4026_v43, %v7909_v4  ;;  %v4027_v60 = vld [vmem:[%s7548_s0 + $0x230] sm:$0xff]  ;;  %v7915_v16 = vld [vmem:[#allocation94_spill] sm:$0xff] }
 0x336   :  { %2243 = vrot.lane.b32.xlu1 %v3756_v30, %s4083_s1  ;;  %2187 = vrot.lane.b32.xlu0 %v3728_v14, %s4083_s1  ;;  %v2526_v30 = vsel %vm2484_vm4, %v2469_v20, %v7902_v9  ;;  %v2357_v2 = vsel %vm2313_vm1, %v4027_v60, %v7912_v26  ;;  %v3649_v24 = vld [vmem:[%s7548_s0 + $0x2e8] sm:$0xff]  ;;  %v3622_v61 = vld [vmem:[%s7548_s0 + $0x170] sm:$0xff]  ;;  %v7923_v4 = vld [vmem:[#allocation45_spill] sm:$0xff] }
 0x337   :  { %v2414_v35 = vsel %vm2370_vm2, %v2357_v2, %v7915_v16  ;;  %v4029_v43 = vld [vmem:[%s7548_s0 + $0x240] sm:$0xff]  ;;  %v3705_v60 = vld [vmem:[%s7548_s0 + $0x2e9] sm:$0xff] }
 0x338   :  { %v1780_v29 = vpop.permute.xlu1 %1779  ;;  %v1724_v41 = vpop.permute.xlu0 %1723  ;;  %v3677_v26 = vld [vmem:[%s7548_s0 + $0x169] sm:$0xff] }
 0x339   :  { %v7926_v2 = vld [vmem:[#allocation123_spill] sm:$0xff]  ;;  %v4030_v16 = vld [vmem:[%s7548_s0 + $0xc8] sm:$0xff] }
 0x33a   :  { %1797 = vrot.lane.b32.xlu1 %v3645_v62, %s4081_s24  ;;  %1741 = vrot.lane.b32.xlu0 %v3617_v57, %s4081_s24  ;;  %v2583_v62 = vsel %vm2541_vm5, %v2526_v30, %v6023_v8 }
 0x33b   :  { %v2640_v57 = vsel %vm2598_vm6, %v2583_v62, %v1780_v29  ;;  %v7917_v62 = vld [vmem:[#allocation146_spill] sm:$0xff] }
 0x33c   :  { %v2002_v19 = vpop.permute.xlu1 %2001  ;;  %v1946_v31 = vpop.permute.xlu0 %1945 }
 0x33d   :  { %v2696_v63 = vsel %vm2655_vm7, %v2639_v28, %v2002_v19  ;;  %v2668_v58 = vsel %vm2655_vm7, %v2611_v45, %v1946_v31  ;;  %v7910_v28 = vld [vmem:[#allocation173_spill] sm:$0xff] }
 0x33e   :  { %1799 = vrot.lane.b32.xlu1 %v3646_v49, %s4081_s24  ;;  %1743 = vrot.lane.b32.xlu0 %v3618_v39, %s4081_s24  ;;  %v2612_v49 = vsel %vm2598_vm6, %v2555_v3, %v1724_v41  ;;  %v3757_v39 = vld [vmem:[%s7548_s0 + $0x2ba] sm:$0xff]  ;;  %v2499_v45 = vsel %vm2484_vm4, %v2442_v51, %v7910_v28  ;;  %v7924_v28 = vld [vmem:[#allocation71_spill] sm:$0xff] }
 0x33f   :  { %v2556_v20 = vsel %vm2541_vm5, %v2499_v45, %v5896_v46  ;;  %v3704_v46 = vld [vmem:[%s7548_s0 + $0x2d9] sm:$0xff] }
 0x340   :  { %v2004_v55 = vpop.permute.xlu1 %2003  ;;  %v1948_v1 = vpop.permute.xlu0 %1947 }
 0x341   :  { %v2697_v8 = vsel %vm2655_vm7, %v2640_v57, %v2004_v55  ;;  %v2669_v19 = vsel %vm2655_vm7, %v2612_v49, %v1948_v1  ;;  %v4025_v55 = vld [vmem:[%s7548_s0 + $0x228] sm:$0xff]  ;;  %v7904_v1 = vld [vmem:[#allocation43_spill] sm:$0xff]  ;;  %v2471_v57 = vsel %vm2427_vm3, %v2414_v35, %v7917_v62  ;;  %v7931_v62 = vld [vmem:[#allocation44_spill] sm:$0xff] }
 0x342   :  { %2021 = vrot.lane.b32.xlu1 %v3701_v7, %s4082_s8  ;;  %1965 = vrot.lane.b32.xlu0 %v3673_v5, %s4082_s8  ;;  %v3620_v7 = vld [vmem:[%s7548_s0 + $0x158] sm:$0xff]  ;;  %v2356_v12 = vsel %vm2313_vm1, %v4025_v55, %v7904_v1  ;;  %v7928_v35 = vld [vmem:[#allocation18_spill] sm:$0xff] }
 0x343   :  { %v2413_v22 = vsel %vm2370_vm2, %v2356_v12, %v7906_v33  ;;  %v3760_v55 = vld [vmem:[%s7548_s0 + $0x2da] sm:$0xff]  ;;  %v3621_v33 = vld [vmem:[%s7548_s0 + $0x168] sm:$0xff] }
 0x344   :  { %v2226_v32 = vpop.permute.xlu1 %2225  ;;  %v2170_v48 = vpop.permute.xlu0 %2169  ;;  %v2470_v17 = vsel %vm2427_vm3, %v2413_v22, %v7908_v54  ;;  %v3732_v1 = vld [vmem:[%s7548_s0 + $0x15a] sm:$0xff] }
 0x345   :  { %v2753_v14 = vsel %vm2712_vm8, %v2696_v63, %v2226_v32  ;;  %v2725_v42 = vsel %vm2712_vm8, %v2668_v58, %v2170_v48  ;;  %v7913_v63 = vld [vmem:[#allocation234_spill] sm:$0xff]  ;;  %v7914_v32 = vld [vmem:[#allocation68_spill] sm:$0xff] }
 0x346   :  { %2023 = vrot.lane.b32.xlu1 %v3702_v36, %s4082_s8  ;;  %1967 = vrot.lane.b32.xlu0 %v3674_v10, %s4082_s8  ;;  %v7911_v36 = vld [vmem:[#allocation203_spill] sm:$0xff]  ;;  %v2386_v48 = vsel %vm2370_vm2, %v2329_v23, %v7914_v32  ;;  %v2358_v23 = vsel %vm2313_vm1, %v4029_v43, %v7923_v4 }
 0x347   :  { %3910 = vmatprep.mubr.msk.f32.mxu0 %vm2781_vm9, %v2725_v42  ;;  %3952 = vmatprep.mubr.msk.f32.mxu1 %vm2781_vm9, %v2753_v14  ;;  %v2527_v10 = vsel %vm2484_vm4, %v2470_v17, %v7911_v36  ;;  %v3676_v14 = vld [vmem:[%s7548_s0 + $0x159] sm:$0xff] }
 0x348   :  { %v2228_v31 = vpop.permute.xlu1 %2227  ;;  %v2172_v29 = vpop.permute.xlu0 %2171  ;;  %v2584_v58 = vsel %vm2541_vm5, %v2527_v10, %v7913_v63  ;;  %v7916_v42 = vld [vmem:[#allocation120_spill] sm:$0xff]  ;;  %v4028_v17 = vld [vmem:[%s7548_s0 + $0xc0] sm:$0xff] }
 0x349   :  { %v2754_v41 = vsel %vm2712_vm8, %v2697_v8, %v2228_v31  ;;  %v2726_v50 = vsel %vm2712_vm8, %v2669_v19, %v2172_v29  ;;  %v2443_v3 = vsel %vm2427_vm3, %v2386_v48, %v7916_v42  ;;  %v7918_v19 = vld [vmem:[#allocation172_spill] sm:$0xff]  ;;  %v7919_v29 = vld [vmem:[#allocation202_spill] sm:$0xff]  ;;  %v7925_v36 = vld [vmem:[#allocation97_spill] sm:$0xff] }
 0x34a   :  { %2245 = vrot.lane.b32.xlu1 %v3757_v39, %s4083_s1  ;;  %2189 = vrot.lane.b32.xlu0 %v3729_v0, %s4083_s1  ;;  %v2500_v31 = vsel %vm2484_vm4, %v2443_v3, %v7918_v19  ;;  %v2415_v10 = vsel %vm2370_vm2, %v2358_v23, %v7925_v36  ;;  %v7927_v63 = vld [vmem:[#allocation149_spill] sm:$0xff]  ;;  %v4031_v3 = vld [vmem:[%s7548_s0 + $0x248] sm:$0xff]  ;;  %v3762_v4 = vld [vmem:[%s7548_s0 + $0x2f2] sm:$0xff] }
 0x34b   :  { %3911 = vmatmul.mubr.msk.f32.gmra.mrb[12].mxu0 %vm2781_vm9, %v2726_v50  ;;  %3953 = vmatmul.mubr.msk.f32.gmra.mrb[12].mxu1 %vm2781_vm9, %v2754_v41  ;;  %v2528_v41 = vsel %vm2484_vm4, %v2471_v57, %v7919_v29  ;;  %v2359_v57 = vsel %vm2313_vm1, %v4031_v3, %v7931_v62  ;;  %v7934_v19 = vld [vmem:[#allocation70_spill] sm:$0xff]  ;;  %v7935_v29 = vld [vmem:[#allocation96_spill] sm:$0xff] }
 0x34c   :  { %v1782_v40 = vpop.permute.xlu1 %1781  ;;  %v1726_v18 = vpop.permute.xlu0 %1725  ;;  %v3734_v23 = vld [vmem:[%s7548_s0 + $0x172] sm:$0xff] }
 0x34d   :  { %v2641_v9 = vsel %vm2598_vm6, %v2584_v58, %v1782_v40  ;;  %v2613_v30 = vsel %vm2598_vm6, %v2556_v20, %v1726_v18  ;;  %v7921_v18 = vld [vmem:[#allocation233_spill] sm:$0xff]  ;;  %v2472_v58 = vsel %vm2427_vm3, %v2415_v10, %v7927_v63 }
 0x34e   :  { %2247 = vrot.lane.b32.xlu1 %v3758_v6, %s4083_s1  ;;  %2191 = vrot.lane.b32.xlu0 %v3730_v44, %s4083_s1  ;;  %v7920_v44 = vld [vmem:[#allocation220_spill] sm:$0xff] }
 0x34f   :  { %v2557_v40 = vsel %vm2541_vm5, %v2500_v31, %v7920_v44  ;;  %v3706_v44 = vld [vmem:[%s7548_s0 + $0x2f1] sm:$0xff] }
 0x350   :  { %v1784_v53 = vpop.permute.xlu1 %1783  ;;  %v1728_v11 = vpop.permute.xlu0 %1727 }
 0x352   :  { %1801 = vrot.lane.b32.xlu1 %v3647_v13, %s4081_s24  ;;  %1745 = vrot.lane.b32.xlu0 %v3619_v27, %s4081_s24  ;;  %v2585_v13 = vsel %vm2541_vm5, %v2528_v41, %v7921_v18  ;;  %v2416_v41 = vsel %vm2370_vm2, %v2359_v57, %v7935_v29  ;;  %v7936_v18 = vld [vmem:[#allocation122_spill] sm:$0xff] }
 0x353   :  { %v2642_v27 = vsel %vm2598_vm6, %v2585_v13, %v1784_v53 }
 0x354   :  { %v2006_v5 = vpop.permute.xlu1 %2005  ;;  %v1950_v21 = vpop.permute.xlu0 %1949 }
 0x355   :  { %v2698_v49 = vsel %vm2655_vm7, %v2641_v9, %v2006_v5  ;;  %v2670_v39 = vsel %vm2655_vm7, %v2613_v30, %v1950_v21  ;;  %v3731_v5 = vld [vmem:[%s7548_s0 + $0x152] sm:$0xff]  ;;  %v2331_v9 = vsel %vm2313_vm1, %v4030_v16, %v7928_v35  ;;  %v7944_v16 = vld [vmem:[#allocation73_spill] sm:$0xff] }
 0x356   :  { %1803 = vrot.lane.b32.xlu1 %v3648_v59, %s4081_s24  ;;  %1747 = vrot.lane.b32.xlu0 %v3620_v7, %s4081_s24  ;;  %v2614_v59 = vsel %vm2598_vm6, %v2557_v40, %v1728_v11  ;;  %v3759_v7 = vld [vmem:[%s7548_s0 + $0x2d2] sm:$0xff]  ;;  %v2388_v31 = vsel %vm2370_vm2, %v2331_v9, %v7934_v19  ;;  %v4034_v19 = vld [vmem:[%s7548_s0 + $0xe0] sm:$0xff] }
 0x357   :  { %v7929_v30 = vld [vmem:[#allocation175_spill] sm:$0xff]  ;;  %v2445_v13 = vsel %vm2427_vm3, %v2388_v31, %v7936_v18  ;;  %v7950_v31 = vld [vmem:[#allocation20_spill] sm:$0xff]  ;;  %v7953_v18 = vld [vmem:[#allocation238_spill] sm:$0xff] }
 0x358   :  { %v2008_v34 = vpop.permute.xlu1 %2007  ;;  %v1952_v52 = vpop.permute.xlu0 %1951  ;;  %v3678_v40 = vld [vmem:[%s7548_s0 + $0x171] sm:$0xff]  ;;  %v2333_v29 = vsel %vm2313_vm1, %v4034_v19, %v7950_v31  ;;  %v7963_v31 = vld [vmem:[#allocation49_spill] sm:$0xff] }
 0x359   :  { %v2699_v21 = vsel %vm2655_vm7, %v2642_v27, %v2008_v34  ;;  %v2671_v47 = vsel %vm2655_vm7, %v2614_v59, %v1952_v52  ;;  %v7922_v34 = vld [vmem:[#allocation19_spill] sm:$0xff]  ;;  %v7937_v27 = vld [vmem:[#allocation148_spill] sm:$0xff] }
 0x35a   :  { %2025 = vrot.lane.b32.xlu1 %v3703_v38, %s4082_s8  ;;  %1969 = vrot.lane.b32.xlu0 %v3675_v56, %s4082_s8  ;;  %v3650_v56 = vld [vmem:[%s7548_s0 + $0x2f0] sm:$0xff]  ;;  %v2330_v52 = vsel %vm2313_vm1, %v4028_v17, %v7922_v34  ;;  %v2473_v59 = vsel %vm2427_vm3, %v2416_v41, %v7937_v27  ;;  %v4035_v41 = vld [vmem:[%s7548_s0 + $0x260] sm:$0xff]  ;;  %v7954_v27 = vld [vmem:[#allocation72_spill] sm:$0xff] }
 0x35b   :  { %v2387_v45 = vsel %vm2370_vm2, %v2330_v52, %v7924_v28  ;;  %v7945_v9 = vld [vmem:[#allocation99_spill] sm:$0xff] }
 0x35c   :  { %v2230_v0 = vpop.permute.xlu1 %2229  ;;  %v2174_v8 = vpop.permute.xlu0 %2173  ;;  %v2444_v20 = vsel %vm2427_vm3, %v2387_v45, %v7926_v2  ;;  %v4032_v2 = vld [vmem:[%s7548_s0 + $0xd8] sm:$0xff]  ;;  %v4037_v19 = vld [vmem:[%s7548_s0 + $0x270] sm:$0xff] }
 0x35d   :  { %v2755_v50 = vsel %vm2712_vm8, %v2698_v49, %v2230_v0  ;;  %v2727_v6 = vsel %vm2712_vm8, %v2670_v39, %v2174_v8  ;;  %v7932_v49 = vld [vmem:[#allocation222_spill] sm:$0xff]  ;;  %v7933_v0 = vld [vmem:[#allocation236_spill] sm:$0xff] }
 0x35e   :  { %2027 = vrot.lane.b32.xlu1 %v3704_v46, %s4082_s8  ;;  %1971 = vrot.lane.b32.xlu0 %v3676_v14, %s4082_s8  ;;  %v2501_v46 = vsel %vm2484_vm4, %v2444_v20, %v7929_v30  ;;  %v7930_v14 = vld [vmem:[#allocation207_spill] sm:$0xff]  ;;  %v7942_v20 = vld [vmem:[#allocation21_spill] sm:$0xff] }
 0x35f   :  { %3913 = vmatprep.mubr.msk.f32.mxu0 %vm2781_vm9, %v2727_v6  ;;  %3955 = vmatprep.mubr.msk.f32.mxu1 %vm2781_vm9, %v2755_v50  ;;  %v2529_v42 = vsel %vm2484_vm4, %v2472_v58, %v7930_v14  ;;  %v2558_v39 = vsel %vm2541_vm5, %v2501_v46, %v7932_v49  ;;  %v2332_v63 = vsel %vm2313_vm1, %v4032_v2, %v7942_v20  ;;  %v4033_v58 = vld [vmem:[%s7548_s0 + $0x258] sm:$0xff]  ;;  %v7946_v46 = vld [vmem:[#allocation125_spill] sm:$0xff] }
 0x360   :  { %v2232_v37 = vpop.permute.xlu1 %2231  ;;  %v2176_v53 = vpop.permute.xlu0 %2175  ;;  %v2586_v8 = vsel %vm2541_vm5, %v2529_v42, %v7933_v0  ;;  %v2389_v35 = vsel %vm2370_vm2, %v2332_v63, %v7944_v16  ;;  %v7947_v42 = vld [vmem:[#allocation151_spill] sm:$0xff]  ;;  %v7948_v49 = vld [vmem:[#allocation177_spill] sm:$0xff] }
 0x361   :  { %v2756_v11 = vsel %vm2712_vm8, %v2699_v21, %v2232_v37  ;;  %v2728_v25 = vsel %vm2712_vm8, %v2671_v47, %v2176_v53  ;;  %v7938_v37 = vld [vmem:[#allocation174_spill] sm:$0xff]  ;;  %v2446_v14 = vsel %vm2427_vm3, %v2389_v35, %v7946_v46  ;;  %v7949_v0 = vld [vmem:[#allocation209_spill] sm:$0xff] }
 0x362   :  { %2249 = vrot.lane.b32.xlu1 %v3759_v7, %s4083_s1  ;;  %2193 = vrot.lane.b32.xlu0 %v3731_v5, %s4083_s1  ;;  %v2502_v53 = vsel %vm2484_vm4, %v2445_v13, %v7938_v37  ;;  %v7956_v37 = vld [vmem:[#allocation124_spill] sm:$0xff] }
 0x363   :  { %3914 = vmatmul.mubr.msk.f32.gmra.mrb[14].mxu0 %vm2781_vm9, %v2728_v25  ;;  %3956 = vmatmul.mubr.msk.f32.gmra.mrb[14].mxu1 %vm2781_vm9, %v2756_v11  ;;  %v7939_v11 = vld [vmem:[#allocation206_spill] sm:$0xff] }
 0x364   :  { %v1786_v12 = vpop.permute.xlu1 %1785  ;;  %v1730_v15 = vpop.permute.xlu0 %1729  ;;  %v2530_v25 = vsel %vm2484_vm4, %v2473_v59, %v7939_v11  ;;  %v2390_v59 = vsel %vm2370_vm2, %v2333_v29, %v7954_v27  ;;  %v7957_v11 = vld [vmem:[#allocation150_spill] sm:$0xff]  ;;  %v2362_v29 = vsel %vm2313_vm1, %v4037_v19, %v7963_v31 }
 0x365   :  { %v2643_v50 = vsel %vm2598_vm6, %v2586_v8, %v1786_v12  ;;  %v2615_v6 = vsel %vm2598_vm6, %v2558_v39, %v1730_v15  ;;  %v7940_v12 = vld [vmem:[#allocation221_spill] sm:$0xff]  ;;  %v2503_v39 = vsel %vm2484_vm4, %v2446_v14, %v7948_v49 }
 0x366   :  { %2251 = vrot.lane.b32.xlu1 %v3760_v55, %s4083_s1  ;;  %2195 = vrot.lane.b32.xlu0 %v3732_v1, %s4083_s1  ;;  %v2559_v15 = vsel %vm2541_vm5, %v2502_v53, %v7940_v12  ;;  %v2447_v53 = vsel %vm2427_vm3, %v2390_v59, %v7956_v37 }
 0x368   :  { %v1788_v22 = vpop.permute.xlu1 %1787  ;;  %v1732_v38 = vpop.permute.xlu0 %1731 }
 0x36a   :  { %1805 = vrot.lane.b32.xlu1 %v3649_v24, %s4081_s24  ;;  %1749 = vrot.lane.b32.xlu0 %v3621_v33, %s4081_s24  ;;  %v7941_v24 = vld [vmem:[#allocation235_spill] sm:$0xff] }
 0x36b   :  { %v2587_v33 = vsel %vm2541_vm5, %v2530_v25, %v7941_v24  ;;  %v7185_v24 = vld [vmem:[%s7550_s2] ss:$0 sm:$0xff] }
 0x36c   :  { %v2010_v51 = vpop.permute.xlu1 %2009  ;;  %v1954_v54 = vpop.permute.xlu0 %1953 }
 0x36d   :  { %v2700_v7 = vsel %vm2655_vm7, %v2643_v50, %v2010_v51  ;;  %v2672_v5 = vsel %vm2655_vm7, %v2615_v6, %v1954_v54  ;;  %v3761_v51 = vld [vmem:[%s7548_s0 + $0x2ea] sm:$0xff] }
 0x36e   :  { %1807 = vrot.lane.b32.xlu1 %v3650_v56, %s4081_s24  ;;  %1751 = vrot.lane.b32.xlu0 %v3622_v61, %s4081_s24  ;;  %v2644_v56 = vsel %vm2598_vm6, %v2587_v33, %v1788_v22  ;;  %v2616_v61 = vsel %vm2598_vm6, %v2559_v15, %v1732_v38  ;;  %v3733_v54 = vld [vmem:[%s7548_s0 + $0x16a] sm:$0xff]  ;;  %v7958_v33 = vld [vmem:[#allocation176_spill] sm:$0xff] }
 0x36f   :  { %v7951_v50 = vld [vmem:[#allocation46_spill] sm:$0xff] }
 0x370   :  { %v2012_v32 = vpop.permute.xlu1 %2011  ;;  %v1956_v48 = vpop.permute.xlu0 %1955  ;;  %v2361_v6 = vsel %vm2313_vm1, %v4035_v41, %v7951_v50  ;;  %v7964_v41 = vld [vmem:[#allocation75_spill] sm:$0xff] }
 0x371   :  { %v2701_v17 = vsel %vm2655_vm7, %v2644_v56, %v2012_v32  ;;  %v2673_v34 = vsel %vm2655_vm7, %v2616_v61, %v1956_v48  ;;  %v7943_v32 = vld [vmem:[#allocation47_spill] sm:$0xff]  ;;  %v2504_v56 = vsel %vm2484_vm4, %v2447_v53, %v7958_v33  ;;  %v7959_v61 = vld [vmem:[#allocation208_spill] sm:$0xff] }
 0x372   :  { %2029 = vrot.lane.b32.xlu1 %v3705_v60, %s4082_s8  ;;  %1973 = vrot.lane.b32.xlu0 %v3677_v26, %s4082_s8  ;;  %v2360_v48 = vsel %vm2313_vm1, %v4033_v58, %v7943_v32  ;;  %v4038_v53 = vld [vmem:[%s7548_s0 + $0xf8] sm:$0xff] }
 0x373   :  { %v2417_v30 = vsel %vm2370_vm2, %v2360_v48, %v7945_v9 }
 0x374   :  { %v2234_v21 = vpop.permute.xlu1 %2233  ;;  %v2178_v47 = vpop.permute.xlu0 %2177  ;;  %v2474_v3 = vsel %vm2427_vm3, %v2417_v30, %v7947_v42 }
 0x375   :  { %v2757_v55 = vsel %vm2712_vm8, %v2700_v7, %v2234_v21  ;;  %v2729_v1 = vsel %vm2712_vm8, %v2672_v5, %v2178_v47  ;;  %v2531_v8 = vsel %vm2484_vm4, %v2474_v3, %v7949_v0  ;;  %v7955_v7 = vld [vmem:[#allocation98_spill] sm:$0xff]  ;;  %v7962_v0 = vld [vmem:[#allocation23_spill] sm:$0xff] }
 0x376   :  { %2031 = vrot.lane.b32.xlu1 %v3706_v44, %s4082_s8  ;;  %1975 = vrot.lane.b32.xlu0 %v3678_v40, %s4082_s8  ;;  %v7952_v44 = vld [vmem:[#allocation224_spill] sm:$0xff]  ;;  %v2588_v13 = vsel %vm2541_vm5, %v2531_v8, %v7953_v18  ;;  %v2418_v5 = vsel %vm2370_vm2, %v2361_v6, %v7955_v7  ;;  %v7965_v6 = vld [vmem:[#allocation101_spill] sm:$0xff] }
 0x377   :  { %3916 = vmatprep.mubr.msk.f32.mxu0 %vm2781_vm9, %v2729_v1  ;;  %3958 = vmatprep.mubr.msk.f32.mxu1 %vm2781_vm9, %v2757_v55  ;;  %v2560_v40 = vsel %vm2541_vm5, %v2503_v39, %v7952_v44  ;;  %v2475_v25 = vsel %vm2427_vm3, %v2418_v5, %v7957_v11  ;;  %v4036_v39 = vld [vmem:[%s7548_s0 + $0xf0] sm:$0xff]  ;;  %v2419_v44 = vsel %vm2370_vm2, %v2362_v29, %v7965_v6  ;;  %v7970_v11 = vld [vmem:[#allocation22_spill] sm:$0xff] }
 0x378   :  { %v2236_v52 = vpop.permute.xlu1 %2235  ;;  %v2180_v22 = vpop.permute.xlu0 %2179  ;;  %v2334_v8 = vsel %vm2313_vm1, %v4036_v39, %v7962_v0  ;;  %v7968_v5 = vld [vmem:[#allocation179_spill] sm:$0xff] }
 0x379   :  { %v2758_v38 = vsel %vm2712_vm8, %v2701_v17, %v2236_v52  ;;  %v2730_v43 = vsel %vm2712_vm8, %v2673_v34, %v2180_v22  ;;  %v7960_v34 = vld [vmem:[#allocation223_spill] sm:$0xff]  ;;  %v7961_v22 = vld [vmem:[#allocation237_spill] sm:$0xff]  ;;  %v2391_v50 = vsel %vm2370_vm2, %v2334_v8, %v7964_v41 }
 0x37a   :  { %2253 = vrot.lane.b32.xlu1 %v3761_v51, %s4083_s1  ;;  %2197 = vrot.lane.b32.xlu0 %v3733_v54, %s4083_s1  ;;  %v2532_v51 = vsel %vm2484_vm4, %v2475_v25, %v7959_v61  ;;  %v2561_v52 = vsel %vm2541_vm5, %v2504_v56, %v7960_v34  ;;  %v2335_v25 = vsel %vm2313_vm1, %v4038_v53, %v7970_v11  ;;  %v7973_v56 = vld [vmem:[#allocation240_spill] sm:$0xff]  ;;  %v4041_v53 = vld [vmem:[%s7548_s0 + $0x288] sm:$0xff]  ;;  %v7983_v11 = vld [vmem:[#allocation51_spill] sm:$0xff] }
 0x37b   :  { %3917 = vmatmul.mubr.msk.f32.gmra.mrb[16].mxu0 %vm2781_vm9, %v2730_v43  ;;  %3959 = vmatmul.mubr.msk.f32.gmra.mrb[16].mxu1 %vm2781_vm9, %v2758_v38  ;;  %v2589_v38 = vsel %vm2541_vm5, %v2532_v51, %v7961_v22  ;;  %v7974_v51 = vld [vmem:[#allocation74_spill] sm:$0xff] }
 0x37c   :  { %v1790_v28 = vpop.permute.xlu1 %1789  ;;  %v1734_v45 = vpop.permute.xlu0 %1733 }
 0x37d   :  { %v2645_v21 = vsel %vm2598_vm6, %v2588_v13, %v1790_v28  ;;  %v2617_v47 = vsel %vm2598_vm6, %v2560_v40, %v1734_v45  ;;  %v7966_v40 = vld [vmem:[#allocation127_spill] sm:$0xff]  ;;  %v7967_v13 = vld [vmem:[#allocation153_spill] sm:$0xff] }
 0x37e   :  { %2255 = vrot.lane.b32.xlu1 %v3762_v4, %s4083_s1  ;;  %2199 = vrot.lane.b32.xlu0 %v3734_v23, %s4083_s1  ;;  %v2448_v18 = vsel %vm2427_vm3, %v2391_v50, %v7966_v40  ;;  %v2476_v27 = vsel %vm2427_vm3, %v2419_v44, %v7967_v13 }
 0x380   :  { %v1792_v36 = vpop.permute.xlu1 %1791  ;;  %v1736_v10 = vpop.permute.xlu0 %1735 }
 0x381   :  { %v2646_v23 = vsel %vm2598_vm6, %v2589_v38, %v1792_v36  ;;  %v2618_v28 = vsel %vm2598_vm6, %v2561_v52, %v1736_v10  ;;  %v7976_v38 = vld [vmem:[#allocation126_spill] sm:$0xff] }
 0x384   :  { %v2014_v60 = vpop.permute.xlu1 %2013  ;;  %v1958_v26 = vpop.permute.xlu0 %1957 }
 0x385   :  { %v2702_v55 = vsel %vm2655_vm7, %v2645_v21, %v2014_v60  ;;  %v2674_v1 = vsel %vm2655_vm7, %v2617_v47, %v1958_v26  ;;  %v2505_v21 = vsel %vm2484_vm4, %v2448_v18, %v7968_v5  ;;  %v7969_v47 = vld [vmem:[#allocation211_spill] sm:$0xff] }
 0x386   :  { %v2533_v37 = vsel %vm2484_vm4, %v2476_v27, %v7969_v47  ;;  %v7982_v47 = vld [vmem:[#allocation25_spill] sm:$0xff] }
 0x387   :  { %v2590_v61 = vsel %vm2541_vm5, %v2533_v37, %v7973_v56 }
 0x388   :  { %v2016_v62 = vpop.permute.xlu1 %2015  ;;  %v1960_v57 = vpop.permute.xlu0 %1959 }
 0x389   :  { %v2703_v20 = vsel %vm2655_vm7, %v2646_v23, %v2016_v62  ;;  %v2675_v63 = vsel %vm2655_vm7, %v2618_v28, %v1960_v57 }
 0x38c   :  { %v2238_v12 = vpop.permute.xlu1 %2237  ;;  %v2182_v15 = vpop.permute.xlu0 %2181 }
 0x38d   :  { %v2759_v54 = vsel %vm2712_vm8, %v2702_v55, %v2238_v12  ;;  %v2731_v17 = vsel %vm2712_vm8, %v2674_v1, %v2182_v15  ;;  %v4039_v55 = vld [vmem:[%s7548_s0 + $0x278] sm:$0xff]  ;;  %v7972_v15 = vld [vmem:[#allocation226_spill] sm:$0xff] }
 0x38e   :  { %v3894_v43 = vpop.f32.mrb[0].mxu0  ;;  %v3936_v4 = vpop.f32.mrb[0].mxu1  ;;  %3919 = vmatprep.mubr.msk.f32.mxu0 %vm2781_vm9, %v2731_v17  ;;  %3961 = vmatprep.mubr.msk.f32.mxu1 %vm2781_vm9, %v2759_v54  ;;  %v7971_v1 = vld [vmem:[#allocation48_spill] sm:$0xff]  ;;  %v2562_v33 = vsel %vm2541_vm5, %v2505_v21, %v7972_v15  ;;  %v2392_v54 = vsel %vm2370_vm2, %v2335_v25, %v7974_v51  ;;  %v4040_v21 = vld [vmem:[%s7548_s0 + $0x108] sm:$0xff]  ;;  %v2364_v25 = vsel %vm2313_vm1, %v4041_v53, %v7983_v11 }
 0x38f   :  { %v3026_v45 = vadd.f32 %v3894_v43, %v7185_v24  ;;  %v3166_v60 = vadd.f32 %v3936_v4, %v7185_v24  ;;  %v3020_v26 = vpop.f32.mrb[1].mxu0  ;;  %v3160_v2 = vpop.f32.mrb[1].mxu1  ;;  %v2363_v12 = vsel %vm2313_vm1, %v4039_v55, %v7971_v1  ;;  %v7975_v17 = vld [vmem:[#allocation100_spill] sm:$0xff]  ;;  %v2449_v43 = vsel %vm2427_vm3, %v2392_v54, %v7976_v38  ;;  %v7984_v55 = vld [vmem:[#allocation77_spill] sm:$0xff] }
 0x390   :  { %v3021_v58 = vadd.f32 %v7185_v24, %v3020_v26  ;;  %v3161_v32 = vadd.f32 %v7185_v24, %v3160_v2  ;;  %v2240_v48 = vpop.permute.xlu1 %2239  ;;  %v2184_v16 = vpop.permute.xlu0 %2183  ;;  %v2420_v34 = vsel %vm2370_vm2, %v2363_v12, %v7975_v17  ;;  %v7977_v4 = vld [vmem:[#allocation152_spill] sm:$0xff]  ;;  %v7978_v2 = vld [vmem:[#allocation178_spill] sm:$0xff]  ;;  %v2336_v37 = vsel %vm2313_vm1, %v4040_v21, %v7982_v47  ;;  %v7985_v12 = vld [vmem:[#allocation103_spill] sm:$0xff] }
 0x391   :  { %v3300_v35 = vmax.f32 %v3026_v45, 0.0  ;;  %v3328_v36 = vmax.f32 %v3166_v60, 0.0  ;;  %v2760_v10 = vsel %vm2712_vm8, %v2703_v20, %v2240_v48  ;;  %v2732_v9 = vsel %vm2712_vm8, %v2675_v63, %v2184_v16  ;;  %v7979_v63 = vld [vmem:[#allocation210_spill] sm:$0xff]  ;;  %v7980_v16 = vld [vmem:[#allocation225_spill] sm:$0xff] }
 0x392   :  { %v3299_v30 = vmax.f32 %v3021_v58, 0.0  ;;  %v3327_v46 = vmax.f32 %v3161_v32, 0.0  ;;  %3920 = vmatmul.mubr.msk.f32.gmra.mrb[18].mxu0 %vm2781_vm9, %v2732_v9  ;;  %3962 = vmatmul.mubr.msk.f32.gmra.mrb[18].mxu1 %vm2781_vm9, %v2760_v10  ;;  %v2477_v23 = vsel %vm2427_vm3, %v2420_v34, %v7977_v4  ;;  %v2506_v20 = vsel %vm2484_vm4, %v2449_v43, %v7978_v2  ;;  %v7988_v34 = vld [vmem:[#allocation181_spill] sm:$0xff]  ;;  %v4042_v43 = vld [vmem:[%s7548_s0 + $0x110] sm:$0xff]  ;;  %v7990_v4 = vld [vmem:[#allocation24_spill] sm:$0xff] }
 0x393   :  { %3356 = vst [vmem:[#allocation2 + $0x8] sm:$0xff] %v3300_v35  ;;  %3384 = vst [vmem:[#allocation2 + $0xe8] sm:$0xff] %v3328_v36  ;;  %v2534_v58 = vsel %vm2484_vm4, %v2477_v23, %v7979_v63  ;;  %v2563_v35 = vsel %vm2541_vm5, %v2506_v20, %v7980_v16  ;;  %v7981_v36 = vld [vmem:[#allocation239_spill] sm:$0xff]  ;;  %v2393_v1 = vsel %vm2370_vm2, %v2336_v37, %v7984_v55  ;;  %v7993_v20 = vld [vmem:[#allocation242_spill] sm:$0xff] }
 0x394   :  { %3355 = vst [vmem:[#allocation2] sm:$0xff] %v3299_v30  ;;  %3383 = vst [vmem:[#allocation2 + $0xe0] sm:$0xff] %v3327_v46  ;;  %v1794_v14 = vpop.permute.xlu1 %1793  ;;  %v1738_v42 = vpop.permute.xlu0 %1737  ;;  %v2591_v10 = vsel %vm2541_vm5, %v2534_v58, %v7981_v36  ;;  %v2421_v15 = vsel %vm2370_vm2, %v2364_v25, %v7985_v12  ;;  %v2337_v23 = vsel %vm2313_vm1, %v4042_v43, %v7990_v4  ;;  %v7994_v58 = vld [vmem:[#allocation76_spill] sm:$0xff]  ;;  %v4045_v43 = vld [vmem:[%s7548_s0 + $0x2a0] sm:$0xff] }
 0x395   :  { %v2647_v52 = vsel %vm2598_vm6, %v2590_v61, %v1794_v14  ;;  %v2619_v22 = vsel %vm2598_vm6, %v2562_v33, %v1738_v42  ;;  %v7986_v33 = vld [vmem:[#allocation129_spill] sm:$0xff]  ;;  %v7987_v61 = vld [vmem:[#allocation155_spill] sm:$0xff] }
 0x396   :  { %v2450_v56 = vsel %vm2427_vm3, %v2393_v1, %v7986_v33  ;;  %v2478_v51 = vsel %vm2427_vm3, %v2421_v15, %v7987_v61  ;;  %v8003_v4 = vld [vmem:[#allocation53_spill] sm:$0xff] }
 0x398   :  { %v1796_v3 = vpop.permute.xlu1 %1795  ;;  %v1740_v62 = vpop.permute.xlu0 %1739 }
 0x399   :  { %v2648_v46 = vsel %vm2598_vm6, %v2591_v10, %v1796_v3  ;;  %v2620_v14 = vsel %vm2598_vm6, %v2563_v35, %v1740_v62  ;;  %v7996_v10 = vld [vmem:[#allocation128_spill] sm:$0xff] }
 0x39c   :  { %v2018_v57 = vpop.permute.xlu1 %2017  ;;  %v1962_v49 = vpop.permute.xlu0 %1961 }
 0x39d   :  { %v2704_v28 = vsel %vm2655_vm7, %v2647_v52, %v2018_v57  ;;  %v2676_v45 = vsel %vm2655_vm7, %v2619_v22, %v1962_v49  ;;  %v2507_v52 = vsel %vm2484_vm4, %v2450_v56, %v7988_v34  ;;  %v7989_v22 = vld [vmem:[#allocation213_spill] sm:$0xff] }
 0x39e   :  { %v2535_v38 = vsel %vm2484_vm4, %v2478_v51, %v7989_v22  ;;  %v8002_v22 = vld [vmem:[#allocation27_spill] sm:$0xff] }
 0x39f   :  { %v2592_v63 = vsel %vm2541_vm5, %v2535_v38, %v7993_v20 }
 0x3a0   :  { %v2020_v59 = vpop.permute.xlu1 %2019  ;;  %v1964_v7 = vpop.permute.xlu0 %1963 }
 0x3a1   :  { %v2705_v0 = vsel %vm2655_vm7, %v2648_v46, %v2020_v59  ;;  %v2677_v8 = vsel %vm2655_vm7, %v2620_v14, %v1964_v7 }
 0x3a4   :  { %v2242_v60 = vpop.permute.xlu1 %2241  ;;  %v2186_v26 = vpop.permute.xlu0 %2185 }
 0x3a5   :  { %v2761_v32 = vsel %vm2712_vm8, %v2704_v28, %v2242_v60  ;;  %v2733_v48 = vsel %vm2712_vm8, %v2676_v45, %v2186_v26  ;;  %v4043_v28 = vld [vmem:[%s7548_s0 + $0x290] sm:$0xff]  ;;  %v7991_v45 = vld [vmem:[#allocation50_spill] sm:$0xff]  ;;  %v7992_v26 = vld [vmem:[#allocation228_spill] sm:$0xff] }
 0x3a6   :  { %v3897_v9 = vpop.f32.mrb[2].mxu0  ;;  %v3939_v30 = vpop.f32.mrb[2].mxu1  ;;  %3922 = vmatprep.mubr.msk.f32.mxu0 %vm2781_vm9, %v2733_v48  ;;  %3964 = vmatprep.mubr.msk.f32.mxu1 %vm2781_vm9, %v2761_v32  ;;  %v2365_v60 = vsel %vm2313_vm1, %v4043_v28, %v7991_v45  ;;  %v2564_v2 = vsel %vm2541_vm5, %v2507_v52, %v7992_v26  ;;  %v2394_v32 = vsel %vm2370_vm2, %v2337_v23, %v7994_v58  ;;  %v7995_v48 = vld [vmem:[#allocation102_spill] sm:$0xff]  ;;  %v4044_v52 = vld [vmem:[%s7548_s0 + $0x120] sm:$0xff]  ;;  %v8004_v28 = vld [vmem:[#allocation79_spill] sm:$0xff] }
 0x3a7   :  { %v3036_v42 = vadd.f32 %v3897_v9, %v7185_v24  ;;  %v3176_v57 = vadd.f32 %v3939_v30, %v7185_v24  ;;  %v3030_v49 = vpop.f32.mrb[3].mxu0  ;;  %v3170_v39 = vpop.f32.mrb[3].mxu1  ;;  %v2422_v16 = vsel %vm2370_vm2, %v2365_v60, %v7995_v48  ;;  %v2451_v9 = vsel %vm2427_vm3, %v2394_v32, %v7996_v10  ;;  %v7997_v30 = vld [vmem:[#allocation154_spill] sm:$0xff]  ;;  %v8005_v60 = vld [vmem:[#allocation105_spill] sm:$0xff] }
 0x3a8   :  { %v3031_v19 = vadd.f32 %v7185_v24, %v3030_v49  ;;  %v3171_v31 = vadd.f32 %v7185_v24, %v3170_v39  ;;  %v2244_v29 = vpop.permute.xlu1 %2243  ;;  %v2188_v41 = vpop.permute.xlu0 %2187  ;;  %v2479_v46 = vsel %vm2427_vm3, %v2422_v16, %v7997_v30  ;;  %v7998_v39 = vld [vmem:[#allocation180_spill] sm:$0xff]  ;;  %v2338_v38 = vsel %vm2313_vm1, %v4044_v52, %v8002_v22  ;;  %v8008_v16 = vld [vmem:[#allocation183_spill] sm:$0xff]  ;;  %v8010_v30 = vld [vmem:[#allocation26_spill] sm:$0xff] }
 0x3a9   :  { %v3302_v50 = vmax.f32 %v3036_v42, 0.0  ;;  %v3330_v3 = vmax.f32 %v3176_v57, 0.0  ;;  %v2762_v62 = vsel %vm2712_vm8, %v2705_v0, %v2244_v29  ;;  %v2734_v6 = vsel %vm2712_vm8, %v2677_v8, %v2188_v41  ;;  %v7999_v8 = vld [vmem:[#allocation212_spill] sm:$0xff]  ;;  %v8000_v41 = vld [vmem:[#allocation227_spill] sm:$0xff] }
 0x3aa   :  { %v3301_v44 = vmax.f32 %v3031_v19, 0.0  ;;  %v3329_v40 = vmax.f32 %v3171_v31, 0.0  ;;  %3923 = vmatmul.mubr.msk.f32.gmra.mrb[20].mxu0 %vm2781_vm9, %v2734_v6  ;;  %3965 = vmatmul.mubr.msk.f32.gmra.mrb[20].mxu1 %vm2781_vm9, %v2762_v62  ;;  %v2508_v0 = vsel %vm2484_vm4, %v2451_v9, %v7998_v39  ;;  %v2536_v19 = vsel %vm2484_vm4, %v2479_v46, %v7999_v8  ;;  %v4046_v9 = vld [vmem:[%s7548_s0 + $0x128] sm:$0xff] }
 0x3ab   :  { %3358 = vst [vmem:[#allocation2 + $0x18] sm:$0xff] %v3302_v50  ;;  %3386 = vst [vmem:[#allocation2 + $0xf8] sm:$0xff] %v3330_v3  ;;  %v2565_v50 = vsel %vm2541_vm5, %v2508_v0, %v8000_v41  ;;  %v8001_v3 = vld [vmem:[#allocation241_spill] sm:$0xff]  ;;  %v2366_v23 = vsel %vm2313_vm1, %v4045_v43, %v8003_v4  ;;  %v2395_v45 = vsel %vm2370_vm2, %v2338_v38, %v8004_v28  ;;  %v8013_v0 = vld [vmem:[#allocation244_spill] sm:$0xff] }
 0x3ac   :  { %3357 = vst [vmem:[#allocation2 + $0x10] sm:$0xff] %v3301_v44  ;;  %3385 = vst [vmem:[#allocation2 + $0xf0] sm:$0xff] %v3329_v40  ;;  %v1798_v18 = vpop.permute.xlu1 %1797  ;;  %v1742_v13 = vpop.permute.xlu0 %1741  ;;  %v2593_v62 = vsel %vm2541_vm5, %v2536_v19, %v8001_v3  ;;  %v2423_v26 = vsel %vm2370_vm2, %v2366_v23, %v8005_v60  ;;  %v2339_v46 = vsel %vm2313_vm1, %v4046_v9, %v8010_v30  ;;  %v8014_v19 = vld [vmem:[#allocation78_spill] sm:$0xff]  ;;  %v4049_v9 = vld [vmem:[%s7548_s0 + $0x2b8] sm:$0xff] }
 0x3ad   :  { %v2649_v35 = vsel %vm2598_vm6, %v2592_v63, %v1798_v18  ;;  %v2621_v36 = vsel %vm2598_vm6, %v2564_v2, %v1742_v13  ;;  %v8006_v2 = vld [vmem:[#allocation131_spill] sm:$0xff]  ;;  %v8007_v63 = vld [vmem:[#allocation157_spill] sm:$0xff] }
 0x3ae   :  { %v2452_v20 = vsel %vm2427_vm3, %v2395_v45, %v8006_v2  ;;  %v2480_v58 = vsel %vm2427_vm3, %v2423_v26, %v8007_v63  ;;  %v8023_v30 = vld [vmem:[#allocation55_spill] sm:$0xff] }
 0x3b0   :  { %v1800_v27 = vpop.permute.xlu1 %1799  ;;  %v1744_v59 = vpop.permute.xlu0 %1743 }
 0x3b1   :  { %v2650_v40 = vsel %vm2598_vm6, %v2593_v62, %v1800_v27  ;;  %v2622_v18 = vsel %vm2598_vm6, %v2565_v50, %v1744_v59  ;;  %v8016_v62 = vld [vmem:[#allocation130_spill] sm:$0xff] }
 0x3b4   :  { %v2022_v7 = vpop.permute.xlu1 %2021  ;;  %v1966_v5 = vpop.permute.xlu0 %1965 }
 0x3b5   :  { %v2706_v14 = vsel %vm2655_vm7, %v2649_v35, %v2022_v7  ;;  %v2678_v42 = vsel %vm2655_vm7, %v2621_v36, %v1966_v5  ;;  %v2509_v35 = vsel %vm2484_vm4, %v2452_v20, %v8008_v16  ;;  %v8009_v36 = vld [vmem:[#allocation215_spill] sm:$0xff] }
 0x3b6   :  { %v2537_v10 = vsel %vm2484_vm4, %v2480_v58, %v8009_v36  ;;  %v8022_v36 = vld [vmem:[#allocation29_spill] sm:$0xff] }
 0x3b7   :  { %v2594_v8 = vsel %vm2541_vm5, %v2537_v10, %v8013_v0 }
 0x3b8   :  { %v2024_v54 = vpop.permute.xlu1 %2023  ;;  %v1968_v17 = vpop.permute.xlu0 %1967 }
 0x3b9   :  { %v2707_v47 = vsel %vm2655_vm7, %v2650_v40, %v2024_v54  ;;  %v2679_v37 = vsel %vm2655_vm7, %v2622_v18, %v1968_v17 }
 0x3bc   :  { %v2246_v57 = vpop.permute.xlu1 %2245  ;;  %v2190_v49 = vpop.permute.xlu0 %2189 }
 0x3bd   :  { %v2763_v31 = vsel %vm2712_vm8, %v2706_v14, %v2246_v57  ;;  %v2735_v29 = vsel %vm2712_vm8, %v2678_v42, %v2190_v49  ;;  %v4047_v14 = vld [vmem:[%s7548_s0 + $0x2a8] sm:$0xff]  ;;  %v8011_v42 = vld [vmem:[#allocation52_spill] sm:$0xff] }
 0x3be   :  { %v3900_v6 = vpop.f32.mrb[4].mxu0  ;;  %v3942_v44 = vpop.f32.mrb[4].mxu1  ;;  %3925 = vmatprep.mubr.msk.f32.mxu0 %vm2781_vm9, %v2735_v29  ;;  %3967 = vmatprep.mubr.msk.f32.mxu1 %vm2781_vm9, %v2763_v31  ;;  %v2367_v57 = vsel %vm2313_vm1, %v4047_v14, %v8011_v42  ;;  %v8012_v49 = vld [vmem:[#allocation230_spill] sm:$0xff]  ;;  %v2396_v31 = vsel %vm2370_vm2, %v2339_v46, %v8014_v19  ;;  %v8015_v29 = vld [vmem:[#allocation104_spill] sm:$0xff]  ;;  %v2368_v46 = vsel %vm2313_vm1, %v4049_v9, %v8023_v30  ;;  %v8024_v14 = vld [vmem:[#allocation81_spill] sm:$0xff] }
 0x3bf   :  { %v3046_v13 = vadd.f32 %v3900_v6, %v7185_v24  ;;  %v3186_v7 = vadd.f32 %v3942_v44, %v7185_v24  ;;  %v3040_v5 = vpop.f32.mrb[5].mxu0  ;;  %v3180_v21 = vpop.f32.mrb[5].mxu1  ;;  %v2566_v39 = vsel %vm2541_vm5, %v2509_v35, %v8012_v49  ;;  %v2424_v41 = vsel %vm2370_vm2, %v2367_v57, %v8015_v29  ;;  %v8017_v44 = vld [vmem:[#allocation156_spill] sm:$0xff]  ;;  %v8025_v57 = vld [vmem:[#allocation107_spill] sm:$0xff] }
 0x3c0   :  { %v3041_v53 = vadd.f32 %v7185_v24, %v3040_v5  ;;  %v3181_v11 = vadd.f32 %v7185_v24, %v3180_v21  ;;  %v2248_v25 = vpop.permute.xlu1 %2247  ;;  %v2192_v55 = vpop.permute.xlu0 %2191  ;;  %v2453_v6 = vsel %vm2427_vm3, %v2396_v31, %v8016_v62  ;;  %v2481_v40 = vsel %vm2427_vm3, %v2424_v41, %v8017_v44  ;;  %v8018_v21 = vld [vmem:[#allocation182_spill] sm:$0xff]  ;;  %v4048_v35 = vld [vmem:[%s7548_s0 + $0x138] sm:$0xff]  ;;  %v8028_v41 = vld [vmem:[#allocation185_spill] sm:$0xff] }
 0x3c1   :  { %v3304_v1 = vmax.f32 %v3046_v13, 0.0  ;;  %v3332_v27 = vmax.f32 %v3186_v7, 0.0  ;;  %v2764_v59 = vsel %vm2712_vm8, %v2707_v47, %v2248_v25  ;;  %v2736_v12 = vsel %vm2712_vm8, %v2679_v37, %v2192_v55  ;;  %v8019_v37 = vld [vmem:[#allocation214_spill] sm:$0xff]  ;;  %v8020_v55 = vld [vmem:[#allocation229_spill] sm:$0xff]  ;;  %v8030_v44 = vld [vmem:[#allocation28_spill] sm:$0xff] }
 0x3c2   :  { %v3303_v15 = vmax.f32 %v3041_v53, 0.0  ;;  %v3331_v33 = vmax.f32 %v3181_v11, 0.0  ;;  %3926 = vmatmul.mubr.msk.f32.gmra.mrb[22].mxu0 %vm2781_vm9, %v2736_v12  ;;  %3968 = vmatmul.mubr.msk.f32.gmra.mrb[22].mxu1 %vm2781_vm9, %v2764_v59  ;;  %v2510_v47 = vsel %vm2484_vm4, %v2453_v6, %v8018_v21  ;;  %v2538_v53 = vsel %vm2484_vm4, %v2481_v40, %v8019_v37  ;;  %v4050_v6 = vld [vmem:[%s7548_s0 + $0x140] sm:$0xff] }
 0x3c3   :  { %3360 = vst [vmem:[#allocation2 + $0x28] sm:$0xff] %v3304_v1  ;;  %3388 = vst [vmem:[#allocation2 + $0x108] sm:$0xff] %v3332_v27  ;;  %v2567_v1 = vsel %vm2541_vm5, %v2510_v47, %v8020_v55  ;;  %v8021_v27 = vld [vmem:[#allocation243_spill] sm:$0xff]  ;;  %v2340_v10 = vsel %vm2313_vm1, %v4048_v35, %v8022_v36  ;;  %v2425_v49 = vsel %vm2370_vm2, %v2368_v46, %v8025_v57  ;;  %v8033_v47 = vld [vmem:[#allocation246_spill] sm:$0xff] }
 0x3c4   :  { %3359 = vst [vmem:[#allocation2 + $0x20] sm:$0xff] %v3303_v15  ;;  %3387 = vst [vmem:[#allocation2 + $0x100] sm:$0xff] %v3331_v33  ;;  %v1802_v56 = vpop.permute.xlu1 %1801  ;;  %v1746_v61 = vpop.permute.xlu0 %1745  ;;  %v2595_v59 = vsel %vm2541_vm5, %v2538_v53, %v8021_v27  ;;  %v2397_v42 = vsel %vm2370_vm2, %v2340_v10, %v8024_v14  ;;  %v2341_v40 = vsel %vm2313_vm1, %v4050_v6, %v8030_v44  ;;  %v8034_v53 = vld [vmem:[#allocation80_spill] sm:$0xff] }
 0x3c5   :  { %v2651_v50 = vsel %vm2598_vm6, %v2594_v8, %v1802_v56  ;;  %v2623_v3 = vsel %vm2598_vm6, %v2566_v39, %v1746_v61  ;;  %v8026_v39 = vld [vmem:[#allocation133_spill] sm:$0xff]  ;;  %v8027_v8 = vld [vmem:[#allocation159_spill] sm:$0xff] }
 0x3c6   :  { %v2454_v0 = vsel %vm2427_vm3, %v2397_v42, %v8026_v39  ;;  %v2482_v19 = vsel %vm2427_vm3, %v2425_v49, %v8027_v8 }
 0x3c8   :  { %v1804_v51 = vpop.permute.xlu1 %1803  ;;  %v1748_v54 = vpop.permute.xlu0 %1747 }
 0x3c9   :  { %v2652_v33 = vsel %vm2598_vm6, %v2595_v59, %v1804_v51  ;;  %v2624_v56 = vsel %vm2598_vm6, %v2567_v1, %v1748_v54  ;;  %v8036_v59 = vld [vmem:[#allocation132_spill] sm:$0xff] }
 0x3cc   :  { %v2026_v17 = vpop.permute.xlu1 %2025  ;;  %v1970_v34 = vpop.permute.xlu0 %1969 }
 0x3cd   :  { %v2708_v18 = vsel %vm2655_vm7, %v2651_v50, %v2026_v17  ;;  %v2680_v13 = vsel %vm2655_vm7, %v2623_v3, %v1970_v34  ;;  %v2511_v50 = vsel %vm2484_vm4, %v2454_v0, %v8028_v41  ;;  %v8029_v3 = vld [vmem:[#allocation217_spill] sm:$0xff] }
 0x3ce   :  { %v2539_v62 = vsel %vm2484_vm4, %v2482_v19, %v8029_v3 }
 0x3cf   :  { %v2596_v37 = vsel %vm2541_vm5, %v2539_v62, %v8033_v47 }
 0x3d0   :  { %v2028_v32 = vpop.permute.xlu1 %2027  ;;  %v1972_v48 = vpop.permute.xlu0 %1971 }
 0x3d1   :  { %v2709_v22 = vsel %vm2655_vm7, %v2652_v33, %v2028_v32  ;;  %v2681_v38 = vsel %vm2655_vm7, %v2624_v56, %v1972_v48 }
 0x3d4   :  { %v2250_v7 = vpop.permute.xlu1 %2249  ;;  %v2194_v5 = vpop.permute.xlu0 %2193 }
 0x3d5   :  { %v2765_v11 = vsel %vm2712_vm8, %v2708_v18, %v2250_v7  ;;  %v2737_v25 = vsel %vm2712_vm8, %v2680_v13, %v2194_v5  ;;  %v4051_v18 = vld [vmem:[%s7548_s0 + $0x2c0] sm:$0xff]  ;;  %v8031_v13 = vld [vmem:[#allocation54_spill] sm:$0xff]  ;;  %v8032_v5 = vld [vmem:[#allocation232_spill] sm:$0xff]  ;;  %s4084_s0 = smov [#allocation2]  }
 0x3d6   :  { %v3903_v12 = vpop.f32.mrb[6].mxu0  ;;  %v3945_v15 = vpop.f32.mrb[6].mxu1  ;;  %3928 = vmatprep.mubr.msk.f32.mxu0 %vm2781_vm9, %v2737_v25  ;;  %3970 = vmatprep.mubr.msk.f32.mxu1 %vm2781_vm9, %v2765_v11  ;;  %v2369_v7 = vsel %vm2313_vm1, %v4051_v18, %v8031_v13  ;;  %v2568_v21 = vsel %vm2541_vm5, %v2511_v50, %v8032_v5  ;;  %v2398_v11 = vsel %vm2370_vm2, %v2341_v40, %v8034_v53  ;;  %v8035_v25 = vld [vmem:[#allocation106_spill] sm:$0xff]  ;;  %s3416_s21 = sshll.u32 %s4084_s0, 4  ;;  %s3417_s21 = int_to_ptr.vmem [resolvable:$true] %s3416_s21 }
 0x3d7   :  { %v3056_v61 = vadd.f32 %v3903_v12, %v7185_v24  ;;  %v3196_v17 = vadd.f32 %v3945_v15, %v7185_v24  ;;  %v3050_v34 = vpop.f32.mrb[7].mxu0  ;;  %v3190_v52 = vpop.f32.mrb[7].mxu1  ;;  %v2426_v55 = vsel %vm2370_vm2, %v2369_v7, %v8035_v25  ;;  %v2455_v12 = vsel %vm2427_vm3, %v2398_v11, %v8036_v59  ;;  %v8037_v15 = vld [vmem:[#allocation158_spill] sm:$0xff]  ;;  %s4052_s22 = scalar_lea.vmem %s3417_s21, 7168  ;;  %p4057_p1 = scmp.lt.s32.totalorder %s3417_s21, %s3417_s21 }
 0x3d8   :  { %v3051_v43 = vadd.f32 %v7185_v24, %v3050_v34  ;;  %v3191_v4 = vadd.f32 %v7185_v24, %v3190_v52  ;;  %v2252_v23 = vpop.permute.xlu1 %2251  ;;  %v2196_v28 = vpop.permute.xlu0 %2195  ;;  %v2483_v33 = vsel %vm2427_vm3, %v2426_v55, %v8037_v15  ;;  %v8038_v52 = vld [vmem:[#allocation184_spill] sm:$0xff]  ;;  %p4053_p0 = scmp.ne.s32.totalorder %s3417_s21, %s4052_s22  ;;  %p4058_p2 = scmp.lt.s32.totalorder %s4052_s22, %s4052_s22 }
 0x3d9   :  { %v3306_v45 = vmax.f32 %v3056_v61, 0.0  ;;  %v3334_v51 = vmax.f32 %v3196_v17, 0.0  ;;  %v2766_v54 = vsel %vm2712_vm8, %v2709_v22, %v2252_v23  ;;  %v2738_v60 = vsel %vm2712_vm8, %v2681_v38, %v2196_v28  ;;  %v8039_v38 = vld [vmem:[#allocation216_spill] sm:$0xff]  ;;  %v8040_v28 = vld [vmem:[#allocation231_spill] sm:$0xff] }
 0x3da   :  { %v3305_v26 = vmax.f32 %v3051_v43, 0.0  ;;  %v3333_v2 = vmax.f32 %v3191_v4, 0.0  ;;  %3929 = vmatmul.mubr.msk.f32.gmra.mrb[24].mxu0 %vm2781_vm9, %v2738_v60  ;;  %3971 = vmatmul.mubr.msk.f32.gmra.mrb[24].mxu1 %vm2781_vm9, %v2766_v54  ;;  %v2512_v22 = vsel %vm2484_vm4, %v2455_v12, %v8038_v52  ;;  %v2540_v43 = vsel %vm2484_vm4, %v2483_v33, %v8039_v38  ;;  %p4059_p3 = por %p4058_p2, %p4057_p1 }
 0x3db   :  { %3362 = vst [vmem:[#allocation2 + $0x38] sm:$0xff] %v3306_v45  ;;  %3390 = vst [vmem:[#allocation2 + $0x118] sm:$0xff] %v3334_v51  ;;  %v2569_v45 = vsel %vm2541_vm5, %v2512_v22, %v8040_v28  ;;  %v8041_v51 = vld [vmem:[#allocation245_spill] sm:$0xff] }
 0x3dc   :  { %3361 = vst [vmem:[#allocation2 + $0x30] sm:$0xff] %v3305_v26  ;;  %3389 = vst [vmem:[#allocation2 + $0x110] sm:$0xff] %v3333_v2  ;;  %v1806_v20 = vpop.permute.xlu1 %1805  ;;  %v1750_v63 = vpop.permute.xlu0 %1749  ;;  %v2597_v54 = vsel %vm2541_vm5, %v2540_v43, %v8041_v51  ;;  %p4060_p4 = pnand %p4059_p3, %p4053_p0 }
 0x3dd   :  { %v2653_v1 = vsel %vm2598_vm6, %v2596_v37, %v1806_v20  ;;  %v2625_v27 = vsel %vm2598_vm6, %v2568_v21, %v1750_v63 }
 0x3e0   :  { %v1808_v58 = vpop.permute.xlu1 %1807  ;;  %v1752_v32 = vpop.permute.xlu0 %1751 }
 0x3e1   :  { %v2654_v2 = vsel %vm2598_vm6, %v2597_v54, %v1808_v58  ;;  %v2626_v20 = vsel %vm2598_vm6, %v2569_v45, %v1752_v32 }
 0x3e4   :  { %v2030_v48 = vpop.permute.xlu1 %2029  ;;  %v1974_v16 = vpop.permute.xlu0 %1973 }
 0x3e5   :  { %v2710_v56 = vsel %vm2655_vm7, %v2653_v1, %v2030_v48  ;;  %v2682_v61 = vsel %vm2655_vm7, %v2625_v27, %v1974_v16 }
 0x3e8   :  { %v2032_v31 = vpop.permute.xlu1 %2031  ;;  %v1976_v29 = vpop.permute.xlu0 %1975 }
 0x3e9   :  { %v2711_v36 = vsel %vm2655_vm7, %v2654_v2, %v2032_v31  ;;  %v2683_v10 = vsel %vm2655_vm7, %v2626_v20, %v1976_v29 }
 0x3ec   :  { %v2254_v17 = vpop.permute.xlu1 %2253  ;;  %v2198_v34 = vpop.permute.xlu0 %2197 }
 0x3ed   :  { %v2767_v4 = vsel %vm2712_vm8, %v2710_v56, %v2254_v17  ;;  %v2739_v23 = vsel %vm2712_vm8, %v2682_v61, %v2198_v34 }
 0x3ee   :  { %v3906_v60 = vpop.f32.mrb[8].mxu0  ;;  %v3948_v26 = vpop.f32.mrb[8].mxu1  ;;  %3931 = vmatprep.mubr.msk.f32.mxu0 %vm2781_vm9, %v2739_v23  ;;  %3973 = vmatprep.mubr.msk.f32.mxu1 %vm2781_vm9, %v2767_v4 }
 0x3ef   :  { %v3066_v63 = vadd.f32 %v3906_v60, %v7185_v24  ;;  %v3206_v48 = vadd.f32 %v3948_v26, %v7185_v24  ;;  %v3060_v16 = vpop.f32.mrb[9].mxu0  ;;  %v3200_v35 = vpop.f32.mrb[9].mxu1 }
 0x3f0   :  { %v3061_v9 = vadd.f32 %v7185_v24, %v3060_v16  ;;  %v3201_v30 = vadd.f32 %v7185_v24, %v3200_v35  ;;  %v2256_v46 = vpop.permute.xlu1 %2255  ;;  %v2200_v14 = vpop.permute.xlu0 %2199 }
 0x3f1   :  { %v3308_v42 = vmax.f32 %v3066_v63, 0.0  ;;  %v3336_v58 = vmax.f32 %v3206_v48, 0.0  ;;  %v2768_v32 = vsel %vm2712_vm8, %v2711_v36, %v2256_v46  ;;  %v2740_v57 = vsel %vm2712_vm8, %v2683_v10, %v2200_v14 }
 0x3f2   :  { %v3307_v49 = vmax.f32 %v3061_v9, 0.0  ;;  %v3335_v39 = vmax.f32 %v3201_v30, 0.0  ;;  %3932 = vmatmul.mubr.msk.f32.gmra.mrb[26].mxu0 %vm2781_vm9, %v2740_v57  ;;  %3974 = vmatmul.mubr.msk.f32.gmra.mrb[26].mxu1 %vm2781_vm9, %v2768_v32 }
 0x3f3   :  { %3364 = vst [vmem:[#allocation2 + $0x48] sm:$0xff] %v3308_v42  ;;  %3392 = vst [vmem:[#allocation2 + $0x128] sm:$0xff] %v3336_v58 }
 0x3f4   :  { %3363 = vst [vmem:[#allocation2 + $0x40] sm:$0xff] %v3307_v49  ;;  %3391 = vst [vmem:[#allocation2 + $0x120] sm:$0xff] %v3335_v39 }
 0x406   :  { %v3909_v0 = vpop.f32.mrb[10].mxu0  ;;  %v3951_v8 = vpop.f32.mrb[10].mxu1 }
 0x407   :  { %v3076_v19 = vadd.f32 %v3909_v0, %v7185_v24  ;;  %v3216_v31 = vadd.f32 %v3951_v8, %v7185_v24  ;;  %v3070_v29 = vpop.f32.mrb[11].mxu0  ;;  %v3210_v41 = vpop.f32.mrb[11].mxu1 }
 0x408   :  { %v3071_v50 = vadd.f32 %v7185_v24, %v3070_v29  ;;  %v3211_v3 = vadd.f32 %v7185_v24, %v3210_v41 }
 0x409   :  { %v3310_v62 = vmax.f32 %v3076_v19, 0.0  ;;  %v3338_v6 = vmax.f32 %v3216_v31, 0.0 }
 0x40a   :  { %v3309_v44 = vmax.f32 %v3071_v50, 0.0  ;;  %v3337_v40 = vmax.f32 %v3211_v3, 0.0 }
 0x40b   :  { %3366 = vst [vmem:[#allocation2 + $0x58] sm:$0xff] %v3310_v62  ;;  %3394 = vst [vmem:[#allocation2 + $0x138] sm:$0xff] %v3338_v6 }
 0x40c   :  { %3365 = vst [vmem:[#allocation2 + $0x50] sm:$0xff] %v3309_v44  ;;  %3393 = vst [vmem:[#allocation2 + $0x130] sm:$0xff] %v3337_v40 }
 0x41e   :  { %v3912_v18 = vpop.f32.mrb[12].mxu0  ;;  %v3954_v13 = vpop.f32.mrb[12].mxu1 }
 0x41f   :  { %v3086_v7 = vadd.f32 %v3912_v18, %v7185_v24  ;;  %v3226_v5 = vadd.f32 %v3954_v13, %v7185_v24  ;;  %v3080_v21 = vpop.f32.mrb[13].mxu0  ;;  %v3220_v47 = vpop.f32.mrb[13].mxu1 }
 0x420   :  { %v3081_v37 = vadd.f32 %v7185_v24, %v3080_v21  ;;  %v3221_v53 = vadd.f32 %v7185_v24, %v3220_v47 }
 0x421   :  { %v3312_v11 = vmax.f32 %v3086_v7, 0.0  ;;  %v3340_v25 = vmax.f32 %v3226_v5, 0.0 }
 0x422   :  { %v3311_v55 = vmax.f32 %v3081_v37, 0.0  ;;  %v3339_v1 = vmax.f32 %v3221_v53, 0.0 }
 0x423   :  { %3368 = vst [vmem:[#allocation2 + $0x68] sm:$0xff] %v3312_v11  ;;  %3396 = vst [vmem:[#allocation2 + $0x148] sm:$0xff] %v3340_v25 }
 0x424   :  { %3367 = vst [vmem:[#allocation2 + $0x60] sm:$0xff] %v3311_v55  ;;  %3395 = vst [vmem:[#allocation2 + $0x140] sm:$0xff] %v3339_v1 }
 0x436   :  { %v3915_v27 = vpop.f32.mrb[14].mxu0  ;;  %v3957_v59 = vpop.f32.mrb[14].mxu1 }
 0x437   :  { %v3096_v12 = vadd.f32 %v3915_v27, %v7185_v24  ;;  %v3236_v15 = vadd.f32 %v3957_v59, %v7185_v24  ;;  %v3090_v33 = vpop.f32.mrb[15].mxu0  ;;  %v3230_v56 = vpop.f32.mrb[15].mxu1 }
 0x438   :  { %v3091_v61 = vadd.f32 %v7185_v24, %v3090_v33  ;;  %v3231_v17 = vadd.f32 %v7185_v24, %v3230_v56 }
 0x439   :  { %v3314_v34 = vmax.f32 %v3096_v12, 0.0  ;;  %v3342_v52 = vmax.f32 %v3236_v15, 0.0 }
 0x43a   :  { %v3313_v22 = vmax.f32 %v3091_v61, 0.0  ;;  %v3341_v38 = vmax.f32 %v3231_v17, 0.0 }
 0x43b   :  { %3370 = vst [vmem:[#allocation2 + $0x78] sm:$0xff] %v3314_v34  ;;  %3398 = vst [vmem:[#allocation2 + $0x158] sm:$0xff] %v3342_v52 }
 0x43c   :  { %3369 = vst [vmem:[#allocation2 + $0x70] sm:$0xff] %v3313_v22  ;;  %3397 = vst [vmem:[#allocation2 + $0x150] sm:$0xff] %v3341_v38 }
 0x44e   :  { %v3918_v43 = vpop.f32.mrb[16].mxu0  ;;  %v3960_v4 = vpop.f32.mrb[16].mxu1 }
 0x44f   :  { %v3106_v23 = vadd.f32 %v3918_v43, %v7185_v24  ;;  %v3246_v28 = vadd.f32 %v3960_v4, %v7185_v24  ;;  %v3100_v45 = vpop.f32.mrb[17].mxu0  ;;  %v3240_v51 = vpop.f32.mrb[17].mxu1 }
 0x450   :  { %v3101_v54 = vadd.f32 %v7185_v24, %v3100_v45  ;;  %v3241_v60 = vadd.f32 %v7185_v24, %v3240_v51 }
 0x451   :  { %v3316_v26 = vmax.f32 %v3106_v23, 0.0  ;;  %v3344_v2 = vmax.f32 %v3246_v28, 0.0 }
 0x452   :  { %v3315_v20 = vmax.f32 %v3101_v54, 0.0  ;;  %v3343_v63 = vmax.f32 %v3241_v60, 0.0 }
 0x453   :  { %3372 = vst [vmem:[#allocation2 + $0x88] sm:$0xff] %v3316_v26  ;;  %3400 = vst [vmem:[#allocation2 + $0x168] sm:$0xff] %v3344_v2 }
 0x454   :  { %3371 = vst [vmem:[#allocation2 + $0x80] sm:$0xff] %v3315_v20  ;;  %3399 = vst [vmem:[#allocation2 + $0x160] sm:$0xff] %v3343_v63 }
 0x465   :  { %v3921_v48 = vpop.f32.mrb[18].mxu0  ;;  %v3963_v16 = vpop.f32.mrb[18].mxu1 }
 0x466   :  { %v3116_v35 = vadd.f32 %v3921_v48, %v7185_v24  ;;  %v3256_v36 = vadd.f32 %v3963_v16, %v7185_v24  ;;  %v3110_v10 = vpop.f32.mrb[19].mxu0  ;;  %v3250_v9 = vpop.f32.mrb[19].mxu1 }
 0x467   :  { %v3111_v30 = vadd.f32 %v7185_v24, %v3110_v10  ;;  %v3251_v46 = vadd.f32 %v7185_v24, %v3250_v9 }
 0x468   :  { %v3318_v14 = vmax.f32 %v3116_v35, 0.0  ;;  %v3346_v42 = vmax.f32 %v3256_v36, 0.0 }
 0x469   :  { %v3317_v58 = vmax.f32 %v3111_v30, 0.0  ;;  %v3345_v32 = vmax.f32 %v3251_v46, 0.0 }
 0x46a   :  { %3374 = vst [vmem:[#allocation2 + $0x98] sm:$0xff] %v3318_v14  ;;  %3402 = vst [vmem:[#allocation2 + $0x178] sm:$0xff] %v3346_v42 }
 0x46b   :  { %3373 = vst [vmem:[#allocation2 + $0x90] sm:$0xff] %v3317_v58  ;;  %3401 = vst [vmem:[#allocation2 + $0x170] sm:$0xff] %v3345_v32 }
 0x47d   :  { %v3924_v57 = vpop.f32.mrb[20].mxu0  ;;  %v3966_v49 = vpop.f32.mrb[20].mxu1 }
 0x47e   :  { %v3126_v39 = vadd.f32 %v3924_v57, %v7185_v24  ;;  %v3266_v0 = vadd.f32 %v3966_v49, %v7185_v24  ;;  %v3120_v8 = vpop.f32.mrb[21].mxu0  ;;  %v3260_v19 = vpop.f32.mrb[21].mxu1 }
 0x47f   :  { %v3121_v31 = vadd.f32 %v7185_v24, %v3120_v8  ;;  %v3261_v29 = vadd.f32 %v7185_v24, %v3260_v19 }
 0x480   :  { %v3320_v41 = vmax.f32 %v3126_v39, 0.0  ;;  %v3348_v50 = vmax.f32 %v3266_v0, 0.0 }
 0x481   :  { %v3319_v3 = vmax.f32 %v3121_v31, 0.0  ;;  %v3347_v62 = vmax.f32 %v3261_v29, 0.0 }
 0x482   :  { %3376 = vst [vmem:[#allocation2 + $0xa8] sm:$0xff] %v3320_v41  ;;  %3404 = vst [vmem:[#allocation2 + $0x188] sm:$0xff] %v3348_v50 }
 0x483   :  { %3375 = vst [vmem:[#allocation2 + $0xa0] sm:$0xff] %v3319_v3  ;;  %3403 = vst [vmem:[#allocation2 + $0x180] sm:$0xff] %v3347_v62 }
 0x495   :  { %v3927_v6 = vpop.f32.mrb[22].mxu0  ;;  %v3969_v44 = vpop.f32.mrb[22].mxu1 }
 0x496   :  { %v3136_v40 = vadd.f32 %v3927_v6, %v7185_v24  ;;  %v3276_v18 = vadd.f32 %v3969_v44, %v7185_v24  ;;  %v3130_v13 = vpop.f32.mrb[23].mxu0  ;;  %v3270_v7 = vpop.f32.mrb[23].mxu1 }
 0x497   :  { %v3131_v5 = vadd.f32 %v7185_v24, %v3130_v13  ;;  %v3271_v21 = vadd.f32 %v7185_v24, %v3270_v7 }
 0x498   :  { %v3322_v47 = vmax.f32 %v3136_v40, 0.0  ;;  %v3350_v37 = vmax.f32 %v3276_v18, 0.0 }
 0x499   :  { %v3321_v53 = vmax.f32 %v3131_v5, 0.0  ;;  %v3349_v11 = vmax.f32 %v3271_v21, 0.0 }
 0x49a   :  { %3378 = vst [vmem:[#allocation2 + $0xb8] sm:$0xff] %v3322_v47  ;;  %3406 = vst [vmem:[#allocation2 + $0x198] sm:$0xff] %v3350_v37 }
 0x49b   :  { %3377 = vst [vmem:[#allocation2 + $0xb0] sm:$0xff] %v3321_v53  ;;  %3405 = vst [vmem:[#allocation2 + $0x190] sm:$0xff] %v3349_v11 }
 0x4ad   :  { %v3930_v25 = vpop.f32.mrb[24].mxu0  ;;  %v3972_v55 = vpop.f32.mrb[24].mxu1 }
 0x4ae   :  { %v3146_v1 = vadd.f32 %v3930_v25, %v7185_v24  ;;  %v3286_v27 = vadd.f32 %v3972_v55, %v7185_v24  ;;  %v3140_v59 = vpop.f32.mrb[25].mxu0  ;;  %v3280_v12 = vpop.f32.mrb[25].mxu1 }
 0x4af   :  { %v3141_v15 = vadd.f32 %v7185_v24, %v3140_v59  ;;  %v3281_v33 = vadd.f32 %v7185_v24, %v3280_v12 }
 0x4b0   :  { %v3324_v56 = vmax.f32 %v3146_v1, 0.0  ;;  %v3352_v61 = vmax.f32 %v3286_v27, 0.0 }
 0x4b1   :  { %v3323_v17 = vmax.f32 %v3141_v15, 0.0  ;;  %v3351_v34 = vmax.f32 %v3281_v33, 0.0 }
 0x4b2   :  { %3380 = vst [vmem:[#allocation2 + $0xc8] sm:$0xff] %v3324_v56  ;;  %3408 = vst [vmem:[#allocation2 + $0x1a8] sm:$0xff] %v3352_v61 }
 0x4b3   :  { %3379 = vst [vmem:[#allocation2 + $0xc0] sm:$0xff] %v3323_v17  ;;  %3407 = vst [vmem:[#allocation2 + $0x1a0] sm:$0xff] %v3351_v34 }
 0x4c5   :  { %v3933_v52 = vpop.f32.mrb[26].mxu0  ;;  %v3975_v22 = vpop.f32.mrb[26].mxu1 }
 0x4c6   :  { %v3156_v38 = vadd.f32 %v3933_v52, %v7185_v24  ;;  %v3296_v43 = vadd.f32 %v3975_v22, %v7185_v24  ;;  %v3150_v4 = vpop.f32.mrb[27].mxu0  ;;  %v3290_v23 = vpop.f32.mrb[27].mxu1 }
 0x4c7   :  { %v3151_v28 = vadd.f32 %v7185_v24, %v3150_v4  ;;  %v3291_v45 = vadd.f32 %v7185_v24, %v3290_v23 }
 0x4c8   :  { %v3326_v51 = vmax.f32 %v3156_v38, 0.0  ;;  %v3354_v54 = vmax.f32 %v3296_v43, 0.0 }
 0x4c9   :  { %v3325_v60 = vmax.f32 %v3151_v28, 0.0  ;;  %v3353_v26 = vmax.f32 %v3291_v45, 0.0 }
 0x4ca   :  { %3382 = vst [vmem:[#allocation2 + $0xd8] sm:$0xff] %v3326_v51  ;;  %3410 = vst [vmem:[#allocation2 + $0x1b8] sm:$0xff] %v3354_v54 }
 0x4cb   :  { %3381 = vst [vmem:[#allocation2 + $0xd0] sm:$0xff] %v3325_v60  ;;  %3409 = vst [vmem:[#allocation2 + $0x1b0] sm:$0xff] %v3353_v26 }
 0x4cc   :  { %4063 = shalt.err (!%p4060_p4)
}
 0x4cd   :  { %s4064_s23 = scalar_lea.hbm %s7551_s3, 7168 }
 0x4ce   :  { %p4065_p5 = scmp.ne.s32.totalorder %s7551_s3, %s4064_s23  ;;  %p4068_p6 = scmp.lt.u32.totalorder %s4064_s23, %s7551_s3 }
 0x4d0   :  { %p4070_p7 = pnand %p4068_p6, %p4065_p5 }
 0x4d2   :  { %4073 = shalt.err (!%p4070_p7)
}
 0x4d3   :  { %s4085_s16 = smov 128  }
 0x4d4   :  { %3422 = dma.vmem_to_hbm [thread:$0]  %s3417_s21, 7168, %s7551_s3, [#allocation3], %s4085_s16, %s4085_s16, %s4077_s25  }
 0x4d5   :  { %4074 = dma.done.wait [#allocation3], 7168  }
 0x4d6   :  { %4075 = vsyncadd [#allocation3], 4294960128 }
 0x4d7   :  { %3426 = vsyncpa [#allocation3], 1 }

// kernel: tpu_custom_call.1
= control target key start
LH: loop header
LB: loop body
LE: loop exit
PB: predicated region body
PF: predicated region fallthrough
CT: control target
= control target key end

     0   :  { %s4076_s16 = smov 4   ;;  %s7548_s0 = inlined_call_operand.vmem [shape: f32[2,16,18,4], index: 0, kind: input, shape index: {}]   ;;  %s7549_s1 = inlined_call_operand.vmem [shape: f32[36,128], index: 1, kind: input, shape index: {}]   ;;  %s7550_s2 = inlined_call_operand.vmem [shape: f32[1,128], index: 2, kind: input, shape index: {}]   ;;  %s7551_s3 = inlined_call_operand.hbm [shape: f32[2,14,16,128], index: 3, kind: output, shape index: {}]  }
   0x1   :  { %v73_v0 = vld [vmem:[%s7548_s0 + $0x19] sm:$0xff]  ;;  %v71_v1 = vld [vmem:[%s7548_s0 + $0x1] sm:$0xff]  ;;  %v72_v3 = vld [vmem:[%s7548_s0 + $0x9] sm:$0xff] }
   0x2   :  { %581 = vrot.lane.b32.xlu1 %v73_v0, %s4076_s16  ;;  %577 = vrot.lane.b32.xlu0 %v71_v1, %s4076_s16  ;;  %v74_v2 = vld [vmem:[%s7548_s0 + $0x21] sm:$0xff]  ;;  %v76_v4 = vld [vmem:[%s7548_s0 + $0x39] sm:$0xff] }
   0x3   :  { %v75_v5 = vld [vmem:[%s7548_s0 + $0x31] sm:$0xff]  ;;  %v77_v7 = vld [vmem:[%s7548_s0 + $0x49] sm:$0xff]  ;;  %v79_v9 = vld [vmem:[%s7548_s0 + $0x61] sm:$0xff] }
   0x4   :  { %v78_v6 = vld [vmem:[%s7548_s0 + $0x51] sm:$0xff]  ;;  %v80_v8 = vld [vmem:[%s7548_s0 + $0x69] sm:$0xff]  ;;  %v82_v10 = vld [vmem:[%s7548_s0 + $0x81] sm:$0xff] }
   0x5   :  { %v81_v11 = vld [vmem:[%s7548_s0 + $0x79] sm:$0xff]  ;;  %v83_v13 = vld [vmem:[%s7548_s0 + $0x91] sm:$0xff]  ;;  %v85_v15 = vld [vmem:[%s7548_s0 + $0xa9] sm:$0xff] }
   0x6   :  { %583 = vrot.lane.b32.xlu1 %v74_v2, %s4076_s16  ;;  %579 = vrot.lane.b32.xlu0 %v72_v3, %s4076_s16  ;;  %v84_v12 = vld [vmem:[%s7548_s0 + $0x99] sm:$0xff]  ;;  %v86_v14 = vld [vmem:[%s7548_s0 + $0xb1] sm:$0xff] }
   0x7   :  { %v88_v16 = vld [vmem:[%s7548_s0 + $0xc9] sm:$0xff]  ;;  %v87_v17 = vld [vmem:[%s7548_s0 + $0xc1] sm:$0xff]  ;;  %v89_v19 = vld [vmem:[%s7548_s0 + $0xd9] sm:$0xff] }
   0x8   :  { %v90_v18 = vld [vmem:[%s7548_s0 + $0xe1] sm:$0xff]  ;;  %v92_v20 = vld [vmem:[%s7548_s0 + $0xf9] sm:$0xff]  ;;  %v91_v21 = vld [vmem:[%s7548_s0 + $0xf1] sm:$0xff] }
   0xa   :  { %587 = vrot.lane.b32.xlu1 %v76_v4, %s4076_s16  ;;  %585 = vrot.lane.b32.xlu0 %v75_v5, %s4076_s16 }
   0xe   :  { %591 = vrot.lane.b32.xlu1 %v78_v6, %s4076_s16  ;;  %589 = vrot.lane.b32.xlu0 %v77_v7, %s4076_s16 }
  0x12   :  { %595 = vrot.lane.b32.xlu1 %v80_v8, %s4076_s16  ;;  %593 = vrot.lane.b32.xlu0 %v79_v9, %s4076_s16 }
  0x16   :  { %599 = vrot.lane.b32.xlu1 %v82_v10, %s4076_s16  ;;  %597 = vrot.lane.b32.xlu0 %v81_v11, %s4076_s16 }
  0x1a   :  { %603 = vrot.lane.b32.xlu1 %v84_v12, %s4076_s16  ;;  %601 = vrot.lane.b32.xlu0 %v83_v13, %s4076_s16 }
  0x1e   :  { %607 = vrot.lane.b32.xlu1 %v86_v14, %s4076_s16  ;;  %605 = vrot.lane.b32.xlu0 %v85_v15, %s4076_s16 }
  0x22   :  { %611 = vrot.lane.b32.xlu1 %v88_v16, %s4076_s16  ;;  %609 = vrot.lane.b32.xlu0 %v87_v17, %s4076_s16 }
  0x26   :  { %615 = vrot.lane.b32.xlu1 %v90_v18, %s4076_s16  ;;  %613 = vrot.lane.b32.xlu0 %v89_v19, %s4076_s16 }
  0x2a   :  { %619 = vrot.lane.b32.xlu1 %v92_v20, %s4076_s16  ;;  %617 = vrot.lane.b32.xlu0 %v91_v21, %s4076_s16 }
  0x2b   :  { %8 = vsyncpa [#allocation3], 0  ;;  %v94_v22 = vld [vmem:[%s7548_s0 + $0x111] sm:$0xff]  ;;  %v93_v23 = vld [vmem:[%s7548_s0 + $0x109] sm:$0xff]  ;;  %s4077_s25 = smov 8   ;;  %s4078_s6 = smov 12  }
  0x2c   :  { %v96_v24 = vld [vmem:[%s7548_s0 + $0x129] sm:$0xff]  ;;  %v95_v25 = vld [vmem:[%s7548_s0 + $0x121] sm:$0xff]  ;;  %v97_v27 = vld [vmem:[%s7548_s0 + $0x139] sm:$0xff]  ;;  %s4079_s20 = smov 16   ;;  %s4080_s5 = smov 20   ;;  %vm2950_vm0 = vcmask 1043456  }
  0x2d   :  { %v98_v26 = vld [vmem:[%s7548_s0 + $0x141] sm:$0xff]  ;;  %v100_v28 = vld [vmem:[%s7548_s0 + $0x189] sm:$0xff]  ;;  %v101_v31 = vld [vmem:[%s7548_s0 + $0x199] sm:$0xff]  ;;  %s4081_s24 = smov 24   ;;  %s4082_s8 = smov 28   ;;  %vm2313_vm1 = vcmask 31744  }
  0x2e   :  { %623 = vrot.lane.b32.xlu1 %v94_v22, %s4076_s16  ;;  %621 = vrot.lane.b32.xlu0 %v93_v23, %s4076_s16  ;;  %v99_v29 = vld [vmem:[%s7548_s0 + $0x181] sm:$0xff]  ;;  %v104_v32 = vld [vmem:[%s7548_s0 + $0x1b9] sm:$0xff]  ;;  %vm2370_vm2 = vcmask 64512   ;;  %vm2427_vm3 = vcmask 97280   ;;  %vm2484_vm4 = vcmask 130048   ;;  %vm2541_vm5 = vcmask 162816  }
  0x2f   :  { %v102_v30 = vld [vmem:[%s7548_s0 + $0x1a1] sm:$0xff]  ;;  %v103_v33 = vld [vmem:[%s7548_s0 + $0x1b1] sm:$0xff]  ;;  %v105_v35 = vld [vmem:[%s7548_s0 + $0x1c9] sm:$0xff]  ;;  %vm2598_vm6 = vcmask 195584   ;;  %vm2655_vm7 = vcmask 228352   ;;  %vm2712_vm8 = vcmask 261120  }
  0x30   :  { %v106_v34 = vld [vmem:[%s7548_s0 + $0x1d1] sm:$0xff]  ;;  %v108_v36 = vld [vmem:[%s7548_s0 + $0x1e9] sm:$0xff]  ;;  %v107_v37 = vld [vmem:[%s7548_s0 + $0x1e1] sm:$0xff]  ;;  %vm2781_vm9 = vcmask 293888  }
  0x31   :  { %v110_v38 = vld [vmem:[%s7548_s0 + $0x201] sm:$0xff]  ;;  %v109_v39 = vld [vmem:[%s7548_s0 + $0x1f9] sm:$0xff]  ;;  %v111_v41 = vld [vmem:[%s7548_s0 + $0x211] sm:$0xff] }
  0x32   :  { %627 = vrot.lane.b32.xlu1 %v96_v24, %s4076_s16  ;;  %625 = vrot.lane.b32.xlu0 %v95_v25, %s4076_s16  ;;  %v112_v40 = vld [vmem:[%s7548_s0 + $0x219] sm:$0xff]  ;;  %v114_v42 = vld [vmem:[%s7548_s0 + $0x231] sm:$0xff] }
  0x33   :  { %v113_v43 = vld [vmem:[%s7548_s0 + $0x229] sm:$0xff]  ;;  %v115_v45 = vld [vmem:[%s7548_s0 + $0x241] sm:$0xff]  ;;  %v117_v47 = vld [vmem:[%s7548_s0 + $0x259] sm:$0xff] }
  0x34   :  { %v116_v44 = vld [vmem:[%s7548_s0 + $0x249] sm:$0xff]  ;;  %v118_v46 = vld [vmem:[%s7548_s0 + $0x261] sm:$0xff]  ;;  %v120_v48 = vld [vmem:[%s7548_s0 + $0x279] sm:$0xff] }
  0x35   :  { %v119_v49 = vld [vmem:[%s7548_s0 + $0x271] sm:$0xff]  ;;  %v121_v51 = vld [vmem:[%s7548_s0 + $0x289] sm:$0xff]  ;;  %v123_v53 = vld [vmem:[%s7548_s0 + $0x2a1] sm:$0xff] }
  0x36   :  { %631 = vrot.lane.b32.xlu1 %v98_v26, %s4076_s16  ;;  %629 = vrot.lane.b32.xlu0 %v97_v27, %s4076_s16  ;;  %v122_v50 = vld [vmem:[%s7548_s0 + $0x291] sm:$0xff]  ;;  %v124_v52 = vld [vmem:[%s7548_s0 + $0x2a9] sm:$0xff] }
  0x37   :  { %v126_v54 = vld [vmem:[%s7548_s0 + $0x2c1] sm:$0xff]  ;;  %v125_v55 = vld [vmem:[%s7548_s0 + $0x2b9] sm:$0xff]  ;;  %v128_v56 = vld [vmem:[%s7548_s0 + $0xa] sm:$0xff] }
  0x38   :  { %v127_v57 = vld [vmem:[%s7548_s0 + $0x2] sm:$0xff]  ;;  %v129_v59 = vld [vmem:[%s7548_s0 + $0x1a] sm:$0xff]  ;;  %v131_v63 = vld [vmem:[%s7548_s0 + $0x32] sm:$0xff] }
  0x39   :  { %v130_v58 = vld [vmem:[%s7548_s0 + $0x22] sm:$0xff]  ;;  %v132_v62 = vld [vmem:[%s7548_s0 + $0x3a] sm:$0xff]  ;;  %v134_v2 = vld [vmem:[%s7548_s0 + $0x52] sm:$0xff] }
  0x3a   :  { %635 = vrot.lane.b32.xlu1 %v100_v28, %s4076_s16  ;;  %633 = vrot.lane.b32.xlu0 %v99_v29, %s4076_s16  ;;  %v133_v3 = vld [vmem:[%s7548_s0 + $0x4a] sm:$0xff]  ;;  %v135_v7 = vld [vmem:[%s7548_s0 + $0x62] sm:$0xff] }
  0x3b   :  { %v136_v6 = vld [vmem:[%s7548_s0 + $0x6a] sm:$0xff]  ;;  %v138_v10 = vld [vmem:[%s7548_s0 + $0x82] sm:$0xff]  ;;  %v137_v11 = vld [vmem:[%s7548_s0 + $0x7a] sm:$0xff] }
  0x3c   :  { %v140_v14 = vld [vmem:[%s7548_s0 + $0x9a] sm:$0xff]  ;;  %v139_v15 = vld [vmem:[%s7548_s0 + $0x92] sm:$0xff]  ;;  %v141_v19 = vld [vmem:[%s7548_s0 + $0xaa] sm:$0xff] }
  0x3d   :  { %v142_v18 = vld [vmem:[%s7548_s0 + $0xb2] sm:$0xff]  ;;  %v144_v22 = vld [vmem:[%s7548_s0 + $0xca] sm:$0xff]  ;;  %v143_v23 = vld [vmem:[%s7548_s0 + $0xc2] sm:$0xff] }
  0x3e   :  { %639 = vrot.lane.b32.xlu1 %v102_v30, %s4076_s16  ;;  %637 = vrot.lane.b32.xlu0 %v101_v31, %s4076_s16  ;;  %v146_v26 = vld [vmem:[%s7548_s0 + $0xe2] sm:$0xff]  ;;  %v145_v27 = vld [vmem:[%s7548_s0 + $0xda] sm:$0xff] }
  0x3f   :  { %v148_v30 = vld [vmem:[%s7548_s0 + $0xfa] sm:$0xff]  ;;  %v147_v31 = vld [vmem:[%s7548_s0 + $0xf2] sm:$0xff] }
  0x42   :  { %643 = vrot.lane.b32.xlu1 %v104_v32, %s4076_s16  ;;  %641 = vrot.lane.b32.xlu0 %v103_v33, %s4076_s16 }
  0x46   :  { %647 = vrot.lane.b32.xlu1 %v106_v34, %s4076_s16  ;;  %645 = vrot.lane.b32.xlu0 %v105_v35, %s4076_s16  ;;  %v150_v34 = vld [vmem:[%s7548_s0 + $0x112] sm:$0xff]  ;;  %v149_v35 = vld [vmem:[%s7548_s0 + $0x10a] sm:$0xff] }
  0x4a   :  { %651 = vrot.lane.b32.xlu1 %v108_v36, %s4076_s16  ;;  %649 = vrot.lane.b32.xlu0 %v107_v37, %s4076_s16 }
  0x4e   :  { %655 = vrot.lane.b32.xlu1 %v110_v38, %s4076_s16  ;;  %653 = vrot.lane.b32.xlu0 %v109_v39, %s4076_s16  ;;  %v152_v38 = vld [vmem:[%s7548_s0 + $0x12a] sm:$0xff]  ;;  %v151_v39 = vld [vmem:[%s7548_s0 + $0x122] sm:$0xff] }
  0x52   :  { %659 = vrot.lane.b32.xlu1 %v112_v40, %s4076_s16  ;;  %657 = vrot.lane.b32.xlu0 %v111_v41, %s4076_s16 }
  0x56   :  { %663 = vrot.lane.b32.xlu1 %v114_v42, %s4076_s16  ;;  %661 = vrot.lane.b32.xlu0 %v113_v43, %s4076_s16  ;;  %v154_v42 = vld [vmem:[%s7548_s0 + $0x142] sm:$0xff]  ;;  %v153_v43 = vld [vmem:[%s7548_s0 + $0x13a] sm:$0xff] }
  0x5a   :  { %667 = vrot.lane.b32.xlu1 %v116_v44, %s4076_s16  ;;  %665 = vrot.lane.b32.xlu0 %v115_v45, %s4076_s16 }
  0x5e   :  { %671 = vrot.lane.b32.xlu1 %v118_v46, %s4076_s16  ;;  %669 = vrot.lane.b32.xlu0 %v117_v47, %s4076_s16  ;;  %v156_v46 = vld [vmem:[%s7548_s0 + $0x18a] sm:$0xff]  ;;  %v155_v47 = vld [vmem:[%s7548_s0 + $0x182] sm:$0xff] }
  0x62   :  { %675 = vrot.lane.b32.xlu1 %v120_v48, %s4076_s16  ;;  %673 = vrot.lane.b32.xlu0 %v119_v49, %s4076_s16 }
  0x66   :  { %679 = vrot.lane.b32.xlu1 %v122_v50, %s4076_s16  ;;  %677 = vrot.lane.b32.xlu0 %v121_v51, %s4076_s16  ;;  %v158_v50 = vld [vmem:[%s7548_s0 + $0x1a2] sm:$0xff]  ;;  %v157_v51 = vld [vmem:[%s7548_s0 + $0x19a] sm:$0xff] }
  0x6a   :  { %683 = vrot.lane.b32.xlu1 %v124_v52, %s4076_s16  ;;  %681 = vrot.lane.b32.xlu0 %v123_v53, %s4076_s16 }
  0x6e   :  { %687 = vrot.lane.b32.xlu1 %v126_v54, %s4076_s16  ;;  %685 = vrot.lane.b32.xlu0 %v125_v55, %s4076_s16  ;;  %v160_v54 = vld [vmem:[%s7548_s0 + $0x1ba] sm:$0xff]  ;;  %v159_v55 = vld [vmem:[%s7548_s0 + $0x1b2] sm:$0xff] }
  0x72   :  { %803 = vrot.lane.b32.xlu1 %v128_v56, %s4077_s25  ;;  %801 = vrot.lane.b32.xlu0 %v127_v57, %s4077_s25 }
  0x74   :  { %v4344_v60 = vpop.permute.xlu1 %581  ;;  %v4346_v61 = vpop.permute.xlu0 %577 }
  0x76   :  { %807 = vrot.lane.b32.xlu1 %v130_v58, %s4077_s25  ;;  %805 = vrot.lane.b32.xlu0 %v129_v59, %s4077_s25  ;;  %v162_v58 = vld [vmem:[%s7548_s0 + $0x1d2] sm:$0xff]  ;;  %v161_v59 = vld [vmem:[%s7548_s0 + $0x1ca] sm:$0xff] }
  0x78   :  { %v4356_v0 = vpop.permute.xlu1 %583  ;;  %v4358_v1 = vpop.permute.xlu0 %579 }
  0x79   :  { %7558 = vst [vmem:[#allocation5_spill] sm:$0xff] %v4356_v0 }
  0x7a   :  { %811 = vrot.lane.b32.xlu1 %v132_v62, %s4077_s25  ;;  %809 = vrot.lane.b32.xlu0 %v131_v63, %s4077_s25 }
  0x7c   :  { %v4368_v4 = vpop.permute.xlu1 %587  ;;  %v4370_v5 = vpop.permute.xlu0 %585 }
  0x7d   :  { %7559 = vst [vmem:[#allocation6_spill] sm:$0xff] %v4368_v4  ;;  %7560 = vst [vmem:[#allocation7_spill] sm:$0xff] %v4370_v5 }
  0x7e   :  { %815 = vrot.lane.b32.xlu1 %v134_v2, %s4077_s25  ;;  %813 = vrot.lane.b32.xlu0 %v133_v3, %s4077_s25  ;;  %v164_v2 = vld [vmem:[%s7548_s0 + $0x1ea] sm:$0xff]  ;;  %v163_v3 = vld [vmem:[%s7548_s0 + $0x1e2] sm:$0xff] }
  0x80   :  { %v4380_v8 = vpop.permute.xlu1 %591  ;;  %v4382_v9 = vpop.permute.xlu0 %589 }
  0x81   :  { %7561 = vst [vmem:[#allocation8_spill] sm:$0xff] %v4380_v8  ;;  %7562 = vst [vmem:[#allocation9_spill] sm:$0xff] %v4382_v9  ;;  %v5424_v8 = vld [vmem:[%s7548_s0 + $0x6a] sm:$0xff] }
  0x82   :  { %819 = vrot.lane.b32.xlu1 %v136_v6, %s4077_s25  ;;  %817 = vrot.lane.b32.xlu0 %v135_v7, %s4077_s25 }
  0x84   :  { %v4392_v12 = vpop.permute.xlu1 %595  ;;  %v4394_v13 = vpop.permute.xlu0 %593 }
  0x85   :  { %7563 = vst [vmem:[#allocation10_spill] sm:$0xff] %v4392_v12  ;;  %7564 = vst [vmem:[#allocation11_spill] sm:$0xff] %v4394_v13 }
  0x86   :  { %823 = vrot.lane.b32.xlu1 %v138_v10, %s4077_s25  ;;  %821 = vrot.lane.b32.xlu0 %v137_v11, %s4077_s25  ;;  %v166_v10 = vld [vmem:[%s7548_s0 + $0x202] sm:$0xff]  ;;  %v165_v11 = vld [vmem:[%s7548_s0 + $0x1fa] sm:$0xff] }
  0x88   :  { %v4404_v16 = vpop.permute.xlu1 %599  ;;  %v4406_v17 = vpop.permute.xlu0 %597 }
  0x89   :  { %7565 = vst [vmem:[#allocation12_spill] sm:$0xff] %v4404_v16  ;;  %7566 = vst [vmem:[#allocation13_spill] sm:$0xff] %v4406_v17  ;;  %v5234_v17 = vld [vmem:[%s7548_s0 + $0x1e1] sm:$0xff] }
  0x8a   :  { %827 = vrot.lane.b32.xlu1 %v140_v14, %s4077_s25  ;;  %825 = vrot.lane.b32.xlu0 %v139_v15, %s4077_s25 }
  0x8c   :  { %v4416_v20 = vpop.permute.xlu1 %603  ;;  %v4418_v21 = vpop.permute.xlu0 %601 }
  0x8d   :  { %7567 = vst [vmem:[#allocation14_spill] sm:$0xff] %v4416_v20  ;;  %7568 = vst [vmem:[#allocation15_spill] sm:$0xff] %v4418_v21 }
  0x8e   :  { %831 = vrot.lane.b32.xlu1 %v142_v18, %s4077_s25  ;;  %829 = vrot.lane.b32.xlu0 %v141_v19, %s4077_s25  ;;  %v168_v18 = vld [vmem:[%s7548_s0 + $0x21a] sm:$0xff]  ;;  %v167_v19 = vld [vmem:[%s7548_s0 + $0x212] sm:$0xff] }
  0x90   :  { %v4428_v24 = vpop.permute.xlu1 %607  ;;  %v4430_v25 = vpop.permute.xlu0 %605 }
  0x91   :  { %7569 = vst [vmem:[#allocation16_spill] sm:$0xff] %v4428_v24  ;;  %7570 = vst [vmem:[#allocation17_spill] sm:$0xff] %v4430_v25 }
  0x92   :  { %835 = vrot.lane.b32.xlu1 %v144_v22, %s4077_s25  ;;  %833 = vrot.lane.b32.xlu0 %v143_v23, %s4077_s25 }
  0x94   :  { %v4440_v28 = vpop.permute.xlu1 %611  ;;  %v4442_v29 = vpop.permute.xlu0 %609 }
  0x95   :  { %7571 = vst [vmem:[#allocation18_spill] sm:$0xff] %v4440_v28  ;;  %7572 = vst [vmem:[#allocation19_spill] sm:$0xff] %v4442_v29  ;;  %v57_v29 = vld [vmem:[%s7548_s0 + $0x228] sm:$0xff] }
  0x96   :  { %839 = vrot.lane.b32.xlu1 %v146_v26, %s4077_s25  ;;  %837 = vrot.lane.b32.xlu0 %v145_v27, %s4077_s25  ;;  %v170_v26 = vld [vmem:[%s7548_s0 + $0x232] sm:$0xff]  ;;  %v169_v27 = vld [vmem:[%s7548_s0 + $0x22a] sm:$0xff] }
  0x98   :  { %v4452_v32 = vpop.permute.xlu1 %615  ;;  %v4454_v33 = vpop.permute.xlu0 %613 }
  0x99   :  { %7573 = vst [vmem:[#allocation20_spill] sm:$0xff] %v4452_v32  ;;  %7574 = vst [vmem:[#allocation21_spill] sm:$0xff] %v4454_v33  ;;  %v51_v33 = vld [vmem:[%s7548_s0 + $0x1e0] sm:$0xff] }
  0x9a   :  { %843 = vrot.lane.b32.xlu1 %v148_v30, %s4077_s25  ;;  %841 = vrot.lane.b32.xlu0 %v147_v31, %s4077_s25 }
  0x9c   :  { %v4464_v36 = vpop.permute.xlu1 %619  ;;  %v4466_v37 = vpop.permute.xlu0 %617 }
  0x9d   :  { %7575 = vst [vmem:[#allocation22_spill] sm:$0xff] %v4464_v36  ;;  %7576 = vst [vmem:[#allocation23_spill] sm:$0xff] %v4466_v37  ;;  %v35_v36 = vld [vmem:[%s7548_s0 + $0xf0] sm:$0xff]  ;;  %v37_v37 = vld [vmem:[%s7548_s0 + $0x108] sm:$0xff] }
  0x9e   :  { %847 = vrot.lane.b32.xlu1 %v150_v34, %s4077_s25  ;;  %845 = vrot.lane.b32.xlu0 %v149_v35, %s4077_s25  ;;  %v172_v34 = vld [vmem:[%s7548_s0 + $0x24a] sm:$0xff]  ;;  %v171_v35 = vld [vmem:[%s7548_s0 + $0x242] sm:$0xff] }
  0xa0   :  { %v4476_v40 = vpop.permute.xlu1 %623  ;;  %v4478_v41 = vpop.permute.xlu0 %621 }
  0xa1   :  { %7577 = vst [vmem:[#allocation24_spill] sm:$0xff] %v4476_v40  ;;  %7578 = vst [vmem:[#allocation25_spill] sm:$0xff] %v4478_v41  ;;  %v31_v40 = vld [vmem:[%s7548_s0 + $0xc0] sm:$0xff]  ;;  %v33_v41 = vld [vmem:[%s7548_s0 + $0xd8] sm:$0xff] }
  0xa2   :  { %851 = vrot.lane.b32.xlu1 %v152_v38, %s4077_s25  ;;  %849 = vrot.lane.b32.xlu0 %v151_v39, %s4077_s25 }
  0xa4   :  { %v4488_v44 = vpop.permute.xlu1 %627  ;;  %v4490_v45 = vpop.permute.xlu0 %625 }
  0xa5   :  { %7579 = vst [vmem:[#allocation26_spill] sm:$0xff] %v4488_v44  ;;  %7580 = vst [vmem:[#allocation27_spill] sm:$0xff] %v4490_v45  ;;  %v27_v44 = vld [vmem:[%s7548_s0 + $0x90] sm:$0xff]  ;;  %v29_v45 = vld [vmem:[%s7548_s0 + $0xa8] sm:$0xff] }
  0xa6   :  { %855 = vrot.lane.b32.xlu1 %v154_v42, %s4077_s25  ;;  %853 = vrot.lane.b32.xlu0 %v153_v43, %s4077_s25  ;;  %v174_v42 = vld [vmem:[%s7548_s0 + $0x262] sm:$0xff]  ;;  %v173_v43 = vld [vmem:[%s7548_s0 + $0x25a] sm:$0xff] }
  0xa8   :  { %v4500_v48 = vpop.permute.xlu1 %631  ;;  %v4502_v49 = vpop.permute.xlu0 %629 }
  0xa9   :  { %7581 = vst [vmem:[#allocation28_spill] sm:$0xff] %v4500_v48  ;;  %7582 = vst [vmem:[#allocation29_spill] sm:$0xff] %v4502_v49  ;;  %v23_v48 = vld [vmem:[%s7548_s0 + $0x60] sm:$0xff]  ;;  %v25_v49 = vld [vmem:[%s7548_s0 + $0x78] sm:$0xff] }
  0xaa   :  { %859 = vrot.lane.b32.xlu1 %v156_v46, %s4077_s25  ;;  %857 = vrot.lane.b32.xlu0 %v155_v47, %s4077_s25 }
  0xac   :  { %v4512_v52 = vpop.permute.xlu1 %635  ;;  %v4514_v53 = vpop.permute.xlu0 %633 }
  0xae   :  { %863 = vrot.lane.b32.xlu1 %v158_v50, %s4077_s25  ;;  %861 = vrot.lane.b32.xlu0 %v157_v51, %s4077_s25  ;;  %v176_v50 = vld [vmem:[%s7548_s0 + $0x27a] sm:$0xff]  ;;  %v175_v51 = vld [vmem:[%s7548_s0 + $0x272] sm:$0xff] }
  0xb0   :  { %v4524_v56 = vpop.permute.xlu1 %639  ;;  %v4526_v57 = vpop.permute.xlu0 %637 }
  0xb1   :  { %7583 = vst [vmem:[#allocation30_spill] sm:$0xff] %v4524_v56  ;;  %7584 = vst [vmem:[#allocation31_spill] sm:$0xff] %v4526_v57  ;;  %v5687_v56 = vld [vmem:[%s7548_s0 + $0x22a] sm:$0xff] }
  0xb2   :  { %867 = vrot.lane.b32.xlu1 %v160_v54, %s4077_s25  ;;  %865 = vrot.lane.b32.xlu0 %v159_v55, %s4077_s25 }
  0xb4   :  { %v4536_v62 = vpop.permute.xlu1 %643  ;;  %v4538_v63 = vpop.permute.xlu0 %641 }
  0xb5   :  { %7585 = vst [vmem:[#allocation32_spill] sm:$0xff] %v4536_v62  ;;  %7586 = vst [vmem:[#allocation33_spill] sm:$0xff] %v4538_v63  ;;  %v5633_v63 = vld [vmem:[%s7548_s0 + $0x1e2] sm:$0xff] }
  0xb6   :  { %871 = vrot.lane.b32.xlu1 %v162_v58, %s4077_s25  ;;  %869 = vrot.lane.b32.xlu0 %v161_v59, %s4077_s25  ;;  %v178_v58 = vld [vmem:[%s7548_s0 + $0x292] sm:$0xff]  ;;  %v177_v59 = vld [vmem:[%s7548_s0 + $0x28a] sm:$0xff] }
  0xb8   :  { %v4548_v6 = vpop.permute.xlu1 %647  ;;  %v4550_v7 = vpop.permute.xlu0 %645 }
  0xb9   :  { %7587 = vst [vmem:[#allocation34_spill] sm:$0xff] %v4548_v6  ;;  %7588 = vst [vmem:[#allocation35_spill] sm:$0xff] %v4550_v7  ;;  %v5447_v7 = vld [vmem:[%s7548_s0 + $0x7a] sm:$0xff] }
  0xba   :  { %875 = vrot.lane.b32.xlu1 %v164_v2, %s4077_s25  ;;  %873 = vrot.lane.b32.xlu0 %v163_v3, %s4077_s25 }
  0xbc   :  { %v4560_v14 = vpop.permute.xlu1 %651  ;;  %v4562_v15 = vpop.permute.xlu0 %649 }
  0xbd   :  { %7589 = vst [vmem:[#allocation36_spill] sm:$0xff] %v4560_v14  ;;  %7590 = vst [vmem:[#allocation37_spill] sm:$0xff] %v4562_v15  ;;  %v5252_v14 = vld [vmem:[%s7548_s0 + $0x1f9] sm:$0xff] }
  0xbe   :  { %879 = vrot.lane.b32.xlu1 %v166_v10, %s4077_s25  ;;  %877 = vrot.lane.b32.xlu0 %v165_v11, %s4077_s25  ;;  %v180_v10 = vld [vmem:[%s7548_s0 + $0x2aa] sm:$0xff]  ;;  %v179_v11 = vld [vmem:[%s7548_s0 + $0x2a2] sm:$0xff] }
  0xc0   :  { %v4572_v22 = vpop.permute.xlu1 %655  ;;  %v4574_v23 = vpop.permute.xlu0 %653 }
  0xc1   :  { %7591 = vst [vmem:[#allocation38_spill] sm:$0xff] %v4572_v22  ;;  %7592 = vst [vmem:[#allocation39_spill] sm:$0xff] %v4574_v23  ;;  %v5229_v23 = vld [vmem:[%s7548_s0 + $0x1e9] sm:$0xff] }
  0xc2   :  { %883 = vrot.lane.b32.xlu1 %v168_v18, %s4077_s25  ;;  %881 = vrot.lane.b32.xlu0 %v167_v19, %s4077_s25 }
  0xc4   :  { %v4584_v30 = vpop.permute.xlu1 %659  ;;  %v4586_v31 = vpop.permute.xlu0 %657 }
  0xc5   :  { %7593 = vst [vmem:[#allocation40_spill] sm:$0xff] %v4584_v30  ;;  %7594 = vst [vmem:[#allocation41_spill] sm:$0xff] %v4586_v31 }
  0xc6   :  { %887 = vrot.lane.b32.xlu1 %v170_v26, %s4077_s25  ;;  %885 = vrot.lane.b32.xlu0 %v169_v27, %s4077_s25  ;;  %v182_v26 = vld [vmem:[%s7548_s0 + $0x2c2] sm:$0xff]  ;;  %v181_v27 = vld [vmem:[%s7548_s0 + $0x2ba] sm:$0xff] }
  0xc8   :  { %v4596_v38 = vpop.permute.xlu1 %663  ;;  %v4598_v39 = vpop.permute.xlu0 %661 }
  0xc9   :  { %7595 = vst [vmem:[#allocation42_spill] sm:$0xff] %v4596_v38  ;;  %7596 = vst [vmem:[#allocation43_spill] sm:$0xff] %v4598_v39  ;;  %v59_v38 = vld [vmem:[%s7548_s0 + $0x240] sm:$0xff] }
  0xca   :  { %891 = vrot.lane.b32.xlu1 %v172_v34, %s4077_s25  ;;  %889 = vrot.lane.b32.xlu0 %v171_v35, %s4077_s25 }
  0xcc   :  { %v4608_v46 = vpop.permute.xlu1 %667  ;;  %v4610_v47 = vpop.permute.xlu0 %665 }
  0xcd   :  { %7597 = vst [vmem:[#allocation44_spill] sm:$0xff] %v4608_v46  ;;  %7598 = vst [vmem:[#allocation45_spill] sm:$0xff] %v4610_v47  ;;  %v53_v46 = vld [vmem:[%s7548_s0 + $0x1f8] sm:$0xff] }
  0xce   :  { %895 = vrot.lane.b32.xlu1 %v174_v42, %s4077_s25  ;;  %893 = vrot.lane.b32.xlu0 %v173_v43, %s4077_s25 }
  0xd0   :  { %v4620_v54 = vpop.permute.xlu1 %671  ;;  %v4622_v55 = vpop.permute.xlu0 %669 }
  0xd1   :  { %7599 = vst [vmem:[#allocation46_spill] sm:$0xff] %v4620_v54  ;;  %7600 = vst [vmem:[#allocation47_spill] sm:$0xff] %v4622_v55 }
  0xd2   :  { %899 = vrot.lane.b32.xlu1 %v176_v50, %s4077_s25  ;;  %897 = vrot.lane.b32.xlu0 %v175_v51, %s4077_s25  ;;  %v17_v50 = vld [vmem:[%s7548_s0 + $0x18] sm:$0xff]  ;;  %v18_v51 = vld [vmem:[%s7548_s0 + $0x20] sm:$0xff] }
  0xd4   :  { %v4632_v2 = vpop.permute.xlu1 %675  ;;  %v4634_v3 = vpop.permute.xlu0 %673 }
  0xd5   :  { %7601 = vst [vmem:[#allocation48_spill] sm:$0xff] %v4632_v2  ;;  %7602 = vst [vmem:[#allocation49_spill] sm:$0xff] %v4634_v3 }
  0xd6   :  { %903 = vrot.lane.b32.xlu1 %v178_v58, %s4077_s25  ;;  %901 = vrot.lane.b32.xlu0 %v177_v59, %s4077_s25 }
  0xd8   :  { %v4644_v18 = vpop.permute.xlu1 %679  ;;  %v4646_v19 = vpop.permute.xlu0 %677 }
  0xd9   :  { %7603 = vst [vmem:[#allocation50_spill] sm:$0xff] %v4644_v18  ;;  %7604 = vst [vmem:[#allocation51_spill] sm:$0xff] %v4646_v19 }
  0xda   :  { %907 = vrot.lane.b32.xlu1 %v180_v10, %s4077_s25  ;;  %905 = vrot.lane.b32.xlu0 %v179_v11, %s4077_s25  ;;  %v20_v10 = vld [vmem:[%s7548_s0 + $0x38] sm:$0xff]  ;;  %v19_v11 = vld [vmem:[%s7548_s0 + $0x30] sm:$0xff] }
  0xdc   :  { %v4656_v34 = vpop.permute.xlu1 %683  ;;  %v4658_v35 = vpop.permute.xlu0 %681 }
  0xdd   :  { %7605 = vst [vmem:[#allocation52_spill] sm:$0xff] %v4656_v34  ;;  %7606 = vst [vmem:[#allocation53_spill] sm:$0xff] %v4658_v35 }
  0xde   :  { %911 = vrot.lane.b32.xlu1 %v182_v26, %s4077_s25  ;;  %909 = vrot.lane.b32.xlu0 %v181_v27, %s4077_s25 }
  0xe0   :  { %v4662_v42 = vpop.permute.xlu1 %687  ;;  %v4664_v43 = vpop.permute.xlu0 %685 }
  0xe1   :  { %7607 = vst [vmem:[#allocation54_spill] sm:$0xff] %v4662_v42  ;;  %7608 = vst [vmem:[#allocation55_spill] sm:$0xff] %v4664_v43 }
  0xe2   :  { %1027 = vrot.lane.b32.xlu1 %v18_v51, %s4078_s6  ;;  %1025 = vrot.lane.b32.xlu0 %v17_v50, %s4078_s6  ;;  %v22_v50 = vld [vmem:[%s7548_s0 + $0x50] sm:$0xff]  ;;  %v21_v51 = vld [vmem:[%s7548_s0 + $0x48] sm:$0xff] }
  0xe4   :  { %v4674_v58 = vpop.permute.xlu1 %803  ;;  %v4676_v59 = vpop.permute.xlu0 %801 }
  0xe6   :  { %1031 = vrot.lane.b32.xlu1 %v20_v10, %s4078_s6  ;;  %1029 = vrot.lane.b32.xlu0 %v19_v11, %s4078_s6  ;;  %v24_v11 = vld [vmem:[%s7548_s0 + $0x68] sm:$0xff] }
  0xe8   :  { %v4686_v26 = vpop.permute.xlu1 %807  ;;  %v4688_v27 = vpop.permute.xlu0 %805 }
  0xe9   :  { %7609 = vst [vmem:[#allocation56_spill] sm:$0xff] %v4686_v26  ;;  %7610 = vst [vmem:[#allocation57_spill] sm:$0xff] %v4688_v27 }
  0xea   :  { %1035 = vrot.lane.b32.xlu1 %v22_v50, %s4078_s6  ;;  %1033 = vrot.lane.b32.xlu0 %v21_v51, %s4078_s6  ;;  %v26_v51 = vld [vmem:[%s7548_s0 + $0x80] sm:$0xff] }
  0xec   :  { %v4698_v42 = vpop.permute.xlu1 %811  ;;  %v4700_v10 = vpop.permute.xlu0 %809 }
  0xed   :  { %7611 = vst [vmem:[#allocation58_spill] sm:$0xff] %v4698_v42  ;;  %7612 = vst [vmem:[#allocation59_spill] sm:$0xff] %v4700_v10  ;;  %v5483_v42 = vld [vmem:[%s7548_s0 + $0xaa] sm:$0xff] }
  0xee   :  { %1039 = vrot.lane.b32.xlu1 %v24_v11, %s4078_s6  ;;  %1037 = vrot.lane.b32.xlu0 %v23_v48, %s4078_s6  ;;  %v28_v48 = vld [vmem:[%s7548_s0 + $0x98] sm:$0xff]  ;;  %v5628_v10 = vld [vmem:[%s7548_s0 + $0x1ea] sm:$0xff] }
  0xf0   :  { %v4710_v43 = vpop.permute.xlu1 %815  ;;  %v4712_v50 = vpop.permute.xlu0 %813 }
  0xf1   :  { %7613 = vst [vmem:[#allocation60_spill] sm:$0xff] %v4710_v43  ;;  %7614 = vst [vmem:[#allocation61_spill] sm:$0xff] %v4712_v50  ;;  %v5442_v50 = vld [vmem:[%s7548_s0 + $0x82] sm:$0xff] }
  0xf2   :  { %1043 = vrot.lane.b32.xlu1 %v26_v51, %s4078_s6  ;;  %1041 = vrot.lane.b32.xlu0 %v25_v49, %s4078_s6  ;;  %v30_v49 = vld [vmem:[%s7548_s0 + $0xb0] sm:$0xff] }
  0xf4   :  { %v4722_v34 = vpop.permute.xlu1 %819  ;;  %v4724_v11 = vpop.permute.xlu0 %817 }
  0xf5   :  { %7615 = vst [vmem:[#allocation62_spill] sm:$0xff] %v4722_v34  ;;  %7616 = vst [vmem:[#allocation63_spill] sm:$0xff] %v4724_v11  ;;  %v5247_v34 = vld [vmem:[%s7548_s0 + $0x201] sm:$0xff]  ;;  %v5268_v11 = vld [vmem:[%s7548_s0 + $0x211] sm:$0xff] }
  0xf6   :  { %1047 = vrot.lane.b32.xlu1 %v28_v48, %s4078_s6  ;;  %1045 = vrot.lane.b32.xlu0 %v27_v44, %s4078_s6  ;;  %v32_v44 = vld [vmem:[%s7548_s0 + $0xc8] sm:$0xff] }
  0xf8   :  { %v4734_v35 = vpop.permute.xlu1 %823  ;;  %v4736_v51 = vpop.permute.xlu0 %821 }
  0xf9   :  { %7617 = vst [vmem:[#allocation64_spill] sm:$0xff] %v4734_v35  ;;  %7618 = vst [vmem:[#allocation65_spill] sm:$0xff] %v4736_v51 }
  0xfa   :  { %1051 = vrot.lane.b32.xlu1 %v30_v49, %s4078_s6  ;;  %1049 = vrot.lane.b32.xlu0 %v29_v45, %s4078_s6  ;;  %v34_v45 = vld [vmem:[%s7548_s0 + $0xe0] sm:$0xff] }
  0xfc   :  { %v4746_v18 = vpop.permute.xlu1 %827  ;;  %v4748_v48 = vpop.permute.xlu0 %825 }
  0xfd   :  { %7619 = vst [vmem:[#allocation66_spill] sm:$0xff] %v4746_v18  ;;  %7620 = vst [vmem:[#allocation67_spill] sm:$0xff] %v4748_v48  ;;  %v3489_v18 = vld [vmem:[%s7548_s0 + $0x61] sm:$0xff]  ;;  %v3491_v48 = vld [vmem:[%s7548_s0 + $0x79] sm:$0xff] }
  0xfe   :  { %1055 = vrot.lane.b32.xlu1 %v32_v44, %s4078_s6  ;;  %1053 = vrot.lane.b32.xlu0 %v31_v40, %s4078_s6  ;;  %v36_v40 = vld [vmem:[%s7548_s0 + $0xf8] sm:$0xff] }
 0x100   :  { %v4758_v19 = vpop.permute.xlu1 %831  ;;  %v4760_v49 = vpop.permute.xlu0 %829 }
 0x101   :  { %7621 = vst [vmem:[#allocation68_spill] sm:$0xff] %v4758_v19  ;;  %7622 = vst [vmem:[#allocation69_spill] sm:$0xff] %v4760_v49  ;;  %v61_v49 = vld [vmem:[%s7548_s0 + $0x258] sm:$0xff] }
 0x102   :  { %1059 = vrot.lane.b32.xlu1 %v34_v45, %s4078_s6  ;;  %1057 = vrot.lane.b32.xlu0 %v33_v41, %s4078_s6  ;;  %v38_v41 = vld [vmem:[%s7548_s0 + $0x110] sm:$0xff] }
 0x104   :  { %v4770_v2 = vpop.permute.xlu1 %835  ;;  %v4772_v44 = vpop.permute.xlu0 %833 }
 0x105   :  { %7623 = vst [vmem:[#allocation70_spill] sm:$0xff] %v4770_v2  ;;  %7624 = vst [vmem:[#allocation71_spill] sm:$0xff] %v4772_v44  ;;  %v55_v44 = vld [vmem:[%s7548_s0 + $0x210] sm:$0xff] }
 0x106   :  { %1063 = vrot.lane.b32.xlu1 %v36_v40, %s4078_s6  ;;  %1061 = vrot.lane.b32.xlu0 %v35_v36, %s4078_s6  ;;  %v40_v36 = vld [vmem:[%s7548_s0 + $0x128] sm:$0xff] }
 0x108   :  { %v4782_v3 = vpop.permute.xlu1 %839  ;;  %v4784_v45 = vpop.permute.xlu0 %837 }
 0x109   :  { %7625 = vst [vmem:[#allocation72_spill] sm:$0xff] %v4782_v3  ;;  %7626 = vst [vmem:[#allocation73_spill] sm:$0xff] %v4784_v45  ;;  %v39_v3 = vld [vmem:[%s7548_s0 + $0x120] sm:$0xff]  ;;  %v45_v45 = vld [vmem:[%s7548_s0 + $0x198] sm:$0xff] }
 0x10a   :  { %1067 = vrot.lane.b32.xlu1 %v38_v41, %s4078_s6  ;;  %1065 = vrot.lane.b32.xlu0 %v37_v37, %s4078_s6  ;;  %v42_v37 = vld [vmem:[%s7548_s0 + $0x140] sm:$0xff] }
 0x10c   :  { %v4794_v54 = vpop.permute.xlu1 %843  ;;  %v4796_v40 = vpop.permute.xlu0 %841 }
 0x10d   :  { %7627 = vst [vmem:[#allocation74_spill] sm:$0xff] %v4794_v54  ;;  %7628 = vst [vmem:[#allocation75_spill] sm:$0xff] %v4796_v40  ;;  %v41_v54 = vld [vmem:[%s7548_s0 + $0x138] sm:$0xff] }
 0x10e   :  { %1071 = vrot.lane.b32.xlu1 %v40_v36, %s4078_s6  ;;  %1069 = vrot.lane.b32.xlu0 %v39_v3, %s4078_s6  ;;  %v3454_v3 = vld [vmem:[%s7548_s0 + $0x158] sm:$0xff]  ;;  %v3453_v36 = vld [vmem:[%s7548_s0 + $0x150] sm:$0xff] }
 0x110   :  { %v4806_v32 = vpop.permute.xlu1 %847  ;;  %v4808_v41 = vpop.permute.xlu0 %845 }
 0x111   :  { %7629 = vst [vmem:[#allocation76_spill] sm:$0xff] %v4806_v32  ;;  %7630 = vst [vmem:[#allocation77_spill] sm:$0xff] %v4808_v41 }
 0x112   :  { %1075 = vrot.lane.b32.xlu1 %v42_v37, %s4078_s6  ;;  %1073 = vrot.lane.b32.xlu0 %v41_v54, %s4078_s6  ;;  %v46_v54 = vld [vmem:[%s7548_s0 + $0x1a0] sm:$0xff] }
 0x114   :  { %v4824_v32 = vpop.permute.xlu1 %851  ;;  %v4826_v41 = vpop.permute.xlu0 %849 }
 0x115   :  { %7631 = vst [vmem:[#allocation78_spill] sm:$0xff] %v4824_v32  ;;  %7632 = vst [vmem:[#allocation79_spill] sm:$0xff] %v4826_v41  ;;  %v49_v41 = vld [vmem:[%s7548_s0 + $0x1c8] sm:$0xff] }
 0x116   :  { %1079 = vrot.lane.b32.xlu1 %v3454_v3, %s4078_s6  ;;  %1077 = vrot.lane.b32.xlu0 %v3453_v36, %s4078_s6  ;;  %v48_v36 = vld [vmem:[%s7548_s0 + $0x1b8] sm:$0xff] }
 0x118   :  { %v4830_v40 = vpop.permute.xlu1 %855  ;;  %v4832_v37 = vpop.permute.xlu0 %853 }
 0x119   :  { %7633 = vst [vmem:[#allocation80_spill] sm:$0xff] %v4830_v40  ;;  %7634 = vst [vmem:[#allocation81_spill] sm:$0xff] %v4832_v37  ;;  %v47_v40 = vld [vmem:[%s7548_s0 + $0x1b0] sm:$0xff] }
 0x11a   :  { %1083 = vrot.lane.b32.xlu1 %v46_v54, %s4078_s6  ;;  %1081 = vrot.lane.b32.xlu0 %v45_v45, %s4078_s6  ;;  %v50_v45 = vld [vmem:[%s7548_s0 + $0x1d0] sm:$0xff] }
 0x11c   :  { %v4842_v32 = vpop.permute.xlu1 %859  ;;  %v4844_v3 = vpop.permute.xlu0 %857 }
 0x11e   :  { %1087 = vrot.lane.b32.xlu1 %v48_v36, %s4078_s6  ;;  %1085 = vrot.lane.b32.xlu0 %v47_v40, %s4078_s6  ;;  %v52_v40 = vld [vmem:[%s7548_s0 + $0x1e8] sm:$0xff] }
 0x120   :  { %v4854_v37 = vpop.permute.xlu1 %863  ;;  %v4856_v54 = vpop.permute.xlu0 %861 }
 0x121   :  { %7635 = vst [vmem:[#allocation82_spill] sm:$0xff] %v4854_v37  ;;  %7636 = vst [vmem:[#allocation83_spill] sm:$0xff] %v4856_v54  ;;  %v5669_v37 = vld [vmem:[%s7548_s0 + $0x212] sm:$0xff] }
 0x122   :  { %1091 = vrot.lane.b32.xlu1 %v50_v45, %s4078_s6  ;;  %1089 = vrot.lane.b32.xlu0 %v49_v41, %s4078_s6  ;;  %v54_v41 = vld [vmem:[%s7548_s0 + $0x200] sm:$0xff] }
 0x124   :  { %v4866_v55 = vpop.permute.xlu1 %867  ;;  %v4868_v36 = vpop.permute.xlu0 %865 }
 0x125   :  { %7637 = vst [vmem:[#allocation84_spill] sm:$0xff] %v4866_v55  ;;  %7638 = vst [vmem:[#allocation85_spill] sm:$0xff] %v4868_v36 }
 0x126   :  { %1095 = vrot.lane.b32.xlu1 %v52_v40, %s4078_s6  ;;  %1093 = vrot.lane.b32.xlu0 %v51_v33, %s4078_s6  ;;  %v56_v33 = vld [vmem:[%s7548_s0 + $0x218] sm:$0xff] }
 0x128   :  { %v4878_v2 = vpop.permute.xlu1 %871  ;;  %v4880_v45 = vpop.permute.xlu0 %869 }
 0x129   :  { %7639 = vst [vmem:[#allocation86_spill] sm:$0xff] %v4878_v2  ;;  %7640 = vst [vmem:[#allocation87_spill] sm:$0xff] %v4880_v45 }
 0x12a   :  { %1099 = vrot.lane.b32.xlu1 %v54_v41, %s4078_s6  ;;  %1097 = vrot.lane.b32.xlu0 %v53_v46, %s4078_s6  ;;  %v58_v46 = vld [vmem:[%s7548_s0 + $0x230] sm:$0xff] }
 0x12c   :  { %v4890_v28 = vpop.permute.xlu1 %875  ;;  %v4892_v40 = vpop.permute.xlu0 %873 }
 0x12d   :  { %7641 = vst [vmem:[#allocation88_spill] sm:$0xff] %v4890_v28  ;;  %7642 = vst [vmem:[#allocation89_spill] sm:$0xff] %v4892_v40  ;;  %v3522_v40 = vld [vmem:[%s7548_s0 + $0x219] sm:$0xff] }
 0x12e   :  { %1103 = vrot.lane.b32.xlu1 %v56_v33, %s4078_s6  ;;  %1101 = vrot.lane.b32.xlu0 %v55_v44, %s4078_s6  ;;  %v60_v44 = vld [vmem:[%s7548_s0 + $0x248] sm:$0xff] }
 0x130   :  { %v4902_v47 = vpop.permute.xlu1 %879  ;;  %v4904_v41 = vpop.permute.xlu0 %877 }
 0x131   :  { %7643 = vst [vmem:[#allocation90_spill] sm:$0xff] %v4902_v47  ;;  %7644 = vst [vmem:[#allocation91_spill] sm:$0xff] %v4904_v41 }
 0x132   :  { %1107 = vrot.lane.b32.xlu1 %v58_v46, %s4078_s6  ;;  %1105 = vrot.lane.b32.xlu0 %v57_v29, %s4078_s6  ;;  %v62_v29 = vld [vmem:[%s7548_s0 + $0x260] sm:$0xff] }
 0x134   :  { %v4914_v19 = vpop.permute.xlu1 %883  ;;  %v4916_v33 = vpop.permute.xlu0 %881 }
 0x135   :  { %7645 = vst [vmem:[#allocation92_spill] sm:$0xff] %v4914_v19  ;;  %7646 = vst [vmem:[#allocation93_spill] sm:$0xff] %v4916_v33  ;;  %v3490_v19 = vld [vmem:[%s7548_s0 + $0x69] sm:$0xff]  ;;  %v3492_v33 = vld [vmem:[%s7548_s0 + $0x81] sm:$0xff] }
 0x136   :  { %1111 = vrot.lane.b32.xlu1 %v60_v44, %s4078_s6  ;;  %1109 = vrot.lane.b32.xlu0 %v59_v38, %s4078_s6  ;;  %v64_v38 = vld [vmem:[%s7548_s0 + $0x278] sm:$0xff] }
 0x138   :  { %v4926_v24 = vpop.permute.xlu1 %887  ;;  %v4928_v46 = vpop.permute.xlu0 %885 }
 0x139   :  { %7647 = vst [vmem:[#allocation94_spill] sm:$0xff] %v4926_v24  ;;  %7648 = vst [vmem:[#allocation95_spill] sm:$0xff] %v4928_v46  ;;  %v63_v24 = vld [vmem:[%s7548_s0 + $0x270] sm:$0xff] }
 0x13a   :  { %1115 = vrot.lane.b32.xlu1 %v62_v29, %s4078_s6  ;;  %1113 = vrot.lane.b32.xlu0 %v61_v49, %s4078_s6  ;;  %v66_v49 = vld [vmem:[%s7548_s0 + $0x290] sm:$0xff] }
 0x13c   :  { %v4938_v39 = vpop.permute.xlu1 %891  ;;  %v4940_v44 = vpop.permute.xlu0 %889 }
 0x13d   :  { %7649 = vst [vmem:[#allocation96_spill] sm:$0xff] %v4938_v39  ;;  %7650 = vst [vmem:[#allocation97_spill] sm:$0xff] %v4940_v44  ;;  %v65_v39 = vld [vmem:[%s7548_s0 + $0x288] sm:$0xff] }
 0x13e   :  { %1119 = vrot.lane.b32.xlu1 %v64_v38, %s4078_s6  ;;  %1117 = vrot.lane.b32.xlu0 %v63_v24, %s4078_s6  ;;  %v68_v24 = vld [vmem:[%s7548_s0 + $0x2a8] sm:$0xff] }
 0x140   :  { %v4950_v46 = vpop.permute.xlu1 %895  ;;  %v4952_v29 = vpop.permute.xlu0 %893 }
 0x141   :  { %7651 = vst [vmem:[#allocation98_spill] sm:$0xff] %v4950_v46  ;;  %7652 = vst [vmem:[#allocation99_spill] sm:$0xff] %v4952_v29  ;;  %v67_v46 = vld [vmem:[%s7548_s0 + $0x2a0] sm:$0xff] }
 0x142   :  { %1123 = vrot.lane.b32.xlu1 %v66_v49, %s4078_s6  ;;  %1121 = vrot.lane.b32.xlu0 %v65_v39, %s4078_s6  ;;  %v70_v39 = vld [vmem:[%s7548_s0 + $0x2c0] sm:$0xff] }
 0x144   :  { %v4962_v44 = vpop.permute.xlu1 %899  ;;  %v4964_v38 = vpop.permute.xlu0 %897 }
 0x145   :  { %7653 = vst [vmem:[#allocation100_spill] sm:$0xff] %v4962_v44  ;;  %7654 = vst [vmem:[#allocation101_spill] sm:$0xff] %v4964_v38  ;;  %v69_v44 = vld [vmem:[%s7548_s0 + $0x2b8] sm:$0xff] }
 0x146   :  { %1127 = vrot.lane.b32.xlu1 %v68_v24, %s4078_s6  ;;  %1125 = vrot.lane.b32.xlu0 %v67_v46, %s4078_s6  ;;  %v3482_v46 = vld [vmem:[%s7548_s0 + $0x2d8] sm:$0xff]  ;;  %v3481_v24 = vld [vmem:[%s7548_s0 + $0x2d0] sm:$0xff] }
 0x148   :  { %v4974_v29 = vpop.permute.xlu1 %903  ;;  %v4976_v49 = vpop.permute.xlu0 %901 }
 0x149   :  { %7655 = vst [vmem:[#allocation102_spill] sm:$0xff] %v4974_v29  ;;  %7656 = vst [vmem:[#allocation103_spill] sm:$0xff] %v4976_v49 }
 0x14a   :  { %1131 = vrot.lane.b32.xlu1 %v70_v39, %s4078_s6  ;;  %1129 = vrot.lane.b32.xlu0 %v69_v44, %s4078_s6  ;;  %v3484_v44 = vld [vmem:[%s7548_s0 + $0x21] sm:$0xff]  ;;  %v3483_v39 = vld [vmem:[%s7548_s0 + $0x19] sm:$0xff] }
 0x14c   :  { %v4992_v29 = vpop.permute.xlu1 %907  ;;  %v4994_v49 = vpop.permute.xlu0 %905 }
 0x14d   :  { %7657 = vst [vmem:[#allocation104_spill] sm:$0xff] %v4992_v29  ;;  %7658 = vst [vmem:[#allocation105_spill] sm:$0xff] %v4994_v49 }
 0x14e   :  { %1135 = vrot.lane.b32.xlu1 %v3482_v46, %s4078_s6  ;;  %1133 = vrot.lane.b32.xlu0 %v3481_v24, %s4078_s6  ;;  %v5013_v46 = vld [vmem:[%s7548_s0 + $0x39] sm:$0xff]  ;;  %v5018_v24 = vld [vmem:[%s7548_s0 + $0x31] sm:$0xff] }
 0x150   :  { %v5004_v38 = vpop.permute.xlu1 %911  ;;  %v5006_v25 = vpop.permute.xlu0 %909 }
 0x151   :  { %7659 = vst [vmem:[#allocation106_spill] sm:$0xff] %v5004_v38  ;;  %7660 = vst [vmem:[#allocation107_spill] sm:$0xff] %v5006_v25 }
 0x152   :  { %1251 = vrot.lane.b32.xlu1 %v3484_v44, %s4079_s20  ;;  %1249 = vrot.lane.b32.xlu0 %v3483_v39, %s4079_s20  ;;  %v5031_v44 = vld [vmem:[%s7548_s0 + $0x51] sm:$0xff]  ;;  %v5036_v39 = vld [vmem:[%s7548_s0 + $0x49] sm:$0xff] }
 0x154   :  { %v5020_v29 = vpop.permute.xlu1 %1027  ;;  %v5022_v38 = vpop.permute.xlu0 %1025 }
 0x156   :  { %1255 = vrot.lane.b32.xlu1 %v5013_v46, %s4079_s20  ;;  %1253 = vrot.lane.b32.xlu0 %v5018_v24, %s4079_s20 }
 0x158   :  { %v5038_v25 = vpop.permute.xlu1 %1031  ;;  %v5040_v49 = vpop.permute.xlu0 %1029 }
 0x159   :  { %7661 = vst [vmem:[#allocation108_spill] sm:$0xff] %v5038_v25  ;;  %7662 = vst [vmem:[#allocation109_spill] sm:$0xff] %v5040_v49 }
 0x15a   :  { %1259 = vrot.lane.b32.xlu1 %v5031_v44, %s4079_s20  ;;  %1257 = vrot.lane.b32.xlu0 %v5036_v39, %s4079_s20 }
 0x15c   :  { %v5052_v30 = vpop.permute.xlu1 %1035  ;;  %v5054_v20 = vpop.permute.xlu0 %1033 }
 0x15d   :  { %7663 = vst [vmem:[#allocation110_spill] sm:$0xff] %v5052_v30  ;;  %7664 = vst [vmem:[#allocation111_spill] sm:$0xff] %v5054_v20  ;;  %v5465_v30 = vld [vmem:[%s7548_s0 + $0x92] sm:$0xff] }
 0x15e   :  { %1263 = vrot.lane.b32.xlu1 %v3490_v19, %s4079_s20  ;;  %1261 = vrot.lane.b32.xlu0 %v3489_v18, %s4079_s20  ;;  %v3494_v18 = vld [vmem:[%s7548_s0 + $0x99] sm:$0xff]  ;;  %v3493_v19 = vld [vmem:[%s7548_s0 + $0x91] sm:$0xff] }
 0x160   :  { %v5064_v31 = vpop.permute.xlu1 %1039  ;;  %v5066_v21 = vpop.permute.xlu0 %1037 }
 0x161   :  { %7665 = vst [vmem:[#allocation112_spill] sm:$0xff] %v5064_v31  ;;  %7666 = vst [vmem:[#allocation113_spill] sm:$0xff] %v5066_v21  ;;  %v3523_v31 = vld [vmem:[%s7548_s0 + $0x229] sm:$0xff] }
 0x162   :  { %1267 = vrot.lane.b32.xlu1 %v3492_v33, %s4079_s20  ;;  %1265 = vrot.lane.b32.xlu0 %v3491_v48, %s4079_s20  ;;  %v3496_v48 = vld [vmem:[%s7548_s0 + $0xb1] sm:$0xff]  ;;  %v3495_v33 = vld [vmem:[%s7548_s0 + $0xa9] sm:$0xff] }
 0x164   :  { %v5076_v47 = vpop.permute.xlu1 %1043  ;;  %v5078_v35 = vpop.permute.xlu0 %1041 }
 0x165   :  { %7667 = vst [vmem:[#allocation114_spill] sm:$0xff] %v5076_v47  ;;  %7668 = vst [vmem:[#allocation115_spill] sm:$0xff] %v5078_v35 }
 0x166   :  { %1271 = vrot.lane.b32.xlu1 %v3494_v18, %s4079_s20  ;;  %1269 = vrot.lane.b32.xlu0 %v3493_v19, %s4079_s20  ;;  %v3498_v18 = vld [vmem:[%s7548_s0 + $0xc9] sm:$0xff]  ;;  %v3497_v19 = vld [vmem:[%s7548_s0 + $0xc1] sm:$0xff] }
 0x168   :  { %v5088_v22 = vpop.permute.xlu1 %1047  ;;  %v5090_v16 = vpop.permute.xlu0 %1045 }
 0x169   :  { %7669 = vst [vmem:[#allocation116_spill] sm:$0xff] %v5088_v22  ;;  %7670 = vst [vmem:[#allocation117_spill] sm:$0xff] %v5090_v16 }
 0x16a   :  { %1275 = vrot.lane.b32.xlu1 %v3496_v48, %s4079_s20  ;;  %1273 = vrot.lane.b32.xlu0 %v3495_v33, %s4079_s20  ;;  %v3500_v48 = vld [vmem:[%s7548_s0 + $0xe1] sm:$0xff]  ;;  %v3499_v33 = vld [vmem:[%s7548_s0 + $0xd9] sm:$0xff] }
 0x16c   :  { %v5100_v41 = vpop.permute.xlu1 %1051  ;;  %v5102_v51 = vpop.permute.xlu0 %1049 }
 0x16d   :  { %7671 = vst [vmem:[#allocation118_spill] sm:$0xff] %v5100_v41  ;;  %7672 = vst [vmem:[#allocation119_spill] sm:$0xff] %v5102_v51 }
 0x16e   :  { %1279 = vrot.lane.b32.xlu1 %v3498_v18, %s4079_s20  ;;  %1277 = vrot.lane.b32.xlu0 %v3497_v19, %s4079_s20  ;;  %v3502_v18 = vld [vmem:[%s7548_s0 + $0xf9] sm:$0xff]  ;;  %v3501_v19 = vld [vmem:[%s7548_s0 + $0xf1] sm:$0xff] }
 0x170   :  { %v5112_v22 = vpop.permute.xlu1 %1055  ;;  %v5114_v16 = vpop.permute.xlu0 %1053 }
 0x171   :  { %7673 = vst [vmem:[#allocation120_spill] sm:$0xff] %v5112_v22  ;;  %7674 = vst [vmem:[#allocation121_spill] sm:$0xff] %v5114_v16 }
 0x172   :  { %1283 = vrot.lane.b32.xlu1 %v3500_v48, %s4079_s20  ;;  %1281 = vrot.lane.b32.xlu0 %v3499_v33, %s4079_s20  ;;  %v3504_v48 = vld [vmem:[%s7548_s0 + $0x111] sm:$0xff]  ;;  %v3503_v33 = vld [vmem:[%s7548_s0 + $0x109] sm:$0xff] }
 0x174   :  { %v5124_v41 = vpop.permute.xlu1 %1059  ;;  %v5126_v51 = vpop.permute.xlu0 %1057 }
 0x175   :  { %7675 = vst [vmem:[#allocation122_spill] sm:$0xff] %v5124_v41  ;;  %7676 = vst [vmem:[#allocation123_spill] sm:$0xff] %v5126_v51 }
 0x176   :  { %1287 = vrot.lane.b32.xlu1 %v3502_v18, %s4079_s20  ;;  %1285 = vrot.lane.b32.xlu0 %v3501_v19, %s4079_s20  ;;  %v3506_v18 = vld [vmem:[%s7548_s0 + $0x129] sm:$0xff]  ;;  %v3505_v19 = vld [vmem:[%s7548_s0 + $0x121] sm:$0xff] }
 0x178   :  { %v5136_v22 = vpop.permute.xlu1 %1063  ;;  %v5138_v16 = vpop.permute.xlu0 %1061 }
 0x179   :  { %7677 = vst [vmem:[#allocation124_spill] sm:$0xff] %v5136_v22  ;;  %7678 = vst [vmem:[#allocation125_spill] sm:$0xff] %v5138_v16 }
 0x17a   :  { %1291 = vrot.lane.b32.xlu1 %v3504_v48, %s4079_s20  ;;  %1289 = vrot.lane.b32.xlu0 %v3503_v33, %s4079_s20  ;;  %v3508_v48 = vld [vmem:[%s7548_s0 + $0x141] sm:$0xff]  ;;  %v3507_v33 = vld [vmem:[%s7548_s0 + $0x139] sm:$0xff] }
 0x17c   :  { %v5148_v41 = vpop.permute.xlu1 %1067  ;;  %v5150_v51 = vpop.permute.xlu0 %1065 }
 0x17d   :  { %7679 = vst [vmem:[#allocation126_spill] sm:$0xff] %v5148_v41  ;;  %7680 = vst [vmem:[#allocation127_spill] sm:$0xff] %v5150_v51 }
 0x17e   :  { %1295 = vrot.lane.b32.xlu1 %v3506_v18, %s4079_s20  ;;  %1293 = vrot.lane.b32.xlu0 %v3505_v19, %s4079_s20  ;;  %v3510_v18 = vld [vmem:[%s7548_s0 + $0x159] sm:$0xff]  ;;  %v3509_v19 = vld [vmem:[%s7548_s0 + $0x151] sm:$0xff] }
 0x180   :  { %v5160_v22 = vpop.permute.xlu1 %1071  ;;  %v5162_v16 = vpop.permute.xlu0 %1069 }
 0x181   :  { %7681 = vst [vmem:[#allocation128_spill] sm:$0xff] %v5160_v22  ;;  %7682 = vst [vmem:[#allocation129_spill] sm:$0xff] %v5162_v16 }
 0x182   :  { %1299 = vrot.lane.b32.xlu1 %v3508_v48, %s4079_s20  ;;  %1297 = vrot.lane.b32.xlu0 %v3507_v33, %s4079_s20  ;;  %v3512_v48 = vld [vmem:[%s7548_s0 + $0x1a1] sm:$0xff]  ;;  %v3511_v33 = vld [vmem:[%s7548_s0 + $0x199] sm:$0xff] }
 0x184   :  { %v5172_v41 = vpop.permute.xlu1 %1075  ;;  %v5174_v51 = vpop.permute.xlu0 %1073 }
 0x185   :  { %7683 = vst [vmem:[#allocation130_spill] sm:$0xff] %v5172_v41  ;;  %7684 = vst [vmem:[#allocation131_spill] sm:$0xff] %v5174_v51 }
 0x186   :  { %1303 = vrot.lane.b32.xlu1 %v3510_v18, %s4079_s20  ;;  %1301 = vrot.lane.b32.xlu0 %v3509_v19, %s4079_s20  ;;  %v5193_v18 = vld [vmem:[%s7548_s0 + $0x1b9] sm:$0xff]  ;;  %v5198_v19 = vld [vmem:[%s7548_s0 + $0x1b1] sm:$0xff] }
 0x188   :  { %v5184_v22 = vpop.permute.xlu1 %1079  ;;  %v5186_v16 = vpop.permute.xlu0 %1077 }
 0x189   :  { %7685 = vst [vmem:[#allocation132_spill] sm:$0xff] %v5184_v22  ;;  %7686 = vst [vmem:[#allocation133_spill] sm:$0xff] %v5186_v16 }
 0x18a   :  { %1307 = vrot.lane.b32.xlu1 %v3512_v48, %s4079_s20  ;;  %1305 = vrot.lane.b32.xlu0 %v3511_v33, %s4079_s20  ;;  %v5211_v48 = vld [vmem:[%s7548_s0 + $0x1d1] sm:$0xff]  ;;  %v5216_v33 = vld [vmem:[%s7548_s0 + $0x1c9] sm:$0xff] }
 0x18c   :  { %v5200_v41 = vpop.permute.xlu1 %1083  ;;  %v5202_v51 = vpop.permute.xlu0 %1081 }
 0x18e   :  { %1311 = vrot.lane.b32.xlu1 %v5193_v18, %s4079_s20  ;;  %1309 = vrot.lane.b32.xlu0 %v5198_v19, %s4079_s20 }
 0x190   :  { %v5218_v22 = vpop.permute.xlu1 %1087  ;;  %v5220_v16 = vpop.permute.xlu0 %1085 }
 0x191   :  { %7687 = vst [vmem:[#allocation134_spill] sm:$0xff] %v5218_v22  ;;  %7688 = vst [vmem:[#allocation135_spill] sm:$0xff] %v5220_v16  ;;  %v5651_v22 = vld [vmem:[%s7548_s0 + $0x1fa] sm:$0xff] }
 0x192   :  { %1315 = vrot.lane.b32.xlu1 %v5211_v48, %s4079_s20  ;;  %1313 = vrot.lane.b32.xlu0 %v5216_v33, %s4079_s20  ;;  %v5723_v16 = vld [vmem:[%s7548_s0 + $0x25a] sm:$0xff] }
 0x193   :  { %7754 = vst [vmem:[#allocation201_spill] sm:$0xff] %v5723_v16 }
 0x194   :  { %v5236_v47 = vpop.permute.xlu1 %1091  ;;  %v5238_v28 = vpop.permute.xlu0 %1089 }
 0x195   :  { %7689 = vst [vmem:[#allocation136_spill] sm:$0xff] %v5236_v47  ;;  %7690 = vst [vmem:[#allocation137_spill] sm:$0xff] %v5238_v28  ;;  %v5460_v47 = vld [vmem:[%s7548_s0 + $0x9a] sm:$0xff] }
 0x196   :  { %1319 = vrot.lane.b32.xlu1 %v5229_v23, %s4079_s20  ;;  %1317 = vrot.lane.b32.xlu0 %v5234_v17, %s4079_s20 }
 0x198   :  { %v5254_v12 = vpop.permute.xlu1 %1095  ;;  %v5256_v35 = vpop.permute.xlu0 %1093 }
 0x199   :  { %7691 = vst [vmem:[#allocation138_spill] sm:$0xff] %v5254_v12  ;;  %7692 = vst [vmem:[#allocation139_spill] sm:$0xff] %v5256_v35  ;;  %v3524_v12 = vld [vmem:[%s7548_s0 + $0x231] sm:$0xff]  ;;  %v5429_v35 = vld [vmem:[%s7548_s0 + $0x62] sm:$0xff] }
 0x19a   :  { %1323 = vrot.lane.b32.xlu1 %v5247_v34, %s4079_s20  ;;  %1321 = vrot.lane.b32.xlu0 %v5252_v14, %s4079_s20 }
 0x19c   :  { %v5270_v15 = vpop.permute.xlu1 %1099  ;;  %v5272_v13 = vpop.permute.xlu0 %1097 }
 0x19d   :  { %7693 = vst [vmem:[#allocation140_spill] sm:$0xff] %v5270_v15  ;;  %7694 = vst [vmem:[#allocation141_spill] sm:$0xff] %v5272_v13  ;;  %v3525_v15 = vld [vmem:[%s7548_s0 + $0x241] sm:$0xff] }
 0x19e   :  { %1327 = vrot.lane.b32.xlu1 %v3522_v40, %s4079_s20  ;;  %1325 = vrot.lane.b32.xlu0 %v5268_v11, %s4079_s20  ;;  %v3526_v40 = vld [vmem:[%s7548_s0 + $0x249] sm:$0xff] }
 0x1a0   :  { %v5283_v2 = vpop.permute.xlu1 %1103  ;;  %v5285_v43 = vpop.permute.xlu0 %1101 }
 0x1a1   :  { %7695 = vst [vmem:[#allocation142_spill] sm:$0xff] %v5283_v2  ;;  %7696 = vst [vmem:[#allocation143_spill] sm:$0xff] %v5285_v43 }
 0x1a2   :  { %1331 = vrot.lane.b32.xlu1 %v3524_v12, %s4079_s20  ;;  %1329 = vrot.lane.b32.xlu0 %v3523_v31, %s4079_s20  ;;  %v3528_v12 = vld [vmem:[%s7548_s0 + $0x261] sm:$0xff]  ;;  %v3527_v31 = vld [vmem:[%s7548_s0 + $0x259] sm:$0xff] }
 0x1a4   :  { %v5295_v13 = vpop.permute.xlu1 %1107  ;;  %v5297_v6 = vpop.permute.xlu0 %1105 }
 0x1a5   :  { %7697 = vst [vmem:[#allocation144_spill] sm:$0xff] %v5295_v13  ;;  %7698 = vst [vmem:[#allocation145_spill] sm:$0xff] %v5297_v6 }
 0x1a6   :  { %1335 = vrot.lane.b32.xlu1 %v3526_v40, %s4079_s20  ;;  %1333 = vrot.lane.b32.xlu0 %v3525_v15, %s4079_s20  ;;  %v3530_v15 = vld [vmem:[%s7548_s0 + $0x279] sm:$0xff]  ;;  %v3529_v40 = vld [vmem:[%s7548_s0 + $0x271] sm:$0xff] }
 0x1a8   :  { %v5307_v2 = vpop.permute.xlu1 %1111  ;;  %v5309_v43 = vpop.permute.xlu0 %1109 }
 0x1a9   :  { %7699 = vst [vmem:[#allocation146_spill] sm:$0xff] %v5307_v2  ;;  %7700 = vst [vmem:[#allocation147_spill] sm:$0xff] %v5309_v43 }
 0x1aa   :  { %1339 = vrot.lane.b32.xlu1 %v3528_v12, %s4079_s20  ;;  %1337 = vrot.lane.b32.xlu0 %v3527_v31, %s4079_s20  ;;  %v3532_v12 = vld [vmem:[%s7548_s0 + $0x291] sm:$0xff]  ;;  %v3531_v31 = vld [vmem:[%s7548_s0 + $0x289] sm:$0xff] }
 0x1ac   :  { %v5319_v13 = vpop.permute.xlu1 %1115  ;;  %v5321_v6 = vpop.permute.xlu0 %1113 }
 0x1ad   :  { %7701 = vst [vmem:[#allocation148_spill] sm:$0xff] %v5319_v13  ;;  %7702 = vst [vmem:[#allocation149_spill] sm:$0xff] %v5321_v6 }
 0x1ae   :  { %1343 = vrot.lane.b32.xlu1 %v3530_v15, %s4079_s20  ;;  %1341 = vrot.lane.b32.xlu0 %v3529_v40, %s4079_s20  ;;  %v3534_v15 = vld [vmem:[%s7548_s0 + $0x2a9] sm:$0xff]  ;;  %v3533_v40 = vld [vmem:[%s7548_s0 + $0x2a1] sm:$0xff] }
 0x1b0   :  { %v5331_v2 = vpop.permute.xlu1 %1119  ;;  %v5333_v43 = vpop.permute.xlu0 %1117 }
 0x1b1   :  { %7703 = vst [vmem:[#allocation150_spill] sm:$0xff] %v5331_v2  ;;  %7704 = vst [vmem:[#allocation151_spill] sm:$0xff] %v5333_v43 }
 0x1b2   :  { %1347 = vrot.lane.b32.xlu1 %v3532_v12, %s4079_s20  ;;  %1345 = vrot.lane.b32.xlu0 %v3531_v31, %s4079_s20  ;;  %v3536_v12 = vld [vmem:[%s7548_s0 + $0x2c1] sm:$0xff]  ;;  %v3535_v31 = vld [vmem:[%s7548_s0 + $0x2b9] sm:$0xff] }
 0x1b4   :  { %v5343_v13 = vpop.permute.xlu1 %1123  ;;  %v5345_v6 = vpop.permute.xlu0 %1121 }
 0x1b5   :  { %7705 = vst [vmem:[#allocation152_spill] sm:$0xff] %v5343_v13  ;;  %7706 = vst [vmem:[#allocation153_spill] sm:$0xff] %v5345_v6 }
 0x1b6   :  { %1351 = vrot.lane.b32.xlu1 %v3534_v15, %s4079_s20  ;;  %1349 = vrot.lane.b32.xlu0 %v3533_v40, %s4079_s20  ;;  %v3538_v15 = vld [vmem:[%s7548_s0 + $0x2d9] sm:$0xff]  ;;  %v3537_v40 = vld [vmem:[%s7548_s0 + $0x2d1] sm:$0xff] }
 0x1b8   :  { %v5355_v2 = vpop.permute.xlu1 %1127  ;;  %v5357_v43 = vpop.permute.xlu0 %1125 }
 0x1b9   :  { %7707 = vst [vmem:[#allocation154_spill] sm:$0xff] %v5355_v2  ;;  %7708 = vst [vmem:[#allocation155_spill] sm:$0xff] %v5357_v43 }
 0x1ba   :  { %1355 = vrot.lane.b32.xlu1 %v3536_v12, %s4079_s20  ;;  %1353 = vrot.lane.b32.xlu0 %v3535_v31, %s4079_s20  ;;  %v3540_v12 = vld [vmem:[%s7548_s0 + $0x22] sm:$0xff]  ;;  %v3539_v31 = vld [vmem:[%s7548_s0 + $0x1a] sm:$0xff] }
 0x1bc   :  { %v5367_v13 = vpop.permute.xlu1 %1131  ;;  %v5369_v6 = vpop.permute.xlu0 %1129 }
 0x1bd   :  { %7709 = vst [vmem:[#allocation156_spill] sm:$0xff] %v5367_v13  ;;  %7710 = vst [vmem:[#allocation157_spill] sm:$0xff] %v5369_v6 }
 0x1be   :  { %1359 = vrot.lane.b32.xlu1 %v3538_v15, %s4079_s20  ;;  %1357 = vrot.lane.b32.xlu0 %v3537_v40, %s4079_s20  ;;  %v5388_v15 = vld [vmem:[%s7548_s0 + $0x3a] sm:$0xff]  ;;  %v5393_v40 = vld [vmem:[%s7548_s0 + $0x32] sm:$0xff] }
 0x1c0   :  { %v5379_v2 = vpop.permute.xlu1 %1135  ;;  %v5381_v43 = vpop.permute.xlu0 %1133 }
 0x1c1   :  { %7711 = vst [vmem:[#allocation158_spill] sm:$0xff] %v5379_v2  ;;  %7712 = vst [vmem:[#allocation159_spill] sm:$0xff] %v5381_v43 }
 0x1c2   :  { %1475 = vrot.lane.b32.xlu1 %v3540_v12, %s4080_s5  ;;  %1473 = vrot.lane.b32.xlu0 %v3539_v31, %s4080_s5  ;;  %v5406_v12 = vld [vmem:[%s7548_s0 + $0x52] sm:$0xff]  ;;  %v5411_v31 = vld [vmem:[%s7548_s0 + $0x4a] sm:$0xff] }
 0x1c4   :  { %v5395_v13 = vpop.permute.xlu1 %1251  ;;  %v5397_v2 = vpop.permute.xlu0 %1249 }
 0x1c6   :  { %1479 = vrot.lane.b32.xlu1 %v5388_v15, %s4080_s5  ;;  %1477 = vrot.lane.b32.xlu0 %v5393_v40, %s4080_s5 }
 0x1c8   :  { %v5413_v43 = vpop.permute.xlu1 %1255  ;;  %v5415_v6 = vpop.permute.xlu0 %1253 }
 0x1c9   :  { %7713 = vst [vmem:[#allocation160_spill] sm:$0xff] %v5413_v43  ;;  %7714 = vst [vmem:[#allocation161_spill] sm:$0xff] %v5415_v6  ;;  %v5646_v43 = vld [vmem:[%s7548_s0 + $0x202] sm:$0xff] }
 0x1ca   :  { %1483 = vrot.lane.b32.xlu1 %v5406_v12, %s4080_s5  ;;  %1481 = vrot.lane.b32.xlu0 %v5411_v31, %s4080_s5  ;;  %v5705_v6 = vld [vmem:[%s7548_s0 + $0x242] sm:$0xff] }
 0x1cb   :  { %7750 = vst [vmem:[#allocation197_spill] sm:$0xff] %v5705_v6 }
 0x1cc   :  { %v5431_v21 = vpop.permute.xlu1 %1259  ;;  %v5433_v45 = vpop.permute.xlu0 %1257 }
 0x1cd   :  { %7715 = vst [vmem:[#allocation162_spill] sm:$0xff] %v5431_v21  ;;  %7716 = vst [vmem:[#allocation163_spill] sm:$0xff] %v5433_v45  ;;  %v3553_v45 = vld [vmem:[%s7548_s0 + $0xc2] sm:$0xff] }
 0x1ce   :  { %1487 = vrot.lane.b32.xlu1 %v5424_v8, %s4080_s5  ;;  %1485 = vrot.lane.b32.xlu0 %v5429_v35, %s4080_s5 }
 0x1d0   :  { %v5449_v9 = vpop.permute.xlu1 %1263  ;;  %v5451_v21 = vpop.permute.xlu0 %1261 }
 0x1d1   :  { %7717 = vst [vmem:[#allocation164_spill] sm:$0xff] %v5449_v9  ;;  %7718 = vst [vmem:[#allocation165_spill] sm:$0xff] %v5451_v21  ;;  %v5478_v21 = vld [vmem:[%s7548_s0 + $0xb2] sm:$0xff] }
 0x1d2   :  { %1491 = vrot.lane.b32.xlu1 %v5442_v50, %s4080_s5  ;;  %1489 = vrot.lane.b32.xlu0 %v5447_v7, %s4080_s5 }
 0x1d4   :  { %v5467_v55 = vpop.permute.xlu1 %1267  ;;  %v5469_v9 = vpop.permute.xlu0 %1265 }
 0x1d5   :  { %7719 = vst [vmem:[#allocation166_spill] sm:$0xff] %v5467_v55  ;;  %7720 = vst [vmem:[#allocation167_spill] sm:$0xff] %v5469_v9  ;;  %v3554_v9 = vld [vmem:[%s7548_s0 + $0xca] sm:$0xff] }
 0x1d6   :  { %1495 = vrot.lane.b32.xlu1 %v5460_v47, %s4080_s5  ;;  %1493 = vrot.lane.b32.xlu0 %v5465_v30, %s4080_s5 }
 0x1d8   :  { %v5485_v62 = vpop.permute.xlu1 %1271  ;;  %v5487_v55 = vpop.permute.xlu0 %1269 }
 0x1d9   :  { %7721 = vst [vmem:[#allocation168_spill] sm:$0xff] %v5485_v62  ;;  %7722 = vst [vmem:[#allocation169_spill] sm:$0xff] %v5487_v55  ;;  %v3556_v62 = vld [vmem:[%s7548_s0 + $0xe2] sm:$0xff]  ;;  %v3555_v55 = vld [vmem:[%s7548_s0 + $0xda] sm:$0xff] }
 0x1da   :  { %1499 = vrot.lane.b32.xlu1 %v5478_v21, %s4080_s5  ;;  %1497 = vrot.lane.b32.xlu0 %v5483_v42, %s4080_s5 }
 0x1dc   :  { %v5499_v4 = vpop.permute.xlu1 %1275  ;;  %v5501_v28 = vpop.permute.xlu0 %1273 }
 0x1dd   :  { %7723 = vst [vmem:[#allocation170_spill] sm:$0xff] %v5499_v4  ;;  %7724 = vst [vmem:[#allocation171_spill] sm:$0xff] %v5501_v28 }
 0x1de   :  { %1503 = vrot.lane.b32.xlu1 %v3554_v9, %s4080_s5  ;;  %1501 = vrot.lane.b32.xlu0 %v3553_v45, %s4080_s5  ;;  %v3558_v9 = vld [vmem:[%s7548_s0 + $0xfa] sm:$0xff]  ;;  %v3557_v45 = vld [vmem:[%s7548_s0 + $0xf2] sm:$0xff] }
 0x1e0   :  { %v5511_v20 = vpop.permute.xlu1 %1279  ;;  %v5513_v36 = vpop.permute.xlu0 %1277 }
 0x1e1   :  { %7725 = vst [vmem:[#allocation172_spill] sm:$0xff] %v5511_v20  ;;  %7726 = vst [vmem:[#allocation173_spill] sm:$0xff] %v5513_v36 }
 0x1e2   :  { %1507 = vrot.lane.b32.xlu1 %v3556_v62, %s4080_s5  ;;  %1505 = vrot.lane.b32.xlu0 %v3555_v55, %s4080_s5  ;;  %v3560_v62 = vld [vmem:[%s7548_s0 + $0x112] sm:$0xff]  ;;  %v3559_v55 = vld [vmem:[%s7548_s0 + $0x10a] sm:$0xff] }
 0x1e4   :  { %v5523_v4 = vpop.permute.xlu1 %1283  ;;  %v5525_v28 = vpop.permute.xlu0 %1281 }
 0x1e5   :  { %7727 = vst [vmem:[#allocation174_spill] sm:$0xff] %v5523_v4  ;;  %7728 = vst [vmem:[#allocation175_spill] sm:$0xff] %v5525_v28 }
 0x1e6   :  { %1511 = vrot.lane.b32.xlu1 %v3558_v9, %s4080_s5  ;;  %1509 = vrot.lane.b32.xlu0 %v3557_v45, %s4080_s5  ;;  %v3562_v9 = vld [vmem:[%s7548_s0 + $0x12a] sm:$0xff]  ;;  %v3561_v45 = vld [vmem:[%s7548_s0 + $0x122] sm:$0xff] }
 0x1e8   :  { %v5535_v20 = vpop.permute.xlu1 %1287  ;;  %v5537_v36 = vpop.permute.xlu0 %1285 }
 0x1e9   :  { %7729 = vst [vmem:[#allocation176_spill] sm:$0xff] %v5535_v20  ;;  %7730 = vst [vmem:[#allocation177_spill] sm:$0xff] %v5537_v36 }
 0x1ea   :  { %1515 = vrot.lane.b32.xlu1 %v3560_v62, %s4080_s5  ;;  %1513 = vrot.lane.b32.xlu0 %v3559_v55, %s4080_s5  ;;  %v3564_v62 = vld [vmem:[%s7548_s0 + $0x142] sm:$0xff]  ;;  %v3563_v55 = vld [vmem:[%s7548_s0 + $0x13a] sm:$0xff] }
 0x1ec   :  { %v5547_v4 = vpop.permute.xlu1 %1291  ;;  %v5549_v28 = vpop.permute.xlu0 %1289 }
 0x1ed   :  { %7731 = vst [vmem:[#allocation178_spill] sm:$0xff] %v5547_v4  ;;  %7732 = vst [vmem:[#allocation179_spill] sm:$0xff] %v5549_v28 }
 0x1ee   :  { %1519 = vrot.lane.b32.xlu1 %v3562_v9, %s4080_s5  ;;  %1517 = vrot.lane.b32.xlu0 %v3561_v45, %s4080_s5  ;;  %v3566_v9 = vld [vmem:[%s7548_s0 + $0x15a] sm:$0xff]  ;;  %v3565_v45 = vld [vmem:[%s7548_s0 + $0x152] sm:$0xff] }
 0x1f0   :  { %v5559_v20 = vpop.permute.xlu1 %1295  ;;  %v5561_v36 = vpop.permute.xlu0 %1293 }
 0x1f1   :  { %7733 = vst [vmem:[#allocation180_spill] sm:$0xff] %v5559_v20  ;;  %7734 = vst [vmem:[#allocation181_spill] sm:$0xff] %v5561_v36 }
 0x1f2   :  { %1523 = vrot.lane.b32.xlu1 %v3564_v62, %s4080_s5  ;;  %1521 = vrot.lane.b32.xlu0 %v3563_v55, %s4080_s5  ;;  %v3568_v62 = vld [vmem:[%s7548_s0 + $0x1a2] sm:$0xff]  ;;  %v3567_v55 = vld [vmem:[%s7548_s0 + $0x19a] sm:$0xff] }
 0x1f4   :  { %v5571_v4 = vpop.permute.xlu1 %1299  ;;  %v5573_v28 = vpop.permute.xlu0 %1297 }
 0x1f5   :  { %7735 = vst [vmem:[#allocation182_spill] sm:$0xff] %v5571_v4  ;;  %7736 = vst [vmem:[#allocation183_spill] sm:$0xff] %v5573_v28 }
 0x1f6   :  { %1527 = vrot.lane.b32.xlu1 %v3566_v9, %s4080_s5  ;;  %1525 = vrot.lane.b32.xlu0 %v3565_v45, %s4080_s5  ;;  %v5592_v9 = vld [vmem:[%s7548_s0 + $0x1ba] sm:$0xff]  ;;  %v5597_v45 = vld [vmem:[%s7548_s0 + $0x1b2] sm:$0xff] }
 0x1f8   :  { %v5583_v20 = vpop.permute.xlu1 %1303  ;;  %v5585_v36 = vpop.permute.xlu0 %1301 }
 0x1f9   :  { %7737 = vst [vmem:[#allocation184_spill] sm:$0xff] %v5583_v20  ;;  %7738 = vst [vmem:[#allocation185_spill] sm:$0xff] %v5585_v36 }
 0x1fa   :  { %1531 = vrot.lane.b32.xlu1 %v3568_v62, %s4080_s5  ;;  %1529 = vrot.lane.b32.xlu0 %v3567_v55, %s4080_s5  ;;  %v5610_v62 = vld [vmem:[%s7548_s0 + $0x1d2] sm:$0xff]  ;;  %v5615_v55 = vld [vmem:[%s7548_s0 + $0x1ca] sm:$0xff] }
 0x1fc   :  { %v5599_v4 = vpop.permute.xlu1 %1307  ;;  %v5601_v28 = vpop.permute.xlu0 %1305 }
 0x1fe   :  { %1535 = vrot.lane.b32.xlu1 %v5592_v9, %s4080_s5  ;;  %1533 = vrot.lane.b32.xlu0 %v5597_v45, %s4080_s5 }
 0x200   :  { %v5617_v20 = vpop.permute.xlu1 %1311  ;;  %v5619_v36 = vpop.permute.xlu0 %1309 }
 0x201   :  { %7739 = vst [vmem:[#allocation186_spill] sm:$0xff] %v5617_v20  ;;  %7740 = vst [vmem:[#allocation187_spill] sm:$0xff] %v5619_v36 }
 0x202   :  { %1539 = vrot.lane.b32.xlu1 %v5610_v62, %s4080_s5  ;;  %1537 = vrot.lane.b32.xlu0 %v5615_v55, %s4080_s5 }
 0x204   :  { %v5635_v5 = vpop.permute.xlu1 %1315  ;;  %v5637_v20 = vpop.permute.xlu0 %1313 }
 0x205   :  { %7741 = vst [vmem:[#allocation188_spill] sm:$0xff] %v5635_v5  ;;  %7742 = vst [vmem:[#allocation189_spill] sm:$0xff] %v5637_v20  ;;  %v5664_v20 = vld [vmem:[%s7548_s0 + $0x21a] sm:$0xff] }
 0x206   :  { %1543 = vrot.lane.b32.xlu1 %v5628_v10, %s4080_s5  ;;  %1541 = vrot.lane.b32.xlu0 %v5633_v63, %s4080_s5 }
 0x208   :  { %v5653_v25 = vpop.permute.xlu1 %1319  ;;  %v5655_v5 = vpop.permute.xlu0 %1317 }
 0x209   :  { %7743 = vst [vmem:[#allocation190_spill] sm:$0xff] %v5653_v25  ;;  %7744 = vst [vmem:[#allocation191_spill] sm:$0xff] %v5655_v5  ;;  %v5682_v5 = vld [vmem:[%s7548_s0 + $0x232] sm:$0xff] }
 0x20a   :  { %1547 = vrot.lane.b32.xlu1 %v5646_v43, %s4080_s5  ;;  %1545 = vrot.lane.b32.xlu0 %v5651_v22, %s4080_s5 }
 0x20c   :  { %v5671_v26 = vpop.permute.xlu1 %1323  ;;  %v5673_v25 = vpop.permute.xlu0 %1321 }
 0x20d   :  { %7745 = vst [vmem:[#allocation192_spill] sm:$0xff] %v5671_v26  ;;  %7746 = vst [vmem:[#allocation193_spill] sm:$0xff] %v5673_v25  ;;  %v5700_v25 = vld [vmem:[%s7548_s0 + $0x24a] sm:$0xff] }
 0x20e   :  { %1551 = vrot.lane.b32.xlu1 %v5664_v20, %s4080_s5  ;;  %1549 = vrot.lane.b32.xlu0 %v5669_v37, %s4080_s5  ;;  %7749 = vst [vmem:[#allocation196_spill] sm:$0xff] %v5700_v25 }
 0x210   :  { %v5689_v36 = vpop.permute.xlu1 %1327  ;;  %v5691_v26 = vpop.permute.xlu0 %1325 }
 0x211   :  { %7747 = vst [vmem:[#allocation194_spill] sm:$0xff] %v5689_v36  ;;  %7748 = vst [vmem:[#allocation195_spill] sm:$0xff] %v5691_v26  ;;  %v5718_v26 = vld [vmem:[%s7548_s0 + $0x262] sm:$0xff] }
 0x212   :  { %1555 = vrot.lane.b32.xlu1 %v5682_v5, %s4080_s5  ;;  %1553 = vrot.lane.b32.xlu0 %v5687_v56, %s4080_s5  ;;  %7753 = vst [vmem:[#allocation200_spill] sm:$0xff] %v5718_v26 }
 0x214   :  { %v5707_v0 = vpop.permute.xlu1 %1331  ;;  %v5709_v36 = vpop.permute.xlu0 %1329 }
 0x215   :  { %7751 = vst [vmem:[#allocation198_spill] sm:$0xff] %v5707_v0  ;;  %7752 = vst [vmem:[#allocation199_spill] sm:$0xff] %v5709_v36  ;;  %v5736_v36 = vld [vmem:[%s7548_s0 + $0x27a] sm:$0xff] }
 0x216   :  { %1559 = vrot.lane.b32.xlu1 %v5700_v25, %s4080_s5  ;;  %1557 = vrot.lane.b32.xlu0 %v5705_v6, %s4080_s5  ;;  %7757 = vst [vmem:[#allocation204_spill] sm:$0xff] %v5736_v36  ;;  %v5741_v25 = vld [vmem:[%s7548_s0 + $0x272] sm:$0xff] }
 0x217   :  { %7758 = vst [vmem:[#allocation205_spill] sm:$0xff] %v5741_v25 }
 0x218   :  { %v5725_v49 = vpop.permute.xlu1 %1335  ;;  %v5727_v0 = vpop.permute.xlu0 %1333 }
 0x219   :  { %7755 = vst [vmem:[#allocation202_spill] sm:$0xff] %v5725_v49  ;;  %7756 = vst [vmem:[#allocation203_spill] sm:$0xff] %v5727_v0  ;;  %v3588_v0 = vld [vmem:[%s7548_s0 + $0x292] sm:$0xff] }
 0x21a   :  { %1563 = vrot.lane.b32.xlu1 %v5718_v26, %s4080_s5  ;;  %1561 = vrot.lane.b32.xlu0 %v5723_v16, %s4080_s5  ;;  %v3587_v26 = vld [vmem:[%s7548_s0 + $0x28a] sm:$0xff] }
 0x21c   :  { %v5743_v6 = vpop.permute.xlu1 %1339  ;;  %v5745_v49 = vpop.permute.xlu0 %1337 }
 0x21d   :  { %7759 = vst [vmem:[#allocation206_spill] sm:$0xff] %v5743_v6  ;;  %7760 = vst [vmem:[#allocation207_spill] sm:$0xff] %v5745_v49  ;;  %v3590_v6 = vld [vmem:[%s7548_s0 + $0x2aa] sm:$0xff]  ;;  %v3589_v49 = vld [vmem:[%s7548_s0 + $0x2a2] sm:$0xff] }
 0x21e   :  { %1567 = vrot.lane.b32.xlu1 %v5736_v36, %s4080_s5  ;;  %1565 = vrot.lane.b32.xlu0 %v5741_v25, %s4080_s5 }
 0x220   :  { %v5757_v16 = vpop.permute.xlu1 %1343  ;;  %v5759_v54 = vpop.permute.xlu0 %1341 }
 0x221   :  { %7761 = vst [vmem:[#allocation208_spill] sm:$0xff] %v5757_v16  ;;  %7762 = vst [vmem:[#allocation209_spill] sm:$0xff] %v5759_v54 }
 0x222   :  { %1571 = vrot.lane.b32.xlu1 %v3588_v0, %s4080_s5  ;;  %1569 = vrot.lane.b32.xlu0 %v3587_v26, %s4080_s5  ;;  %v3592_v0 = vld [vmem:[%s7548_s0 + $0x2c2] sm:$0xff]  ;;  %v3591_v26 = vld [vmem:[%s7548_s0 + $0x2ba] sm:$0xff] }
 0x224   :  { %v5769_v36 = vpop.permute.xlu1 %1347  ;;  %v5771_v25 = vpop.permute.xlu0 %1345 }
 0x225   :  { %7763 = vst [vmem:[#allocation210_spill] sm:$0xff] %v5769_v36  ;;  %7764 = vst [vmem:[#allocation211_spill] sm:$0xff] %v5771_v25 }
 0x226   :  { %1575 = vrot.lane.b32.xlu1 %v3590_v6, %s4080_s5  ;;  %1573 = vrot.lane.b32.xlu0 %v3589_v49, %s4080_s5  ;;  %v3594_v6 = vld [vmem:[%s7548_s0 + $0x2da] sm:$0xff]  ;;  %v3593_v49 = vld [vmem:[%s7548_s0 + $0x2d2] sm:$0xff] }
 0x228   :  { %v5781_v16 = vpop.permute.xlu1 %1351  ;;  %v5783_v54 = vpop.permute.xlu0 %1349 }
 0x229   :  { %7765 = vst [vmem:[#allocation212_spill] sm:$0xff] %v5781_v16  ;;  %7766 = vst [vmem:[#allocation213_spill] sm:$0xff] %v5783_v54  ;;  %v2769_v16 = vld [vmem:[%s7549_s1] sm:$0xff] }
 0x22a   :  { %1579 = vrot.lane.b32.xlu1 %v3592_v0, %s4080_s5  ;;  %1577 = vrot.lane.b32.xlu0 %v3591_v26, %s4080_s5  ;;  %v2770_v0 = vld [vmem:[%s7549_s1 + $0x8] sm:$0xff]  ;;  %v3596_v26 = vld [vmem:[%s7548_s0 + $0x38] sm:$0xff] }
 0x22c   :  { %v5793_v36 = vpop.permute.xlu1 %1355  ;;  %v5795_v25 = vpop.permute.xlu0 %1353 }
 0x22d   :  { %7767 = vst [vmem:[#allocation214_spill] sm:$0xff] %v5793_v36  ;;  %7768 = vst [vmem:[#allocation215_spill] sm:$0xff] %v5795_v25  ;;  %v3595_v36 = vld [vmem:[%s7548_s0 + $0x30] sm:$0xff]  ;;  %v3976_v25 = vpack.c.bf16 %v2770_v0, %v2769_v16  ;;  %v3624_v16 = vld [vmem:[%s7548_s0 + $0x1b8] sm:$0xff] }
 0x22e   :  { %1583 = vrot.lane.b32.xlu1 %v3594_v6, %s4080_s5  ;;  %1581 = vrot.lane.b32.xlu0 %v3593_v49, %s4080_s5  ;;  %v2771_v6 = vld [vmem:[%s7549_s1 + $0x10] sm:$0xff]  ;;  %v2772_v49 = vld [vmem:[%s7549_s1 + $0x18] sm:$0xff] }
 0x22f   :  { %3977 = vmatprep.subr.bf16.mxu0 %v3976_v25  ;;  %3984 = vmatprep.subr.bf16.mxu1 %v3976_v25  ;;  %v3623_v0 = vld [vmem:[%s7548_s0 + $0x1b0] sm:$0xff] }
 0x230   :  { %v5811_v54 = vpop.permute.xlu1 %1359  ;;  %v5813_v27 = vpop.permute.xlu0 %1357  ;;  %3979 = vmatpush3.bf16.msra.mxu0 %v3976_v25  ;;  %3987 = vmatpush3.bf16.msra.mxu1 %v3976_v25 }
 0x231   :  { %7769 = vst [vmem:[#allocation216_spill] sm:$0xff] %v5811_v54  ;;  %7770 = vst [vmem:[#allocation217_spill] sm:$0xff] %v5813_v27  ;;  %v3980_v54 = vpack.c.bf16 %v2772_v49, %v2771_v6 }
 0x232   :  { %1699 = vrot.lane.b32.xlu1 %v3596_v26, %s4081_s24  ;;  %1697 = vrot.lane.b32.xlu0 %v3595_v36, %s4081_s24  ;;  %v2773_v36 = vld [vmem:[%s7549_s1 + $0x20] sm:$0xf]  ;;  %s4083_s1 = smov 32  }
 0x233   :  { %3981 = vmatprep.subr.bf16.mxu0 %v3980_v54  ;;  %3985 = vmatprep.subr.bf16.mxu1 %v3980_v54 }
 0x234   :  { %v5829_v27 = vpop.permute.xlu1 %1475  ;;  %v5831_v26 = vpop.permute.xlu0 %1473  ;;  %3983 = vmatpush3.bf16.msra.mxu0 %v3980_v54  ;;  %3988 = vmatpush3.bf16.msra.mxu1 %v3980_v54 }
 0x235   :  { %3890 = vmatprep.subr.msk.mxu0 %vm2950_vm0, %v2773_v36  ;;  %3986 = vmatprep.subr.msk.mxu1 %vm2950_vm0, %v2773_v36 }
 0x236   :  { %1755 = vrot.lane.b32.xlu1 %v3624_v16, %s4081_s24  ;;  %1753 = vrot.lane.b32.xlu0 %v3623_v0, %s4081_s24 }
 0x238   :  { %v5838_v57 = vpop.permute.xlu1 %1479  ;;  %v5840_v25 = vpop.permute.xlu0 %1477  ;;  %3891 = vmatpush3.msk.msra.mxu0 %vm2950_vm0, %v2773_v36  ;;  %3989 = vmatpush3.msk.msra.mxu1 %vm2950_vm0, %v2773_v36 }
 0x23a   :  { %1977 = vrot.lane.b32.xlu1 %v5198_v19, %s4082_s8  ;;  %1921 = vrot.lane.b32.xlu0 %v5018_v24, %s4082_s8 }
 0x23c   :  { %v5846_v54 = vpop.permute.xlu1 %1483  ;;  %v5848_v6 = vpop.permute.xlu0 %1481 }
 0x23e   :  { %1979 = vrot.lane.b32.xlu1 %v5193_v18, %s4082_s8  ;;  %1923 = vrot.lane.b32.xlu0 %v5013_v46, %s4082_s8  ;;  %v3625_v46 = vld [vmem:[%s7548_s0 + $0x1c8] sm:$0xff] }
 0x23f   :  { %v3597_v18 = vld [vmem:[%s7548_s0 + $0x48] sm:$0xff] }
 0x240   :  { %v5854_v49 = vpop.permute.xlu1 %1487  ;;  %v5856_v16 = vpop.permute.xlu0 %1485 }
 0x242   :  { %2201 = vrot.lane.b32.xlu1 %v5597_v45, %s4083_s1  ;;  %2145 = vrot.lane.b32.xlu0 %v5393_v40, %s4083_s1 }
 0x244   :  { %v5862_v24 = vpop.permute.xlu1 %1491  ;;  %v5864_v19 = vpop.permute.xlu0 %1489 }
 0x246   :  { %2203 = vrot.lane.b32.xlu1 %v5592_v9, %s4083_s1  ;;  %2147 = vrot.lane.b32.xlu0 %v5388_v15, %s4083_s1  ;;  %v3626_v15 = vld [vmem:[%s7548_s0 + $0x1d0] sm:$0xff] }
 0x247   :  { %v3598_v9 = vld [vmem:[%s7548_s0 + $0x50] sm:$0xff] }
 0x248   :  { %v5876_v45 = vpop.permute.xlu1 %1495  ;;  %v5878_v40 = vpop.permute.xlu0 %1493 }
 0x249   :  { %7771 = vst [vmem:[#allocation218_spill] sm:$0xff] %v5876_v45  ;;  %7772 = vst [vmem:[#allocation219_spill] sm:$0xff] %v5878_v40 }
 0x24a   :  { %1757 = vrot.lane.b32.xlu1 %v3625_v46, %s4081_s24  ;;  %1701 = vrot.lane.b32.xlu0 %v3597_v18, %s4081_s24 }
 0x24c   :  { %v5888_v0 = vpop.permute.xlu1 %1499  ;;  %v5890_v36 = vpop.permute.xlu0 %1497 }
 0x24e   :  { %1759 = vrot.lane.b32.xlu1 %v3626_v15, %s4081_s24  ;;  %1703 = vrot.lane.b32.xlu0 %v3598_v9, %s4081_s24 }
 0x250   :  { %v5894_v45 = vpop.permute.xlu1 %1503  ;;  %v5896_v46 = vpop.permute.xlu0 %1501 }
 0x251   :  { %7773 = vst [vmem:[#allocation220_spill] sm:$0xff] %v5894_v45 }
 0x252   :  { %1981 = vrot.lane.b32.xlu1 %v5216_v33, %s4082_s8  ;;  %1925 = vrot.lane.b32.xlu0 %v5036_v39, %s4082_s8 }
 0x254   :  { %v5902_v18 = vpop.permute.xlu1 %1507  ;;  %v5904_v40 = vpop.permute.xlu0 %1505 }
 0x255   :  { %7774 = vst [vmem:[#allocation221_spill] sm:$0xff] %v5902_v18  ;;  %7775 = vst [vmem:[#allocation222_spill] sm:$0xff] %v5904_v40 }
 0x256   :  { %1983 = vrot.lane.b32.xlu1 %v5211_v48, %s4082_s8  ;;  %1927 = vrot.lane.b32.xlu0 %v5031_v44, %s4082_s8  ;;  %v3627_v44 = vld [vmem:[%s7548_s0 + $0x1e0] sm:$0xff] }
 0x257   :  { %v3599_v48 = vld [vmem:[%s7548_s0 + $0x60] sm:$0xff] }
 0x258   :  { %v5910_v15 = vpop.permute.xlu1 %1511  ;;  %v5912_v9 = vpop.permute.xlu0 %1509 }
 0x259   :  { %7776 = vst [vmem:[#allocation223_spill] sm:$0xff] %v5910_v15  ;;  %7777 = vst [vmem:[#allocation224_spill] sm:$0xff] %v5912_v9  ;;  %v3658_v9 = vld [vmem:[%s7548_s0 + $0x81] sm:$0xff] }
 0x25a   :  { %2205 = vrot.lane.b32.xlu1 %v5615_v55, %s4083_s1  ;;  %2149 = vrot.lane.b32.xlu0 %v5411_v31, %s4083_s1 }
 0x25c   :  { %v5918_v39 = vpop.permute.xlu1 %1515  ;;  %v5920_v33 = vpop.permute.xlu0 %1513 }
 0x25d   :  { %7778 = vst [vmem:[#allocation225_spill] sm:$0xff] %v5918_v39  ;;  %7779 = vst [vmem:[#allocation226_spill] sm:$0xff] %v5920_v33 }
 0x25e   :  { %2207 = vrot.lane.b32.xlu1 %v5610_v62, %s4083_s1  ;;  %2151 = vrot.lane.b32.xlu0 %v5406_v12, %s4083_s1  ;;  %v3628_v12 = vld [vmem:[%s7548_s0 + $0x1e8] sm:$0xff] }
 0x25f   :  { %v3600_v62 = vld [vmem:[%s7548_s0 + $0x68] sm:$0xff] }
 0x260   :  { %v5932_v55 = vpop.permute.xlu1 %1519  ;;  %v5934_v31 = vpop.permute.xlu0 %1517 }
 0x261   :  { %7780 = vst [vmem:[#allocation227_spill] sm:$0xff] %v5932_v55  ;;  %7781 = vst [vmem:[#allocation228_spill] sm:$0xff] %v5934_v31 }
 0x262   :  { %1761 = vrot.lane.b32.xlu1 %v3627_v44, %s4081_s24  ;;  %1705 = vrot.lane.b32.xlu0 %v3599_v48, %s4081_s24  ;;  %v3655_v44 = vld [vmem:[%s7548_s0 + $0x61] sm:$0xff] }
 0x264   :  { %v5944_v39 = vpop.permute.xlu1 %1523  ;;  %v5946_v33 = vpop.permute.xlu0 %1521 }
 0x265   :  { %7782 = vst [vmem:[#allocation229_spill] sm:$0xff] %v5944_v39  ;;  %7783 = vst [vmem:[#allocation230_spill] sm:$0xff] %v5946_v33  ;;  %v3656_v39 = vld [vmem:[%s7548_s0 + $0x69] sm:$0xff] }
 0x266   :  { %1763 = vrot.lane.b32.xlu1 %v3628_v12, %s4081_s24  ;;  %1707 = vrot.lane.b32.xlu0 %v3600_v62, %s4081_s24 }
 0x268   :  { %v5953_v48 = vpop.permute.xlu1 %1527  ;;  %v5955_v55 = vpop.permute.xlu0 %1525 }
 0x269   :  { %7784 = vst [vmem:[#allocation231_spill] sm:$0xff] %v5953_v48  ;;  %7785 = vst [vmem:[#allocation232_spill] sm:$0xff] %v5955_v55 }
 0x26a   :  { %1985 = vrot.lane.b32.xlu1 %v5234_v17, %s4082_s8  ;;  %1929 = vrot.lane.b32.xlu0 %v3655_v44, %s4082_s8 }
 0x26c   :  { %v5963_v12 = vpop.permute.xlu1 %1531  ;;  %v5965_v62 = vpop.permute.xlu0 %1529 }
 0x26e   :  { %1987 = vrot.lane.b32.xlu1 %v5229_v23, %s4082_s8  ;;  %1931 = vrot.lane.b32.xlu0 %v3656_v39, %s4082_s8  ;;  %v3629_v23 = vld [vmem:[%s7548_s0 + $0x1f8] sm:$0xff] }
 0x270   :  { %v5970_v48 = vpop.permute.xlu1 %1535  ;;  %v5972_v55 = vpop.permute.xlu0 %1533 }
 0x272   :  { %2209 = vrot.lane.b32.xlu1 %v5633_v63, %s4083_s1  ;;  %2153 = vrot.lane.b32.xlu0 %v5429_v35, %s4083_s1  ;;  %v3601_v63 = vld [vmem:[%s7548_s0 + $0x78] sm:$0xff] }
 0x274   :  { %v5978_v17 = vpop.permute.xlu1 %1539  ;;  %v5980_v44 = vpop.permute.xlu0 %1537 }
 0x276   :  { %2211 = vrot.lane.b32.xlu1 %v5628_v10, %s4083_s1  ;;  %2155 = vrot.lane.b32.xlu0 %v5424_v8, %s4083_s1  ;;  %v3630_v8 = vld [vmem:[%s7548_s0 + $0x200] sm:$0xff] }
 0x277   :  { %v3602_v10 = vld [vmem:[%s7548_s0 + $0x80] sm:$0xff] }
 0x278   :  { %v5992_v39 = vpop.permute.xlu1 %1543  ;;  %v5994_v35 = vpop.permute.xlu0 %1541 }
 0x27a   :  { %1765 = vrot.lane.b32.xlu1 %v3629_v23, %s4081_s24  ;;  %1709 = vrot.lane.b32.xlu0 %v3601_v63, %s4081_s24  ;;  %v3657_v23 = vld [vmem:[%s7548_s0 + $0x79] sm:$0xff] }
 0x27c   :  { %v6004_v33 = vpop.permute.xlu1 %1547  ;;  %v6006_v31 = vpop.permute.xlu0 %1545 }
 0x27e   :  { %1767 = vrot.lane.b32.xlu1 %v3630_v8, %s4081_s24  ;;  %1711 = vrot.lane.b32.xlu0 %v3602_v10, %s4081_s24 }
 0x280   :  { %v6013_v63 = vpop.permute.xlu1 %1551  ;;  %v6015_v15 = vpop.permute.xlu0 %1549 }
 0x282   :  { %1989 = vrot.lane.b32.xlu1 %v5252_v14, %s4082_s8  ;;  %1933 = vrot.lane.b32.xlu0 %v3657_v23, %s4082_s8 }
 0x284   :  { %v6023_v8 = vpop.permute.xlu1 %1555  ;;  %v6025_v10 = vpop.permute.xlu0 %1553 }
 0x286   :  { %1991 = vrot.lane.b32.xlu1 %v5247_v34, %s4082_s8  ;;  %1935 = vrot.lane.b32.xlu0 %v3658_v9, %s4082_s8  ;;  %v3631_v34 = vld [vmem:[%s7548_s0 + $0x210] sm:$0xff] }
 0x288   :  { %v6030_v18 = vpop.permute.xlu1 %1559  ;;  %v6032_v40 = vpop.permute.xlu0 %1557 }
 0x289   :  { %7786 = vst [vmem:[#allocation233_spill] sm:$0xff] %v6030_v18  ;;  %7787 = vst [vmem:[#allocation234_spill] sm:$0xff] %v6032_v40 }
 0x28a   :  { %2213 = vrot.lane.b32.xlu1 %v5651_v22, %s4083_s1  ;;  %2157 = vrot.lane.b32.xlu0 %v5447_v7, %s4083_s1  ;;  %v3603_v22 = vld [vmem:[%s7548_s0 + $0x90] sm:$0xff] }
 0x28c   :  { %v6038_v14 = vpop.permute.xlu1 %1563  ;;  %v6040_v23 = vpop.permute.xlu0 %1561 }
 0x28d   :  { %7788 = vst [vmem:[#allocation235_spill] sm:$0xff] %v6038_v14  ;;  %7789 = vst [vmem:[#allocation236_spill] sm:$0xff] %v6040_v23 }
 0x28e   :  { %2215 = vrot.lane.b32.xlu1 %v5646_v43, %s4083_s1  ;;  %2159 = vrot.lane.b32.xlu0 %v5442_v50, %s4083_s1  ;;  %v3632_v43 = vld [vmem:[%s7548_s0 + $0x218] sm:$0xff] }
 0x28f   :  { %v3604_v50 = vld [vmem:[%s7548_s0 + $0x98] sm:$0xff] }
 0x290   :  { %v6052_v9 = vpop.permute.xlu1 %1567  ;;  %v6054_v7 = vpop.permute.xlu0 %1565 }
 0x291   :  { %7790 = vst [vmem:[#allocation237_spill] sm:$0xff] %v6052_v9  ;;  %7791 = vst [vmem:[#allocation238_spill] sm:$0xff] %v6054_v7  ;;  %v44_v7 = vld [vmem:[%s7548_s0 + $0x188] sm:$0xff] }
 0x292   :  { %1769 = vrot.lane.b32.xlu1 %v3631_v34, %s4081_s24  ;;  %1713 = vrot.lane.b32.xlu0 %v3603_v22, %s4081_s24  ;;  %v3659_v34 = vld [vmem:[%s7548_s0 + $0x91] sm:$0xff] }
 0x294   :  { %v6064_v14 = vpop.permute.xlu1 %1571  ;;  %v6066_v23 = vpop.permute.xlu0 %1569 }
 0x295   :  { %7792 = vst [vmem:[#allocation239_spill] sm:$0xff] %v6064_v14  ;;  %7793 = vst [vmem:[#allocation240_spill] sm:$0xff] %v6066_v23  ;;  %v3688_v14 = vld [vmem:[%s7548_s0 + $0x219] sm:$0xff] }
 0x296   :  { %1771 = vrot.lane.b32.xlu1 %v3632_v43, %s4081_s24  ;;  %1715 = vrot.lane.b32.xlu0 %v3604_v50, %s4081_s24  ;;  %v3660_v43 = vld [vmem:[%s7548_s0 + $0x99] sm:$0xff] }
 0x298   :  { %v6073_v22 = vpop.permute.xlu1 %1575  ;;  %v6075_v9 = vpop.permute.xlu0 %1573 }
 0x299   :  { %7794 = vst [vmem:[#allocation241_spill] sm:$0xff] %v6073_v22  ;;  %7795 = vst [vmem:[#allocation242_spill] sm:$0xff] %v6075_v9 }
 0x29a   :  { %1993 = vrot.lane.b32.xlu1 %v5268_v11, %s4082_s8  ;;  %1937 = vrot.lane.b32.xlu0 %v3659_v34, %s4082_s8 }
 0x29c   :  { %v6086_v50 = vpop.permute.xlu1 %1579  ;;  %v6088_v23 = vpop.permute.xlu0 %1577 }
 0x29d   :  { %7796 = vst [vmem:[#allocation243_spill] sm:$0xff] %v6086_v50  ;;  %7797 = vst [vmem:[#allocation244_spill] sm:$0xff] %v6088_v23 }
 0x29e   :  { %1995 = vrot.lane.b32.xlu1 %v3688_v14, %s4082_s8  ;;  %1939 = vrot.lane.b32.xlu0 %v3660_v43, %s4082_s8  ;;  %v3633_v14 = vld [vmem:[%s7548_s0 + $0x228] sm:$0xff] }
 0x2a0   :  { %v6092_v22 = vpop.permute.xlu1 %1583  ;;  %v6094_v11 = vpop.permute.xlu0 %1581 }
 0x2a1   :  { %7798 = vst [vmem:[#allocation245_spill] sm:$0xff] %v6092_v22  ;;  %7799 = vst [vmem:[#allocation246_spill] sm:$0xff] %v6094_v11  ;;  %v15_v22 = vld [vmem:[%s7548_s0] sm:$0xff]  ;;  %v3606_v11 = vld [vmem:[%s7548_s0 + $0xb0] sm:$0xff] }
 0x2a2   :  { %2217 = vrot.lane.b32.xlu1 %v5669_v37, %s4083_s1  ;;  %2161 = vrot.lane.b32.xlu0 %v5465_v30, %s4083_s1  ;;  %v3605_v37 = vld [vmem:[%s7548_s0 + $0xa8] sm:$0xff] }
 0x2a4   :  { %v6100_v34 = vpop.permute.xlu1 %1699  ;;  %v1698_v9 = vpop.permute.xlu0 %1697 }
 0x2a6   :  { %2219 = vrot.lane.b32.xlu1 %v5664_v20, %s4083_s1  ;;  %2163 = vrot.lane.b32.xlu0 %v5460_v47, %s4083_s1  ;;  %v43_v20 = vld [vmem:[%s7548_s0 + $0x180] sm:$0xff]  ;;  %v3634_v47 = vld [vmem:[%s7548_s0 + $0x230] sm:$0xff] }
 0x2a7   :  { %v2342_v18 = vsel %vm2313_vm1, %v43_v20, %v4514_v53  ;;  %v3661_v53 = vld [vmem:[%s7548_s0 + $0xa9] sm:$0xff]  ;;  %v2343_v20 = vsel %vm2313_vm1, %v44_v7, %v4512_v52 }
 0x2a8   :  { %v6112_v43 = vpop.permute.xlu1 %1755  ;;  %v1754_v30 = vpop.permute.xlu0 %1753  ;;  %v2399_v40 = vsel %vm2370_vm2, %v2342_v18, %v4844_v3  ;;  %v2400_v52 = vsel %vm2370_vm2, %v2343_v20, %v4842_v32 }
 0x2aa   :  { %1773 = vrot.lane.b32.xlu1 %v3633_v14, %s4081_s24  ;;  %1717 = vrot.lane.b32.xlu0 %v3605_v37, %s4081_s24  ;;  %v16_v14 = vld [vmem:[%s7548_s0 + $0x8] sm:$0xff]  ;;  %v2314_v37 = vsel %vm2313_vm1, %v15_v22, %v4346_v61 }
 0x2ab   :  { %v2371_v45 = vsel %vm2370_vm2, %v2314_v37, %v4676_v59  ;;  %v3689_v61 = vld [vmem:[%s7548_s0 + $0x229] sm:$0xff]  ;;  %v2315_v22 = vsel %vm2313_vm1, %v16_v14, %v4358_v1  ;;  %v2456_v59 = vsel %vm2427_vm3, %v2399_v40, %v5202_v51  ;;  %v2457_v40 = vsel %vm2427_vm3, %v2400_v52, %v5200_v41  ;;  %v7801_v52 = vld [vmem:[#allocation57_spill] sm:$0xff] }
 0x2ac   :  { %v1978_v50 = vpop.permute.xlu1 %1977  ;;  %v1922_v23 = vpop.permute.xlu0 %1921  ;;  %v2513_v37 = vsel %vm2484_vm4, %v2456_v59, %v5601_v28  ;;  %v2372_v1 = vsel %vm2370_vm2, %v2315_v22, %v4674_v58  ;;  %v3635_v59 = vld [vmem:[%s7548_s0 + $0x240] sm:$0xff] }
 0x2ad   :  { %v2570_v51 = vsel %vm2541_vm5, %v2513_v37, %v5965_v62  ;;  %v2429_v28 = vsel %vm2427_vm3, %v2372_v1, %v5020_v29  ;;  %v4001_v1 = vld [vmem:[%s7548_s0 + $0x198] sm:$0xff] }
 0x2ae   :  { %1775 = vrot.lane.b32.xlu1 %v3634_v47, %s4081_s24  ;;  %1719 = vrot.lane.b32.xlu0 %v3606_v11, %s4081_s24  ;;  %v2428_v11 = vsel %vm2427_vm3, %v2371_v45, %v5022_v38  ;;  %v2627_v58 = vsel %vm2598_vm6, %v2570_v51, %v1754_v30  ;;  %v3662_v45 = vld [vmem:[%s7548_s0 + $0xb1] sm:$0xff]  ;;  %v2514_v30 = vsel %vm2484_vm4, %v2457_v40, %v5599_v4 }
 0x2af   :  { %v2485_v47 = vsel %vm2484_vm4, %v2428_v11, %v5397_v2  ;;  %v2684_v32 = vsel %vm2655_vm7, %v2627_v58, %v1978_v50  ;;  %v2571_v50 = vsel %vm2541_vm5, %v2514_v30, %v5963_v12  ;;  %v7805_v30 = vld [vmem:[#allocation5_spill] sm:$0xff] }
 0x2b0   :  { %v1980_v3 = vpop.permute.xlu1 %1979  ;;  %v1924_v18 = vpop.permute.xlu0 %1923  ;;  %v2542_v38 = vsel %vm2541_vm5, %v2485_v47, %v5831_v26  ;;  %v3690_v26 = vld [vmem:[%s7548_s0 + $0x231] sm:$0xff]  ;;  %v2628_v4 = vsel %vm2598_vm6, %v2571_v50, %v6112_v43 }
 0x2b1   :  { %v2599_v2 = vsel %vm2598_vm6, %v2542_v38, %v1698_v9  ;;  %v2486_v9 = vsel %vm2484_vm4, %v2429_v28, %v5395_v13  ;;  %v4000_v47 = vld [vmem:[%s7548_s0 + $0x18] sm:$0xff]  ;;  %v7800_v38 = vld [vmem:[#allocation31_spill] sm:$0xff] }
 0x2b2   :  { %1997 = vrot.lane.b32.xlu1 %v3689_v61, %s4082_s8  ;;  %1941 = vrot.lane.b32.xlu0 %v3661_v53, %s4082_s8  ;;  %v2656_v62 = vsel %vm2655_vm7, %v2599_v2, %v1922_v23  ;;  %v2543_v41 = vsel %vm2541_vm5, %v2486_v9, %v5829_v27  ;;  %v2685_v23 = vsel %vm2655_vm7, %v2628_v4, %v1980_v3  ;;  %v7802_v2 = vld [vmem:[#allocation83_spill] sm:$0xff]  ;;  %v4002_v9 = vld [vmem:[%s7548_s0 + $0x20] sm:$0xff] }
 0x2b3   :  { %v2600_v13 = vsel %vm2598_vm6, %v2543_v41, %v6100_v34  ;;  %v2316_v37 = vsel %vm2313_vm1, %v4000_v47, %v4344_v60  ;;  %v2344_v51 = vsel %vm2313_vm1, %v4001_v1, %v7800_v38  ;;  %v3691_v60 = vld [vmem:[%s7548_s0 + $0x241] sm:$0xff]  ;;  %v7807_v50 = vld [vmem:[#allocation187_spill] sm:$0xff]  ;;  %v7811_v47 = vld [vmem:[#allocation108_spill] sm:$0xff] }
 0x2b4   :  { %v2202_v29 = vpop.permute.xlu1 %2201  ;;  %v2146_v7 = vpop.permute.xlu0 %2145  ;;  %v2657_v27 = vsel %vm2655_vm7, %v2600_v13, %v1924_v18  ;;  %v2373_v28 = vsel %vm2370_vm2, %v2316_v37, %v7801_v52  ;;  %v2401_v58 = vsel %vm2370_vm2, %v2344_v51, %v7802_v2  ;;  %v4003_v4 = vld [vmem:[%s7548_s0 + $0x1a0] sm:$0xff]  ;;  %v7812_v1 = vld [vmem:[#allocation134_spill] sm:$0xff] }
 0x2b5   :  { %v2713_v14 = vsel %vm2712_vm8, %v2656_v62, %v2146_v7  ;;  %v2741_v61 = vsel %vm2712_vm8, %v2684_v32, %v2202_v29  ;;  %v7804_v32 = vld [vmem:[#allocation135_spill] sm:$0xff] }
 0x2b6   :  { %1999 = vrot.lane.b32.xlu1 %v3690_v26, %s4082_s8  ;;  %1943 = vrot.lane.b32.xlu0 %v3662_v45, %s4082_s8  ;;  %v3663_v26 = vld [vmem:[%s7548_s0 + $0xc1] sm:$0xff]  ;;  %v2458_v62 = vsel %vm2427_vm3, %v2401_v58, %v7804_v32 }
 0x2b7   :  { %3892 = vmatprep.mubr.msk.f32.mxu0 %vm2781_vm9, %v2713_v14  ;;  %3934 = vmatprep.mubr.msk.f32.mxu1 %vm2781_vm9, %v2741_v61  ;;  %v7803_v45 = vld [vmem:[#allocation109_spill] sm:$0xff]  ;;  %v2317_v14 = vsel %vm2313_vm1, %v4002_v9, %v7805_v30  ;;  %v2515_v13 = vsel %vm2484_vm4, %v2458_v62, %v7807_v50  ;;  %v7814_v58 = vld [vmem:[#allocation186_spill] sm:$0xff]  ;;  %v3637_v50 = vld [vmem:[%s7548_s0 + $0x258] sm:$0xff] }
 0x2b8   :  { %v2204_v53 = vpop.permute.xlu1 %2203  ;;  %v2148_v12 = vpop.permute.xlu0 %2147  ;;  %v2430_v40 = vsel %vm2427_vm3, %v2373_v28, %v7803_v45  ;;  %v7806_v61 = vld [vmem:[#allocation161_spill] sm:$0xff]  ;;  %v7813_v28 = vld [vmem:[#allocation160_spill] sm:$0xff] }
 0x2b9   :  { %v2742_v22 = vsel %vm2712_vm8, %v2685_v23, %v2204_v53  ;;  %v2714_v11 = vsel %vm2712_vm8, %v2657_v27, %v2148_v12  ;;  %v2487_v41 = vsel %vm2484_vm4, %v2430_v40, %v7806_v61  ;;  %v7808_v23 = vld [vmem:[#allocation30_spill] sm:$0xff]  ;;  %v2572_v12 = vsel %vm2541_vm5, %v2515_v13, %v5972_v55  ;;  %v3609_v13 = vld [vmem:[%s7548_s0 + $0xd8] sm:$0xff] }
 0x2ba   :  { %2221 = vrot.lane.b32.xlu1 %v5687_v56, %s4083_s1  ;;  %2165 = vrot.lane.b32.xlu0 %v5483_v42, %s4083_s1  ;;  %v3607_v56 = vld [vmem:[%s7548_s0 + $0xc0] sm:$0xff]  ;;  %v2345_v27 = vsel %vm2313_vm1, %v4003_v4, %v7808_v23  ;;  %v2544_v53 = vsel %vm2541_vm5, %v2487_v41, %v5840_v25  ;;  %v3692_v25 = vld [vmem:[%s7548_s0 + $0x249] sm:$0xff]  ;;  %v7816_v41 = vld [vmem:[#allocation196_spill] sm:$0xff] }
 0x2bb   :  { %3893 = vmatmul.mubr.msk.f32.vlgmr.msra.gmra.mrb[0].mxu0 %vm2781_vm9, %v2714_v11  ;;  %3935 = vmatmul.mubr.msk.f32.vlgmr.msra.gmra.mrb[0].mxu1 %vm2781_vm9, %v2742_v22  ;;  %v7809_v22 = vld [vmem:[#allocation56_spill] sm:$0xff]  ;;  %v3664_v55 = vld [vmem:[%s7548_s0 + $0xc9] sm:$0xff] }
 0x2bc   :  { %v1758_v34 = vpop.permute.xlu1 %1757  ;;  %v1702_v43 = vpop.permute.xlu0 %1701  ;;  %v2374_v11 = vsel %vm2370_vm2, %v2317_v14, %v7809_v22  ;;  %v3719_v62 = vld [vmem:[%s7548_s0 + $0xc2] sm:$0xff] }
 0x2bd   :  { %v2431_v37 = vsel %vm2427_vm3, %v2374_v11, %v7811_v47  ;;  %v4004_v11 = vld [vmem:[%s7548_s0 + $0x30] sm:$0xff] }
 0x2be   :  { %2223 = vrot.lane.b32.xlu1 %v5682_v5, %s4083_s1  ;;  %2167 = vrot.lane.b32.xlu0 %v5478_v21, %s4083_s1  ;;  %v3636_v5 = vld [vmem:[%s7548_s0 + $0x248] sm:$0xff]  ;;  %v2488_v2 = vsel %vm2484_vm4, %v2431_v37, %v7813_v28  ;;  %v7820_v37 = vld [vmem:[#allocation85_spill] sm:$0xff] }
 0x2bf   :  { %v3608_v21 = vld [vmem:[%s7548_s0 + $0xc8] sm:$0xff]  ;;  %v2545_v40 = vsel %vm2541_vm5, %v2488_v2, %v5838_v57 }
 0x2c0   :  { %v1760_v42 = vpop.permute.xlu1 %1759  ;;  %v1704_v3 = vpop.permute.xlu0 %1703 }
 0x2c1   :  { %v2602_v32 = vsel %vm2598_vm6, %v2545_v40, %v1704_v3  ;;  %v7815_v3 = vld [vmem:[#allocation197_spill] sm:$0xff]  ;;  %v7824_v40 = vld [vmem:[#allocation163_spill] sm:$0xff] }
 0x2c2   :  { %1777 = vrot.lane.b32.xlu1 %v3635_v59, %s4081_s24  ;;  %1721 = vrot.lane.b32.xlu0 %v3607_v56, %s4081_s24  ;;  %v7810_v59 = vld [vmem:[#allocation82_spill] sm:$0xff] }
 0x2c3   :  { %v2402_v56 = vsel %vm2370_vm2, %v2345_v27, %v7810_v59  ;;  %v3638_v27 = vld [vmem:[%s7548_s0 + $0x260] sm:$0xff]  ;;  %v7817_v59 = vld [vmem:[#allocation7_spill] sm:$0xff] }
 0x2c4   :  { %v1982_v18 = vpop.permute.xlu1 %1981  ;;  %v1926_v20 = vpop.permute.xlu0 %1925  ;;  %v2459_v38 = vsel %vm2427_vm3, %v2402_v56, %v7812_v1  ;;  %v2318_v56 = vsel %vm2313_vm1, %v4004_v11, %v7817_v59 }
 0x2c6   :  { %1779 = vrot.lane.b32.xlu1 %v3636_v5, %s4081_s24  ;;  %1723 = vrot.lane.b32.xlu0 %v3608_v21, %s4081_s24  ;;  %v2629_v5 = vsel %vm2598_vm6, %v2572_v12, %v1758_v34  ;;  %v2601_v21 = vsel %vm2598_vm6, %v2544_v53, %v1702_v43  ;;  %v3610_v53 = vld [vmem:[%s7548_s0 + $0xe0] sm:$0xff] }
 0x2c7   :  { %v2686_v51 = vsel %vm2655_vm7, %v2629_v5, %v1982_v18  ;;  %v2658_v34 = vsel %vm2655_vm7, %v2601_v21, %v1926_v20  ;;  %v4005_v5 = vld [vmem:[%s7548_s0 + $0x1b0] sm:$0xff]  ;;  %v7818_v21 = vld [vmem:[#allocation33_spill] sm:$0xff] }
 0x2c8   :  { %v1984_v29 = vpop.permute.xlu1 %1983  ;;  %v1928_v7 = vpop.permute.xlu0 %1927 }
 0x2ca   :  { %2001 = vrot.lane.b32.xlu1 %v3691_v60, %s4082_s8  ;;  %1945 = vrot.lane.b32.xlu0 %v3663_v26, %s4082_s8  ;;  %v2516_v60 = vsel %vm2484_vm4, %v2459_v38, %v7814_v58  ;;  %v3693_v38 = vld [vmem:[%s7548_s0 + $0x259] sm:$0xff] }
 0x2cb   :  { %v2573_v18 = vsel %vm2541_vm5, %v2516_v60, %v5970_v48  ;;  %v2659_v48 = vsel %vm2655_vm7, %v2602_v32, %v1928_v7  ;;  %v4006_v60 = vld [vmem:[%s7548_s0 + $0x38] sm:$0xff] }
 0x2cc   :  { %v2206_v52 = vpop.permute.xlu1 %2205  ;;  %v2150_v43 = vpop.permute.xlu0 %2149  ;;  %v2630_v20 = vsel %vm2598_vm6, %v2573_v18, %v1760_v42 }
 0x2cd   :  { %v2743_v26 = vsel %vm2712_vm8, %v2686_v51, %v2206_v52  ;;  %v2715_v45 = vsel %vm2712_vm8, %v2658_v34, %v2150_v43  ;;  %v2687_v57 = vsel %vm2655_vm7, %v2630_v20, %v1984_v29  ;;  %v3720_v29 = vld [vmem:[%s7548_s0 + $0xca] sm:$0xff]  ;;  %v3665_v51 = vld [vmem:[%s7548_s0 + $0xd9] sm:$0xff] }
 0x2ce   :  { %2003 = vrot.lane.b32.xlu1 %v3692_v25, %s4082_s8  ;;  %1947 = vrot.lane.b32.xlu0 %v3664_v55, %s4082_s8  ;;  %v2346_v25 = vsel %vm2313_vm1, %v4005_v5, %v7818_v21  ;;  %v7819_v55 = vld [vmem:[#allocation59_spill] sm:$0xff]  ;;  %v7822_v43 = vld [vmem:[#allocation137_spill] sm:$0xff]  ;;  %v7831_v5 = vld [vmem:[#allocation162_spill] sm:$0xff] }
 0x2cf   :  { %3895 = vmatprep.mubr.msk.f32.mxu0 %vm2781_vm9, %v2715_v45  ;;  %3937 = vmatprep.mubr.msk.f32.mxu1 %vm2781_vm9, %v2743_v26  ;;  %v2375_v47 = vsel %vm2370_vm2, %v2318_v56, %v7819_v55  ;;  %v2403_v1 = vsel %vm2370_vm2, %v2346_v25, %v7820_v37  ;;  %v7821_v34 = vld [vmem:[#allocation111_spill] sm:$0xff]  ;;  %v7823_v26 = vld [vmem:[#allocation6_spill] sm:$0xff]  ;;  %v7825_v20 = vld [vmem:[#allocation189_spill] sm:$0xff] }
 0x2d0   :  { %v2208_v9 = vpop.permute.xlu1 %2207  ;;  %v2152_v30 = vpop.permute.xlu0 %2151  ;;  %v2432_v52 = vsel %vm2427_vm3, %v2375_v47, %v7821_v34  ;;  %v2460_v28 = vsel %vm2427_vm3, %v2403_v1, %v7822_v43  ;;  %v2319_v45 = vsel %vm2313_vm1, %v4006_v60, %v7823_v26  ;;  %v7832_v25 = vld [vmem:[#allocation188_spill] sm:$0xff]  ;;  %v3639_v26 = vld [vmem:[%s7548_s0 + $0x270] sm:$0xff] }
 0x2d1   :  { %v2744_v14 = vsel %vm2712_vm8, %v2687_v57, %v2208_v9  ;;  %v2716_v42 = vsel %vm2712_vm8, %v2659_v48, %v2152_v30  ;;  %v2489_v18 = vsel %vm2484_vm4, %v2432_v52, %v7824_v40  ;;  %v2517_v32 = vsel %vm2484_vm4, %v2460_v28, %v7825_v20  ;;  %v7826_v57 = vld [vmem:[#allocation32_spill] sm:$0xff]  ;;  %v3722_v28 = vld [vmem:[%s7548_s0 + $0xe2] sm:$0xff] }
 0x2d2   :  { %2225 = vrot.lane.b32.xlu1 %v7815_v3, %s4083_s1  ;;  %2169 = vrot.lane.b32.xlu0 %v3719_v62, %s4083_s1  ;;  %v4007_v62 = vld [vmem:[%s7548_s0 + $0x1b8] sm:$0xff]  ;;  %v2546_v9 = vsel %vm2541_vm5, %v2489_v18, %v5848_v6  ;;  %v2574_v30 = vsel %vm2541_vm5, %v2517_v32, %v5980_v44  ;;  %v3694_v6 = vld [vmem:[%s7548_s0 + $0x261] sm:$0xff] }
 0x2d3   :  { %3896 = vmatmul.mubr.msk.f32.gmra.mrb[2].mxu0 %vm2781_vm9, %v2716_v42  ;;  %3938 = vmatmul.mubr.msk.f32.gmra.mrb[2].mxu1 %vm2781_vm9, %v2744_v14  ;;  %v2347_v48 = vsel %vm2313_vm1, %v4007_v62, %v7826_v57  ;;  %v7827_v14 = vld [vmem:[#allocation58_spill] sm:$0xff]  ;;  %v7828_v3 = vld [vmem:[#allocation84_spill] sm:$0xff] }
 0x2d4   :  { %v1762_v7 = vpop.permute.xlu1 %1761  ;;  %v1706_v61 = vpop.permute.xlu0 %1705  ;;  %v2376_v42 = vsel %vm2370_vm2, %v2319_v45, %v7827_v14  ;;  %v3666_v44 = vld [vmem:[%s7548_s0 + $0xe1] sm:$0xff]  ;;  %v7834_v60 = vld [vmem:[#allocation200_spill] sm:$0xff]  ;;  %v3611_v45 = vld [vmem:[%s7548_s0 + $0xf0] sm:$0xff] }
 0x2d5   :  { %v3640_v20 = vld [vmem:[%s7548_s0 + $0x278] sm:$0xff]  ;;  %v4009_v14 = vld [vmem:[%s7548_s0 + $0x1c8] sm:$0xff] }
 0x2d6   :  { %2227 = vrot.lane.b32.xlu1 %v7816_v41, %s4083_s1  ;;  %2171 = vrot.lane.b32.xlu0 %v3720_v29, %s4083_s1  ;;  %v2404_v29 = vsel %vm2370_vm2, %v2347_v48, %v7828_v3  ;;  %v2631_v41 = vsel %vm2598_vm6, %v2574_v30, %v1762_v7  ;;  %v3612_v32 = vld [vmem:[%s7548_s0 + $0xf8] sm:$0xff]  ;;  %v4008_v48 = vld [vmem:[%s7548_s0 + $0x48] sm:$0xff] }
 0x2d8   :  { %v1764_v4 = vpop.permute.xlu1 %1763  ;;  %v1708_v23 = vpop.permute.xlu0 %1707 }
 0x2da   :  { %1781 = vrot.lane.b32.xlu1 %v3637_v50, %s4081_s24  ;;  %1725 = vrot.lane.b32.xlu0 %v3609_v13, %s4081_s24  ;;  %v2603_v50 = vsel %vm2598_vm6, %v2546_v9, %v1706_v61  ;;  %v7829_v13 = vld [vmem:[#allocation110_spill] sm:$0xff]  ;;  %v7835_v9 = vld [vmem:[#allocation9_spill] sm:$0xff] }
 0x2db   :  { %v2320_v30 = vsel %vm2313_vm1, %v4008_v48, %v7835_v9  ;;  %v7850_v9 = vld [vmem:[#allocation190_spill] sm:$0xff] }
 0x2dc   :  { %v1986_v12 = vpop.permute.xlu1 %1985  ;;  %v1930_v22 = vpop.permute.xlu0 %1929 }
 0x2dd   :  { %v2688_v59 = vsel %vm2655_vm7, %v2631_v41, %v1986_v12  ;;  %v2660_v7 = vsel %vm2655_vm7, %v2603_v50, %v1930_v22  ;;  %v7838_v50 = vld [vmem:[#allocation87_spill] sm:$0xff] }
 0x2de   :  { %1783 = vrot.lane.b32.xlu1 %v3638_v27, %s4081_s24  ;;  %1727 = vrot.lane.b32.xlu0 %v3610_v53, %s4081_s24  ;;  %v2433_v27 = vsel %vm2427_vm3, %v2376_v42, %v7829_v13  ;;  %v7830_v53 = vld [vmem:[#allocation136_spill] sm:$0xff]  ;;  %v7836_v42 = vld [vmem:[#allocation35_spill] sm:$0xff] }
 0x2df   :  { %v2461_v11 = vsel %vm2427_vm3, %v2404_v29, %v7830_v53  ;;  %v2490_v21 = vsel %vm2484_vm4, %v2433_v27, %v7831_v5  ;;  %v2348_v3 = vsel %vm2313_vm1, %v4009_v14, %v7836_v42  ;;  %v7837_v29 = vld [vmem:[#allocation61_spill] sm:$0xff]  ;;  %v3667_v13 = vld [vmem:[%s7548_s0 + $0xf1] sm:$0xff] }
 0x2e0   :  { %v1988_v2 = vpop.permute.xlu1 %1987  ;;  %v1932_v58 = vpop.permute.xlu0 %1931  ;;  %v2518_v55 = vsel %vm2484_vm4, %v2461_v11, %v7832_v25  ;;  %v2547_v1 = vsel %vm2541_vm5, %v2490_v21, %v5846_v54  ;;  %v2377_v41 = vsel %vm2370_vm2, %v2320_v30, %v7837_v29  ;;  %v7839_v27 = vld [vmem:[#allocation113_spill] sm:$0xff]  ;;  %v7840_v11 = vld [vmem:[#allocation139_spill] sm:$0xff]  ;;  %v7841_v5 = vld [vmem:[#allocation8_spill] sm:$0xff] }
 0x2e1   :  { %v2575_v12 = vsel %vm2541_vm5, %v2518_v55, %v5978_v17  ;;  %v2434_v53 = vsel %vm2427_vm3, %v2377_v41, %v7839_v27  ;;  %v7842_v25 = vld [vmem:[#allocation165_spill] sm:$0xff]  ;;  %v3723_v41 = vld [vmem:[%s7548_s0 + $0xf2] sm:$0xff] }
 0x2e2   :  { %2005 = vrot.lane.b32.xlu1 %v3693_v38, %s4082_s8  ;;  %1949 = vrot.lane.b32.xlu0 %v3665_v51, %s4082_s8  ;;  %v2632_v22 = vsel %vm2598_vm6, %v2575_v12, %v1764_v4  ;;  %v2604_v38 = vsel %vm2598_vm6, %v2547_v1, %v1708_v23  ;;  %v3721_v51 = vld [vmem:[%s7548_s0 + $0xda] sm:$0xff]  ;;  %v2491_v55 = vsel %vm2484_vm4, %v2434_v53, %v7842_v25  ;;  %v4011_v1 = vld [vmem:[%s7548_s0 + $0x1d0] sm:$0xff]  ;;  %v7844_v12 = vld [vmem:[#allocation34_spill] sm:$0xff] }
 0x2e3   :  { %v2689_v54 = vsel %vm2655_vm7, %v2632_v22, %v1988_v2  ;;  %v2661_v17 = vsel %vm2655_vm7, %v2604_v38, %v1932_v58  ;;  %v7833_v23 = vld [vmem:[#allocation201_spill] sm:$0xff]  ;;  %v2349_v22 = vsel %vm2313_vm1, %v4011_v1, %v7844_v12  ;;  %v2548_v38 = vsel %vm2541_vm5, %v2491_v55, %v5856_v16 }
 0x2e4   :  { %v2210_v56 = vpop.permute.xlu1 %2209  ;;  %v2154_v61 = vpop.permute.xlu0 %2153  ;;  %v3696_v16 = vld [vmem:[%s7548_s0 + $0x279] sm:$0xff] }
 0x2e5   :  { %v2745_v47 = vsel %vm2712_vm8, %v2688_v59, %v2210_v56  ;;  %v2717_v37 = vsel %vm2712_vm8, %v2660_v7, %v2154_v61  ;;  %v4010_v61 = vld [vmem:[%s7548_s0 + $0x50] sm:$0xff]  ;;  %v4013_v12 = vld [vmem:[%s7548_s0 + $0x1e0] sm:$0xff] }
 0x2e6   :  { %2007 = vrot.lane.b32.xlu1 %v3694_v6, %s4082_s8  ;;  %1951 = vrot.lane.b32.xlu0 %v3666_v44, %s4082_s8  ;;  %v2405_v6 = vsel %vm2370_vm2, %v2348_v3, %v7838_v50  ;;  %v3695_v44 = vld [vmem:[%s7548_s0 + $0x271] sm:$0xff]  ;;  %v2321_v21 = vsel %vm2313_vm1, %v4010_v61, %v7841_v5 }
 0x2e7   :  { %3898 = vmatprep.mubr.msk.f32.mxu0 %vm2781_vm9, %v2717_v37  ;;  %3940 = vmatprep.mubr.msk.f32.mxu1 %vm2781_vm9, %v2745_v47  ;;  %v2462_v59 = vsel %vm2427_vm3, %v2405_v6, %v7840_v11  ;;  %v7843_v47 = vld [vmem:[#allocation191_spill] sm:$0xff]  ;;  %v7852_v11 = vld [vmem:[#allocation204_spill] sm:$0xff] }
 0x2e8   :  { %v2212_v34 = vpop.permute.xlu1 %2211  ;;  %v2156_v52 = vpop.permute.xlu0 %2155  ;;  %v2519_v37 = vsel %vm2484_vm4, %v2462_v59, %v7843_v47  ;;  %v3641_v59 = vld [vmem:[%s7548_s0 + $0x288] sm:$0xff]  ;;  %v3642_v5 = vld [vmem:[%s7548_s0 + $0x290] sm:$0xff]  ;;  %v4012_v47 = vld [vmem:[%s7548_s0 + $0x60] sm:$0xff] }
 0x2e9   :  { %v2746_v43 = vsel %vm2712_vm8, %v2689_v54, %v2212_v34  ;;  %v2718_v4 = vsel %vm2712_vm8, %v2661_v17, %v2156_v52  ;;  %v7845_v54 = vld [vmem:[#allocation60_spill] sm:$0xff]  ;;  %v7846_v34 = vld [vmem:[#allocation86_spill] sm:$0xff] }
 0x2ea   :  { %2229 = vrot.lane.b32.xlu1 %v7833_v23, %s4083_s1  ;;  %2173 = vrot.lane.b32.xlu0 %v3721_v51, %s4083_s1  ;;  %v2576_v51 = vsel %vm2541_vm5, %v2519_v37, %v5994_v35  ;;  %v2378_v17 = vsel %vm2370_vm2, %v2321_v21, %v7845_v54  ;;  %v2406_v52 = vsel %vm2370_vm2, %v2349_v22, %v7846_v34  ;;  %v3668_v35 = vld [vmem:[%s7548_s0 + $0xf9] sm:$0xff]  ;;  %v3614_v21 = vld [vmem:[%s7548_s0 + $0x110] sm:$0xff] }
 0x2eb   :  { %3899 = vmatmul.mubr.msk.f32.gmra.mrb[4].mxu0 %vm2781_vm9, %v2718_v4  ;;  %3941 = vmatmul.mubr.msk.f32.gmra.mrb[4].mxu1 %vm2781_vm9, %v2746_v43  ;;  %v7847_v23 = vld [vmem:[#allocation112_spill] sm:$0xff]  ;;  %v7853_v37 = vld [vmem:[#allocation11_spill] sm:$0xff]  ;;  %v7854_v22 = vld [vmem:[#allocation37_spill] sm:$0xff] }
 0x2ec   :  { %v1766_v2 = vpop.permute.xlu1 %1765  ;;  %v1710_v58 = vpop.permute.xlu0 %1709  ;;  %v2322_v1 = vsel %vm2313_vm1, %v4012_v47, %v7853_v37 }
 0x2ed   :  { %v2633_v43 = vsel %vm2598_vm6, %v2576_v51, %v1766_v2  ;;  %v2605_v4 = vsel %vm2598_vm6, %v2548_v38, %v1710_v58  ;;  %v2350_v38 = vsel %vm2313_vm1, %v4013_v12, %v7854_v22  ;;  %v7855_v51 = vld [vmem:[#allocation63_spill] sm:$0xff] }
 0x2ee   :  { %2231 = vrot.lane.b32.xlu1 %v7834_v60, %s4083_s1  ;;  %2175 = vrot.lane.b32.xlu0 %v3722_v28, %s4083_s1  ;;  %v2435_v28 = vsel %vm2427_vm3, %v2378_v17, %v7847_v23  ;;  %v7848_v60 = vld [vmem:[#allocation138_spill] sm:$0xff]  ;;  %v2379_v54 = vsel %vm2370_vm2, %v2322_v1, %v7855_v51  ;;  %v7856_v17 = vld [vmem:[#allocation89_spill] sm:$0xff] }
 0x2ef   :  { %v2407_v34 = vsel %vm2370_vm2, %v2350_v38, %v7856_v17  ;;  %v3753_v12 = vld [vmem:[%s7548_s0 + $0x28a] sm:$0xff]  ;;  %v3726_v17 = vld [vmem:[%s7548_s0 + $0x112] sm:$0xff] }
 0x2f0   :  { %v1768_v40 = vpop.permute.xlu1 %1767  ;;  %v1712_v18 = vpop.permute.xlu0 %1711 }
 0x2f2   :  { %1785 = vrot.lane.b32.xlu1 %v3639_v26, %s4081_s24  ;;  %1729 = vrot.lane.b32.xlu0 %v3611_v45, %s4081_s24  ;;  %v2463_v26 = vsel %vm2427_vm3, %v2406_v52, %v7848_v60  ;;  %v3697_v52 = vld [vmem:[%s7548_s0 + $0x289] sm:$0xff] }
 0x2f3   :  { %v2520_v30 = vsel %vm2484_vm4, %v2463_v26, %v7850_v9  ;;  %v4014_v26 = vld [vmem:[%s7548_s0 + $0x68] sm:$0xff] }
 0x2f4   :  { %v1990_v62 = vpop.permute.xlu1 %1989  ;;  %v1934_v57 = vpop.permute.xlu0 %1933  ;;  %v4015_v9 = vld [vmem:[%s7548_s0 + $0x1e8] sm:$0xff] }
 0x2f5   :  { %v2690_v45 = vsel %vm2655_vm7, %v2633_v43, %v1990_v62  ;;  %v2662_v2 = vsel %vm2655_vm7, %v2605_v4, %v1934_v57  ;;  %v2577_v62 = vsel %vm2541_vm5, %v2520_v30, %v5992_v39  ;;  %v3669_v43 = vld [vmem:[%s7548_s0 + $0x109] sm:$0xff]  ;;  %v7862_v30 = vld [vmem:[#allocation36_spill] sm:$0xff] }
 0x2f6   :  { %1787 = vrot.lane.b32.xlu1 %v3640_v20, %s4081_s24  ;;  %1731 = vrot.lane.b32.xlu0 %v3612_v32, %s4081_s24  ;;  %v7849_v32 = vld [vmem:[#allocation164_spill] sm:$0xff]  ;;  %v2634_v57 = vsel %vm2598_vm6, %v2577_v62, %v1768_v40  ;;  %v7857_v4 = vld [vmem:[#allocation115_spill] sm:$0xff]  ;;  %v7863_v62 = vld [vmem:[#allocation62_spill] sm:$0xff] }
 0x2f7   :  { %v2492_v48 = vsel %vm2484_vm4, %v2435_v28, %v7849_v32  ;;  %v7861_v32 = vld [vmem:[#allocation193_spill] sm:$0xff] }
 0x2f8   :  { %v1992_v7 = vpop.permute.xlu1 %1991  ;;  %v1936_v56 = vpop.permute.xlu0 %1935  ;;  %v2549_v3 = vsel %vm2541_vm5, %v2492_v48, %v5854_v49 }
 0x2f9   :  { %v2606_v29 = vsel %vm2598_vm6, %v2549_v3, %v1712_v18  ;;  %v2691_v49 = vsel %vm2655_vm7, %v2634_v57, %v1992_v7  ;;  %v7851_v18 = vld [vmem:[#allocation205_spill] sm:$0xff]  ;;  %v3613_v7 = vld [vmem:[%s7548_s0 + $0x108] sm:$0xff] }
 0x2fa   :  { %2009 = vrot.lane.b32.xlu1 %v3695_v44, %s4082_s8  ;;  %1953 = vrot.lane.b32.xlu0 %v3667_v13, %s4082_s8  ;;  %v2663_v39 = vsel %vm2655_vm7, %v2606_v29, %v1936_v56  ;;  %v3724_v13 = vld [vmem:[%s7548_s0 + $0xfa] sm:$0xff] }
 0x2fb   :  { %v7864_v29 = vld [vmem:[#allocation88_spill] sm:$0xff] }
 0x2fc   :  { %v2214_v20 = vpop.permute.xlu1 %2213  ;;  %v2158_v58 = vpop.permute.xlu0 %2157 }
 0x2fd   :  { %v2747_v14 = vsel %vm2712_vm8, %v2690_v45, %v2214_v20  ;;  %v2719_v42 = vsel %vm2712_vm8, %v2662_v2, %v2158_v58  ;;  %v7859_v45 = vld [vmem:[#allocation10_spill] sm:$0xff]  ;;  %v7860_v20 = vld [vmem:[#allocation167_spill] sm:$0xff] }
 0x2fe   :  { %2011 = vrot.lane.b32.xlu1 %v3696_v16, %s4082_s8  ;;  %1955 = vrot.lane.b32.xlu0 %v3668_v35, %s4082_s8  ;;  %v2436_v16 = vsel %vm2427_vm3, %v2379_v54, %v7857_v4  ;;  %v7858_v35 = vld [vmem:[#allocation141_spill] sm:$0xff]  ;;  %v2323_v2 = vsel %vm2313_vm1, %v4014_v26, %v7859_v45  ;;  %v3754_v54 = vld [vmem:[%s7548_s0 + $0x292] sm:$0xff] }
 0x2ff   :  { %3901 = vmatprep.mubr.msk.f32.mxu0 %vm2781_vm9, %v2719_v42  ;;  %3943 = vmatprep.mubr.msk.f32.mxu1 %vm2781_vm9, %v2747_v14  ;;  %v2464_v23 = vsel %vm2427_vm3, %v2407_v34, %v7858_v35  ;;  %v2493_v58 = vsel %vm2484_vm4, %v2436_v16, %v7860_v20  ;;  %v2351_v14 = vsel %vm2313_vm1, %v4015_v9, %v7862_v30  ;;  %v3615_v4 = vld [vmem:[%s7548_s0 + $0x120] sm:$0xff]  ;;  %v4016_v45 = vld [vmem:[%s7548_s0 + $0x78] sm:$0xff] }
 0x300   :  { %v2216_v50 = vpop.permute.xlu1 %2215  ;;  %v2160_v6 = vpop.permute.xlu0 %2159  ;;  %v2521_v48 = vsel %vm2484_vm4, %v2464_v23, %v7861_v32  ;;  %v2550_v42 = vsel %vm2541_vm5, %v2493_v58, %v5864_v19  ;;  %v2380_v57 = vsel %vm2370_vm2, %v2323_v2, %v7863_v62  ;;  %v3698_v19 = vld [vmem:[%s7548_s0 + $0x291] sm:$0xff]  ;;  %v3644_v23 = vld [vmem:[%s7548_s0 + $0x2a8] sm:$0xff]  ;;  %v7869_v2 = vld [vmem:[#allocation13_spill] sm:$0xff] }
 0x301   :  { %v2748_v44 = vsel %vm2712_vm8, %v2691_v49, %v2216_v50  ;;  %v2720_v40 = vsel %vm2712_vm8, %v2663_v39, %v2160_v6  ;;  %v2578_v3 = vsel %vm2541_vm5, %v2521_v48, %v6006_v31  ;;  %v3670_v31 = vld [vmem:[%s7548_s0 + $0x111] sm:$0xff]  ;;  %v7865_v50 = vld [vmem:[#allocation114_spill] sm:$0xff]  ;;  %v2324_v20 = vsel %vm2313_vm1, %v4016_v45, %v7869_v2  ;;  %v7871_v9 = vld [vmem:[#allocation65_spill] sm:$0xff] }
 0x302   :  { %2233 = vrot.lane.b32.xlu1 %v7851_v18, %s4083_s1  ;;  %2177 = vrot.lane.b32.xlu0 %v3723_v41, %s4083_s1  ;;  %v2408_v41 = vsel %vm2370_vm2, %v2351_v14, %v7864_v29  ;;  %v2437_v6 = vsel %vm2427_vm3, %v2380_v57, %v7865_v50  ;;  %v4017_v58 = vld [vmem:[%s7548_s0 + $0x1f8] sm:$0xff]  ;;  %v7870_v32 = vld [vmem:[#allocation39_spill] sm:$0xff]  ;;  %v2381_v30 = vsel %vm2370_vm2, %v2324_v20, %v7871_v9  ;;  %v3671_v62 = vld [vmem:[%s7548_s0 + $0x121] sm:$0xff] }
 0x303   :  { %3902 = vmatmul.mubr.msk.f32.gmra.mrb[6].mxu0 %vm2781_vm9, %v2720_v40  ;;  %3944 = vmatmul.mubr.msk.f32.gmra.mrb[6].mxu1 %vm2781_vm9, %v2748_v44  ;;  %v7866_v44 = vld [vmem:[#allocation140_spill] sm:$0xff]  ;;  %v2352_v48 = vsel %vm2313_vm1, %v4017_v58, %v7870_v32  ;;  %v7872_v14 = vld [vmem:[#allocation91_spill] sm:$0xff]  ;;  %v7873_v57 = vld [vmem:[#allocation117_spill] sm:$0xff] }
 0x304   :  { %v1770_v27 = vpop.permute.xlu1 %1769  ;;  %v1714_v53 = vpop.permute.xlu0 %1713  ;;  %v2465_v40 = vsel %vm2427_vm3, %v2408_v41, %v7866_v44  ;;  %v2438_v29 = vsel %vm2427_vm3, %v2381_v30, %v7873_v57  ;;  %v7874_v41 = vld [vmem:[#allocation143_spill] sm:$0xff]  ;;  %v7875_v50 = vld [vmem:[#allocation12_spill] sm:$0xff]  ;;  %v7876_v44 = vld [vmem:[#allocation169_spill] sm:$0xff] }
 0x305   :  { %v2635_v49 = vsel %vm2598_vm6, %v2578_v3, %v1770_v27  ;;  %v2607_v39 = vsel %vm2598_vm6, %v2550_v42, %v1714_v53  ;;  %v2409_v42 = vsel %vm2370_vm2, %v2352_v48, %v7872_v14  ;;  %v3699_v3 = vld [vmem:[%s7548_s0 + $0x2a1] sm:$0xff]  ;;  %v3756_v30 = vld [vmem:[%s7548_s0 + $0x2aa] sm:$0xff]  ;;  %v3617_v57 = vld [vmem:[%s7548_s0 + $0x138] sm:$0xff] }
 0x306   :  { %2235 = vrot.lane.b32.xlu1 %v7852_v11, %s4083_s1  ;;  %2179 = vrot.lane.b32.xlu0 %v3724_v13, %s4083_s1  ;;  %v7867_v11 = vld [vmem:[#allocation166_spill] sm:$0xff] }
 0x307   :  { %v3755_v20 = vld [vmem:[%s7548_s0 + $0x2a2] sm:$0xff]  ;;  %v3728_v14 = vld [vmem:[%s7548_s0 + $0x12a] sm:$0xff] }
 0x308   :  { %v1772_v56 = vpop.permute.xlu1 %1771  ;;  %v1716_v61 = vpop.permute.xlu0 %1715 }
 0x30a   :  { %1789 = vrot.lane.b32.xlu1 %v3641_v59, %s4081_s24  ;;  %1733 = vrot.lane.b32.xlu0 %v3613_v7, %s4081_s24  ;;  %v2494_v59 = vsel %vm2484_vm4, %v2437_v6, %v7867_v11  ;;  %v7868_v7 = vld [vmem:[#allocation192_spill] sm:$0xff] }
 0x30b   :  { %v2551_v37 = vsel %vm2541_vm5, %v2494_v59, %v5862_v24  ;;  %v3725_v24 = vld [vmem:[%s7548_s0 + $0x10a] sm:$0xff] }
 0x30c   :  { %v1994_v25 = vpop.permute.xlu1 %1993  ;;  %v1938_v55 = vpop.permute.xlu0 %1937  ;;  %v2608_v1 = vsel %vm2598_vm6, %v2551_v37, %v1716_v61  ;;  %v7879_v59 = vld [vmem:[#allocation219_spill] sm:$0xff]  ;;  %v7881_v37 = vld [vmem:[#allocation90_spill] sm:$0xff] }
 0x30d   :  { %v2692_v18 = vsel %vm2655_vm7, %v2635_v49, %v1994_v25  ;;  %v2664_v13 = vsel %vm2655_vm7, %v2607_v39, %v1938_v55  ;;  %v2466_v49 = vsel %vm2427_vm3, %v2409_v42, %v7874_v41 }
 0x30e   :  { %1791 = vrot.lane.b32.xlu1 %v3642_v5, %s4081_s24  ;;  %1735 = vrot.lane.b32.xlu0 %v3614_v21, %s4081_s24  ;;  %v2522_v5 = vsel %vm2484_vm4, %v2465_v40, %v7868_v7  ;;  %v2495_v40 = vsel %vm2484_vm4, %v2438_v29, %v7876_v44 }
 0x30f   :  { %v2579_v25 = vsel %vm2541_vm5, %v2522_v5, %v6004_v33  ;;  %v2552_v7 = vsel %vm2541_vm5, %v2495_v40, %v7879_v59  ;;  %v4021_v40 = vld [vmem:[%s7548_s0 + $0x210] sm:$0xff] }
 0x310   :  { %v1996_v28 = vpop.permute.xlu1 %1995  ;;  %v1940_v60 = vpop.permute.xlu0 %1939  ;;  %v2636_v55 = vsel %vm2598_vm6, %v2579_v25, %v1772_v56 }
 0x311   :  { %v2693_v33 = vsel %vm2655_vm7, %v2636_v55, %v1996_v28  ;;  %v2665_v22 = vsel %vm2655_vm7, %v2608_v1, %v1940_v60  ;;  %v3616_v28 = vld [vmem:[%s7548_s0 + $0x128] sm:$0xff] }
 0x312   :  { %2013 = vrot.lane.b32.xlu1 %v3697_v52, %s4082_s8  ;;  %1957 = vrot.lane.b32.xlu0 %v3669_v43, %s4082_s8  ;;  %v3643_v43 = vld [vmem:[%s7548_s0 + $0x2a0] sm:$0xff] }
 0x314   :  { %v2218_v27 = vpop.permute.xlu1 %2217  ;;  %v2162_v53 = vpop.permute.xlu0 %2161 }
 0x315   :  { %v2749_v21 = vsel %vm2712_vm8, %v2692_v18, %v2218_v27  ;;  %v2721_v47 = vsel %vm2712_vm8, %v2664_v13, %v2162_v53  ;;  %v7877_v18 = vld [vmem:[#allocation195_spill] sm:$0xff]  ;;  %v4019_v27 = vld [vmem:[%s7548_s0 + $0x200] sm:$0xff]  ;;  %v7878_v53 = vld [vmem:[#allocation38_spill] sm:$0xff] }
 0x316   :  { %2015 = vrot.lane.b32.xlu1 %v3698_v19, %s4082_s8  ;;  %1959 = vrot.lane.b32.xlu0 %v3670_v31, %s4082_s8  ;;  %v4018_v31 = vld [vmem:[%s7548_s0 + $0x80] sm:$0xff]  ;;  %v2523_v13 = vsel %vm2484_vm4, %v2466_v49, %v7877_v18  ;;  %v2353_v11 = vsel %vm2313_vm1, %v4019_v27, %v7878_v53  ;;  %v7889_v27 = vld [vmem:[#allocation67_spill] sm:$0xff] }
 0x317   :  { %3904 = vmatprep.mubr.msk.f32.mxu0 %vm2781_vm9, %v2721_v47  ;;  %3946 = vmatprep.mubr.msk.f32.mxu1 %vm2781_vm9, %v2749_v21  ;;  %v2325_v6 = vsel %vm2313_vm1, %v4018_v31, %v7875_v50  ;;  %v2580_v5 = vsel %vm2541_vm5, %v2523_v13, %v6015_v15  ;;  %v7880_v21 = vld [vmem:[#allocation64_spill] sm:$0xff]  ;;  %v2410_v25 = vsel %vm2370_vm2, %v2353_v11, %v7881_v37  ;;  %v3672_v15 = vld [vmem:[%s7548_s0 + $0x129] sm:$0xff]  ;;  %v3646_v49 = vld [vmem:[%s7548_s0 + $0x2c0] sm:$0xff] }
 0x318   :  { %v2220_v38 = vpop.permute.xlu1 %2219  ;;  %v2164_v56 = vpop.permute.xlu0 %2163  ;;  %v2382_v47 = vsel %vm2370_vm2, %v2325_v6, %v7880_v21  ;;  %v4020_v50 = vld [vmem:[%s7548_s0 + $0x90] sm:$0xff]  ;;  %v7888_v18 = vld [vmem:[#allocation41_spill] sm:$0xff] }
 0x319   :  { %v2750_v61 = vsel %vm2712_vm8, %v2693_v33, %v2220_v38  ;;  %v2722_v51 = vsel %vm2712_vm8, %v2665_v22, %v2164_v56  ;;  %v7883_v22 = vld [vmem:[#allocation142_spill] sm:$0xff]  ;;  %v7887_v6 = vld [vmem:[#allocation15_spill] sm:$0xff]  ;;  %v2354_v13 = vsel %vm2313_vm1, %v4021_v40, %v7888_v18  ;;  %v7890_v11 = vld [vmem:[#allocation93_spill] sm:$0xff] }
 0x31a   :  { %2237 = vrot.lane.b32.xlu1 %v3753_v12, %s4083_s1  ;;  %2181 = vrot.lane.b32.xlu0 %v3725_v24, %s4083_s1  ;;  %v3700_v12 = vld [vmem:[%s7548_s0 + $0x2a9] sm:$0xff]  ;;  %v7882_v24 = vld [vmem:[#allocation116_spill] sm:$0xff]  ;;  %v2467_v38 = vsel %vm2427_vm3, %v2410_v25, %v7883_v22  ;;  %v2326_v44 = vsel %vm2313_vm1, %v4020_v50, %v7887_v6  ;;  %v2411_v59 = vsel %vm2370_vm2, %v2354_v13, %v7890_v11  ;;  %v7892_v37 = vld [vmem:[#allocation145_spill] sm:$0xff] }
 0x31b   :  { %3905 = vmatmul.mubr.msk.f32.gmra.mrb[8].mxu0 %vm2781_vm9, %v2722_v51  ;;  %3947 = vmatmul.mubr.msk.f32.gmra.mrb[8].mxu1 %vm2781_vm9, %v2750_v61  ;;  %v2439_v33 = vsel %vm2427_vm3, %v2382_v47, %v7882_v24  ;;  %v2383_v53 = vsel %vm2370_vm2, %v2326_v44, %v7889_v27  ;;  %v7891_v21 = vld [vmem:[#allocation119_spill] sm:$0xff]  ;;  %v2468_v25 = vsel %vm2427_vm3, %v2411_v59, %v7892_v37  ;;  %v3758_v6 = vld [vmem:[%s7548_s0 + $0x2c2] sm:$0xff]  ;;  %v3648_v59 = vld [vmem:[%s7548_s0 + $0x2d8] sm:$0xff] }
 0x31c   :  { %v1774_v34 = vpop.permute.xlu1 %1773  ;;  %v1718_v52 = vpop.permute.xlu0 %1717  ;;  %v2440_v47 = vsel %vm2427_vm3, %v2383_v53, %v7891_v21  ;;  %v3730_v44 = vld [vmem:[%s7548_s0 + $0x142] sm:$0xff]  ;;  %v3647_v13 = vld [vmem:[%s7548_s0 + $0x2d0] sm:$0xff] }
 0x31d   :  { %v2637_v55 = vsel %vm2598_vm6, %v2580_v5, %v1774_v34  ;;  %v2609_v1 = vsel %vm2598_vm6, %v2552_v7, %v1718_v52  ;;  %v7885_v52 = vld [vmem:[#allocation194_spill] sm:$0xff]  ;;  %v3701_v7 = vld [vmem:[%s7548_s0 + $0x2b9] sm:$0xff]  ;;  %v3619_v27 = vld [vmem:[%s7548_s0 + $0x150] sm:$0xff] }
 0x31e   :  { %2239 = vrot.lane.b32.xlu1 %v3754_v54, %s4083_s1  ;;  %2183 = vrot.lane.b32.xlu0 %v3726_v17, %s4083_s1  ;;  %v7884_v17 = vld [vmem:[#allocation168_spill] sm:$0xff]  ;;  %v7903_v37 = vld [vmem:[#allocation17_spill] sm:$0xff] }
 0x31f   :  { %v2496_v34 = vsel %vm2484_vm4, %v2439_v33, %v7884_v17  ;;  %v3673_v5 = vld [vmem:[%s7548_s0 + $0x139] sm:$0xff]  ;;  %v7894_v33 = vld [vmem:[#allocation171_spill] sm:$0xff] }
 0x320   :  { %v1776_v16 = vpop.permute.xlu1 %1775  ;;  %v1720_v35 = vpop.permute.xlu0 %1719  ;;  %v2497_v22 = vsel %vm2484_vm4, %v2440_v47, %v7894_v33  ;;  %v4024_v47 = vld [vmem:[%s7548_s0 + $0xa8] sm:$0xff]  ;;  %v7906_v33 = vld [vmem:[#allocation95_spill] sm:$0xff] }
 0x321   :  { %v2554_v17 = vsel %vm2541_vm5, %v2497_v22, %v5890_v36  ;;  %v3702_v36 = vld [vmem:[%s7548_s0 + $0x2c1] sm:$0xff] }
 0x322   :  { %1793 = vrot.lane.b32.xlu1 %v3643_v43, %s4081_s24  ;;  %1737 = vrot.lane.b32.xlu0 %v3615_v4, %s4081_s24  ;;  %v2524_v43 = vsel %vm2484_vm4, %v2467_v38, %v7885_v52  ;;  %v7895_v38 = vld [vmem:[#allocation199_spill] sm:$0xff]  ;;  %v7897_v52 = vld [vmem:[#allocation66_spill] sm:$0xff] }
 0x324   :  { %v1998_v60 = vpop.permute.xlu1 %1997  ;;  %v1942_v26 = vpop.permute.xlu0 %1941 }
 0x325   :  { %v2694_v56 = vsel %vm2655_vm7, %v2637_v55, %v1998_v60  ;;  %v2666_v61 = vsel %vm2655_vm7, %v2609_v1, %v1942_v26  ;;  %v2581_v60 = vsel %vm2541_vm5, %v2524_v43, %v6013_v63  ;;  %v3727_v63 = vld [vmem:[%s7548_s0 + $0x122] sm:$0xff] }
 0x326   :  { %1795 = vrot.lane.b32.xlu1 %v3644_v23, %s4081_s24  ;;  %1739 = vrot.lane.b32.xlu0 %v3616_v28, %s4081_s24  ;;  %v7886_v28 = vld [vmem:[#allocation218_spill] sm:$0xff]  ;;  %v2638_v26 = vsel %vm2598_vm6, %v2581_v60, %v1776_v16 }
 0x327   :  { %v2553_v45 = vsel %vm2541_vm5, %v2496_v34, %v7886_v28  ;;  %v7899_v60 = vld [vmem:[#allocation118_spill] sm:$0xff] }
 0x328   :  { %v2000_v39 = vpop.permute.xlu1 %1999  ;;  %v1944_v19 = vpop.permute.xlu0 %1943  ;;  %v2610_v2 = vsel %vm2598_vm6, %v2553_v45, %v1720_v35 }
 0x329   :  { %v2695_v58 = vsel %vm2655_vm7, %v2638_v26, %v2000_v39  ;;  %v2667_v32 = vsel %vm2655_vm7, %v2610_v2, %v1944_v19  ;;  %v3618_v39 = vld [vmem:[%s7548_s0 + $0x140] sm:$0xff]  ;;  %v7900_v2 = vld [vmem:[#allocation144_spill] sm:$0xff] }
 0x32a   :  { %2017 = vrot.lane.b32.xlu1 %v3699_v3, %s4082_s8  ;;  %1961 = vrot.lane.b32.xlu0 %v3671_v62, %s4082_s8  ;;  %v3645_v62 = vld [vmem:[%s7548_s0 + $0x2b8] sm:$0xff] }
 0x32c   :  { %v2222_v51 = vpop.permute.xlu1 %2221  ;;  %v2166_v54 = vpop.permute.xlu0 %2165 }
 0x32d   :  { %v2751_v4 = vsel %vm2712_vm8, %v2694_v56, %v2222_v51  ;;  %v2723_v23 = vsel %vm2712_vm8, %v2666_v61, %v2166_v54  ;;  %v2525_v56 = vsel %vm2484_vm4, %v2468_v25, %v7895_v38  ;;  %v4023_v61 = vld [vmem:[%s7548_s0 + $0x218] sm:$0xff]  ;;  %v2328_v25 = vsel %vm2313_vm1, %v4024_v47, %v7903_v37 }
 0x32e   :  { %2019 = vrot.lane.b32.xlu1 %v3700_v12, %s4082_s8  ;;  %1963 = vrot.lane.b32.xlu0 %v3672_v15, %s4082_s8  ;;  %v4022_v12 = vld [vmem:[%s7548_s0 + $0x98] sm:$0xff]  ;;  %v7893_v15 = vld [vmem:[#allocation14_spill] sm:$0xff]  ;;  %v2582_v34 = vsel %vm2541_vm5, %v2525_v56, %v6025_v10 }
 0x32f   :  { %3907 = vmatprep.mubr.msk.f32.mxu0 %vm2781_vm9, %v2723_v23  ;;  %3949 = vmatprep.mubr.msk.f32.mxu1 %vm2781_vm9, %v2751_v4  ;;  %v2327_v24 = vsel %vm2313_vm1, %v4022_v12, %v7893_v15  ;;  %v7896_v51 = vld [vmem:[#allocation40_spill] sm:$0xff]  ;;  %v3674_v10 = vld [vmem:[%s7548_s0 + $0x141] sm:$0xff] }
 0x330   :  { %v2224_v48 = vpop.permute.xlu1 %2223  ;;  %v2168_v16 = vpop.permute.xlu0 %2167  ;;  %v2355_v54 = vsel %vm2313_vm1, %v4023_v61, %v7896_v51  ;;  %v2384_v43 = vsel %vm2370_vm2, %v2327_v24, %v7897_v52  ;;  %v7898_v4 = vld [vmem:[#allocation92_spill] sm:$0xff]  ;;  %v7905_v15 = vld [vmem:[#allocation69_spill] sm:$0xff] }
 0x331   :  { %v2752_v35 = vsel %vm2712_vm8, %v2695_v58, %v2224_v48  ;;  %v2724_v9 = vsel %vm2712_vm8, %v2667_v32, %v2168_v16  ;;  %v2412_v23 = vsel %vm2370_vm2, %v2355_v54, %v7898_v4  ;;  %v2441_v26 = vsel %vm2427_vm3, %v2384_v43, %v7899_v60  ;;  %v7901_v16 = vld [vmem:[#allocation170_spill] sm:$0xff]  ;;  %v3703_v38 = vld [vmem:[%s7548_s0 + $0x2d1] sm:$0xff]  ;;  %v7907_v61 = vld [vmem:[#allocation121_spill] sm:$0xff] }
 0x332   :  { %2241 = vrot.lane.b32.xlu1 %v3755_v20, %s4083_s1  ;;  %2185 = vrot.lane.b32.xlu0 %v3727_v63, %s4083_s1  ;;  %v2469_v20 = vsel %vm2427_vm3, %v2412_v23, %v7900_v2  ;;  %v2385_v24 = vsel %vm2370_vm2, %v2328_v25, %v7905_v15  ;;  %v3675_v56 = vld [vmem:[%s7548_s0 + $0x151] sm:$0xff] }
 0x333   :  { %3908 = vmatmul.mubr.msk.f32.gmra.mrb[10].mxu0 %vm2781_vm9, %v2724_v9  ;;  %3950 = vmatmul.mubr.msk.f32.gmra.mrb[10].mxu1 %vm2781_vm9, %v2752_v35  ;;  %v2498_v35 = vsel %vm2484_vm4, %v2441_v26, %v7901_v16  ;;  %v7902_v9 = vld [vmem:[#allocation198_spill] sm:$0xff]  ;;  %v2442_v51 = vsel %vm2427_vm3, %v2385_v24, %v7907_v61  ;;  %v7908_v54 = vld [vmem:[#allocation147_spill] sm:$0xff]  ;;  %v7909_v4 = vld [vmem:[#allocation16_spill] sm:$0xff] }
 0x334   :  { %v1778_v42 = vpop.permute.xlu1 %1777  ;;  %v1722_v3 = vpop.permute.xlu0 %1721  ;;  %v4026_v43 = vld [vmem:[%s7548_s0 + $0xb0] sm:$0xff]  ;;  %v7912_v26 = vld [vmem:[#allocation42_spill] sm:$0xff] }
 0x335   :  { %v2639_v28 = vsel %vm2598_vm6, %v2582_v34, %v1778_v42  ;;  %v2611_v45 = vsel %vm2598_vm6, %v2554_v17, %v1722_v3  ;;  %v2555_v3 = vsel %vm2541_vm5, %v2498_v35, %v5888_v0  ;;  %v3729_v0 = vld [vmem:[%s7548_s0 + $0x13a] sm:$0xff]  ;;  %v2329_v23 = vsel %vm2313_vm1, %v4026_v43, %v7909_v4  ;;  %v4027_v60 = vld [vmem:[%s7548_s0 + $0x230] sm:$0xff]  ;;  %v7915_v16 = vld [vmem:[#allocation94_spill] sm:$0xff] }
 0x336   :  { %2243 = vrot.lane.b32.xlu1 %v3756_v30, %s4083_s1  ;;  %2187 = vrot.lane.b32.xlu0 %v3728_v14, %s4083_s1  ;;  %v2526_v30 = vsel %vm2484_vm4, %v2469_v20, %v7902_v9  ;;  %v2357_v2 = vsel %vm2313_vm1, %v4027_v60, %v7912_v26  ;;  %v3649_v24 = vld [vmem:[%s7548_s0 + $0x2e8] sm:$0xff]  ;;  %v3622_v61 = vld [vmem:[%s7548_s0 + $0x170] sm:$0xff]  ;;  %v7923_v4 = vld [vmem:[#allocation45_spill] sm:$0xff] }
 0x337   :  { %v2414_v35 = vsel %vm2370_vm2, %v2357_v2, %v7915_v16  ;;  %v4029_v43 = vld [vmem:[%s7548_s0 + $0x240] sm:$0xff]  ;;  %v3705_v60 = vld [vmem:[%s7548_s0 + $0x2e9] sm:$0xff] }
 0x338   :  { %v1780_v29 = vpop.permute.xlu1 %1779  ;;  %v1724_v41 = vpop.permute.xlu0 %1723  ;;  %v3677_v26 = vld [vmem:[%s7548_s0 + $0x169] sm:$0xff] }
 0x339   :  { %v7926_v2 = vld [vmem:[#allocation123_spill] sm:$0xff]  ;;  %v4030_v16 = vld [vmem:[%s7548_s0 + $0xc8] sm:$0xff] }
 0x33a   :  { %1797 = vrot.lane.b32.xlu1 %v3645_v62, %s4081_s24  ;;  %1741 = vrot.lane.b32.xlu0 %v3617_v57, %s4081_s24  ;;  %v2583_v62 = vsel %vm2541_vm5, %v2526_v30, %v6023_v8 }
 0x33b   :  { %v2640_v57 = vsel %vm2598_vm6, %v2583_v62, %v1780_v29  ;;  %v7917_v62 = vld [vmem:[#allocation146_spill] sm:$0xff] }
 0x33c   :  { %v2002_v19 = vpop.permute.xlu1 %2001  ;;  %v1946_v31 = vpop.permute.xlu0 %1945 }
 0x33d   :  { %v2696_v63 = vsel %vm2655_vm7, %v2639_v28, %v2002_v19  ;;  %v2668_v58 = vsel %vm2655_vm7, %v2611_v45, %v1946_v31  ;;  %v7910_v28 = vld [vmem:[#allocation173_spill] sm:$0xff] }
 0x33e   :  { %1799 = vrot.lane.b32.xlu1 %v3646_v49, %s4081_s24  ;;  %1743 = vrot.lane.b32.xlu0 %v3618_v39, %s4081_s24  ;;  %v2612_v49 = vsel %vm2598_vm6, %v2555_v3, %v1724_v41  ;;  %v3757_v39 = vld [vmem:[%s7548_s0 + $0x2ba] sm:$0xff]  ;;  %v2499_v45 = vsel %vm2484_vm4, %v2442_v51, %v7910_v28  ;;  %v7924_v28 = vld [vmem:[#allocation71_spill] sm:$0xff] }
 0x33f   :  { %v2556_v20 = vsel %vm2541_vm5, %v2499_v45, %v5896_v46  ;;  %v3704_v46 = vld [vmem:[%s7548_s0 + $0x2d9] sm:$0xff] }
 0x340   :  { %v2004_v55 = vpop.permute.xlu1 %2003  ;;  %v1948_v1 = vpop.permute.xlu0 %1947 }
 0x341   :  { %v2697_v8 = vsel %vm2655_vm7, %v2640_v57, %v2004_v55  ;;  %v2669_v19 = vsel %vm2655_vm7, %v2612_v49, %v1948_v1  ;;  %v4025_v55 = vld [vmem:[%s7548_s0 + $0x228] sm:$0xff]  ;;  %v7904_v1 = vld [vmem:[#allocation43_spill] sm:$0xff]  ;;  %v2471_v57 = vsel %vm2427_vm3, %v2414_v35, %v7917_v62  ;;  %v7931_v62 = vld [vmem:[#allocation44_spill] sm:$0xff] }
 0x342   :  { %2021 = vrot.lane.b32.xlu1 %v3701_v7, %s4082_s8  ;;  %1965 = vrot.lane.b32.xlu0 %v3673_v5, %s4082_s8  ;;  %v3620_v7 = vld [vmem:[%s7548_s0 + $0x158] sm:$0xff]  ;;  %v2356_v12 = vsel %vm2313_vm1, %v4025_v55, %v7904_v1  ;;  %v7928_v35 = vld [vmem:[#allocation18_spill] sm:$0xff] }
 0x343   :  { %v2413_v22 = vsel %vm2370_vm2, %v2356_v12, %v7906_v33  ;;  %v3760_v55 = vld [vmem:[%s7548_s0 + $0x2da] sm:$0xff]  ;;  %v3621_v33 = vld [vmem:[%s7548_s0 + $0x168] sm:$0xff] }
 0x344   :  { %v2226_v32 = vpop.permute.xlu1 %2225  ;;  %v2170_v48 = vpop.permute.xlu0 %2169  ;;  %v2470_v17 = vsel %vm2427_vm3, %v2413_v22, %v7908_v54  ;;  %v3732_v1 = vld [vmem:[%s7548_s0 + $0x15a] sm:$0xff] }
 0x345   :  { %v2753_v14 = vsel %vm2712_vm8, %v2696_v63, %v2226_v32  ;;  %v2725_v42 = vsel %vm2712_vm8, %v2668_v58, %v2170_v48  ;;  %v7913_v63 = vld [vmem:[#allocation234_spill] sm:$0xff]  ;;  %v7914_v32 = vld [vmem:[#allocation68_spill] sm:$0xff] }
 0x346   :  { %2023 = vrot.lane.b32.xlu1 %v3702_v36, %s4082_s8  ;;  %1967 = vrot.lane.b32.xlu0 %v3674_v10, %s4082_s8  ;;  %v7911_v36 = vld [vmem:[#allocation203_spill] sm:$0xff]  ;;  %v2386_v48 = vsel %vm2370_vm2, %v2329_v23, %v7914_v32  ;;  %v2358_v23 = vsel %vm2313_vm1, %v4029_v43, %v7923_v4 }
 0x347   :  { %3910 = vmatprep.mubr.msk.f32.mxu0 %vm2781_vm9, %v2725_v42  ;;  %3952 = vmatprep.mubr.msk.f32.mxu1 %vm2781_vm9, %v2753_v14  ;;  %v2527_v10 = vsel %vm2484_vm4, %v2470_v17, %v7911_v36  ;;  %v3676_v14 = vld [vmem:[%s7548_s0 + $0x159] sm:$0xff] }
 0x348   :  { %v2228_v31 = vpop.permute.xlu1 %2227  ;;  %v2172_v29 = vpop.permute.xlu0 %2171  ;;  %v2584_v58 = vsel %vm2541_vm5, %v2527_v10, %v7913_v63  ;;  %v7916_v42 = vld [vmem:[#allocation120_spill] sm:$0xff]  ;;  %v4028_v17 = vld [vmem:[%s7548_s0 + $0xc0] sm:$0xff] }
 0x349   :  { %v2754_v41 = vsel %vm2712_vm8, %v2697_v8, %v2228_v31  ;;  %v2726_v50 = vsel %vm2712_vm8, %v2669_v19, %v2172_v29  ;;  %v2443_v3 = vsel %vm2427_vm3, %v2386_v48, %v7916_v42  ;;  %v7918_v19 = vld [vmem:[#allocation172_spill] sm:$0xff]  ;;  %v7919_v29 = vld [vmem:[#allocation202_spill] sm:$0xff]  ;;  %v7925_v36 = vld [vmem:[#allocation97_spill] sm:$0xff] }
 0x34a   :  { %2245 = vrot.lane.b32.xlu1 %v3757_v39, %s4083_s1  ;;  %2189 = vrot.lane.b32.xlu0 %v3729_v0, %s4083_s1  ;;  %v2500_v31 = vsel %vm2484_vm4, %v2443_v3, %v7918_v19  ;;  %v2415_v10 = vsel %vm2370_vm2, %v2358_v23, %v7925_v36  ;;  %v7927_v63 = vld [vmem:[#allocation149_spill] sm:$0xff]  ;;  %v4031_v3 = vld [vmem:[%s7548_s0 + $0x248] sm:$0xff]  ;;  %v3762_v4 = vld [vmem:[%s7548_s0 + $0x2f2] sm:$0xff] }
 0x34b   :  { %3911 = vmatmul.mubr.msk.f32.gmra.mrb[12].mxu0 %vm2781_vm9, %v2726_v50  ;;  %3953 = vmatmul.mubr.msk.f32.gmra.mrb[12].mxu1 %vm2781_vm9, %v2754_v41  ;;  %v2528_v41 = vsel %vm2484_vm4, %v2471_v57, %v7919_v29  ;;  %v2359_v57 = vsel %vm2313_vm1, %v4031_v3, %v7931_v62  ;;  %v7934_v19 = vld [vmem:[#allocation70_spill] sm:$0xff]  ;;  %v7935_v29 = vld [vmem:[#allocation96_spill] sm:$0xff] }
 0x34c   :  { %v1782_v40 = vpop.permute.xlu1 %1781  ;;  %v1726_v18 = vpop.permute.xlu0 %1725  ;;  %v3734_v23 = vld [vmem:[%s7548_s0 + $0x172] sm:$0xff] }
 0x34d   :  { %v2641_v9 = vsel %vm2598_vm6, %v2584_v58, %v1782_v40  ;;  %v2613_v30 = vsel %vm2598_vm6, %v2556_v20, %v1726_v18  ;;  %v7921_v18 = vld [vmem:[#allocation233_spill] sm:$0xff]  ;;  %v2472_v58 = vsel %vm2427_vm3, %v2415_v10, %v7927_v63 }
 0x34e   :  { %2247 = vrot.lane.b32.xlu1 %v3758_v6, %s4083_s1  ;;  %2191 = vrot.lane.b32.xlu0 %v3730_v44, %s4083_s1  ;;  %v7920_v44 = vld [vmem:[#allocation220_spill] sm:$0xff] }
 0x34f   :  { %v2557_v40 = vsel %vm2541_vm5, %v2500_v31, %v7920_v44  ;;  %v3706_v44 = vld [vmem:[%s7548_s0 + $0x2f1] sm:$0xff] }
 0x350   :  { %v1784_v53 = vpop.permute.xlu1 %1783  ;;  %v1728_v11 = vpop.permute.xlu0 %1727 }
 0x352   :  { %1801 = vrot.lane.b32.xlu1 %v3647_v13, %s4081_s24  ;;  %1745 = vrot.lane.b32.xlu0 %v3619_v27, %s4081_s24  ;;  %v2585_v13 = vsel %vm2541_vm5, %v2528_v41, %v7921_v18  ;;  %v2416_v41 = vsel %vm2370_vm2, %v2359_v57, %v7935_v29  ;;  %v7936_v18 = vld [vmem:[#allocation122_spill] sm:$0xff] }
 0x353   :  { %v2642_v27 = vsel %vm2598_vm6, %v2585_v13, %v1784_v53 }
 0x354   :  { %v2006_v5 = vpop.permute.xlu1 %2005  ;;  %v1950_v21 = vpop.permute.xlu0 %1949 }
 0x355   :  { %v2698_v49 = vsel %vm2655_vm7, %v2641_v9, %v2006_v5  ;;  %v2670_v39 = vsel %vm2655_vm7, %v2613_v30, %v1950_v21  ;;  %v3731_v5 = vld [vmem:[%s7548_s0 + $0x152] sm:$0xff]  ;;  %v2331_v9 = vsel %vm2313_vm1, %v4030_v16, %v7928_v35  ;;  %v7944_v16 = vld [vmem:[#allocation73_spill] sm:$0xff] }
 0x356   :  { %1803 = vrot.lane.b32.xlu1 %v3648_v59, %s4081_s24  ;;  %1747 = vrot.lane.b32.xlu0 %v3620_v7, %s4081_s24  ;;  %v2614_v59 = vsel %vm2598_vm6, %v2557_v40, %v1728_v11  ;;  %v3759_v7 = vld [vmem:[%s7548_s0 + $0x2d2] sm:$0xff]  ;;  %v2388_v31 = vsel %vm2370_vm2, %v2331_v9, %v7934_v19  ;;  %v4034_v19 = vld [vmem:[%s7548_s0 + $0xe0] sm:$0xff] }
 0x357   :  { %v7929_v30 = vld [vmem:[#allocation175_spill] sm:$0xff]  ;;  %v2445_v13 = vsel %vm2427_vm3, %v2388_v31, %v7936_v18  ;;  %v7950_v31 = vld [vmem:[#allocation20_spill] sm:$0xff]  ;;  %v7953_v18 = vld [vmem:[#allocation238_spill] sm:$0xff] }
 0x358   :  { %v2008_v34 = vpop.permute.xlu1 %2007  ;;  %v1952_v52 = vpop.permute.xlu0 %1951  ;;  %v3678_v40 = vld [vmem:[%s7548_s0 + $0x171] sm:$0xff]  ;;  %v2333_v29 = vsel %vm2313_vm1, %v4034_v19, %v7950_v31  ;;  %v7963_v31 = vld [vmem:[#allocation49_spill] sm:$0xff] }
 0x359   :  { %v2699_v21 = vsel %vm2655_vm7, %v2642_v27, %v2008_v34  ;;  %v2671_v47 = vsel %vm2655_vm7, %v2614_v59, %v1952_v52  ;;  %v7922_v34 = vld [vmem:[#allocation19_spill] sm:$0xff]  ;;  %v7937_v27 = vld [vmem:[#allocation148_spill] sm:$0xff] }
 0x35a   :  { %2025 = vrot.lane.b32.xlu1 %v3703_v38, %s4082_s8  ;;  %1969 = vrot.lane.b32.xlu0 %v3675_v56, %s4082_s8  ;;  %v3650_v56 = vld [vmem:[%s7548_s0 + $0x2f0] sm:$0xff]  ;;  %v2330_v52 = vsel %vm2313_vm1, %v4028_v17, %v7922_v34  ;;  %v2473_v59 = vsel %vm2427_vm3, %v2416_v41, %v7937_v27  ;;  %v4035_v41 = vld [vmem:[%s7548_s0 + $0x260] sm:$0xff]  ;;  %v7954_v27 = vld [vmem:[#allocation72_spill] sm:$0xff] }
 0x35b   :  { %v2387_v45 = vsel %vm2370_vm2, %v2330_v52, %v7924_v28  ;;  %v7945_v9 = vld [vmem:[#allocation99_spill] sm:$0xff] }
 0x35c   :  { %v2230_v0 = vpop.permute.xlu1 %2229  ;;  %v2174_v8 = vpop.permute.xlu0 %2173  ;;  %v2444_v20 = vsel %vm2427_vm3, %v2387_v45, %v7926_v2  ;;  %v4032_v2 = vld [vmem:[%s7548_s0 + $0xd8] sm:$0xff]  ;;  %v4037_v19 = vld [vmem:[%s7548_s0 + $0x270] sm:$0xff] }
 0x35d   :  { %v2755_v50 = vsel %vm2712_vm8, %v2698_v49, %v2230_v0  ;;  %v2727_v6 = vsel %vm2712_vm8, %v2670_v39, %v2174_v8  ;;  %v7932_v49 = vld [vmem:[#allocation222_spill] sm:$0xff]  ;;  %v7933_v0 = vld [vmem:[#allocation236_spill] sm:$0xff] }
 0x35e   :  { %2027 = vrot.lane.b32.xlu1 %v3704_v46, %s4082_s8  ;;  %1971 = vrot.lane.b32.xlu0 %v3676_v14, %s4082_s8  ;;  %v2501_v46 = vsel %vm2484_vm4, %v2444_v20, %v7929_v30  ;;  %v7930_v14 = vld [vmem:[#allocation207_spill] sm:$0xff]  ;;  %v7942_v20 = vld [vmem:[#allocation21_spill] sm:$0xff] }
 0x35f   :  { %3913 = vmatprep.mubr.msk.f32.mxu0 %vm2781_vm9, %v2727_v6  ;;  %3955 = vmatprep.mubr.msk.f32.mxu1 %vm2781_vm9, %v2755_v50  ;;  %v2529_v42 = vsel %vm2484_vm4, %v2472_v58, %v7930_v14  ;;  %v2558_v39 = vsel %vm2541_vm5, %v2501_v46, %v7932_v49  ;;  %v2332_v63 = vsel %vm2313_vm1, %v4032_v2, %v7942_v20  ;;  %v4033_v58 = vld [vmem:[%s7548_s0 + $0x258] sm:$0xff]  ;;  %v7946_v46 = vld [vmem:[#allocation125_spill] sm:$0xff] }
 0x360   :  { %v2232_v37 = vpop.permute.xlu1 %2231  ;;  %v2176_v53 = vpop.permute.xlu0 %2175  ;;  %v2586_v8 = vsel %vm2541_vm5, %v2529_v42, %v7933_v0  ;;  %v2389_v35 = vsel %vm2370_vm2, %v2332_v63, %v7944_v16  ;;  %v7947_v42 = vld [vmem:[#allocation151_spill] sm:$0xff]  ;;  %v7948_v49 = vld [vmem:[#allocation177_spill] sm:$0xff] }
 0x361   :  { %v2756_v11 = vsel %vm2712_vm8, %v2699_v21, %v2232_v37  ;;  %v2728_v25 = vsel %vm2712_vm8, %v2671_v47, %v2176_v53  ;;  %v7938_v37 = vld [vmem:[#allocation174_spill] sm:$0xff]  ;;  %v2446_v14 = vsel %vm2427_vm3, %v2389_v35, %v7946_v46  ;;  %v7949_v0 = vld [vmem:[#allocation209_spill] sm:$0xff] }
 0x362   :  { %2249 = vrot.lane.b32.xlu1 %v3759_v7, %s4083_s1  ;;  %2193 = vrot.lane.b32.xlu0 %v3731_v5, %s4083_s1  ;;  %v2502_v53 = vsel %vm2484_vm4, %v2445_v13, %v7938_v37  ;;  %v7956_v37 = vld [vmem:[#allocation124_spill] sm:$0xff] }
 0x363   :  { %3914 = vmatmul.mubr.msk.f32.gmra.mrb[14].mxu0 %vm2781_vm9, %v2728_v25  ;;  %3956 = vmatmul.mubr.msk.f32.gmra.mrb[14].mxu1 %vm2781_vm9, %v2756_v11  ;;  %v7939_v11 = vld [vmem:[#allocation206_spill] sm:$0xff] }
 0x364   :  { %v1786_v12 = vpop.permute.xlu1 %1785  ;;  %v1730_v15 = vpop.permute.xlu0 %1729  ;;  %v2530_v25 = vsel %vm2484_vm4, %v2473_v59, %v7939_v11  ;;  %v2390_v59 = vsel %vm2370_vm2, %v2333_v29, %v7954_v27  ;;  %v7957_v11 = vld [vmem:[#allocation150_spill] sm:$0xff]  ;;  %v2362_v29 = vsel %vm2313_vm1, %v4037_v19, %v7963_v31 }
 0x365   :  { %v2643_v50 = vsel %vm2598_vm6, %v2586_v8, %v1786_v12  ;;  %v2615_v6 = vsel %vm2598_vm6, %v2558_v39, %v1730_v15  ;;  %v7940_v12 = vld [vmem:[#allocation221_spill] sm:$0xff]  ;;  %v2503_v39 = vsel %vm2484_vm4, %v2446_v14, %v7948_v49 }
 0x366   :  { %2251 = vrot.lane.b32.xlu1 %v3760_v55, %s4083_s1  ;;  %2195 = vrot.lane.b32.xlu0 %v3732_v1, %s4083_s1  ;;  %v2559_v15 = vsel %vm2541_vm5, %v2502_v53, %v7940_v12  ;;  %v2447_v53 = vsel %vm2427_vm3, %v2390_v59, %v7956_v37 }
 0x368   :  { %v1788_v22 = vpop.permute.xlu1 %1787  ;;  %v1732_v38 = vpop.permute.xlu0 %1731 }
 0x36a   :  { %1805 = vrot.lane.b32.xlu1 %v3649_v24, %s4081_s24  ;;  %1749 = vrot.lane.b32.xlu0 %v3621_v33, %s4081_s24  ;;  %v7941_v24 = vld [vmem:[#allocation235_spill] sm:$0xff] }
 0x36b   :  { %v2587_v33 = vsel %vm2541_vm5, %v2530_v25, %v7941_v24  ;;  %v7185_v24 = vld [vmem:[%s7550_s2] ss:$0 sm:$0xff] }
 0x36c   :  { %v2010_v51 = vpop.permute.xlu1 %2009  ;;  %v1954_v54 = vpop.permute.xlu0 %1953 }
 0x36d   :  { %v2700_v7 = vsel %vm2655_vm7, %v2643_v50, %v2010_v51  ;;  %v2672_v5 = vsel %vm2655_vm7, %v2615_v6, %v1954_v54  ;;  %v3761_v51 = vld [vmem:[%s7548_s0 + $0x2ea] sm:$0xff] }
 0x36e   :  { %1807 = vrot.lane.b32.xlu1 %v3650_v56, %s4081_s24  ;;  %1751 = vrot.lane.b32.xlu0 %v3622_v61, %s4081_s24  ;;  %v2644_v56 = vsel %vm2598_vm6, %v2587_v33, %v1788_v22  ;;  %v2616_v61 = vsel %vm2598_vm6, %v2559_v15, %v1732_v38  ;;  %v3733_v54 = vld [vmem:[%s7548_s0 + $0x16a] sm:$0xff]  ;;  %v7958_v33 = vld [vmem:[#allocation176_spill] sm:$0xff] }
 0x36f   :  { %v7951_v50 = vld [vmem:[#allocation46_spill] sm:$0xff] }
 0x370   :  { %v2012_v32 = vpop.permute.xlu1 %2011  ;;  %v1956_v48 = vpop.permute.xlu0 %1955  ;;  %v2361_v6 = vsel %vm2313_vm1, %v4035_v41, %v7951_v50  ;;  %v7964_v41 = vld [vmem:[#allocation75_spill] sm:$0xff] }
 0x371   :  { %v2701_v17 = vsel %vm2655_vm7, %v2644_v56, %v2012_v32  ;;  %v2673_v34 = vsel %vm2655_vm7, %v2616_v61, %v1956_v48  ;;  %v7943_v32 = vld [vmem:[#allocation47_spill] sm:$0xff]  ;;  %v2504_v56 = vsel %vm2484_vm4, %v2447_v53, %v7958_v33  ;;  %v7959_v61 = vld [vmem:[#allocation208_spill] sm:$0xff] }
 0x372   :  { %2029 = vrot.lane.b32.xlu1 %v3705_v60, %s4082_s8  ;;  %1973 = vrot.lane.b32.xlu0 %v3677_v26, %s4082_s8  ;;  %v2360_v48 = vsel %vm2313_vm1, %v4033_v58, %v7943_v32  ;;  %v4038_v53 = vld [vmem:[%s7548_s0 + $0xf8] sm:$0xff] }
 0x373   :  { %v2417_v30 = vsel %vm2370_vm2, %v2360_v48, %v7945_v9 }
 0x374   :  { %v2234_v21 = vpop.permute.xlu1 %2233  ;;  %v2178_v47 = vpop.permute.xlu0 %2177  ;;  %v2474_v3 = vsel %vm2427_vm3, %v2417_v30, %v7947_v42 }
 0x375   :  { %v2757_v55 = vsel %vm2712_vm8, %v2700_v7, %v2234_v21  ;;  %v2729_v1 = vsel %vm2712_vm8, %v2672_v5, %v2178_v47  ;;  %v2531_v8 = vsel %vm2484_vm4, %v2474_v3, %v7949_v0  ;;  %v7955_v7 = vld [vmem:[#allocation98_spill] sm:$0xff]  ;;  %v7962_v0 = vld [vmem:[#allocation23_spill] sm:$0xff] }
 0x376   :  { %2031 = vrot.lane.b32.xlu1 %v3706_v44, %s4082_s8  ;;  %1975 = vrot.lane.b32.xlu0 %v3678_v40, %s4082_s8  ;;  %v7952_v44 = vld [vmem:[#allocation224_spill] sm:$0xff]  ;;  %v2588_v13 = vsel %vm2541_vm5, %v2531_v8, %v7953_v18  ;;  %v2418_v5 = vsel %vm2370_vm2, %v2361_v6, %v7955_v7  ;;  %v7965_v6 = vld [vmem:[#allocation101_spill] sm:$0xff] }
 0x377   :  { %3916 = vmatprep.mubr.msk.f32.mxu0 %vm2781_vm9, %v2729_v1  ;;  %3958 = vmatprep.mubr.msk.f32.mxu1 %vm2781_vm9, %v2757_v55  ;;  %v2560_v40 = vsel %vm2541_vm5, %v2503_v39, %v7952_v44  ;;  %v2475_v25 = vsel %vm2427_vm3, %v2418_v5, %v7957_v11  ;;  %v4036_v39 = vld [vmem:[%s7548_s0 + $0xf0] sm:$0xff]  ;;  %v2419_v44 = vsel %vm2370_vm2, %v2362_v29, %v7965_v6  ;;  %v7970_v11 = vld [vmem:[#allocation22_spill] sm:$0xff] }
 0x378   :  { %v2236_v52 = vpop.permute.xlu1 %2235  ;;  %v2180_v22 = vpop.permute.xlu0 %2179  ;;  %v2334_v8 = vsel %vm2313_vm1, %v4036_v39, %v7962_v0  ;;  %v7968_v5 = vld [vmem:[#allocation179_spill] sm:$0xff] }
 0x379   :  { %v2758_v38 = vsel %vm2712_vm8, %v2701_v17, %v2236_v52  ;;  %v2730_v43 = vsel %vm2712_vm8, %v2673_v34, %v2180_v22  ;;  %v7960_v34 = vld [vmem:[#allocation223_spill] sm:$0xff]  ;;  %v7961_v22 = vld [vmem:[#allocation237_spill] sm:$0xff]  ;;  %v2391_v50 = vsel %vm2370_vm2, %v2334_v8, %v7964_v41 }
 0x37a   :  { %2253 = vrot.lane.b32.xlu1 %v3761_v51, %s4083_s1  ;;  %2197 = vrot.lane.b32.xlu0 %v3733_v54, %s4083_s1  ;;  %v2532_v51 = vsel %vm2484_vm4, %v2475_v25, %v7959_v61  ;;  %v2561_v52 = vsel %vm2541_vm5, %v2504_v56, %v7960_v34  ;;  %v2335_v25 = vsel %vm2313_vm1, %v4038_v53, %v7970_v11  ;;  %v7973_v56 = vld [vmem:[#allocation240_spill] sm:$0xff]  ;;  %v4041_v53 = vld [vmem:[%s7548_s0 + $0x288] sm:$0xff]  ;;  %v7983_v11 = vld [vmem:[#allocation51_spill] sm:$0xff] }
 0x37b   :  { %3917 = vmatmul.mubr.msk.f32.gmra.mrb[16].mxu0 %vm2781_vm9, %v2730_v43  ;;  %3959 = vmatmul.mubr.msk.f32.gmra.mrb[16].mxu1 %vm2781_vm9, %v2758_v38  ;;  %v2589_v38 = vsel %vm2541_vm5, %v2532_v51, %v7961_v22  ;;  %v7974_v51 = vld [vmem:[#allocation74_spill] sm:$0xff] }
 0x37c   :  { %v1790_v28 = vpop.permute.xlu1 %1789  ;;  %v1734_v45 = vpop.permute.xlu0 %1733 }
 0x37d   :  { %v2645_v21 = vsel %vm2598_vm6, %v2588_v13, %v1790_v28  ;;  %v2617_v47 = vsel %vm2598_vm6, %v2560_v40, %v1734_v45  ;;  %v7966_v40 = vld [vmem:[#allocation127_spill] sm:$0xff]  ;;  %v7967_v13 = vld [vmem:[#allocation153_spill] sm:$0xff] }
 0x37e   :  { %2255 = vrot.lane.b32.xlu1 %v3762_v4, %s4083_s1  ;;  %2199 = vrot.lane.b32.xlu0 %v3734_v23, %s4083_s1  ;;  %v2448_v18 = vsel %vm2427_vm3, %v2391_v50, %v7966_v40  ;;  %v2476_v27 = vsel %vm2427_vm3, %v2419_v44, %v7967_v13 }
 0x380   :  { %v1792_v36 = vpop.permute.xlu1 %1791  ;;  %v1736_v10 = vpop.permute.xlu0 %1735 }
 0x381   :  { %v2646_v23 = vsel %vm2598_vm6, %v2589_v38, %v1792_v36  ;;  %v2618_v28 = vsel %vm2598_vm6, %v2561_v52, %v1736_v10  ;;  %v7976_v38 = vld [vmem:[#allocation126_spill] sm:$0xff] }
 0x384   :  { %v2014_v60 = vpop.permute.xlu1 %2013  ;;  %v1958_v26 = vpop.permute.xlu0 %1957 }
 0x385   :  { %v2702_v55 = vsel %vm2655_vm7, %v2645_v21, %v2014_v60  ;;  %v2674_v1 = vsel %vm2655_vm7, %v2617_v47, %v1958_v26  ;;  %v2505_v21 = vsel %vm2484_vm4, %v2448_v18, %v7968_v5  ;;  %v7969_v47 = vld [vmem:[#allocation211_spill] sm:$0xff] }
 0x386   :  { %v2533_v37 = vsel %vm2484_vm4, %v2476_v27, %v7969_v47  ;;  %v7982_v47 = vld [vmem:[#allocation25_spill] sm:$0xff] }
 0x387   :  { %v2590_v61 = vsel %vm2541_vm5, %v2533_v37, %v7973_v56 }
 0x388   :  { %v2016_v62 = vpop.permute.xlu1 %2015  ;;  %v1960_v57 = vpop.permute.xlu0 %1959 }
 0x389   :  { %v2703_v20 = vsel %vm2655_vm7, %v2646_v23, %v2016_v62  ;;  %v2675_v63 = vsel %vm2655_vm7, %v2618_v28, %v1960_v57 }
 0x38c   :  { %v2238_v12 = vpop.permute.xlu1 %2237  ;;  %v2182_v15 = vpop.permute.xlu0 %2181 }
 0x38d   :  { %v2759_v54 = vsel %vm2712_vm8, %v2702_v55, %v2238_v12  ;;  %v2731_v17 = vsel %vm2712_vm8, %v2674_v1, %v2182_v15  ;;  %v4039_v55 = vld [vmem:[%s7548_s0 + $0x278] sm:$0xff]  ;;  %v7972_v15 = vld [vmem:[#allocation226_spill] sm:$0xff] }
 0x38e   :  { %v3894_v43 = vpop.f32.mrb[0].mxu0  ;;  %v3936_v4 = vpop.f32.mrb[0].mxu1  ;;  %3919 = vmatprep.mubr.msk.f32.mxu0 %vm2781_vm9, %v2731_v17  ;;  %3961 = vmatprep.mubr.msk.f32.mxu1 %vm2781_vm9, %v2759_v54  ;;  %v7971_v1 = vld [vmem:[#allocation48_spill] sm:$0xff]  ;;  %v2562_v33 = vsel %vm2541_vm5, %v2505_v21, %v7972_v15  ;;  %v2392_v54 = vsel %vm2370_vm2, %v2335_v25, %v7974_v51  ;;  %v4040_v21 = vld [vmem:[%s7548_s0 + $0x108] sm:$0xff]  ;;  %v2364_v25 = vsel %vm2313_vm1, %v4041_v53, %v7983_v11 }
 0x38f   :  { %v3026_v45 = vadd.f32 %v3894_v43, %v7185_v24  ;;  %v3166_v60 = vadd.f32 %v3936_v4, %v7185_v24  ;;  %v3020_v26 = vpop.f32.mrb[1].mxu0  ;;  %v3160_v2 = vpop.f32.mrb[1].mxu1  ;;  %v2363_v12 = vsel %vm2313_vm1, %v4039_v55, %v7971_v1  ;;  %v7975_v17 = vld [vmem:[#allocation100_spill] sm:$0xff]  ;;  %v2449_v43 = vsel %vm2427_vm3, %v2392_v54, %v7976_v38  ;;  %v7984_v55 = vld [vmem:[#allocation77_spill] sm:$0xff] }
 0x390   :  { %v3021_v58 = vadd.f32 %v7185_v24, %v3020_v26  ;;  %v3161_v32 = vadd.f32 %v7185_v24, %v3160_v2  ;;  %v2240_v48 = vpop.permute.xlu1 %2239  ;;  %v2184_v16 = vpop.permute.xlu0 %2183  ;;  %v2420_v34 = vsel %vm2370_vm2, %v2363_v12, %v7975_v17  ;;  %v7977_v4 = vld [vmem:[#allocation152_spill] sm:$0xff]  ;;  %v7978_v2 = vld [vmem:[#allocation178_spill] sm:$0xff]  ;;  %v2336_v37 = vsel %vm2313_vm1, %v4040_v21, %v7982_v47  ;;  %v7985_v12 = vld [vmem:[#allocation103_spill] sm:$0xff] }
 0x391   :  { %v3300_v35 = vmax.f32 %v3026_v45, 0.0  ;;  %v3328_v36 = vmax.f32 %v3166_v60, 0.0  ;;  %v2760_v10 = vsel %vm2712_vm8, %v2703_v20, %v2240_v48  ;;  %v2732_v9 = vsel %vm2712_vm8, %v2675_v63, %v2184_v16  ;;  %v7979_v63 = vld [vmem:[#allocation210_spill] sm:$0xff]  ;;  %v7980_v16 = vld [vmem:[#allocation225_spill] sm:$0xff] }
 0x392   :  { %v3299_v30 = vmax.f32 %v3021_v58, 0.0  ;;  %v3327_v46 = vmax.f32 %v3161_v32, 0.0  ;;  %3920 = vmatmul.mubr.msk.f32.gmra.mrb[18].mxu0 %vm2781_vm9, %v2732_v9  ;;  %3962 = vmatmul.mubr.msk.f32.gmra.mrb[18].mxu1 %vm2781_vm9, %v2760_v10  ;;  %v2477_v23 = vsel %vm2427_vm3, %v2420_v34, %v7977_v4  ;;  %v2506_v20 = vsel %vm2484_vm4, %v2449_v43, %v7978_v2  ;;  %v7988_v34 = vld [vmem:[#allocation181_spill] sm:$0xff]  ;;  %v4042_v43 = vld [vmem:[%s7548_s0 + $0x110] sm:$0xff]  ;;  %v7990_v4 = vld [vmem:[#allocation24_spill] sm:$0xff] }
 0x393   :  { %3356 = vst [vmem:[#allocation2 + $0x8] sm:$0xff] %v3300_v35  ;;  %3384 = vst [vmem:[#allocation2 + $0xe8] sm:$0xff] %v3328_v36  ;;  %v2534_v58 = vsel %vm2484_vm4, %v2477_v23, %v7979_v63  ;;  %v2563_v35 = vsel %vm2541_vm5, %v2506_v20, %v7980_v16  ;;  %v7981_v36 = vld [vmem:[#allocation239_spill] sm:$0xff]  ;;  %v2393_v1 = vsel %vm2370_vm2, %v2336_v37, %v7984_v55  ;;  %v7993_v20 = vld [vmem:[#allocation242_spill] sm:$0xff] }
 0x394   :  { %3355 = vst [vmem:[#allocation2] sm:$0xff] %v3299_v30  ;;  %3383 = vst [vmem:[#allocation2 + $0xe0] sm:$0xff] %v3327_v46  ;;  %v1794_v14 = vpop.permute.xlu1 %1793  ;;  %v1738_v42 = vpop.permute.xlu0 %1737  ;;  %v2591_v10 = vsel %vm2541_vm5, %v2534_v58, %v7981_v36  ;;  %v2421_v15 = vsel %vm2370_vm2, %v2364_v25, %v7985_v12  ;;  %v2337_v23 = vsel %vm2313_vm1, %v4042_v43, %v7990_v4  ;;  %v7994_v58 = vld [vmem:[#allocation76_spill] sm:$0xff]  ;;  %v4045_v43 = vld [vmem:[%s7548_s0 + $0x2a0] sm:$0xff] }
 0x395   :  { %v2647_v52 = vsel %vm2598_vm6, %v2590_v61, %v1794_v14  ;;  %v2619_v22 = vsel %vm2598_vm6, %v2562_v33, %v1738_v42  ;;  %v7986_v33 = vld [vmem:[#allocation129_spill] sm:$0xff]  ;;  %v7987_v61 = vld [vmem:[#allocation155_spill] sm:$0xff] }
 0x396   :  { %v2450_v56 = vsel %vm2427_vm3, %v2393_v1, %v7986_v33  ;;  %v2478_v51 = vsel %vm2427_vm3, %v2421_v15, %v7987_v61  ;;  %v8003_v4 = vld [vmem:[#allocation53_spill] sm:$0xff] }
 0x398   :  { %v1796_v3 = vpop.permute.xlu1 %1795  ;;  %v1740_v62 = vpop.permute.xlu0 %1739 }
 0x399   :  { %v2648_v46 = vsel %vm2598_vm6, %v2591_v10, %v1796_v3  ;;  %v2620_v14 = vsel %vm2598_vm6, %v2563_v35, %v1740_v62  ;;  %v7996_v10 = vld [vmem:[#allocation128_spill] sm:$0xff] }
 0x39c   :  { %v2018_v57 = vpop.permute.xlu1 %2017  ;;  %v1962_v49 = vpop.permute.xlu0 %1961 }
 0x39d   :  { %v2704_v28 = vsel %vm2655_vm7, %v2647_v52, %v2018_v57  ;;  %v2676_v45 = vsel %vm2655_vm7, %v2619_v22, %v1962_v49  ;;  %v2507_v52 = vsel %vm2484_vm4, %v2450_v56, %v7988_v34  ;;  %v7989_v22 = vld [vmem:[#allocation213_spill] sm:$0xff] }
 0x39e   :  { %v2535_v38 = vsel %vm2484_vm4, %v2478_v51, %v7989_v22  ;;  %v8002_v22 = vld [vmem:[#allocation27_spill] sm:$0xff] }
 0x39f   :  { %v2592_v63 = vsel %vm2541_vm5, %v2535_v38, %v7993_v20 }
 0x3a0   :  { %v2020_v59 = vpop.permute.xlu1 %2019  ;;  %v1964_v7 = vpop.permute.xlu0 %1963 }
 0x3a1   :  { %v2705_v0 = vsel %vm2655_vm7, %v2648_v46, %v2020_v59  ;;  %v2677_v8 = vsel %vm2655_vm7, %v2620_v14, %v1964_v7 }
 0x3a4   :  { %v2242_v60 = vpop.permute.xlu1 %2241  ;;  %v2186_v26 = vpop.permute.xlu0 %2185 }
 0x3a5   :  { %v2761_v32 = vsel %vm2712_vm8, %v2704_v28, %v2242_v60  ;;  %v2733_v48 = vsel %vm2712_vm8, %v2676_v45, %v2186_v26  ;;  %v4043_v28 = vld [vmem:[%s7548_s0 + $0x290] sm:$0xff]  ;;  %v7991_v45 = vld [vmem:[#allocation50_spill] sm:$0xff]  ;;  %v7992_v26 = vld [vmem:[#allocation228_spill] sm:$0xff] }
 0x3a6   :  { %v3897_v9 = vpop.f32.mrb[2].mxu0  ;;  %v3939_v30 = vpop.f32.mrb[2].mxu1  ;;  %3922 = vmatprep.mubr.msk.f32.mxu0 %vm2781_vm9, %v2733_v48  ;;  %3964 = vmatprep.mubr.msk.f32.mxu1 %vm2781_vm9, %v2761_v32  ;;  %v2365_v60 = vsel %vm2313_vm1, %v4043_v28, %v7991_v45  ;;  %v2564_v2 = vsel %vm2541_vm5, %v2507_v52, %v7992_v26  ;;  %v2394_v32 = vsel %vm2370_vm2, %v2337_v23, %v7994_v58  ;;  %v7995_v48 = vld [vmem:[#allocation102_spill] sm:$0xff]  ;;  %v4044_v52 = vld [vmem:[%s7548_s0 + $0x120] sm:$0xff]  ;;  %v8004_v28 = vld [vmem:[#allocation79_spill] sm:$0xff] }
 0x3a7   :  { %v3036_v42 = vadd.f32 %v3897_v9, %v7185_v24  ;;  %v3176_v57 = vadd.f32 %v3939_v30, %v7185_v24  ;;  %v3030_v49 = vpop.f32.mrb[3].mxu0  ;;  %v3170_v39 = vpop.f32.mrb[3].mxu1  ;;  %v2422_v16 = vsel %vm2370_vm2, %v2365_v60, %v7995_v48  ;;  %v2451_v9 = vsel %vm2427_vm3, %v2394_v32, %v7996_v10  ;;  %v7997_v30 = vld [vmem:[#allocation154_spill] sm:$0xff]  ;;  %v8005_v60 = vld [vmem:[#allocation105_spill] sm:$0xff] }
 0x3a8   :  { %v3031_v19 = vadd.f32 %v7185_v24, %v3030_v49  ;;  %v3171_v31 = vadd.f32 %v7185_v24, %v3170_v39  ;;  %v2244_v29 = vpop.permute.xlu1 %2243  ;;  %v2188_v41 = vpop.permute.xlu0 %2187  ;;  %v2479_v46 = vsel %vm2427_vm3, %v2422_v16, %v7997_v30  ;;  %v7998_v39 = vld [vmem:[#allocation180_spill] sm:$0xff]  ;;  %v2338_v38 = vsel %vm2313_vm1, %v4044_v52, %v8002_v22  ;;  %v8008_v16 = vld [vmem:[#allocation183_spill] sm:$0xff]  ;;  %v8010_v30 = vld [vmem:[#allocation26_spill] sm:$0xff] }
 0x3a9   :  { %v3302_v50 = vmax.f32 %v3036_v42, 0.0  ;;  %v3330_v3 = vmax.f32 %v3176_v57, 0.0  ;;  %v2762_v62 = vsel %vm2712_vm8, %v2705_v0, %v2244_v29  ;;  %v2734_v6 = vsel %vm2712_vm8, %v2677_v8, %v2188_v41  ;;  %v7999_v8 = vld [vmem:[#allocation212_spill] sm:$0xff]  ;;  %v8000_v41 = vld [vmem:[#allocation227_spill] sm:$0xff] }
 0x3aa   :  { %v3301_v44 = vmax.f32 %v3031_v19, 0.0  ;;  %v3329_v40 = vmax.f32 %v3171_v31, 0.0  ;;  %3923 = vmatmul.mubr.msk.f32.gmra.mrb[20].mxu0 %vm2781_vm9, %v2734_v6  ;;  %3965 = vmatmul.mubr.msk.f32.gmra.mrb[20].mxu1 %vm2781_vm9, %v2762_v62  ;;  %v2508_v0 = vsel %vm2484_vm4, %v2451_v9, %v7998_v39  ;;  %v2536_v19 = vsel %vm2484_vm4, %v2479_v46, %v7999_v8  ;;  %v4046_v9 = vld [vmem:[%s7548_s0 + $0x128] sm:$0xff] }
 0x3ab   :  { %3358 = vst [vmem:[#allocation2 + $0x18] sm:$0xff] %v3302_v50  ;;  %3386 = vst [vmem:[#allocation2 + $0xf8] sm:$0xff] %v3330_v3  ;;  %v2565_v50 = vsel %vm2541_vm5, %v2508_v0, %v8000_v41  ;;  %v8001_v3 = vld [vmem:[#allocation241_spill] sm:$0xff]  ;;  %v2366_v23 = vsel %vm2313_vm1, %v4045_v43, %v8003_v4  ;;  %v2395_v45 = vsel %vm2370_vm2, %v2338_v38, %v8004_v28  ;;  %v8013_v0 = vld [vmem:[#allocation244_spill] sm:$0xff] }
 0x3ac   :  { %3357 = vst [vmem:[#allocation2 + $0x10] sm:$0xff] %v3301_v44  ;;  %3385 = vst [vmem:[#allocation2 + $0xf0] sm:$0xff] %v3329_v40  ;;  %v1798_v18 = vpop.permute.xlu1 %1797  ;;  %v1742_v13 = vpop.permute.xlu0 %1741  ;;  %v2593_v62 = vsel %vm2541_vm5, %v2536_v19, %v8001_v3  ;;  %v2423_v26 = vsel %vm2370_vm2, %v2366_v23, %v8005_v60  ;;  %v2339_v46 = vsel %vm2313_vm1, %v4046_v9, %v8010_v30  ;;  %v8014_v19 = vld [vmem:[#allocation78_spill] sm:$0xff]  ;;  %v4049_v9 = vld [vmem:[%s7548_s0 + $0x2b8] sm:$0xff] }
 0x3ad   :  { %v2649_v35 = vsel %vm2598_vm6, %v2592_v63, %v1798_v18  ;;  %v2621_v36 = vsel %vm2598_vm6, %v2564_v2, %v1742_v13  ;;  %v8006_v2 = vld [vmem:[#allocation131_spill] sm:$0xff]  ;;  %v8007_v63 = vld [vmem:[#allocation157_spill] sm:$0xff] }
 0x3ae   :  { %v2452_v20 = vsel %vm2427_vm3, %v2395_v45, %v8006_v2  ;;  %v2480_v58 = vsel %vm2427_vm3, %v2423_v26, %v8007_v63  ;;  %v8023_v30 = vld [vmem:[#allocation55_spill] sm:$0xff] }
 0x3b0   :  { %v1800_v27 = vpop.permute.xlu1 %1799  ;;  %v1744_v59 = vpop.permute.xlu0 %1743 }
 0x3b1   :  { %v2650_v40 = vsel %vm2598_vm6, %v2593_v62, %v1800_v27  ;;  %v2622_v18 = vsel %vm2598_vm6, %v2565_v50, %v1744_v59  ;;  %v8016_v62 = vld [vmem:[#allocation130_spill] sm:$0xff] }
 0x3b4   :  { %v2022_v7 = vpop.permute.xlu1 %2021  ;;  %v1966_v5 = vpop.permute.xlu0 %1965 }
 0x3b5   :  { %v2706_v14 = vsel %vm2655_vm7, %v2649_v35, %v2022_v7  ;;  %v2678_v42 = vsel %vm2655_vm7, %v2621_v36, %v1966_v5  ;;  %v2509_v35 = vsel %vm2484_vm4, %v2452_v20, %v8008_v16  ;;  %v8009_v36 = vld [vmem:[#allocation215_spill] sm:$0xff] }
 0x3b6   :  { %v2537_v10 = vsel %vm2484_vm4, %v2480_v58, %v8009_v36  ;;  %v8022_v36 = vld [vmem:[#allocation29_spill] sm:$0xff] }
 0x3b7   :  { %v2594_v8 = vsel %vm2541_vm5, %v2537_v10, %v8013_v0 }
 0x3b8   :  { %v2024_v54 = vpop.permute.xlu1 %2023  ;;  %v1968_v17 = vpop.permute.xlu0 %1967 }
 0x3b9   :  { %v2707_v47 = vsel %vm2655_vm7, %v2650_v40, %v2024_v54  ;;  %v2679_v37 = vsel %vm2655_vm7, %v2622_v18, %v1968_v17 }
 0x3bc   :  { %v2246_v57 = vpop.permute.xlu1 %2245  ;;  %v2190_v49 = vpop.permute.xlu0 %2189 }
 0x3bd   :  { %v2763_v31 = vsel %vm2712_vm8, %v2706_v14, %v2246_v57  ;;  %v2735_v29 = vsel %vm2712_vm8, %v2678_v42, %v2190_v49  ;;  %v4047_v14 = vld [vmem:[%s7548_s0 + $0x2a8] sm:$0xff]  ;;  %v8011_v42 = vld [vmem:[#allocation52_spill] sm:$0xff] }
 0x3be   :  { %v3900_v6 = vpop.f32.mrb[4].mxu0  ;;  %v3942_v44 = vpop.f32.mrb[4].mxu1  ;;  %3925 = vmatprep.mubr.msk.f32.mxu0 %vm2781_vm9, %v2735_v29  ;;  %3967 = vmatprep.mubr.msk.f32.mxu1 %vm2781_vm9, %v2763_v31  ;;  %v2367_v57 = vsel %vm2313_vm1, %v4047_v14, %v8011_v42  ;;  %v8012_v49 = vld [vmem:[#allocation230_spill] sm:$0xff]  ;;  %v2396_v31 = vsel %vm2370_vm2, %v2339_v46, %v8014_v19  ;;  %v8015_v29 = vld [vmem:[#allocation104_spill] sm:$0xff]  ;;  %v2368_v46 = vsel %vm2313_vm1, %v4049_v9, %v8023_v30  ;;  %v8024_v14 = vld [vmem:[#allocation81_spill] sm:$0xff] }
 0x3bf   :  { %v3046_v13 = vadd.f32 %v3900_v6, %v7185_v24  ;;  %v3186_v7 = vadd.f32 %v3942_v44, %v7185_v24  ;;  %v3040_v5 = vpop.f32.mrb[5].mxu0  ;;  %v3180_v21 = vpop.f32.mrb[5].mxu1  ;;  %v2566_v39 = vsel %vm2541_vm5, %v2509_v35, %v8012_v49  ;;  %v2424_v41 = vsel %vm2370_vm2, %v2367_v57, %v8015_v29  ;;  %v8017_v44 = vld [vmem:[#allocation156_spill] sm:$0xff]  ;;  %v8025_v57 = vld [vmem:[#allocation107_spill] sm:$0xff] }
 0x3c0   :  { %v3041_v53 = vadd.f32 %v7185_v24, %v3040_v5  ;;  %v3181_v11 = vadd.f32 %v7185_v24, %v3180_v21  ;;  %v2248_v25 = vpop.permute.xlu1 %2247  ;;  %v2192_v55 = vpop.permute.xlu0 %2191  ;;  %v2453_v6 = vsel %vm2427_vm3, %v2396_v31, %v8016_v62  ;;  %v2481_v40 = vsel %vm2427_vm3, %v2424_v41, %v8017_v44  ;;  %v8018_v21 = vld [vmem:[#allocation182_spill] sm:$0xff]  ;;  %v4048_v35 = vld [vmem:[%s7548_s0 + $0x138] sm:$0xff]  ;;  %v8028_v41 = vld [vmem:[#allocation185_spill] sm:$0xff] }
 0x3c1   :  { %v3304_v1 = vmax.f32 %v3046_v13, 0.0  ;;  %v3332_v27 = vmax.f32 %v3186_v7, 0.0  ;;  %v2764_v59 = vsel %vm2712_vm8, %v2707_v47, %v2248_v25  ;;  %v2736_v12 = vsel %vm2712_vm8, %v2679_v37, %v2192_v55  ;;  %v8019_v37 = vld [vmem:[#allocation214_spill] sm:$0xff]  ;;  %v8020_v55 = vld [vmem:[#allocation229_spill] sm:$0xff]  ;;  %v8030_v44 = vld [vmem:[#allocation28_spill] sm:$0xff] }
 0x3c2   :  { %v3303_v15 = vmax.f32 %v3041_v53, 0.0  ;;  %v3331_v33 = vmax.f32 %v3181_v11, 0.0  ;;  %3926 = vmatmul.mubr.msk.f32.gmra.mrb[22].mxu0 %vm2781_vm9, %v2736_v12  ;;  %3968 = vmatmul.mubr.msk.f32.gmra.mrb[22].mxu1 %vm2781_vm9, %v2764_v59  ;;  %v2510_v47 = vsel %vm2484_vm4, %v2453_v6, %v8018_v21  ;;  %v2538_v53 = vsel %vm2484_vm4, %v2481_v40, %v8019_v37  ;;  %v4050_v6 = vld [vmem:[%s7548_s0 + $0x140] sm:$0xff] }
 0x3c3   :  { %3360 = vst [vmem:[#allocation2 + $0x28] sm:$0xff] %v3304_v1  ;;  %3388 = vst [vmem:[#allocation2 + $0x108] sm:$0xff] %v3332_v27  ;;  %v2567_v1 = vsel %vm2541_vm5, %v2510_v47, %v8020_v55  ;;  %v8021_v27 = vld [vmem:[#allocation243_spill] sm:$0xff]  ;;  %v2340_v10 = vsel %vm2313_vm1, %v4048_v35, %v8022_v36  ;;  %v2425_v49 = vsel %vm2370_vm2, %v2368_v46, %v8025_v57  ;;  %v8033_v47 = vld [vmem:[#allocation246_spill] sm:$0xff] }
 0x3c4   :  { %3359 = vst [vmem:[#allocation2 + $0x20] sm:$0xff] %v3303_v15  ;;  %3387 = vst [vmem:[#allocation2 + $0x100] sm:$0xff] %v3331_v33  ;;  %v1802_v56 = vpop.permute.xlu1 %1801  ;;  %v1746_v61 = vpop.permute.xlu0 %1745  ;;  %v2595_v59 = vsel %vm2541_vm5, %v2538_v53, %v8021_v27  ;;  %v2397_v42 = vsel %vm2370_vm2, %v2340_v10, %v8024_v14  ;;  %v2341_v40 = vsel %vm2313_vm1, %v4050_v6, %v8030_v44  ;;  %v8034_v53 = vld [vmem:[#allocation80_spill] sm:$0xff] }
 0x3c5   :  { %v2651_v50 = vsel %vm2598_vm6, %v2594_v8, %v1802_v56  ;;  %v2623_v3 = vsel %vm2598_vm6, %v2566_v39, %v1746_v61  ;;  %v8026_v39 = vld [vmem:[#allocation133_spill] sm:$0xff]  ;;  %v8027_v8 = vld [vmem:[#allocation159_spill] sm:$0xff] }
 0x3c6   :  { %v2454_v0 = vsel %vm2427_vm3, %v2397_v42, %v8026_v39  ;;  %v2482_v19 = vsel %vm2427_vm3, %v2425_v49, %v8027_v8 }
 0x3c8   :  { %v1804_v51 = vpop.permute.xlu1 %1803  ;;  %v1748_v54 = vpop.permute.xlu0 %1747 }
 0x3c9   :  { %v2652_v33 = vsel %vm2598_vm6, %v2595_v59, %v1804_v51  ;;  %v2624_v56 = vsel %vm2598_vm6, %v2567_v1, %v1748_v54  ;;  %v8036_v59 = vld [vmem:[#allocation132_spill] sm:$0xff] }
 0x3cc   :  { %v2026_v17 = vpop.permute.xlu1 %2025  ;;  %v1970_v34 = vpop.permute.xlu0 %1969 }
 0x3cd   :  { %v2708_v18 = vsel %vm2655_vm7, %v2651_v50, %v2026_v17  ;;  %v2680_v13 = vsel %vm2655_vm7, %v2623_v3, %v1970_v34  ;;  %v2511_v50 = vsel %vm2484_vm4, %v2454_v0, %v8028_v41  ;;  %v8029_v3 = vld [vmem:[#allocation217_spill] sm:$0xff] }
 0x3ce   :  { %v2539_v62 = vsel %vm2484_vm4, %v2482_v19, %v8029_v3 }
 0x3cf   :  { %v2596_v37 = vsel %vm2541_vm5, %v2539_v62, %v8033_v47 }
 0x3d0   :  { %v2028_v32 = vpop.permute.xlu1 %2027  ;;  %v1972_v48 = vpop.permute.xlu0 %1971 }
 0x3d1   :  { %v2709_v22 = vsel %vm2655_vm7, %v2652_v33, %v2028_v32  ;;  %v2681_v38 = vsel %vm2655_vm7, %v2624_v56, %v1972_v48 }
 0x3d4   :  { %v2250_v7 = vpop.permute.xlu1 %2249  ;;  %v2194_v5 = vpop.permute.xlu0 %2193 }
 0x3d5   :  { %v2765_v11 = vsel %vm2712_vm8, %v2708_v18, %v2250_v7  ;;  %v2737_v25 = vsel %vm2712_vm8, %v2680_v13, %v2194_v5  ;;  %v4051_v18 = vld [vmem:[%s7548_s0 + $0x2c0] sm:$0xff]  ;;  %v8031_v13 = vld [vmem:[#allocation54_spill] sm:$0xff]  ;;  %v8032_v5 = vld [vmem:[#allocation232_spill] sm:$0xff]  ;;  %s4084_s0 = smov [#allocation2]  }
 0x3d6   :  { %v3903_v12 = vpop.f32.mrb[6].mxu0  ;;  %v3945_v15 = vpop.f32.mrb[6].mxu1  ;;  %3928 = vmatprep.mubr.msk.f32.mxu0 %vm2781_vm9, %v2737_v25  ;;  %3970 = vmatprep.mubr.msk.f32.mxu1 %vm2781_vm9, %v2765_v11  ;;  %v2369_v7 = vsel %vm2313_vm1, %v4051_v18, %v8031_v13  ;;  %v2568_v21 = vsel %vm2541_vm5, %v2511_v50, %v8032_v5  ;;  %v2398_v11 = vsel %vm2370_vm2, %v2341_v40, %v8034_v53  ;;  %v8035_v25 = vld [vmem:[#allocation106_spill] sm:$0xff]  ;;  %s3416_s21 = sshll.u32 %s4084_s0, 4  ;;  %s3417_s21 = int_to_ptr.vmem [resolvable:$true] %s3416_s21 }
 0x3d7   :  { %v3056_v61 = vadd.f32 %v3903_v12, %v7185_v24  ;;  %v3196_v17 = vadd.f32 %v3945_v15, %v7185_v24  ;;  %v3050_v34 = vpop.f32.mrb[7].mxu0  ;;  %v3190_v52 = vpop.f32.mrb[7].mxu1  ;;  %v2426_v55 = vsel %vm2370_vm2, %v2369_v7, %v8035_v25  ;;  %v2455_v12 = vsel %vm2427_vm3, %v2398_v11, %v8036_v59  ;;  %v8037_v15 = vld [vmem:[#allocation158_spill] sm:$0xff]  ;;  %s4052_s22 = scalar_lea.vmem %s3417_s21, 7168  ;;  %p4057_p1 = scmp.lt.s32.totalorder %s3417_s21, %s3417_s21 }
 0x3d8   :  { %v3051_v43 = vadd.f32 %v7185_v24, %v3050_v34  ;;  %v3191_v4 = vadd.f32 %v7185_v24, %v3190_v52  ;;  %v2252_v23 = vpop.permute.xlu1 %2251  ;;  %v2196_v28 = vpop.permute.xlu0 %2195  ;;  %v2483_v33 = vsel %vm2427_vm3, %v2426_v55, %v8037_v15  ;;  %v8038_v52 = vld [vmem:[#allocation184_spill] sm:$0xff]  ;;  %p4053_p0 = scmp.ne.s32.totalorder %s3417_s21, %s4052_s22  ;;  %p4058_p2 = scmp.lt.s32.totalorder %s4052_s22, %s4052_s22 }
 0x3d9   :  { %v3306_v45 = vmax.f32 %v3056_v61, 0.0  ;;  %v3334_v51 = vmax.f32 %v3196_v17, 0.0  ;;  %v2766_v54 = vsel %vm2712_vm8, %v2709_v22, %v2252_v23  ;;  %v2738_v60 = vsel %vm2712_vm8, %v2681_v38, %v2196_v28  ;;  %v8039_v38 = vld [vmem:[#allocation216_spill] sm:$0xff]  ;;  %v8040_v28 = vld [vmem:[#allocation231_spill] sm:$0xff] }
 0x3da   :  { %v3305_v26 = vmax.f32 %v3051_v43, 0.0  ;;  %v3333_v2 = vmax.f32 %v3191_v4, 0.0  ;;  %3929 = vmatmul.mubr.msk.f32.gmra.mrb[24].mxu0 %vm2781_vm9, %v2738_v60  ;;  %3971 = vmatmul.mubr.msk.f32.gmra.mrb[24].mxu1 %vm2781_vm9, %v2766_v54  ;;  %v2512_v22 = vsel %vm2484_vm4, %v2455_v12, %v8038_v52  ;;  %v2540_v43 = vsel %vm2484_vm4, %v2483_v33, %v8039_v38  ;;  %p4059_p3 = por %p4058_p2, %p4057_p1 }
 0x3db   :  { %3362 = vst [vmem:[#allocation2 + $0x38] sm:$0xff] %v3306_v45  ;;  %3390 = vst [vmem:[#allocation2 + $0x118] sm:$0xff] %v3334_v51  ;;  %v2569_v45 = vsel %vm2541_vm5, %v2512_v22, %v8040_v28  ;;  %v8041_v51 = vld [vmem:[#allocation245_spill] sm:$0xff] }
 0x3dc   :  { %3361 = vst [vmem:[#allocation2 + $0x30] sm:$0xff] %v3305_v26  ;;  %3389 = vst [vmem:[#allocation2 + $0x110] sm:$0xff] %v3333_v2  ;;  %v1806_v20 = vpop.permute.xlu1 %1805  ;;  %v1750_v63 = vpop.permute.xlu0 %1749  ;;  %v2597_v54 = vsel %vm2541_vm5, %v2540_v43, %v8041_v51  ;;  %p4060_p4 = pnand %p4059_p3, %p4053_p0 }
 0x3dd   :  { %v2653_v1 = vsel %vm2598_vm6, %v2596_v37, %v1806_v20  ;;  %v2625_v27 = vsel %vm2598_vm6, %v2568_v21, %v1750_v63 }
 0x3e0   :  { %v1808_v58 = vpop.permute.xlu1 %1807  ;;  %v1752_v32 = vpop.permute.xlu0 %1751 }
 0x3e1   :  { %v2654_v2 = vsel %vm2598_vm6, %v2597_v54, %v1808_v58  ;;  %v2626_v20 = vsel %vm2598_vm6, %v2569_v45, %v1752_v32 }
 0x3e4   :  { %v2030_v48 = vpop.permute.xlu1 %2029  ;;  %v1974_v16 = vpop.permute.xlu0 %1973 }
 0x3e5   :  { %v2710_v56 = vsel %vm2655_vm7, %v2653_v1, %v2030_v48  ;;  %v2682_v61 = vsel %vm2655_vm7, %v2625_v27, %v1974_v16 }
 0x3e8   :  { %v2032_v31 = vpop.permute.xlu1 %2031  ;;  %v1976_v29 = vpop.permute.xlu0 %1975 }
 0x3e9   :  { %v2711_v36 = vsel %vm2655_vm7, %v2654_v2, %v2032_v31  ;;  %v2683_v10 = vsel %vm2655_vm7, %v2626_v20, %v1976_v29 }
 0x3ec   :  { %v2254_v17 = vpop.permute.xlu1 %2253  ;;  %v2198_v34 = vpop.permute.xlu0 %2197 }
 0x3ed   :  { %v2767_v4 = vsel %vm2712_vm8, %v2710_v56, %v2254_v17  ;;  %v2739_v23 = vsel %vm2712_vm8, %v2682_v61, %v2198_v34 }
 0x3ee   :  { %v3906_v60 = vpop.f32.mrb[8].mxu0  ;;  %v3948_v26 = vpop.f32.mrb[8].mxu1  ;;  %3931 = vmatprep.mubr.msk.f32.mxu0 %vm2781_vm9, %v2739_v23  ;;  %3973 = vmatprep.mubr.msk.f32.mxu1 %vm2781_vm9, %v2767_v4 }
 0x3ef   :  { %v3066_v63 = vadd.f32 %v3906_v60, %v7185_v24  ;;  %v3206_v48 = vadd.f32 %v3948_v26, %v7185_v24  ;;  %v3060_v16 = vpop.f32.mrb[9].mxu0  ;;  %v3200_v35 = vpop.f32.mrb[9].mxu1 }
 0x3f0   :  { %v3061_v9 = vadd.f32 %v7185_v24, %v3060_v16  ;;  %v3201_v30 = vadd.f32 %v7185_v24, %v3200_v35  ;;  %v2256_v46 = vpop.permute.xlu1 %2255  ;;  %v2200_v14 = vpop.permute.xlu0 %2199 }
 0x3f1   :  { %v3308_v42 = vmax.f32 %v3066_v63, 0.0  ;;  %v3336_v58 = vmax.f32 %v3206_v48, 0.0  ;;  %v2768_v32 = vsel %vm2712_vm8, %v2711_v36, %v2256_v46  ;;  %v2740_v57 = vsel %vm2712_vm8, %v2683_v10, %v2200_v14 }
 0x3f2   :  { %v3307_v49 = vmax.f32 %v3061_v9, 0.0  ;;  %v3335_v39 = vmax.f32 %v3201_v30, 0.0  ;;  %3932 = vmatmul.mubr.msk.f32.gmra.mrb[26].mxu0 %vm2781_vm9, %v2740_v57  ;;  %3974 = vmatmul.mubr.msk.f32.gmra.mrb[26].mxu1 %vm2781_vm9, %v2768_v32 }
 0x3f3   :  { %3364 = vst [vmem:[#allocation2 + $0x48] sm:$0xff] %v3308_v42  ;;  %3392 = vst [vmem:[#allocation2 + $0x128] sm:$0xff] %v3336_v58 }
 0x3f4   :  { %3363 = vst [vmem:[#allocation2 + $0x40] sm:$0xff] %v3307_v49  ;;  %3391 = vst [vmem:[#allocation2 + $0x120] sm:$0xff] %v3335_v39 }
 0x406   :  { %v3909_v0 = vpop.f32.mrb[10].mxu0  ;;  %v3951_v8 = vpop.f32.mrb[10].mxu1 }
 0x407   :  { %v3076_v19 = vadd.f32 %v3909_v0, %v7185_v24  ;;  %v3216_v31 = vadd.f32 %v3951_v8, %v7185_v24  ;;  %v3070_v29 = vpop.f32.mrb[11].mxu0  ;;  %v3210_v41 = vpop.f32.mrb[11].mxu1 }
 0x408   :  { %v3071_v50 = vadd.f32 %v7185_v24, %v3070_v29  ;;  %v3211_v3 = vadd.f32 %v7185_v24, %v3210_v41 }
 0x409   :  { %v3310_v62 = vmax.f32 %v3076_v19, 0.0  ;;  %v3338_v6 = vmax.f32 %v3216_v31, 0.0 }
 0x40a   :  { %v3309_v44 = vmax.f32 %v3071_v50, 0.0  ;;  %v3337_v40 = vmax.f32 %v3211_v3, 0.0 }
 0x40b   :  { %3366 = vst [vmem:[#allocation2 + $0x58] sm:$0xff] %v3310_v62  ;;  %3394 = vst [vmem:[#allocation2 + $0x138] sm:$0xff] %v3338_v6 }
 0x40c   :  { %3365 = vst [vmem:[#allocation2 + $0x50] sm:$0xff] %v3309_v44  ;;  %3393 = vst [vmem:[#allocation2 + $0x130] sm:$0xff] %v3337_v40 }
 0x41e   :  { %v3912_v18 = vpop.f32.mrb[12].mxu0  ;;  %v3954_v13 = vpop.f32.mrb[12].mxu1 }
 0x41f   :  { %v3086_v7 = vadd.f32 %v3912_v18, %v7185_v24  ;;  %v3226_v5 = vadd.f32 %v3954_v13, %v7185_v24  ;;  %v3080_v21 = vpop.f32.mrb[13].mxu0  ;;  %v3220_v47 = vpop.f32.mrb[13].mxu1 }
 0x420   :  { %v3081_v37 = vadd.f32 %v7185_v24, %v3080_v21  ;;  %v3221_v53 = vadd.f32 %v7185_v24, %v3220_v47 }
 0x421   :  { %v3312_v11 = vmax.f32 %v3086_v7, 0.0  ;;  %v3340_v25 = vmax.f32 %v3226_v5, 0.0 }
 0x422   :  { %v3311_v55 = vmax.f32 %v3081_v37, 0.0  ;;  %v3339_v1 = vmax.f32 %v3221_v53, 0.0 }
 0x423   :  { %3368 = vst [vmem:[#allocation2 + $0x68] sm:$0xff] %v3312_v11  ;;  %3396 = vst [vmem:[#allocation2 + $0x148] sm:$0xff] %v3340_v25 }
 0x424   :  { %3367 = vst [vmem:[#allocation2 + $0x60] sm:$0xff] %v3311_v55  ;;  %3395 = vst [vmem:[#allocation2 + $0x140] sm:$0xff] %v3339_v1 }
 0x436   :  { %v3915_v27 = vpop.f32.mrb[14].mxu0  ;;  %v3957_v59 = vpop.f32.mrb[14].mxu1 }
 0x437   :  { %v3096_v12 = vadd.f32 %v3915_v27, %v7185_v24  ;;  %v3236_v15 = vadd.f32 %v3957_v59, %v7185_v24  ;;  %v3090_v33 = vpop.f32.mrb[15].mxu0  ;;  %v3230_v56 = vpop.f32.mrb[15].mxu1 }
 0x438   :  { %v3091_v61 = vadd.f32 %v7185_v24, %v3090_v33  ;;  %v3231_v17 = vadd.f32 %v7185_v24, %v3230_v56 }
 0x439   :  { %v3314_v34 = vmax.f32 %v3096_v12, 0.0  ;;  %v3342_v52 = vmax.f32 %v3236_v15, 0.0 }
 0x43a   :  { %v3313_v22 = vmax.f32 %v3091_v61, 0.0  ;;  %v3341_v38 = vmax.f32 %v3231_v17, 0.0 }
 0x43b   :  { %3370 = vst [vmem:[#allocation2 + $0x78] sm:$0xff] %v3314_v34  ;;  %3398 = vst [vmem:[#allocation2 + $0x158] sm:$0xff] %v3342_v52 }
 0x43c   :  { %3369 = vst [vmem:[#allocation2 + $0x70] sm:$0xff] %v3313_v22  ;;  %3397 = vst [vmem:[#allocation2 + $0x150] sm:$0xff] %v3341_v38 }
 0x44e   :  { %v3918_v43 = vpop.f32.mrb[16].mxu0  ;;  %v3960_v4 = vpop.f32.mrb[16].mxu1 }
 0x44f   :  { %v3106_v23 = vadd.f32 %v3918_v43, %v7185_v24  ;;  %v3246_v28 = vadd.f32 %v3960_v4, %v7185_v24  ;;  %v3100_v45 = vpop.f32.mrb[17].mxu0  ;;  %v3240_v51 = vpop.f32.mrb[17].mxu1 }
 0x450   :  { %v3101_v54 = vadd.f32 %v7185_v24, %v3100_v45  ;;  %v3241_v60 = vadd.f32 %v7185_v24, %v3240_v51 }
 0x451   :  { %v3316_v26 = vmax.f32 %v3106_v23, 0.0  ;;  %v3344_v2 = vmax.f32 %v3246_v28, 0.0 }
 0x452   :  { %v3315_v20 = vmax.f32 %v3101_v54, 0.0  ;;  %v3343_v63 = vmax.f32 %v3241_v60, 0.0 }
 0x453   :  { %3372 = vst [vmem:[#allocation2 + $0x88] sm:$0xff] %v3316_v26  ;;  %3400 = vst [vmem:[#allocation2 + $0x168] sm:$0xff] %v3344_v2 }
 0x454   :  { %3371 = vst [vmem:[#allocation2 + $0x80] sm:$0xff] %v3315_v20  ;;  %3399 = vst [vmem:[#allocation2 + $0x160] sm:$0xff] %v3343_v63 }
 0x465   :  { %v3921_v48 = vpop.f32.mrb[18].mxu0  ;;  %v3963_v16 = vpop.f32.mrb[18].mxu1 }
 0x466   :  { %v3116_v35 = vadd.f32 %v3921_v48, %v7185_v24  ;;  %v3256_v36 = vadd.f32 %v3963_v16, %v7185_v24  ;;  %v3110_v10 = vpop.f32.mrb[19].mxu0  ;;  %v3250_v9 = vpop.f32.mrb[19].mxu1 }
 0x467   :  { %v3111_v30 = vadd.f32 %v7185_v24, %v3110_v10  ;;  %v3251_v46 = vadd.f32 %v7185_v24, %v3250_v9 }
 0x468   :  { %v3318_v14 = vmax.f32 %v3116_v35, 0.0  ;;  %v3346_v42 = vmax.f32 %v3256_v36, 0.0 }
 0x469   :  { %v3317_v58 = vmax.f32 %v3111_v30, 0.0  ;;  %v3345_v32 = vmax.f32 %v3251_v46, 0.0 }
 0x46a   :  { %3374 = vst [vmem:[#allocation2 + $0x98] sm:$0xff] %v3318_v14  ;;  %3402 = vst [vmem:[#allocation2 + $0x178] sm:$0xff] %v3346_v42 }
 0x46b   :  { %3373 = vst [vmem:[#allocation2 + $0x90] sm:$0xff] %v3317_v58  ;;  %3401 = vst [vmem:[#allocation2 + $0x170] sm:$0xff] %v3345_v32 }
 0x47d   :  { %v3924_v57 = vpop.f32.mrb[20].mxu0  ;;  %v3966_v49 = vpop.f32.mrb[20].mxu1 }
 0x47e   :  { %v3126_v39 = vadd.f32 %v3924_v57, %v7185_v24  ;;  %v3266_v0 = vadd.f32 %v3966_v49, %v7185_v24  ;;  %v3120_v8 = vpop.f32.mrb[21].mxu0  ;;  %v3260_v19 = vpop.f32.mrb[21].mxu1 }
 0x47f   :  { %v3121_v31 = vadd.f32 %v7185_v24, %v3120_v8  ;;  %v3261_v29 = vadd.f32 %v7185_v24, %v3260_v19 }
 0x480   :  { %v3320_v41 = vmax.f32 %v3126_v39, 0.0  ;;  %v3348_v50 = vmax.f32 %v3266_v0, 0.0 }
 0x481   :  { %v3319_v3 = vmax.f32 %v3121_v31, 0.0  ;;  %v3347_v62 = vmax.f32 %v3261_v29, 0.0 }
 0x482   :  { %3376 = vst [vmem:[#allocation2 + $0xa8] sm:$0xff] %v3320_v41  ;;  %3404 = vst [vmem:[#allocation2 + $0x188] sm:$0xff] %v3348_v50 }
 0x483   :  { %3375 = vst [vmem:[#allocation2 + $0xa0] sm:$0xff] %v3319_v3  ;;  %3403 = vst [vmem:[#allocation2 + $0x180] sm:$0xff] %v3347_v62 }
 0x495   :  { %v3927_v6 = vpop.f32.mrb[22].mxu0  ;;  %v3969_v44 = vpop.f32.mrb[22].mxu1 }
 0x496   :  { %v3136_v40 = vadd.f32 %v3927_v6, %v7185_v24  ;;  %v3276_v18 = vadd.f32 %v3969_v44, %v7185_v24  ;;  %v3130_v13 = vpop.f32.mrb[23].mxu0  ;;  %v3270_v7 = vpop.f32.mrb[23].mxu1 }
 0x497   :  { %v3131_v5 = vadd.f32 %v7185_v24, %v3130_v13  ;;  %v3271_v21 = vadd.f32 %v7185_v24, %v3270_v7 }
 0x498   :  { %v3322_v47 = vmax.f32 %v3136_v40, 0.0  ;;  %v3350_v37 = vmax.f32 %v3276_v18, 0.0 }
 0x499   :  { %v3321_v53 = vmax.f32 %v3131_v5, 0.0  ;;  %v3349_v11 = vmax.f32 %v3271_v21, 0.0 }
 0x49a   :  { %3378 = vst [vmem:[#allocation2 + $0xb8] sm:$0xff] %v3322_v47  ;;  %3406 = vst [vmem:[#allocation2 + $0x198] sm:$0xff] %v3350_v37 }
 0x49b   :  { %3377 = vst [vmem:[#allocation2 + $0xb0] sm:$0xff] %v3321_v53  ;;  %3405 = vst [vmem:[#allocation2 + $0x190] sm:$0xff] %v3349_v11 }
 0x4ad   :  { %v3930_v25 = vpop.f32.mrb[24].mxu0  ;;  %v3972_v55 = vpop.f32.mrb[24].mxu1 }
 0x4ae   :  { %v3146_v1 = vadd.f32 %v3930_v25, %v7185_v24  ;;  %v3286_v27 = vadd.f32 %v3972_v55, %v7185_v24  ;;  %v3140_v59 = vpop.f32.mrb[25].mxu0  ;;  %v3280_v12 = vpop.f32.mrb[25].mxu1 }
 0x4af   :  { %v3141_v15 = vadd.f32 %v7185_v24, %v3140_v59  ;;  %v3281_v33 = vadd.f32 %v7185_v24, %v3280_v12 }
 0x4b0   :  { %v3324_v56 = vmax.f32 %v3146_v1, 0.0  ;;  %v3352_v61 = vmax.f32 %v3286_v27, 0.0 }
 0x4b1   :  { %v3323_v17 = vmax.f32 %v3141_v15, 0.0  ;;  %v3351_v34 = vmax.f32 %v3281_v33, 0.0 }
 0x4b2   :  { %3380 = vst [vmem:[#allocation2 + $0xc8] sm:$0xff] %v3324_v56  ;;  %3408 = vst [vmem:[#allocation2 + $0x1a8] sm:$0xff] %v3352_v61 }
 0x4b3   :  { %3379 = vst [vmem:[#allocation2 + $0xc0] sm:$0xff] %v3323_v17  ;;  %3407 = vst [vmem:[#allocation2 + $0x1a0] sm:$0xff] %v3351_v34 }
 0x4c5   :  { %v3933_v52 = vpop.f32.mrb[26].mxu0  ;;  %v3975_v22 = vpop.f32.mrb[26].mxu1 }
 0x4c6   :  { %v3156_v38 = vadd.f32 %v3933_v52, %v7185_v24  ;;  %v3296_v43 = vadd.f32 %v3975_v22, %v7185_v24  ;;  %v3150_v4 = vpop.f32.mrb[27].mxu0  ;;  %v3290_v23 = vpop.f32.mrb[27].mxu1 }
 0x4c7   :  { %v3151_v28 = vadd.f32 %v7185_v24, %v3150_v4  ;;  %v3291_v45 = vadd.f32 %v7185_v24, %v3290_v23 }
 0x4c8   :  { %v3326_v51 = vmax.f32 %v3156_v38, 0.0  ;;  %v3354_v54 = vmax.f32 %v3296_v43, 0.0 }
 0x4c9   :  { %v3325_v60 = vmax.f32 %v3151_v28, 0.0  ;;  %v3353_v26 = vmax.f32 %v3291_v45, 0.0 }
 0x4ca   :  { %3382 = vst [vmem:[#allocation2 + $0xd8] sm:$0xff] %v3326_v51  ;;  %3410 = vst [vmem:[#allocation2 + $0x1b8] sm:$0xff] %v3354_v54 }
 0x4cb   :  { %3381 = vst [vmem:[#allocation2 + $0xd0] sm:$0xff] %v3325_v60  ;;  %3409 = vst [vmem:[#allocation2 + $0x1b0] sm:$0xff] %v3353_v26 }
 0x4cc   :  { %4063 = shalt.err (!%p4060_p4)
}
 0x4cd   :  { %s4064_s23 = scalar_lea.hbm %s7551_s3, 7168 }
 0x4ce   :  { %p4065_p5 = scmp.ne.s32.totalorder %s7551_s3, %s4064_s23  ;;  %p4068_p6 = scmp.lt.u32.totalorder %s4064_s23, %s7551_s3 }
 0x4d0   :  { %p4070_p7 = pnand %p4068_p6, %p4065_p5 }
 0x4d2   :  { %4073 = shalt.err (!%p4070_p7)
}
 0x4d3   :  { %s4085_s16 = smov 128  }
 0x4d4   :  { %3422 = dma.vmem_to_hbm [thread:$0]  %s3417_s21, 7168, %s7551_s3, [#allocation3], %s4085_s16, %s4085_s16, %s4077_s25  }
 0x4d5   :  { %4074 = dma.done.wait [#allocation3], 7168  }
 0x4d6   :  { %4075 = vsyncadd [#allocation3], 4294960128 }
 0x4d7   :  { %3426 = vsyncpa [#allocation3], 1 }

</bundles_post_ra>
